<compile_context>
chip_gen: v6e
topology: v6e:2x2x1
jax: 0.10.0
libtpu: 0.0.40
codegen_flags: <defaults>
</compile_context>

<pallas_src>
import functools

import jax
import jax.numpy as jnp
from jax import lax
from jax.experimental import pallas as pl
from jax.experimental.pallas import tpu as pltpu


def _round_up(x, m):
    return ((x + m - 1) // m) * m


# ---------------- fused conv-matmul kernel (MXU) with epilogue -------------------------
def _conv_mm_kernel(*refs, mode, alpha, eps, m_real, single_k):
    """o = epilogue(A @ B); epilogue = identity / LeakyReLU / train-BN + LeakyReLU.

    BN mode requires a single M tile: the f32 accumulator then holds the full batch for
    this channel tile, so batch moments are computed in-register (centered two-pass)."""
    if mode == "bn_lrelu":
        a_ref, b_ref, g_ref, t_ref, *rest = refs
    else:
        a_ref, b_ref, *rest = refs
        g_ref = t_ref = None

    def epilogue(acc, o_ref):
        if mode == "bn_lrelu":
            inv_m = 1.0 / m_real
            # Padded rows of A are exact zeros -> contribute 0 to the channel sums.
            mean = jnp.sum(acc, axis=0, keepdims=True) * inv_m
            cen = acc - mean
            if m_real < acc.shape[0]:                       # mask zero-padded rows
                rows = lax.broadcasted_iota(jnp.int32, acc.shape, 0)
                sq = jnp.where(rows < m_real, cen * cen, 0.0)
            else:
                sq = cen * cen
            var = jnp.sum(sq, axis=0, keepdims=True) * inv_m   # biased (train-mode BN)
            scale = g_ref[...] * lax.rsqrt(var + eps)          # gamma / sqrt(var+eps)
            y = cen * scale + t_ref[...]
            y = jnp.where(y >= 0, y, alpha * y)
        elif mode == "lrelu":
            y = jnp.where(acc >= 0, acc, alpha * acc)
        else:
            y = acc
        o_ref[...] = y.astype(o_ref.dtype)

    if single_k:
        # kt == 1 fast path: no f32 accumulator scratch, no init/finalize branches.
        (o_ref,) = rest
        epilogue(jnp.dot(a_ref[...], b_ref[...], preferred_element_type=jnp.float32),
                 o_ref)
    else:
        o_ref, acc_ref = rest

        @pl.when(pl.program_id(2) == 0)
        def _():
            acc_ref[...] = jnp.zeros_like(acc_ref)

        acc_ref[...] += jnp.dot(a_ref[...], b_ref[...],
                                preferred_element_type=jnp.float32)

        @pl.when(pl.program_id(2) == pl.num_programs(2) - 1)
        def _():
            epilogue(acc_ref[...], o_ref)


def conv_matmul(a, b, *, mode="linear", gamma=None, beta=None, alpha=0.2, eps=1e-5,
                out_dtype=jnp.bfloat16):
    """a: (M, K) bf16 patches, b: (K, N) bf16 weights; K, N multiples of 128."""
    M, K = a.shape
    K2, N = b.shape
    assert K == K2 and K % 128 == 0 and N % 128 == 0

    # M tiling: full-M single tile for BN fusion / small layers (rounded to 16 rows for
    # bf16 sublane packing), 256-row tiles otherwise (mt>=2 feeds both v7x TCs).
    if mode == "bn_lrelu" or M <= 256:
        Mp = _round_up(M, 16)
        tm = Mp
    else:
        tm = 256
        Mp = _round_up(M, tm)
    if Mp != M:
        a = jnp.pad(a, ((0, Mp - M), (0, 0)))

    if mode == "bn_lrelu":
        # TODO(synk): fused BN needs the whole batch in one M tile; for large images a
        # two-pass BN (moments output + affine kernel) fallback would be needed.
        assert Mp == tm and Mp <= 2048, "fused BN requires a single, modest M tile"
        assert gamma is not None and beta is not None
        assert gamma.shape == (1, N) and beta.shape == (1, N)

    # N tiling: prefer nt>=2 so both v7x TensorCores get 'parallel' work.
    if N >= 512:
        tn = 256
    elif N >= 256:
        tn = 128
    else:
        tn = N
    # K tiling: single K tile whenever it fits (kt==1 fast path); else 2048-wide tiles.
    if K <= 4096:
        tk = K
    else:
        tk = next(t for t in (2048, 1024, 512, 256, 128) if K % t == 0)

    mt, nt, kt = Mp // tm, N // tn, K // tk
    single_k = kt == 1

    kern = functools.partial(_conv_mm_kernel, mode=mode, alpha=alpha, eps=eps,
                             m_real=M, single_k=single_k)

    operands = [a, b]
    if mode == "bn_lrelu":
        operands += [gamma, beta]

    if single_k:
        grid = (mt, nt)
        in_specs = [pl.BlockSpec((tm, tk), lambda i, j: (i, 0)),
                    pl.BlockSpec((tk, tn), lambda i, j: (0, j))]
        if mode == "bn_lrelu":
            in_specs += [pl.BlockSpec((1, tn), lambda i, j: (0, j)),
                         pl.BlockSpec((1, tn), lambda i, j: (0, j))]
        out_specs = pl.BlockSpec((tm, tn), lambda i, j: (i, j))
        scratch = []
        dims = ("parallel", "parallel")
    else:
        grid = (mt, nt, kt)
        in_specs = [pl.BlockSpec((tm, tk), lambda i, j, k: (i, k)),
                    pl.BlockSpec((tk, tn), lambda i, j, k: (k, j))]
        if mode == "bn_lrelu":
            in_specs += [pl.BlockSpec((1, tn), lambda i, j, k: (0, j)),
                         pl.BlockSpec((1, tn), lambda i, j, k: (0, j))]
        out_specs = pl.BlockSpec((tm, tn), lambda i, j, k: (i, j))
        scratch = [pltpu.VMEM((tm, tn), jnp.float32)]
        dims = ("parallel", "parallel", "arbitrary")

    out = pl.pallas_call(
        kern,
        out_shape=jax.ShapeDtypeStruct((Mp, N), out_dtype),
        grid_spec=pltpu.PrefetchScalarGridSpec(
            num_scalar_prefetch=0, grid=grid,
            in_specs=in_specs, out_specs=out_specs, scratch_shapes=scratch),
        compiler_params=pltpu.CompilerParams(
            dimension_semantics=dims, vmem_limit_bytes=32 * 1024 * 1024),
        cost_estimate=pl.CostEstimate(
            flops=2 * Mp * K * N,
            transcendentals=(N if mode == "bn_lrelu" else 0),
            bytes_accessed=Mp * K * 2 + K * N * 2
                           + Mp * N * jnp.dtype(out_dtype).itemsize),
    )(*operands)
    return out[:M]


# ---------------- last_conv (Cout=1) as a VPU mat-vec: no zero-padded B DMA ------------
def _matvec_kernel(a_ref, w_ref, o_ref):
    a = a_ref[...].astype(jnp.float32)
    w = w_ref[...].astype(jnp.float32)            # (1, K) broadcast over rows
    o_ref[...] = jnp.sum(a * w, axis=1, keepdims=True)


def lastconv_matvec(a, w_row):
    """a: (M, K) bf16 patches; w_row: (1, K) bf16; returns (M, 1) f32."""
    M, K = a.shape
    assert w_row.shape == (1, K) and K % 128 == 0
    if M <= 512:
        Mp = _round_up(M, 8)
        tm = Mp
    else:
        tm = 256
        Mp = _round_up(M, tm)
    if Mp != M:
        a = jnp.pad(a, ((0, Mp - M), (0, 0)))
    out = pl.pallas_call(
        _matvec_kernel,
        out_shape=jax.ShapeDtypeStruct((Mp, 1), jnp.float32),
        grid_spec=pltpu.PrefetchScalarGridSpec(
            num_scalar_prefetch=0, grid=(Mp // tm,),
            in_specs=[pl.BlockSpec((tm, K), lambda i: (i, 0)),
                      pl.BlockSpec((1, K), lambda i: (0, 0))],
            out_specs=pl.BlockSpec((tm, 1), lambda i: (i, 0))),
        compiler_params=pltpu.CompilerParams(
            dimension_semantics=("parallel",), vmem_limit_bytes=32 * 1024 * 1024),
        cost_estimate=pl.CostEstimate(
            flops=2 * Mp * K, transcendentals=0,
            bytes_accessed=Mp * K * 2 + K * 2 + Mp * 4),
    )(a, w_row)
    return out[:M]


# ---------------------------------- conv2d via im2col ----------------------------------
def _im2col(x_nhwc, kh, kw, stride, pad):
    # TODO(synk): could be lax.conv_general_dilated_patches / in-kernel halo gather to
    # cut XLA glue-op count; the sliced form is kept for verified patch ordering.
    N, H, W, C = x_nhwc.shape
    xp = jnp.pad(x_nhwc, ((0, 0), (pad, pad), (pad, pad), (0, 0)))
    OH = (H + 2 * pad - kh) // stride + 1
    OW = (W + 2 * pad - kw) // stride + 1
    cols = [xp[:, i:i + stride * OH:stride, j:j + stride * OW:stride, :]
            for i in range(kh) for j in range(kw)]
    patches = jnp.stack(cols, axis=3)                          # (N, OH, OW, kh*kw, C)
    return patches.reshape(N * OH * OW, kh * kw * C), (N, OH, OW)


def conv2d_pallas(x_nhwc, wmat, *, cout, stride, pad, mode="linear",
                  gamma=None, beta=None, kh=4, kw=4, out_dtype=jnp.bfloat16):
    """Conv2d (no bias) with fused LeakyReLU / train-BN+LeakyReLU epilogue.

    `wmat` is the cached, preprocessed (KH*KW*Cin_p, Np) bf16 weight matrix."""
    K, Np = wmat.shape
    cin_p = K // (kh * kw)
    cin = x_nhwc.shape[-1]
    x = x_nhwc
    if cin_p != cin:
        x = jnp.pad(x, ((0, 0), (0, 0), (0, 0), (0, cin_p - cin)))
    patches, (n, oh, ow) = _im2col(x, kh, kw, stride, pad)     # (M, K) bf16
    out2d = conv_matmul(patches, wmat, mode=mode, gamma=gamma, beta=beta,
                        out_dtype=out_dtype)
    return out2d[:, :cout].reshape(n, oh, ow, cout)


# ------------------------------------- parameters ---------------------------------------
def init_params(key):
    ks = jax.random.split(key, 12)

    def w(k, cout, cin):
        return 0.05 * jax.random.normal(k, (cout, cin, 4, 4), jnp.float32)

    return dict(
        d1_w=w(ks[0], 64, 4),
        d2_w=w(ks[1], 128, 64),
        d2_gamma=1.0 + 0.1 * jax.random.normal(ks[2], (128,), jnp.float32),
        d2_beta=0.1 * jax.random.normal(ks[3], (128,), jnp.float32),
        d3_w=w(ks[4], 256, 128),
        d3_gamma=1.0 + 0.1 * jax.random.normal(ks[5], (256,), jnp.float32),
        d3_beta=0.1 * jax.random.normal(ks[6], (256,), jnp.float32),
        conv_w=w(ks[7], 512, 256),
        bn1_gamma=1.0 + 0.1 * jax.random.normal(ks[8], (512,), jnp.float32),
        bn1_beta=0.1 * jax.random.normal(ks[9], (512,), jnp.float32),
        last_w=w(ks[10], 1, 512),
    )


def _prep_conv_weight(w_oihw):
    """OIHW f32 -> (KH*KW*Cin_p, Np) bf16; Cin padded to 8, Cout padded to 128."""
    cout, cin, kh, kw = w_oihw.shape
    cin_p = _round_up(cin, 8)
    w = w_oihw
    if cin_p != cin:
        w = jnp.pad(w, ((0, 0), (0, cin_p - cin), (0, 0), (0, 0)))
    wmat = jnp.transpose(w, (2, 3, 1, 0)).reshape(kh * kw * cin_p, cout)
    np_ = _round_up(cout, 128)
    if np_ != cout:
        wmat = jnp.pad(wmat, ((0, 0), (0, np_ - cout)))
    return wmat.astype(jnp.bfloat16)


def preprocess_params(params):
    """One-time (outside jit) weight layout/pad/bf16 cast; cached across forwards."""
    lw = params["last_w"]                                       # (1, 512, 4, 4)
    last_row = jnp.transpose(lw, (2, 3, 1, 0)).reshape(-1, 1).T  # (1, K=8192)
    return dict(
        d1_w=_prep_conv_weight(params["d1_w"]),
        d2_w=_prep_conv_weight(params["d2_w"]),
        d2_g=params["d2_gamma"].reshape(1, -1).astype(jnp.float32),
        d2_b=params["d2_beta"].reshape(1, -1).astype(jnp.float32),
        d3_w=_prep_conv_weight(params["d3_w"]),
        d3_g=params["d3_gamma"].reshape(1, -1).astype(jnp.float32),
        d3_b=params["d3_beta"].reshape(1, -1).astype(jnp.float32),
        conv_w=_prep_conv_weight(params["conv_w"]),
        bn1_g=params["bn1_gamma"].reshape(1, -1).astype(jnp.float32),
        bn1_b=params["bn1_beta"].reshape(1, -1).astype(jnp.float32),
        last_w=last_row.astype(jnp.bfloat16),
    )


# --------------------------------------- forward ----------------------------------------
@jax.jit
def discriminator_forward(prep, inp_nchw, tgt_nchw):
    x = jnp.concatenate([inp_nchw, tgt_nchw], axis=1)            # NCHW, 4 channels
    x = jnp.transpose(x, (0, 2, 3, 1)).astype(jnp.bfloat16)      # NHWC, bf16 for MXU

    # d1: conv + fused LeakyReLU
    x = conv2d_pallas(x, prep["d1_w"], cout=64, stride=2, pad=1, mode="lrelu")
    # d2 / d3 / conv+bn1+lr1: conv + fused train-BN + LeakyReLU (single pallas_call each)
    x = conv2d_pallas(x, prep["d2_w"], cout=128, stride=2, pad=1, mode="bn_lrelu",
                      gamma=prep["d2_g"], beta=prep["d2_b"])
    x = conv2d_pallas(x, prep["d3_w"], cout=256, stride=2, pad=1, mode="bn_lrelu",
                      gamma=prep["d3_g"], beta=prep["d3_b"])
    x = conv2d_pallas(x, prep["conv_w"], cout=512, stride=1, pad=1, mode="bn_lrelu",
                      gamma=prep["bn1_g"], beta=prep["bn1_b"])

    # last_conv (Cout=1): VPU mat-vec, no 128x zero-padded weight DMA.
    patches, (n, oh, ow) = _im2col(x, 4, 4, 1, 1)                # (M, 8192) bf16
    y = lastconv_matvec(patches, prep["last_w"]).reshape(n, oh, ow, 1)
    return jnp.transpose(y, (0, 3, 1, 2)).astype(jnp.float32)    # back to NCHW


if __name__ == "__main__":
    key = jax.random.PRNGKey(0)
    kp, ki, kt = jax.random.split(key, 3)
    params = init_params(kp)
    prep = preprocess_params(params)      # cached bf16 weights (outside jit)

    # "OneChannelInput": input is 1-channel, target is 3-channel -> 4 channels after concat.
    B, H, W = 2, 32, 32
    inp = jax.random.normal(ki, (B, 1, H, W), jnp.float32)
    tgt = jax.random.normal(kt, (B, 3, H, W), jnp.float32)

    out = discriminator_forward(prep, inp, tgt)
    out = jax.block_until_ready(out)

    assert out.shape == (B, 1, 2, 2), out.shape
    assert out.dtype == jnp.float32
    assert bool(jnp.all(jnp.isfinite(out)))
    print("KERNEL_OK")
</pallas_src>

<mosaic_0001>
module attributes {stable_mosaic.version = 11 : i64} {
  func.func @_conv_mm_kernel(%arg0: i32, %arg1: i32, %arg2: memref<256x128xbf16, #tpu.memory_space<vmem>>, %arg3: memref<128x128xbf16, #tpu.memory_space<vmem>>, %arg4: memref<256x128xbf16, #tpu.memory_space<vmem>>) attributes {dimension_semantics = [#tpu.dimension_semantics<parallel>, #tpu.dimension_semantics<parallel>], iteration_bounds = array<i64: 2, 1>, scalar_prefetch = 0 : i64, scratch_operands = 0 : i64, tpu.core_type = #tpu.core_type<tc>, window_params = [{transform_indices = @transform_0, window_bounds = array<i64: 256, 128>}, {transform_indices = @transform_1, window_bounds = array<i64: 128, 128>}, {transform_indices = @transform_2, window_bounds = array<i64: 256, 128>}]} {
    %c0 = arith.constant 0 : index
    %c0_0 = arith.constant 0 : index
    %0 = vector.load %arg2[%c0, %c0_0] : memref<256x128xbf16, #tpu.memory_space<vmem>>, vector<256x128xbf16>
    %c0_1 = arith.constant 0 : index
    %c0_2 = arith.constant 0 : index
    %1 = vector.load %arg3[%c0_1, %c0_2] : memref<128x128xbf16, #tpu.memory_space<vmem>>, vector<128x128xbf16>
    %cst = arith.constant dense<0.000000e+00> : vector<256x128xf32>
    %2 = tpu.matmul %0, %1, %cst {dimension_numbers = #tpu.dot_dimension_numbers<[1], [0], [0], [1], [0, 0, 1, 1], [], []>} : vector<256x128xbf16>, vector<128x128xbf16>, vector<256x128xf32> -> vector<256x128xf32>
    %cst_3 = arith.constant 0.000000e+00 : f32
    %3 = vector.broadcast %cst_3 : f32 to vector<256x128xf32>
    %4 = arith.cmpf oge, %2, %3 : vector<256x128xf32>
    %cst_4 = arith.constant 2.000000e-01 : f32
    %5 = vector.broadcast %cst_4 : f32 to vector<256x128xf32>
    %6 = arith.mulf %5, %2 : vector<256x128xf32>
    %7 = arith.select %4, %2, %6 : vector<256x128xi1>, vector<256x128xf32>
    %8 = arith.truncf %7 : vector<256x128xf32> to vector<256x128xbf16>
    %c0_5 = arith.constant 0 : index
    %c0_6 = arith.constant 0 : index
    %9 = vector.load %arg4[%c0_5, %c0_6] : memref<256x128xbf16, #tpu.memory_space<vmem>>, vector<256x128xbf16>
    tpu.vector_store %arg4[%c0_5, %c0_6], %8 {strides = array<i32>} : memref<256x128xbf16, #tpu.memory_space<vmem>>, vector<256x128xbf16>,
    return
  }
  func.func @transform_0(%arg0: i32, %arg1: i32) -> (i32, i32) {
    %c0_i32 = arith.constant 0 : i32
    %c0_i32_0 = arith.constant 0 : i32
    return %arg0, %c0_i32 : i32, i32
  }
  func.func @transform_1(%arg0: i32, %arg1: i32) -> (i32, i32) {
    %c0_i32 = arith.constant 0 : i32
    %c0_i32_0 = arith.constant 0 : i32
    return %c0_i32, %arg1 : i32, i32
  }
  func.func @transform_2(%arg0: i32, %arg1: i32) -> (i32, i32) {
    %c0_i32 = arith.constant 0 : i32
    return %arg0, %arg1 : i32, i32
  }
}

module attributes {stable_mosaic.version = 11 : i64} {
  func.func @_conv_mm_kernel(%arg0: i32, %arg1: i32, %arg2: memref<128x1024xbf16, #tpu.memory_space<vmem>>, %arg3: memref<1024x128xbf16, #tpu.memory_space<vmem>>, %arg4: memref<1x128xf32, #tpu.memory_space<vmem>>, %arg5: memref<1x128xf32, #tpu.memory_space<vmem>>, %arg6: memref<128x128xbf16, #tpu.memory_space<vmem>>) attributes {dimension_semantics = [#tpu.dimension_semantics<parallel>, #tpu.dimension_semantics<parallel>], iteration_bounds = array<i64: 1, 1>, scalar_prefetch = 0 : i64, scratch_operands = 0 : i64, tpu.core_type = #tpu.core_type<tc>, window_params = [{transform_indices = @transform_0, window_bounds = array<i64: 128, 1024>}, {transform_indices = @transform_1, window_bounds = array<i64: 1024, 128>}, {transform_indices = @transform_2, window_bounds = array<i64: 1, 128>}, {transform_indices = @transform_3, window_bounds = array<i64: 1, 128>}, {transform_indices = @transform_4, window_bounds = array<i64: 128, 128>}]} {
    %c0 = arith.constant 0 : index
    %c0_0 = arith.constant 0 : index
    %0 = vector.load %arg2[%c0, %c0_0] : memref<128x1024xbf16, #tpu.memory_space<vmem>>, vector<128x1024xbf16>
    %c0_1 = arith.constant 0 : index
    %c0_2 = arith.constant 0 : index
    %1 = vector.load %arg3[%c0_1, %c0_2] : memref<1024x128xbf16, #tpu.memory_space<vmem>>, vector<1024x128xbf16>
    %cst = arith.constant dense<0.000000e+00> : vector<128x128xf32>
    %2 = tpu.matmul %0, %1, %cst {dimension_numbers = #tpu.dot_dimension_numbers<[1], [0], [0], [1], [0, 0, 1, 1], [], []>} : vector<128x1024xbf16>, vector<1024x128xbf16>, vector<128x128xf32> -> vector<128x128xf32>
    %cst_3 = arith.constant dense<0.000000e+00> : vector<128xf32>
    %3 = vector.multi_reduction <add>, %2, %cst_3 [0] : vector<128x128xf32> to vector<128xf32>
    %4 = vector.shape_cast %3 : vector<128xf32> to vector<1x128xf32>
    %cst_4 = arith.constant 7.812500e-03 : f32
    %5 = vector.broadcast %cst_4 : f32 to vector<1x128xf32>
    %6 = arith.mulf %4, %5 : vector<1x128xf32>
    %7 = vector.broadcast %6 : vector<1x128xf32> to vector<128x128xf32>
    %8 = arith.subf %2, %7 : vector<128x128xf32>
    %9 = arith.mulf %8, %8 : vector<128x128xf32>
    %cst_5 = arith.constant dense<0.000000e+00> : vector<128xf32>
    %10 = vector.multi_reduction <add>, %9, %cst_5 [0] : vector<128x128xf32> to vector<128xf32>
    %11 = vector.shape_cast %10 : vector<128xf32> to vector<1x128xf32>
    %cst_6 = arith.constant 7.812500e-03 : f32
    %12 = vector.broadcast %cst_6 : f32 to vector<1x128xf32>
    %13 = arith.mulf %11, %12 : vector<1x128xf32>
    %c0_7 = arith.constant 0 : index
    %c0_8 = arith.constant 0 : index
    %14 = vector.load %arg4[%c0_7, %c0_8] : memref<1x128xf32, #tpu.memory_space<vmem>>, vector<1x128xf32>
    %cst_9 = arith.constant 9.99999974E-6 : f32
    %15 = vector.broadcast %cst_9 : f32 to vector<1x128xf32>
    %16 = arith.addf %13, %15 : vector<1x128xf32>
    %17 = math.rsqrt %16 : vector<1x128xf32>
    %18 = arith.mulf %14, %17 : vector<1x128xf32>
    %19 = vector.broadcast %18 : vector<1x128xf32> to vector<128x128xf32>
    %20 = arith.mulf %8, %19 : vector<128x128xf32>
    %c0_10 = arith.constant 0 : index
    %c0_11 = arith.constant 0 : index
    %21 = vector.load %arg5[%c0_10, %c0_11] : memref<1x128xf32, #tpu.memory_space<vmem>>, vector<1x128xf32>
    %22 = vector.broadcast %21 : vector<1x128xf32> to vector<128x128xf32>
    %23 = arith.addf %20, %22 : vector<128x128xf32>
    %cst_12 = arith.constant 0.000000e+00 : f32
    %24 = vector.broadcast %cst_12 : f32 to vector<128x128xf32>
    %25 = arith.cmpf oge, %23, %24 : vector<128x128xf32>
    %cst_13 = arith.constant 2.000000e-01 : f32
    %26 = vector.broadcast %cst_13 : f32 to vector<128x128xf32>
    %27 = arith.mulf %26, %23 : vector<128x128xf32>
    %28 = arith.select %25, %23, %27 : vector<128x128xi1>, vector<128x128xf32>
    %29 = arith.truncf %28 : vector<128x128xf32> to vector<128x128xbf16>
    %c0_14 = arith.constant 0 : index
    %c0_15 = arith.constant 0 : index
    %30 = vector.load %arg6[%c0_14, %c0_15] : memref<128x128xbf16, #tpu.memory_space<vmem>>, vector<128x128xbf16>
    tpu.vector_store %arg6[%c0_14, %c0_15], %29 {strides = array<i32>} : memref<128x128xbf16, #tpu.memory_space<vmem>>, vector<128x128xbf16>,
    return
  }
  func.func @transform_0(%arg0: i32, %arg1: i32) -> (i32, i32) {
    %c0_i32 = arith.constant 0 : i32
    %c0_i32_0 = arith.constant 0 : i32
    return %arg0, %c0_i32 : i32, i32
  }
  func.func @transform_1(%arg0: i32, %arg1: i32) -> (i32, i32) {
    %c0_i32 = arith.constant 0 : i32
    %c0_i32_0 = arith.constant 0 : i32
    return %c0_i32, %arg1 : i32, i32
  }
  func.func @transform_2(%arg0: i32, %arg1: i32) -> (i32, i32) {
    %c0_i32 = arith.constant 0 : i32
    %c0_i32_0 = arith.constant 0 : i32
    return %c0_i32, %arg1 : i32, i32
  }
  func.func @transform_3(%arg0: i32, %arg1: i32) -> (i32, i32) {
    %c0_i32 = arith.constant 0 : i32
    %c0_i32_0 = arith.constant 0 : i32
    return %c0_i32, %arg1 : i32, i32
  }
  func.func @transform_4(%arg0: i32, %arg1: i32) -> (i32, i32) {
    %c0_i32 = arith.constant 0 : i32
    return %arg0, %arg1 : i32, i32
  }
}

module attributes {stable_mosaic.version = 11 : i64} {
  func.func @_conv_mm_kernel(%arg0: i32, %arg1: i32, %arg2: memref<32x2048xbf16, #tpu.memory_space<vmem>>, %arg3: memref<2048x128xbf16, #tpu.memory_space<vmem>>, %arg4: memref<1x128xf32, #tpu.memory_space<vmem>>, %arg5: memref<1x128xf32, #tpu.memory_space<vmem>>, %arg6: memref<32x128xbf16, #tpu.memory_space<vmem>>) attributes {dimension_semantics = [#tpu.dimension_semantics<parallel>, #tpu.dimension_semantics<parallel>], iteration_bounds = array<i64: 1, 2>, scalar_prefetch = 0 : i64, scratch_operands = 0 : i64, tpu.core_type = #tpu.core_type<tc>, window_params = [{transform_indices = @transform_0, window_bounds = array<i64: 32, 2048>}, {transform_indices = @transform_1, window_bounds = array<i64: 2048, 128>}, {transform_indices = @transform_2, window_bounds = array<i64: 1, 128>}, {transform_indices = @transform_3, window_bounds = array<i64: 1, 128>}, {transform_indices = @transform_4, window_bounds = array<i64: 32, 128>}]} {
    %c0 = arith.constant 0 : index
    %c0_0 = arith.constant 0 : index
    %0 = vector.load %arg2[%c0, %c0_0] : memref<32x2048xbf16, #tpu.memory_space<vmem>>, vector<32x2048xbf16>
    %c0_1 = arith.constant 0 : index
    %c0_2 = arith.constant 0 : index
    %1 = vector.load %arg3[%c0_1, %c0_2] : memref<2048x128xbf16, #tpu.memory_space<vmem>>, vector<2048x128xbf16>
    %cst = arith.constant dense<0.000000e+00> : vector<32x128xf32>
    %2 = tpu.matmul %0, %1, %cst {dimension_numbers = #tpu.dot_dimension_numbers<[1], [0], [0], [1], [0, 0, 1, 1], [], []>} : vector<32x2048xbf16>, vector<2048x128xbf16>, vector<32x128xf32> -> vector<32x128xf32>
    %cst_3 = arith.constant dense<0.000000e+00> : vector<128xf32>
    %3 = vector.multi_reduction <add>, %2, %cst_3 [0] : vector<32x128xf32> to vector<128xf32>
    %4 = vector.shape_cast %3 : vector<128xf32> to vector<1x128xf32>
    %cst_4 = arith.constant 3.125000e-02 : f32
    %5 = vector.broadcast %cst_4 : f32 to vector<1x128xf32>
    %6 = arith.mulf %4, %5 : vector<1x128xf32>
    %7 = vector.broadcast %6 : vector<1x128xf32> to vector<32x128xf32>
    %8 = arith.subf %2, %7 : vector<32x128xf32>
    %9 = arith.mulf %8, %8 : vector<32x128xf32>
    %cst_5 = arith.constant dense<0.000000e+00> : vector<128xf32>
    %10 = vector.multi_reduction <add>, %9, %cst_5 [0] : vector<32x128xf32> to vector<128xf32>
    %11 = vector.shape_cast %10 : vector<128xf32> to vector<1x128xf32>
    %cst_6 = arith.constant 3.125000e-02 : f32
    %12 = vector.broadcast %cst_6 : f32 to vector<1x128xf32>
    %13 = arith.mulf %11, %12 : vector<1x128xf32>
    %c0_7 = arith.constant 0 : index
    %c0_8 = arith.constant 0 : index
    %14 = vector.load %arg4[%c0_7, %c0_8] : memref<1x128xf32, #tpu.memory_space<vmem>>, vector<1x128xf32>
    %cst_9 = arith.constant 9.99999974E-6 : f32
    %15 = vector.broadcast %cst_9 : f32 to vector<1x128xf32>
    %16 = arith.addf %13, %15 : vector<1x128xf32>
    %17 = math.rsqrt %16 : vector<1x128xf32>
    %18 = arith.mulf %14, %17 : vector<1x128xf32>
    %19 = vector.broadcast %18 : vector<1x128xf32> to vector<32x128xf32>
    %20 = arith.mulf %8, %19 : vector<32x128xf32>
    %c0_10 = arith.constant 0 : index
    %c0_11 = arith.constant 0 : index
    %21 = vector.load %arg5[%c0_10, %c0_11] : memref<1x128xf32, #tpu.memory_space<vmem>>, vector<1x128xf32>
    %22 = vector.broadcast %21 : vector<1x128xf32> to vector<32x128xf32>
    %23 = arith.addf %20, %22 : vector<32x128xf32>
    %cst_12 = arith.constant 0.000000e+00 : f32
    %24 = vector.broadcast %cst_12 : f32 to vector<32x128xf32>
    %25 = arith.cmpf oge, %23, %24 : vector<32x128xf32>
    %cst_13 = arith.constant 2.000000e-01 : f32
    %26 = vector.broadcast %cst_13 : f32 to vector<32x128xf32>
    %27 = arith.mulf %26, %23 : vector<32x128xf32>
    %28 = arith.select %25, %23, %27 : vector<32x128xi1>, vector<32x128xf32>
    %29 = arith.truncf %28 : vector<32x128xf32> to vector<32x128xbf16>
    %c0_14 = arith.constant 0 : index
    %c0_15 = arith.constant 0 : index
    %30 = vector.load %arg6[%c0_14, %c0_15] : memref<32x128xbf16, #tpu.memory_space<vmem>>, vector<32x128xbf16>
    tpu.vector_store %arg6[%c0_14, %c0_15], %29 {strides = array<i32>} : memref<32x128xbf16, #tpu.memory_space<vmem>>, vector<32x128xbf16>,
    return
  }
  func.func @transform_0(%arg0: i32, %arg1: i32) -> (i32, i32) {
    %c0_i32 = arith.constant 0 : i32
    %c0_i32_0 = arith.constant 0 : i32
    return %arg0, %c0_i32 : i32, i32
  }
  func.func @transform_1(%arg0: i32, %arg1: i32) -> (i32, i32) {
    %c0_i32 = arith.constant 0 : i32
    %c0_i32_0 = arith.constant 0 : i32
    return %c0_i32, %arg1 : i32, i32
  }
  func.func @transform_2(%arg0: i32, %arg1: i32) -> (i32, i32) {
    %c0_i32 = arith.constant 0 : i32
    %c0_i32_0 = arith.constant 0 : i32
    return %c0_i32, %arg1 : i32, i32
  }
  func.func @transform_3(%arg0: i32, %arg1: i32) -> (i32, i32) {
    %c0_i32 = arith.constant 0 : i32
    %c0_i32_0 = arith.constant 0 : i32
    return %c0_i32, %arg1 : i32, i32
  }
  func.func @transform_4(%arg0: i32, %arg1: i32) -> (i32, i32) {
    %c0_i32 = arith.constant 0 : i32
    return %arg0, %arg1 : i32, i32
  }
}

module attributes {stable_mosaic.version = 11 : i64} {
  func.func @_conv_mm_kernel(%arg0: i32, %arg1: i32, %arg2: memref<32x4096xbf16, #tpu.memory_space<vmem>>, %arg3: memref<4096x256xbf16, #tpu.memory_space<vmem>>, %arg4: memref<1x256xf32, #tpu.memory_space<vmem>>, %arg5: memref<1x256xf32, #tpu.memory_space<vmem>>, %arg6: memref<32x256xbf16, #tpu.memory_space<vmem>>) attributes {dimension_semantics = [#tpu.dimension_semantics<parallel>, #tpu.dimension_semantics<parallel>], iteration_bounds = array<i64: 1, 2>, scalar_prefetch = 0 : i64, scratch_operands = 0 : i64, tpu.core_type = #tpu.core_type<tc>, window_params = [{transform_indices = @transform_0, window_bounds = array<i64: 32, 4096>}, {transform_indices = @transform_1, window_bounds = array<i64: 4096, 256>}, {transform_indices = @transform_2, window_bounds = array<i64: 1, 256>}, {transform_indices = @transform_3, window_bounds = array<i64: 1, 256>}, {transform_indices = @transform_4, window_bounds = array<i64: 32, 256>}]} {
    %c0 = arith.constant 0 : index
    %c0_0 = arith.constant 0 : index
    %0 = vector.load %arg2[%c0, %c0_0] : memref<32x4096xbf16, #tpu.memory_space<vmem>>, vector<32x4096xbf16>
    %c0_1 = arith.constant 0 : index
    %c0_2 = arith.constant 0 : index
    %1 = vector.load %arg3[%c0_1, %c0_2] : memref<4096x256xbf16, #tpu.memory_space<vmem>>, vector<4096x256xbf16>
    %cst = arith.constant dense<0.000000e+00> : vector<32x256xf32>
    %2 = tpu.matmul %0, %1, %cst {dimension_numbers = #tpu.dot_dimension_numbers<[1], [0], [0], [1], [0, 0, 1, 1], [], []>} : vector<32x4096xbf16>, vector<4096x256xbf16>, vector<32x256xf32> -> vector<32x256xf32>
    %cst_3 = arith.constant dense<0.000000e+00> : vector<256xf32>
    %3 = vector.multi_reduction <add>, %2, %cst_3 [0] : vector<32x256xf32> to vector<256xf32>
    %4 = vector.shape_cast %3 : vector<256xf32> to vector<1x256xf32>
    %cst_4 = arith.constant 0.055555556 : f32
    %5 = vector.broadcast %cst_4 : f32 to vector<1x256xf32>
    %6 = arith.mulf %4, %5 : vector<1x256xf32>
    %7 = vector.broadcast %6 : vector<1x256xf32> to vector<32x256xf32>
    %8 = arith.subf %2, %7 : vector<32x256xf32>
    %9 = tpu.iota {dimensions = array<i32: 0>} : vector<32x256xi32>
    %c18_i32 = arith.constant 18 : i32
    %10 = vector.broadcast %c18_i32 : i32 to vector<32x256xi32>
    %11 = arith.cmpi slt, %9, %10 : vector<32x256xi32>
    %12 = arith.mulf %8, %8 : vector<32x256xf32>
    %cst_5 = arith.constant 0.000000e+00 : f32
    %13 = vector.broadcast %cst_5 : f32 to vector<32x256xf32>
    %14 = arith.select %11, %12, %13 : vector<32x256xi1>, vector<32x256xf32>
    %cst_6 = arith.constant dense<0.000000e+00> : vector<256xf32>
    %15 = vector.multi_reduction <add>, %14, %cst_6 [0] : vector<32x256xf32> to vector<256xf32>
    %16 = vector.shape_cast %15 : vector<256xf32> to vector<1x256xf32>
    %cst_7 = arith.constant 0.055555556 : f32
    %17 = vector.broadcast %cst_7 : f32 to vector<1x256xf32>
    %18 = arith.mulf %16, %17 : vector<1x256xf32>
    %c0_8 = arith.constant 0 : index
    %c0_9 = arith.constant 0 : index
    %19 = vector.load %arg4[%c0_8, %c0_9] : memref<1x256xf32, #tpu.memory_space<vmem>>, vector<1x256xf32>
    %cst_10 = arith.constant 9.99999974E-6 : f32
    %20 = vector.broadcast %cst_10 : f32 to vector<1x256xf32>
    %21 = arith.addf %18, %20 : vector<1x256xf32>
    %22 = math.rsqrt %21 : vector<1x256xf32>
    %23 = arith.mulf %19, %22 : vector<1x256xf32>
    %24 = vector.broadcast %23 : vector<1x256xf32> to vector<32x256xf32>
    %25 = arith.mulf %8, %24 : vector<32x256xf32>
    %c0_11 = arith.constant 0 : index
    %c0_12 = arith.constant 0 : index
    %26 = vector.load %arg5[%c0_11, %c0_12] : memref<1x256xf32, #tpu.memory_space<vmem>>, vector<1x256xf32>
    %27 = vector.broadcast %26 : vector<1x256xf32> to vector<32x256xf32>
    %28 = arith.addf %25, %27 : vector<32x256xf32>
    %cst_13 = arith.constant 0.000000e+00 : f32
    %29 = vector.broadcast %cst_13 : f32 to vector<32x256xf32>
    %30 = arith.cmpf oge, %28, %29 : vector<32x256xf32>
    %cst_14 = arith.constant 2.000000e-01 : f32
    %31 = vector.broadcast %cst_14 : f32 to vector<32x256xf32>
    %32 = arith.mulf %31, %28 : vector<32x256xf32>
    %33 = arith.select %30, %28, %32 : vector<32x256xi1>, vector<32x256xf32>
    %34 = arith.truncf %33 : vector<32x256xf32> to vector<32x256xbf16>
    %c0_15 = arith.constant 0 : index
    %c0_16 = arith.constant 0 : index
    %35 = vector.load %arg6[%c0_15, %c0_16] : memref<32x256xbf16, #tpu.memory_space<vmem>>, vector<32x256xbf16>
    tpu.vector_store %arg6[%c0_15, %c0_16], %34 {strides = array<i32>} : memref<32x256xbf16, #tpu.memory_space<vmem>>, vector<32x256xbf16>,
    return
  }
  func.func @transform_0(%arg0: i32, %arg1: i32) -> (i32, i32) {
    %c0_i32 = arith.constant 0 : i32
    %c0_i32_0 = arith.constant 0 : i32
    return %arg0, %c0_i32 : i32, i32
  }
  func.func @transform_1(%arg0: i32, %arg1: i32) -> (i32, i32) {
    %c0_i32 = arith.constant 0 : i32
    %c0_i32_0 = arith.constant 0 : i32
    return %c0_i32, %arg1 : i32, i32
  }
  func.func @transform_2(%arg0: i32, %arg1: i32) -> (i32, i32) {
    %c0_i32 = arith.constant 0 : i32
    %c0_i32_0 = arith.constant 0 : i32
    return %c0_i32, %arg1 : i32, i32
  }
  func.func @transform_3(%arg0: i32, %arg1: i32) -> (i32, i32) {
    %c0_i32 = arith.constant 0 : i32
    %c0_i32_0 = arith.constant 0 : i32
    return %c0_i32, %arg1 : i32, i32
  }
  func.func @transform_4(%arg0: i32, %arg1: i32) -> (i32, i32) {
    %c0_i32 = arith.constant 0 : i32
    return %arg0, %arg1 : i32, i32
  }
}

module attributes {stable_mosaic.version = 11 : i64} {
  func.func @_matvec_kernel(%arg0: i32, %arg1: memref<8x8192xbf16, #tpu.memory_space<vmem>>, %arg2: memref<1x8192xbf16, #tpu.memory_space<vmem>>, %arg3: memref<8x1xf32, #tpu.memory_space<vmem>>) attributes {dimension_semantics = [#tpu.dimension_semantics<parallel>], iteration_bounds = array<i64: 1>, scalar_prefetch = 0 : i64, scratch_operands = 0 : i64, tpu.core_type = #tpu.core_type<tc>, window_params = [{transform_indices = @transform_0, window_bounds = array<i64: 8, 8192>}, {pipeline_mode = #tpu.pipeline_mode<synchronous>, transform_indices = @transform_1, window_bounds = array<i64: 1, 8192>}, {transform_indices = @transform_2, window_bounds = array<i64: 8, 1>}]} {
    %c0 = arith.constant 0 : index
    %c0_0 = arith.constant 0 : index
    %0 = vector.load %arg1[%c0, %c0_0] : memref<8x8192xbf16, #tpu.memory_space<vmem>>, vector<8x8192xbf16>
    %1 = arith.extf %0 : vector<8x8192xbf16> to vector<8x8192xf32>
    %c0_1 = arith.constant 0 : index
    %c0_2 = arith.constant 0 : index
    %2 = vector.load %arg2[%c0_1, %c0_2] : memref<1x8192xbf16, #tpu.memory_space<vmem>>, vector<1x8192xbf16>
    %3 = arith.extf %2 : vector<1x8192xbf16> to vector<1x8192xf32>
    %4 = vector.broadcast %3 : vector<1x8192xf32> to vector<8x8192xf32>
    %5 = arith.mulf %1, %4 : vector<8x8192xf32>
    %cst = arith.constant dense<0.000000e+00> : vector<8xf32>
    %6 = vector.multi_reduction <add>, %5, %cst [1] : vector<8x8192xf32> to vector<8xf32>
    %7 = vector.shape_cast %6 : vector<8xf32> to vector<8x1xf32>
    %c0_3 = arith.constant 0 : index
    %c0_4 = arith.constant 0 : index
    %8 = vector.load %arg3[%c0_3, %c0_4] : memref<8x1xf32, #tpu.memory_space<vmem>>, vector<8x1xf32>
    tpu.vector_store %arg3[%c0_3, %c0_4], %7 {strides = array<i32>} : memref<8x1xf32, #tpu.memory_space<vmem>>, vector<8x1xf32>,
    return
  }
  func.func @transform_0(%arg0: i32) -> (i32, i32) {
    %c0_i32 = arith.constant 0 : i32
    %c0_i32_0 = arith.constant 0 : i32
    return %arg0, %c0_i32 : i32, i32
  }
  func.func @transform_1(%arg0: i32) -> (i32, i32) {
    %c0_i32 = arith.constant 0 : i32
    %c0_i32_0 = arith.constant 0 : i32
    %c0_i32_1 = arith.constant 0 : i32
    return %c0_i32, %c0_i32_0 : i32, i32
  }
  func.func @transform_2(%arg0: i32) -> (i32, i32) {
    %c0_i32 = arith.constant 0 : i32
    %c0_i32_0 = arith.constant 0 : i32
    return %arg0, %c0_i32 : i32, i32
  }
}

</mosaic_0001>

<bundles_post_ra>
// kernel: discriminator_forward.5
= control target key start
LH: loop header
LB: loop body
LE: loop exit
PB: predicated region body
PF: predicated region fallthrough
CT: control target
= control target key end

     0   :  { %s1254_s9 = smov 0   ;;  %s1256_s10 = smov 0   ;;  %s1359_s0 = inlined_call_operand.vmem [shape: bf16[512,128], index: 0, kind: input, shape index: {}]   ;;  %s1360_s1 = inlined_call_operand.vmem [shape: bf16[128,128], index: 1, kind: input, shape index: {}]   ;;  %s1361_s2 = inlined_call_operand.vmem [shape: bf16[512,128], index: 2, kind: output, shape index: {}]  }
   0x1   :  { %s1258_s11 = smov 0  }
   0x2 LB: > { %s24_s12 = sadd.s32 1, %s1233_s10  ;;  %p889_p0 = scmp.ge.s32.totalorder %s1237_s11, 1  ;;  %s1237_s11 = sphi %s1258_s11, %s12_s11   ;;  %s1233_s10 = sphi %s1256_s10, %s1363_s10   ;;  %s1229_s9 = sphi %s1254_s9, %s1362_s9  }
   0x3   : > { %p26_p1 = scmp.ge.s32.totalorder %s24_s12, 2  ;;  %p136_p2 = scmp.lt.s32.totalorder %s1237_s11, 3 }
   0x5   : > { %s1365_s12 = smov (%p26_p1, %s24_s12), 0  ;;  %p137_p3 = pnand %p889_p0, %p136_p2 }
   0x6   : > { %s890_s15 = sshll.u32 (!%p137_p3), %s1229_s9, 5 }
   0x7   : > { %140 = sbr.rel (%p137_p3) target bundleno = 275 (0x113), region = 28  ;;  %p166_p4 = scmp.lt.s32.totalorder (!%p137_p3), %s890_s15, 63 }
   0xc   : > { %v1191_v0 = vld [vmem:[%s1360_s1 + $0x38] sm:$0xff]   ;;  %v1192_v1 = vld [vmem:[%s1360_s1 + $0x30] sm:$0xff]   ;;  %s1367_s15 = smov (!%p166_p4, %s890_s15), 63  ;;  %v1193_v2 = vld [vmem:[%s1360_s1 + $0x28] sm:$0xff]  }
   0xd   : > { %1103 = vmatprep.subr.bf16.mxu0 %v1191_v0  ;;  %1151 = vmatprep.subr.bf16.mxu1 %v1191_v0  ;;  %s891_s20 = sshll.u32 %s1367_s15, 2  ;;  %v1194_v3 = vld [vmem:[%s1360_s1 + $0x20] sm:$0xff]   ;;  %v1195_v6 = vld [vmem:[%s1360_s1 + $0x18] sm:$0xff]   ;;  %v1196_v7 = vld [vmem:[%s1360_s1 + $0x10] sm:$0xff]  }
   0xe   : > { %1104 = vmatpush3.bf16.msra.mxu0 %v1191_v0  ;;  %1159 = vmatpush3.bf16.msra.mxu1 %v1191_v0  ;;  %s1289_s23 = scalar_lea.vmem %s1359_s0, %s891_s20  ;;  %v1197_v8 = vld [vmem:[%s1360_s1 + $0x8] sm:$0xff]   ;;  %v1198_v9 = vld [vmem:[%s1360_s1] sm:$0xff]   ;;  %s1327_s8 = scalar_lea.vmem %s1361_s2, %s891_s20 }
   0xf   : > { %1105 = vmatprep.subr.bf16.mxu0 %v1192_v1  ;;  %1152 = vmatprep.subr.bf16.mxu1 %v1192_v1  ;;  %v1199_v4 = vld [vmem:[%s1289_s23] sm:$0xff]   ;;  %v1201_v10 = vld [vmem:[%s1289_s23 + $0x8] sm:$0xff]   ;;  %v1203_v12 = vld [vmem:[%s1289_s23 + $0x10] sm:$0xff]  }
  0x10   : > { %v1200_v5 = vld [vmem:[%s1289_s23 + $0x40] sm:$0xff]   ;;  %1119 = vmatprep.mubr.bf16.mxu0 %v1199_v4  ;;  %v1202_v11 = vld [vmem:[%s1289_s23 + $0x48] sm:$0xff]   ;;  %v1204_v13 = vld [vmem:[%s1289_s23 + $0x50] sm:$0xff]  }
  0x11   : > { %1135 = vmatprep.mubr.bf16.mxu1 %v1200_v5  ;;  %v1205_v14 = vld [vmem:[%s1289_s23 + $0x18] sm:$0xff]   ;;  %v1207_v16 = vld [vmem:[%s1289_s23 + $0x20] sm:$0xff]   ;;  %v1209_v18 = vld [vmem:[%s1289_s23 + $0x28] sm:$0xff]  }
  0x12   : > { %1106 = vmatpush3.bf16.msra.mxu0 %v1192_v1  ;;  %1160 = vmatpush3.bf16.msra.mxu1 %v1192_v1  ;;  %v1206_v15 = vld [vmem:[%s1289_s23 + $0x58] sm:$0xff]   ;;  %v1208_v17 = vld [vmem:[%s1289_s23 + $0x60] sm:$0xff]   ;;  %v1210_v19 = vld [vmem:[%s1289_s23 + $0x68] sm:$0xff]  }
  0x13   : > { %1107 = vmatprep.subr.bf16.mxu0 %v1193_v2  ;;  %1153 = vmatprep.subr.bf16.mxu1 %v1193_v2  ;;  %v1211_v20 = vld [vmem:[%s1289_s23 + $0x30] sm:$0xff]   ;;  %v1213_v22 = vld [vmem:[%s1289_s23 + $0x38] sm:$0xff]  }
  0x14   : > { %v1212_v21 = vld [vmem:[%s1289_s23 + $0x70] sm:$0xff]   ;;  %v1214_v23 = vld [vmem:[%s1289_s23 + $0x78] sm:$0xff]  }
  0x16   : > { %1108 = vmatpush3.bf16.msra.mxu0 %v1193_v2  ;;  %1161 = vmatpush3.bf16.msra.mxu1 %v1193_v2 }
  0x17   : > { %1109 = vmatprep.subr.bf16.mxu0 %v1194_v3  ;;  %1154 = vmatprep.subr.bf16.mxu1 %v1194_v3 }
  0x1a   : > { %1110 = vmatpush3.bf16.msra.mxu0 %v1194_v3  ;;  %1162 = vmatpush3.bf16.msra.mxu1 %v1194_v3 }
  0x1b   : > { %1111 = vmatprep.subr.bf16.mxu0 %v1195_v6  ;;  %1155 = vmatprep.subr.bf16.mxu1 %v1195_v6 }
  0x1e   : > { %1112 = vmatpush3.bf16.msra.mxu0 %v1195_v6  ;;  %1163 = vmatpush3.bf16.msra.mxu1 %v1195_v6 }
  0x1f   : > { %1113 = vmatprep.subr.bf16.mxu0 %v1196_v7  ;;  %1156 = vmatprep.subr.bf16.mxu1 %v1196_v7 }
  0x22   : > { %1114 = vmatpush3.bf16.msra.mxu0 %v1196_v7  ;;  %1164 = vmatpush3.bf16.msra.mxu1 %v1196_v7 }
  0x23   : > { %1115 = vmatprep.subr.bf16.mxu0 %v1197_v8  ;;  %1157 = vmatprep.subr.bf16.mxu1 %v1197_v8 }
  0x26   : > { %1116 = vmatpush3.bf16.msra.mxu0 %v1197_v8  ;;  %1165 = vmatpush3.bf16.msra.mxu1 %v1197_v8 }
  0x27   : > { %1117 = vmatprep.subr.bf16.mxu0 %v1198_v9  ;;  %1158 = vmatprep.subr.bf16.mxu1 %v1198_v9 }
  0x2a   : > { %1118 = vmatpush3.bf16.msra.mxu0 %v1198_v9  ;;  %1166 = vmatpush3.bf16.msra.mxu1 %v1198_v9 }
  0x2d   : > { %1120 = vmatmul.mubr.bf16.vlgmr.msra.gmra.mxu0 %v1201_v10  ;;  %1136 = vmatmul.mubr.bf16.vlgmr.msra.gmra.mxu1 %v1202_v11 }
  0x2e   : > { %1123 = vmatprep.mubr.bf16.mxu0 %v1203_v12  ;;  %1139 = vmatprep.mubr.bf16.mxu1 %v1204_v13 }
  0x35   : > { %1124 = vmatmul.mubr.bf16.gmra.mxu0 %v1205_v14  ;;  %1140 = vmatmul.mubr.bf16.gmra.mxu1 %v1206_v15 }
  0x36   : > { %1127 = vmatprep.mubr.bf16.mxu0 %v1207_v16  ;;  %1143 = vmatprep.mubr.bf16.mxu1 %v1208_v17 }
  0x3d   : > { %1128 = vmatmul.mubr.bf16.gmra.mxu0 %v1209_v18  ;;  %1144 = vmatmul.mubr.bf16.gmra.mxu1 %v1210_v19 }
  0x3e   : > { %1131 = vmatprep.mubr.bf16.mxu0 %v1211_v20  ;;  %1147 = vmatprep.mubr.bf16.mxu1 %v1212_v21 }
  0x45   : > { %1132 = vmatmul.mubr.bf16.gmra.mxu0 %v1213_v22  ;;  %1148 = vmatmul.mubr.bf16.gmra.mxu1 %v1214_v23 }
  0xed   : > { %v1121_v24 = vpop.f32.mrf.mxu0  ;;  %v1137_v25 = vpop.f32.mrf.mxu1 }
  0xee   : > { %vm540_vm0 = vcmp.ge.f32.partialorder %v1121_v24, 0.0  ;;  %v572_v26 = vmul.f32 0.2, %v1121_v24  ;;  %v588_v27 = vmul.f32 0.2, %v1137_v25  ;;  %vm556_vm1 = vcmp.ge.f32.partialorder %v1137_v25, 0.0 }
  0xef   : > { %v411_v28 = vpop.f32.mrf.mxu0  ;;  %v475_v29 = vpop.f32.mrf.mxu1 }
  0xf0   : > { %v604_v30 = vsel %vm540_vm0, %v1121_v24, %v572_v26  ;;  %v570_v31 = vmul.f32 0.2, %v411_v28  ;;  %vm538_vm2 = vcmp.ge.f32.partialorder %v411_v28, 0.0  ;;  %v620_v35 = vsel %vm556_vm1, %v1137_v25, %v588_v27 }
  0xf1   : > { %v1122_v32 = vpop.f32.mrf.mxu0  ;;  %v1138_v33 = vpop.f32.mrf.mxu1  ;;  %vm554_vm5 = vcmp.ge.f32.partialorder %v475_v29, 0.0  ;;  %v586_v36 = vmul.f32 0.2, %v475_v29 }
  0xf2   : > { %vm541_vm3 = vcmp.ge.f32.partialorder %v1122_v32, 0.0  ;;  %v573_v34 = vmul.f32 0.2, %v1122_v32  ;;  %vm557_vm4 = vcmp.ge.f32.partialorder %v1138_v33, 0.0  ;;  %v589_v37 = vmul.f32 0.2, %v1138_v33 }
  0xf3   : > { %v414_v38 = vpop.f32.mrf.mxu0  ;;  %v478_v39 = vpop.f32.mrf.mxu1  ;;  %v602_v42 = vsel %vm538_vm2, %v411_v28, %v570_v31  ;;  %v618_v51 = vsel %vm554_vm5, %v475_v29, %v586_v36 }
  0xf4   : > { %v605_v40 = vsel %vm541_vm3, %v1122_v32, %v573_v34  ;;  %vm539_vm6 = vcmp.ge.f32.partialorder %v414_v38, 0.0  ;;  %v571_v41 = vmul.f32 0.2, %v414_v38  ;;  %vm555_vm7 = vcmp.ge.f32.partialorder %v478_v39, 0.0 }
  0xf5   : > { %v992_v43 = vpack.c.bf16 %v605_v40, %v604_v30  ;;  %v621_v44 = vsel %vm557_vm4, %v1138_v33, %v589_v37  ;;  %v587_v45 = vmul.f32 0.2, %v478_v39  ;;  %v1125_v46 = vpop.f32.mrf.mxu0  ;;  %v1141_v47 = vpop.f32.mrf.mxu1 }
  0xf6   : > { %v1032_v48 = vpack.c.bf16 %v621_v44, %v620_v35  ;;  %v603_v49 = vsel %vm539_vm6, %v414_v38, %v571_v41  ;;  %vm544_vm8 = vcmp.ge.f32.partialorder %v1125_v46, 0.0  ;;  %v576_v50 = vmul.f32 0.2, %v1125_v46 }
  0xf7   : > { %1064 = vst [vmem:[%s1327_s8 + $0x8] sm:$0xff] %v992_v43   ;;  %v987_v52 = vpack.c.bf16 %v603_v49, %v602_v42  ;;  %v619_v53 = vsel %vm555_vm7, %v478_v39, %v587_v45  ;;  %v592_v54 = vmul.f32 0.2, %v1141_v47  ;;  %v427_v55 = vpop.f32.mrf.mxu0  ;;  %v491_v56 = vpop.f32.mrf.mxu1  ;;  %vm560_vm9 = vcmp.ge.f32.partialorder %v1141_v47, 0.0 }
  0xf8   : > { %1072 = vst [vmem:[%s1327_s8 + $0x48] sm:$0xff] %v1032_v48   ;;  %v1027_v57 = vpack.c.bf16 %v619_v53, %v618_v51  ;;  %v608_v58 = vsel %vm544_vm8, %v1125_v46, %v576_v50  ;;  %v574_v59 = vmul.f32 0.2, %v427_v55  ;;  %vm542_vm10 = vcmp.ge.f32.partialorder %v427_v55, 0.0 }
  0xf9   : > { %988 = vst [vmem:[%s1327_s8] sm:$0xff] %v987_v52   ;;  %v1126_v60 = vpop.f32.mrf.mxu0  ;;  %v1142_v61 = vpop.f32.mrf.mxu1  ;;  %v624_v63 = vsel %vm560_vm9, %v1141_v47, %v592_v54  ;;  %vm558_vm13 = vcmp.ge.f32.partialorder %v491_v56, 0.0  ;;  %v590_v0 = vmul.f32 0.2, %v491_v56 }
  0xfa   : > { %1071 = vst [vmem:[%s1327_s8 + $0x40] sm:$0xff] %v1027_v57   ;;  %vm545_vm11 = vcmp.ge.f32.partialorder %v1126_v60, 0.0  ;;  %v577_v62 = vmul.f32 0.2, %v1126_v60  ;;  %vm561_vm12 = vcmp.ge.f32.partialorder %v1142_v61, 0.0  ;;  %v606_v6 = vsel %vm542_vm10, %v427_v55, %v574_v59 }
  0xfb   : > { %v593_v1 = vmul.f32 0.2, %v1142_v61  ;;  %v430_v2 = vpop.f32.mrf.mxu0  ;;  %v494_v3 = vpop.f32.mrf.mxu1  ;;  %v622_v15 = vsel %vm558_vm13, %v491_v56, %v590_v0 }
  0xfc   : > { %v609_v4 = vsel %vm545_vm11, %v1126_v60, %v577_v62  ;;  %vm543_vm14 = vcmp.ge.f32.partialorder %v430_v2, 0.0  ;;  %v575_v5 = vmul.f32 0.2, %v430_v2  ;;  %vm559_vm15 = vcmp.ge.f32.partialorder %v494_v3, 0.0 }
  0xfd   : > { %v1002_v7 = vpack.c.bf16 %v609_v4, %v608_v58  ;;  %v625_v8 = vsel %vm561_vm12, %v1142_v61, %v593_v1  ;;  %v591_v9 = vmul.f32 0.2, %v494_v3  ;;  %v1129_v10 = vpop.f32.mrf.mxu0  ;;  %v1145_v11 = vpop.f32.mrf.mxu1 }
  0xfe   : > { %v1042_v12 = vpack.c.bf16 %v625_v8, %v624_v63  ;;  %v607_v13 = vsel %vm543_vm14, %v430_v2, %v575_v5  ;;  %vm548_vm0 = vcmp.ge.f32.partialorder %v1129_v10, 0.0  ;;  %v580_v14 = vmul.f32 0.2, %v1129_v10 }
  0xff   : > { %1066 = vst [vmem:[%s1327_s8 + $0x18] sm:$0xff] %v1002_v7   ;;  %v997_v16 = vpack.c.bf16 %v607_v13, %v606_v6  ;;  %v623_v17 = vsel %vm559_vm15, %v494_v3, %v591_v9  ;;  %v596_v18 = vmul.f32 0.2, %v1145_v11  ;;  %v443_v19 = vpop.f32.mrf.mxu0  ;;  %v507_v20 = vpop.f32.mrf.mxu1  ;;  %vm564_vm1 = vcmp.ge.f32.partialorder %v1145_v11, 0.0 }
 0x100   : > { %1074 = vst [vmem:[%s1327_s8 + $0x58] sm:$0xff] %v1042_v12   ;;  %v1037_v21 = vpack.c.bf16 %v623_v17, %v622_v15  ;;  %v612_v22 = vsel %vm548_vm0, %v1129_v10, %v580_v14  ;;  %v578_v23 = vmul.f32 0.2, %v443_v19  ;;  %vm546_vm2 = vcmp.ge.f32.partialorder %v443_v19, 0.0 }
 0x101   : > { %1065 = vst [vmem:[%s1327_s8 + $0x10] sm:$0xff] %v997_v16   ;;  %v1130_v24 = vpop.f32.mrf.mxu0  ;;  %v1146_v25 = vpop.f32.mrf.mxu1  ;;  %v628_v27 = vsel %vm564_vm1, %v1145_v11, %v596_v18  ;;  %vm562_vm5 = vcmp.ge.f32.partialorder %v507_v20, 0.0  ;;  %v594_v28 = vmul.f32 0.2, %v507_v20 }
 0x102   : > { %1073 = vst [vmem:[%s1327_s8 + $0x50] sm:$0xff] %v1037_v21   ;;  %vm549_vm3 = vcmp.ge.f32.partialorder %v1130_v24, 0.0  ;;  %v581_v26 = vmul.f32 0.2, %v1130_v24  ;;  %vm565_vm4 = vcmp.ge.f32.partialorder %v1146_v25, 0.0  ;;  %v610_v34 = vsel %vm546_vm2, %v443_v19, %v578_v23 }
 0x103   : > { %v597_v29 = vmul.f32 0.2, %v1146_v25  ;;  %v446_v30 = vpop.f32.mrf.mxu0  ;;  %v510_v31 = vpop.f32.mrf.mxu1  ;;  %v626_v43 = vsel %vm562_vm5, %v507_v20, %v594_v28 }
 0x104   : > { %v613_v32 = vsel %vm549_vm3, %v1130_v24, %v581_v26  ;;  %vm547_vm6 = vcmp.ge.f32.partialorder %v446_v30, 0.0  ;;  %v579_v33 = vmul.f32 0.2, %v446_v30  ;;  %vm563_vm7 = vcmp.ge.f32.partialorder %v510_v31, 0.0 }
 0x105   : > { %v1012_v35 = vpack.c.bf16 %v613_v32, %v612_v22  ;;  %v629_v36 = vsel %vm565_vm4, %v1146_v25, %v597_v29  ;;  %v595_v37 = vmul.f32 0.2, %v510_v31  ;;  %v1133_v38 = vpop.f32.mrf.mxu0  ;;  %v1149_v39 = vpop.f32.mrf.mxu1 }
 0x106   : > { %v1052_v40 = vpack.c.bf16 %v629_v36, %v628_v27  ;;  %v611_v41 = vsel %vm547_vm6, %v446_v30, %v579_v33  ;;  %vm552_vm8 = vcmp.ge.f32.partialorder %v1133_v38, 0.0  ;;  %v584_v42 = vmul.f32 0.2, %v1133_v38 }
 0x107   : > { %1068 = vst [vmem:[%s1327_s8 + $0x28] sm:$0xff] %v1012_v35   ;;  %v1007_v44 = vpack.c.bf16 %v611_v41, %v610_v34  ;;  %v627_v45 = vsel %vm563_vm7, %v510_v31, %v595_v37  ;;  %v459_v46 = vpop.f32.mrf.mxu0  ;;  %v523_v47 = vpop.f32.mrf.mxu1  ;;  %vm568_vm9 = vcmp.ge.f32.partialorder %v1149_v39, 0.0  ;;  %v600_v50 = vmul.f32 0.2, %v1149_v39 }
 0x108   : > { %1076 = vst [vmem:[%s1327_s8 + $0x68] sm:$0xff] %v1052_v40   ;;  %v1047_v48 = vpack.c.bf16 %v627_v45, %v626_v43  ;;  %v616_v49 = vsel %vm552_vm8, %v1133_v38, %v584_v42  ;;  %v582_v53 = vmul.f32 0.2, %v459_v46  ;;  %vm550_vm12 = vcmp.ge.f32.partialorder %v459_v46, 0.0 }
 0x109   : > { %1067 = vst [vmem:[%s1327_s8 + $0x20] sm:$0xff] %v1007_v44   ;;  %v1134_v51 = vpop.f32.mrf.mxu0  ;;  %v1150_v52 = vpop.f32.mrf.mxu1  ;;  %vm566_vm13 = vcmp.ge.f32.partialorder %v523_v47, 0.0  ;;  %v598_v55 = vmul.f32 0.2, %v523_v47  ;;  %v632_v61 = vsel %vm568_vm9, %v1149_v39, %v600_v50 }
 0x10a   : > { %1075 = vst [vmem:[%s1327_s8 + $0x60] sm:$0xff] %v1047_v48   ;;  %vm553_vm10 = vcmp.ge.f32.partialorder %v1134_v51, 0.0  ;;  %v585_v54 = vmul.f32 0.2, %v1134_v51  ;;  %vm569_vm11 = vcmp.ge.f32.partialorder %v1150_v52, 0.0  ;;  %v614_v1 = vsel %vm550_vm12, %v459_v46, %v582_v53 }
 0x10b   : > { %v601_v56 = vmul.f32 0.2, %v1150_v52  ;;  %v462_v57 = vpop.f32.mrf.mxu0  ;;  %v526_v58 = vpop.f32.mrf.mxu1  ;;  %v630_v4 = vsel %vm566_vm13, %v523_v47, %v598_v55 }
 0x10c   : > { %v617_v59 = vsel %vm553_vm10, %v1134_v51, %v585_v54  ;;  %vm551_vm14 = vcmp.ge.f32.partialorder %v462_v57, 0.0  ;;  %v583_v60 = vmul.f32 0.2, %v462_v57  ;;  %vm567_vm15 = vcmp.ge.f32.partialorder %v526_v58, 0.0 }
 0x10d   : > { %v1022_v62 = vpack.c.bf16 %v617_v59, %v616_v49  ;;  %v633_v63 = vsel %vm569_vm11, %v1150_v52, %v601_v56  ;;  %v599_v0 = vmul.f32 0.2, %v526_v58 }
 0x10e   : > { %v1062_v2 = vpack.c.bf16 %v633_v63, %v632_v61  ;;  %v615_v3 = vsel %vm551_vm14, %v462_v57, %v583_v60 }
 0x10f   : > { %1070 = vst [vmem:[%s1327_s8 + $0x38] sm:$0xff] %v1022_v62   ;;  %v1017_v5 = vpack.c.bf16 %v615_v3, %v614_v1  ;;  %v631_v6 = vsel %vm567_vm15, %v526_v58, %v599_v0 }
 0x110   : > { %1078 = vst [vmem:[%s1327_s8 + $0x78] sm:$0xff] %v1062_v2   ;;  %v1057_v7 = vpack.c.bf16 %v631_v6, %v630_v4 }
 0x111   : > { %1069 = vst [vmem:[%s1327_s8 + $0x30] sm:$0xff] %v1017_v5  }
 0x112   : > { %1077 = vst [vmem:[%s1327_s8 + $0x70] sm:$0xff] %v1057_v7  }
 0x113 PF: > { %s12_s11 = sadd.s32 1, %s1237_s11   ;;  %s1362_s9 = smov %s1233_s10 }
 0x114   : > { %p9_p5 = scmp.ge.s32.totalorder %s12_s11, 4   ;;  %s1363_s10 = smov %s1365_s12 }
 0x116   :  { %11 = sbr.rel (!%p9_p5) target bundleno = 2 (0x2), region = 61 }

// kernel: discriminator_forward.6
= control target key start
LH: loop header
LB: loop body
LE: loop exit
PB: predicated region body
PF: predicated region fallthrough
CT: control target
= control target key end

     0   :  { %s2725_s1 = inlined_call_operand.vmem [shape: bf16[1024,128], index: 1, kind: input, shape index: {}]   ;;  %s2726_s0 = inlined_call_operand.vmem [shape: bf16[128,1024], index: 0, kind: input, shape index: {}]   ;;  %s2727_s2 = inlined_call_operand.vmem [shape: f32[1,128], index: 2, kind: input, shape index: {}]   ;;  %s2728_s3 = inlined_call_operand.vmem [shape: f32[1,128], index: 3, kind: input, shape index: {}]   ;;  %s2729_s4 = inlined_call_operand.vmem [shape: bf16[128,128], index: 4, kind: output, shape index: {}]  }
   0x1   :  { %v2023_v0 = vld [vmem:[%s2725_s1 + $0x78] sm:$0xff]   ;;  %v2027_v4 = vld [vmem:[%s2725_s1 + $0x70] sm:$0xff]   ;;  %v2031_v8 = vld [vmem:[%s2725_s1 + $0x68] sm:$0xff]  }
   0x2   :  { %v2024_v1 = vld [vmem:[%s2725_s1 + $0xf8] sm:$0xff]   ;;  %1767 = vmatprep.subr.bf16.mxu0 %v2023_v0  ;;  %v2028_v5 = vld [vmem:[%s2725_s1 + $0xf0] sm:$0xff]   ;;  %v2032_v9 = vld [vmem:[%s2725_s1 + $0xe8] sm:$0xff]  }
   0x3   :  { %v2025_v2 = vld [vmem:[%s2725_s1 + $0x38] sm:$0xff]   ;;  %1831 = vmatprep.subr.bf16.mxu1 %v2024_v1  ;;  %v2029_v6 = vld [vmem:[%s2725_s1 + $0x30] sm:$0xff]   ;;  %v2033_v10 = vld [vmem:[%s2725_s1 + $0x28] sm:$0xff]  }
   0x4   :  { %v2026_v3 = vld [vmem:[%s2725_s1 + $0xb8] sm:$0xff]   ;;  %1768 = vmatpush3.bf16.msra.mxu0 %v2025_v2  ;;  %v2030_v7 = vld [vmem:[%s2725_s1 + $0xb0] sm:$0xff]   ;;  %v2034_v11 = vld [vmem:[%s2725_s1 + $0xa8] sm:$0xff]  }
   0x5   :  { %1832 = vmatpush3.bf16.msra.mxu1 %v2026_v3  ;;  %1769 = vmatprep.subr.bf16.mxu0 %v2027_v4  ;;  %v2035_v12 = vld [vmem:[%s2725_s1 + $0x60] sm:$0xff]   ;;  %v2039_v16 = vld [vmem:[%s2725_s1 + $0x58] sm:$0xff]   ;;  %v2043_v20 = vld [vmem:[%s2725_s1 + $0x50] sm:$0xff]  }
   0x6   :  { %1833 = vmatprep.subr.bf16.mxu1 %v2028_v5  ;;  %v2036_v13 = vld [vmem:[%s2725_s1 + $0xe0] sm:$0xff]   ;;  %v2040_v17 = vld [vmem:[%s2725_s1 + $0xd8] sm:$0xff]   ;;  %v2044_v21 = vld [vmem:[%s2725_s1 + $0xd0] sm:$0xff]  }
   0x7   :  { %v2037_v14 = vld [vmem:[%s2725_s1 + $0x20] sm:$0xff]   ;;  %v2041_v18 = vld [vmem:[%s2725_s1 + $0x18] sm:$0xff]   ;;  %v2045_v22 = vld [vmem:[%s2725_s1 + $0x10] sm:$0xff]  }
   0x8   :  { %1770 = vmatpush3.bf16.msra.mxu0 %v2029_v6  ;;  %v2038_v15 = vld [vmem:[%s2725_s1 + $0xa0] sm:$0xff]   ;;  %v2042_v19 = vld [vmem:[%s2725_s1 + $0x98] sm:$0xff]   ;;  %v2046_v23 = vld [vmem:[%s2725_s1 + $0x90] sm:$0xff]  }
   0x9   :  { %1834 = vmatpush3.bf16.msra.mxu1 %v2030_v7  ;;  %1771 = vmatprep.subr.bf16.mxu0 %v2031_v8  ;;  %v2047_v24 = vld [vmem:[%s2725_s1 + $0x48] sm:$0xff]   ;;  %v2051_v28 = vld [vmem:[%s2725_s1 + $0x40] sm:$0xff]   ;;  %v2055_v40 = vld [vmem:[%s2725_s1 + $0x178] sm:$0xff]  }
   0xa   :  { %1835 = vmatprep.subr.bf16.mxu1 %v2032_v9  ;;  %v2048_v25 = vld [vmem:[%s2725_s1 + $0xc8] sm:$0xff]   ;;  %v2052_v29 = vld [vmem:[%s2725_s1 + $0xc0] sm:$0xff]   ;;  %v2056_v41 = vld [vmem:[%s2725_s1 + $0x138] sm:$0xff]  }
   0xb   :  { %v2049_v26 = vld [vmem:[%s2725_s1 + $0x8] sm:$0xff]   ;;  %v2053_v30 = vld [vmem:[%s2725_s1] sm:$0xff]   ;;  %v2057_v42 = vld [vmem:[%s2725_s1 + $0x1f8] sm:$0xff]  }
   0xc   :  { %1772 = vmatpush3.bf16.msra.mxu0 %v2033_v10  ;;  %v2050_v27 = vld [vmem:[%s2725_s1 + $0x88] sm:$0xff]   ;;  %v2054_v31 = vld [vmem:[%s2725_s1 + $0x80] sm:$0xff]   ;;  %v2058_v43 = vld [vmem:[%s2725_s1 + $0x1b8] sm:$0xff]  }
   0xd   :  { %1836 = vmatpush3.bf16.msra.mxu1 %v2034_v11  ;;  %1773 = vmatprep.subr.bf16.mxu0 %v2035_v12  ;;  %v18_v32 = vld [vmem:[%s2726_s0] sm:$0xff]  ;;  %v19_v34 = vld [vmem:[%s2726_s0 + $0x8] sm:$0xff]  ;;  %v2059_v50 = vld [vmem:[%s2725_s1 + $0x170] sm:$0xff]  }
   0xe   :  { %1837 = vmatprep.subr.bf16.mxu1 %v2036_v13  ;;  %v22_v33 = vld [vmem:[%s2726_s0 + $0x20] sm:$0xff]  ;;  %v23_v37 = vld [vmem:[%s2726_s0 + $0x28] sm:$0xff]  ;;  %v2060_v52 = vld [vmem:[%s2725_s1 + $0x130] sm:$0xff]  }
   0xf   :  { %v1559_v35 = vcombine.low %v18_v32, %v22_v33  ;;  %v1560_v36 = vcombine.high %v18_v32, %v22_v33  ;;  %v1561_v38 = vcombine.low %v19_v34, %v23_v37  ;;  %v1562_v39 = vcombine.high %v19_v34, %v23_v37  ;;  %v26_v44 = vld [vmem:[%s2726_s0 + $0x40] sm:$0xff]  ;;  %v27_v47 = vld [vmem:[%s2726_s0 + $0x48] sm:$0xff]  ;;  %v2061_v54 = vld [vmem:[%s2725_s1 + $0x1f0] sm:$0xff]  }
  0x10   :  { %1774 = vmatpush3.bf16.msra.mxu0 %v2037_v14  ;;  %v30_v45 = vld [vmem:[%s2726_s0 + $0x60] sm:$0xff]  ;;  %v31_v48 = vld [vmem:[%s2726_s0 + $0x68] sm:$0xff]  ;;  %v2062_v55 = vld [vmem:[%s2725_s1 + $0x1b0] sm:$0xff]  }
  0x11   :  { %1838 = vmatpush3.bf16.msra.mxu1 %v2038_v15  ;;  %1775 = vmatprep.subr.bf16.mxu0 %v2039_v16  ;;  %v1568_v46 = vcombine.high %v26_v44, %v30_v45  ;;  %v1570_v49 = vcombine.high %v27_v47, %v31_v48  ;;  %v1567_v51 = vcombine.low %v26_v44, %v30_v45  ;;  %v34_v56 = vld [vmem:[%s2726_s0 + $0x80] sm:$0xff]  ;;  %v35_v58 = vld [vmem:[%s2726_s0 + $0x88] sm:$0xff]  ;;  %v2077_v32 = vld [vmem:[%s2725_s1 + $0x1d0] sm:$0xff]  }
  0x12   :  { %1839 = vmatprep.subr.bf16.mxu1 %v2040_v17  ;;  %946 = vmatprep.mubr.bf16.mxu0 %v1560_v36  ;;  %v1569_v53 = vcombine.low %v27_v47, %v31_v48  ;;  %v38_v57 = vld [vmem:[%s2726_s0 + $0xa0] sm:$0xff]  ;;  %v39_v59 = vld [vmem:[%s2726_s0 + $0xa8] sm:$0xff]  ;;  %v2078_v33 = vld [vmem:[%s2725_s1 + $0x190] sm:$0xff]  }
  0x13   :  { %1043 = vmatprep.mubr.bf16.mxu1 %v1562_v39  ;;  %v1576_v60 = vcombine.high %v34_v56, %v38_v57  ;;  %v1578_v61 = vcombine.high %v35_v58, %v39_v59  ;;  %v2063_v62 = vld [vmem:[%s2725_s1 + $0x168] sm:$0xff]   ;;  %v1575_v2 = vcombine.low %v34_v56, %v38_v57  ;;  %v42_v3 = vld [vmem:[%s2726_s0 + $0xc0] sm:$0xff]  ;;  %v1577_v6 = vcombine.low %v35_v58, %v39_v59 }
  0x14   :  { %1776 = vmatpush3.bf16.msra.mxu0 %v2041_v18  ;;  %v2064_v63 = vld [vmem:[%s2725_s1 + $0x128] sm:$0xff]   ;;  %v46_v4 = vld [vmem:[%s2726_s0 + $0xe0] sm:$0xff]  ;;  %v2071_v18 = vld [vmem:[%s2725_s1 + $0x158] sm:$0xff]  }
  0x15   :  { %1840 = vmatpush3.bf16.msra.mxu1 %v2042_v19  ;;  %1777 = vmatprep.subr.bf16.mxu0 %v2043_v20  ;;  %v2065_v0 = vld [vmem:[%s2725_s1 + $0x1e8] sm:$0xff]   ;;  %v1584_v7 = vcombine.high %v42_v3, %v46_v4  ;;  %v2067_v10 = vld [vmem:[%s2725_s1 + $0x160] sm:$0xff]   ;;  %v1583_v19 = vcombine.low %v42_v3, %v46_v4  ;;  %v2072_v20 = vld [vmem:[%s2725_s1 + $0x118] sm:$0xff]  }
  0x16   :  { %1841 = vmatprep.subr.bf16.mxu1 %v2044_v21  ;;  %v2066_v1 = vld [vmem:[%s2725_s1 + $0x1a8] sm:$0xff]   ;;  %v2068_v11 = vld [vmem:[%s2725_s1 + $0x120] sm:$0xff]  }
  0x17   :  { %v43_v5 = vld [vmem:[%s2726_s0 + $0xc8] sm:$0xff]  ;;  %v2069_v12 = vld [vmem:[%s2725_s1 + $0x1e0] sm:$0xff]  }
  0x18   :  { %1778 = vmatpush3.bf16.msra.mxu0 %v2045_v22  ;;  %v47_v8 = vld [vmem:[%s2726_s0 + $0xe8] sm:$0xff]  ;;  %v2070_v13 = vld [vmem:[%s2725_s1 + $0x1a0] sm:$0xff]  }
  0x19   :  { %1842 = vmatpush3.bf16.msra.mxu1 %v2046_v23  ;;  %1779 = vmatprep.subr.bf16.mxu0 %v2047_v24  ;;  %v1586_v9 = vcombine.high %v43_v5, %v47_v8  ;;  %v50_v14 = vld [vmem:[%s2726_s0 + $0x100] sm:$0xff]  ;;  %v51_v16 = vld [vmem:[%s2726_s0 + $0x108] sm:$0xff]  ;;  %v1585_v21 = vcombine.low %v43_v5, %v47_v8  ;;  %v2073_v23 = vld [vmem:[%s2725_s1 + $0x1d8] sm:$0xff]  }
  0x1a   :  { %1843 = vmatprep.subr.bf16.mxu1 %v2048_v25  ;;  %v54_v15 = vld [vmem:[%s2726_s0 + $0x120] sm:$0xff]  ;;  %v55_v17 = vld [vmem:[%s2726_s0 + $0x128] sm:$0xff]  ;;  %v2074_v25 = vld [vmem:[%s2725_s1 + $0x198] sm:$0xff]  }
  0x1b   :  { %v1592_v22 = vcombine.high %v50_v14, %v54_v15  ;;  %v1594_v24 = vcombine.high %v51_v16, %v55_v17  ;;  %v1591_v34 = vcombine.low %v50_v14, %v54_v15  ;;  %v2080_v39 = vld [vmem:[%s2725_s1 + $0x108] sm:$0xff]   ;;  %v2084_v48 = vld [vmem:[%s2725_s1 + $0x100] sm:$0xff]   ;;  %v29_v8 = vld [vmem:[%s2726_s0 + $0x58] sm:$0xff] }
  0x1c   :  { %1780 = vmatpush3.bf16.msra.mxu0 %v2049_v26  ;;  %v58_v26 = vld [vmem:[%s2726_s0 + $0x140] sm:$0xff]  ;;  %v67_v44 = vld [vmem:[%s2726_s0 + $0x188] sm:$0xff]  ;;  %v36_v14 = vld [vmem:[%s2726_s0 + $0x90] sm:$0xff] }
  0x1d   :  { %1844 = vmatpush3.bf16.msra.mxu1 %v2050_v27  ;;  %1781 = vmatprep.subr.bf16.mxu0 %v2051_v28  ;;  %v62_v27 = vld [vmem:[%s2726_s0 + $0x160] sm:$0xff]  ;;  %v2075_v28 = vld [vmem:[%s2725_s1 + $0x150] sm:$0xff]   ;;  %v71_v45 = vld [vmem:[%s2726_s0 + $0x1a8] sm:$0xff] }
  0x1e   :  { %1845 = vmatprep.subr.bf16.mxu1 %v2052_v29  ;;  %v59_v29 = vld [vmem:[%s2726_s0 + $0x148] sm:$0xff]  ;;  %v1600_v36 = vcombine.high %v58_v26, %v62_v27  ;;  %v1599_v47 = vcombine.low %v58_v26, %v62_v27  ;;  %v1609_v59 = vcombine.low %v67_v44, %v71_v45  ;;  %v40_v15 = vld [vmem:[%s2726_s0 + $0xb0] sm:$0xff] }
  0x1f   :  { %v75_v56 = vld [vmem:[%s2726_s0 + $0x1c8] sm:$0xff]  ;;  %v1579_v26 = vcombine.low %v36_v14, %v40_v15 }
  0x20   :  { %1782 = vmatpush3.bf16.msra.mxu0 %v2053_v30  ;;  %v63_v30 = vld [vmem:[%s2726_s0 + $0x168] sm:$0xff] }
  0x21   :  { %1846 = vmatpush3.bf16.msra.mxu1 %v2054_v31  ;;  %1895 = vmatprep.subr.bf16.mxu0 %v2055_v40  ;;  %v2076_v31 = vld [vmem:[%s2725_s1 + $0x110] sm:$0xff]   ;;  %v1602_v37 = vcombine.high %v59_v29, %v63_v30  ;;  %v2081_v40 = vld [vmem:[%s2725_s1 + $0x1c8] sm:$0xff]  }
  0x22   :  { %1959 = vmatprep.subr.bf16.mxu1 %v2057_v42  ;;  %v70_v42 = vld [vmem:[%s2726_s0 + $0x1a0] sm:$0xff]  ;;  %v79_v57 = vld [vmem:[%s2726_s0 + $0x1e8] sm:$0xff] }
  0x23   :  { %947 = vmatmul.mubr.bf16.vlgmr.msra.gmra.mxu0 %v1559_v35  ;;  %v1593_v35 = vcombine.low %v51_v16, %v55_v17  ;;  %v1617_v3 = vcombine.low %v75_v56, %v79_v57  ;;  %v37_v16 = vld [vmem:[%s2726_s0 + $0x98] sm:$0xff] }
  0x24   :  { %1044 = vmatmul.mubr.bf16.vlgmr.msra.gmra.mxu1 %v1561_v38  ;;  %1896 = vmatpush3.bf16.msra.mxu0 %v2056_v41  ;;  %v2079_v38 = vld [vmem:[%s2725_s1 + $0x148] sm:$0xff]   ;;  %v66_v41 = vld [vmem:[%s2726_s0 + $0x180] sm:$0xff]  ;;  %v41_v17 = vld [vmem:[%s2726_s0 + $0xb8] sm:$0xff] }
  0x25   :  { %1960 = vmatpush3.bf16.msra.mxu1 %v2058_v43  ;;  %954 = vmatprep.mubr.bf16.mxu0 %v1568_v46  ;;  %v2082_v43 = vld [vmem:[%s2725_s1 + $0x188] sm:$0xff]   ;;  %v2083_v46 = vld [vmem:[%s2725_s1 + $0x140] sm:$0xff]   ;;  %v1607_v58 = vcombine.low %v66_v41, %v70_v42  ;;  %v1581_v27 = vcombine.low %v37_v16, %v41_v17 }
  0x26   :  { %1051 = vmatprep.mubr.bf16.mxu1 %v1570_v49  ;;  %1897 = vmatprep.subr.bf16.mxu0 %v2059_v50  ;;  %v1601_v49 = vcombine.low %v59_v29, %v63_v30  ;;  %v1608_v50 = vcombine.high %v66_v41, %v70_v42  ;;  %v52_v30 = vld [vmem:[%s2726_s0 + $0x110] sm:$0xff]  ;;  %v65_v41 = vld [vmem:[%s2726_s0 + $0x178] sm:$0xff] }
  0x27   :  { %1961 = vmatprep.subr.bf16.mxu1 %v2061_v54  ;;  %v74_v54 = vld [vmem:[%s2726_s0 + $0x1c0] sm:$0xff] }
  0x28   :  { %1898 = vmatpush3.bf16.msra.mxu0 %v2060_v52  ;;  %v1610_v52 = vcombine.high %v67_v44, %v71_v45 }
  0x29   :  { %1962 = vmatpush3.bf16.msra.mxu1 %v2062_v55  ;;  %1899 = vmatprep.subr.bf16.mxu0 %v2063_v62  ;;  %v78_v55 = vld [vmem:[%s2726_s0 + $0x1e0] sm:$0xff]  ;;  %v20_v62 = vld [vmem:[%s2726_s0 + $0x10] sm:$0xff] }
  0x2a   :  { %1963 = vmatprep.subr.bf16.mxu1 %v2065_v0  ;;  %v21_v0 = vld [vmem:[%s2726_s0 + $0x18] sm:$0xff] }
  0x2b   :  { %955 = vmatmul.mubr.bf16.gmra.mxu0 %v1567_v51  ;;  %v2085_v51 = vld [vmem:[%s2725_s1 + $0x1c0] sm:$0xff]  }
  0x2c   :  { %1052 = vmatmul.mubr.bf16.gmra.mxu1 %v1569_v53  ;;  %962 = vmatprep.mubr.bf16.mxu0 %v1576_v60  ;;  %v2086_v53 = vld [vmem:[%s2725_s1 + $0x180] sm:$0xff]   ;;  %v1616_v60 = vcombine.high %v74_v54, %v78_v55 }
  0x2d   :  { %1059 = vmatprep.mubr.bf16.mxu1 %v1578_v61  ;;  %1900 = vmatpush3.bf16.msra.mxu0 %v2064_v63  ;;  %v1618_v61 = vcombine.high %v75_v56, %v79_v57  ;;  %v24_v63 = vld [vmem:[%s2726_s0 + $0x30] sm:$0xff]  ;;  %v77_v56 = vld [vmem:[%s2726_s0 + $0x1d8] sm:$0xff] }
  0x2e   :  { %1964 = vmatpush3.bf16.msra.mxu1 %v2066_v1  ;;  %1901 = vmatprep.subr.bf16.mxu0 %v2067_v10  ;;  %v25_v1 = vld [vmem:[%s2726_s0 + $0x38] sm:$0xff]  ;;  %v1564_v4 = vcombine.high %v20_v62, %v24_v63  ;;  %v1563_v10 = vcombine.low %v20_v62, %v24_v63 }
  0x2f   :  { %1965 = vmatprep.subr.bf16.mxu1 %v2069_v12  ;;  %v1566_v5 = vcombine.high %v21_v0, %v25_v1  ;;  %v81_v57 = vld [vmem:[%s2726_s0 + $0x1f8] sm:$0xff] }
  0x30   :  { %v1621_v63 = vcombine.low %v77_v56, %v81_v57 }
  0x31   :  { %1902 = vmatpush3.bf16.msra.mxu0 %v2068_v11  ;;  %v1565_v11 = vcombine.low %v21_v0, %v25_v1 }
  0x32   :  { %1966 = vmatpush3.bf16.msra.mxu1 %v2070_v13  ;;  %1903 = vmatprep.subr.bf16.mxu0 %v2071_v18 }
  0x33   :  { %963 = vmatmul.mubr.bf16.gmra.mxu0 %v1575_v2  ;;  %1967 = vmatprep.subr.bf16.mxu1 %v2073_v23  ;;  %v1615_v2 = vcombine.low %v74_v54, %v78_v55  ;;  %v48_v23 = vld [vmem:[%s2726_s0 + $0xf0] sm:$0xff] }
  0x34   :  { %1060 = vmatmul.mubr.bf16.gmra.mxu1 %v1577_v6  ;;  %970 = vmatprep.mubr.bf16.mxu0 %v1584_v7  ;;  %v28_v6 = vld [vmem:[%s2726_s0 + $0x50] sm:$0xff] }
  0x35   :  { %1067 = vmatprep.mubr.bf16.mxu1 %v1586_v9  ;;  %1904 = vmatpush3.bf16.msra.mxu0 %v2072_v20  ;;  %v32_v7 = vld [vmem:[%s2726_s0 + $0x70] sm:$0xff]  ;;  %v33_v9 = vld [vmem:[%s2726_s0 + $0x78] sm:$0xff]  ;;  %v1580_v20 = vcombine.high %v36_v14, %v40_v15 }
  0x36   :  { %1968 = vmatpush3.bf16.msra.mxu1 %v2074_v25  ;;  %1905 = vmatprep.subr.bf16.mxu0 %v2075_v28  ;;  %v1572_v12 = vcombine.high %v28_v6, %v32_v7  ;;  %v1574_v13 = vcombine.high %v29_v8, %v33_v9  ;;  %v1571_v18 = vcombine.low %v28_v6, %v32_v7  ;;  %v49_v25 = vld [vmem:[%s2726_s0 + $0xf8] sm:$0xff]  ;;  %v76_v54 = vld [vmem:[%s2726_s0 + $0x1d0] sm:$0xff] }
  0x37   :  { %1969 = vmatprep.subr.bf16.mxu1 %v2077_v32  ;;  %v53_v32 = vld [vmem:[%s2726_s0 + $0x118] sm:$0xff]  ;;  %v80_v55 = vld [vmem:[%s2726_s0 + $0x1f0] sm:$0xff] }
  0x38   :  { %v1619_v62 = vcombine.low %v76_v54, %v80_v55 }
  0x39   :  { %1906 = vmatpush3.bf16.msra.mxu0 %v2076_v31  ;;  %v56_v31 = vld [vmem:[%s2726_s0 + $0x130] sm:$0xff] }
  0x3a   :  { %1970 = vmatpush3.bf16.msra.mxu1 %v2078_v33  ;;  %1907 = vmatprep.subr.bf16.mxu0 %v2079_v38  ;;  %v57_v33 = vld [vmem:[%s2726_s0 + $0x138] sm:$0xff]  ;;  %v60_v38 = vld [vmem:[%s2726_s0 + $0x150] sm:$0xff]  ;;  %v1595_v42 = vcombine.low %v52_v30, %v56_v31 }
  0x3b   :  { %971 = vmatmul.mubr.bf16.gmra.mxu0 %v1583_v19  ;;  %1971 = vmatprep.subr.bf16.mxu1 %v2081_v40  ;;  %v1573_v19 = vcombine.low %v29_v8, %v33_v9  ;;  %v61_v40 = vld [vmem:[%s2726_s0 + $0x158] sm:$0xff] }
  0x3c   :  { %1068 = vmatmul.mubr.bf16.gmra.mxu1 %v1585_v21  ;;  %978 = vmatprep.mubr.bf16.mxu0 %v1592_v22  ;;  %v1582_v21 = vcombine.high %v37_v16, %v41_v17  ;;  %v44_v22 = vld [vmem:[%s2726_s0 + $0xd0] sm:$0xff]  ;;  %v1606_v45 = vcombine.high %v61_v40, %v65_v41 }
  0x3d   :  { %1075 = vmatprep.mubr.bf16.mxu1 %v1594_v24  ;;  %1908 = vmatpush3.bf16.msra.mxu0 %v2080_v39  ;;  %v45_v24 = vld [vmem:[%s2726_s0 + $0xd8] sm:$0xff]  ;;  %v1588_v28 = vcombine.high %v44_v22, %v48_v23  ;;  %v64_v39 = vld [vmem:[%s2726_s0 + $0x170] sm:$0xff] }
  0x3e   :  { %1972 = vmatpush3.bf16.msra.mxu1 %v2082_v43  ;;  %1909 = vmatprep.subr.bf16.mxu0 %v2083_v46  ;;  %v1590_v29 = vcombine.high %v45_v24, %v49_v25  ;;  %v1597_v43 = vcombine.low %v53_v32, %v57_v33  ;;  %v1604_v44 = vcombine.high %v60_v38, %v64_v39  ;;  %v68_v46 = vld [vmem:[%s2726_s0 + $0x190] sm:$0xff] }
  0x3f   :  { %1973 = vmatprep.subr.bf16.mxu1 %v2085_v51  ;;  %v1605_v51 = vcombine.low %v61_v40, %v65_v41 }
  0x41   :  { %1910 = vmatpush3.bf16.msra.mxu0 %v2084_v48  ;;  %v69_v48 = vld [vmem:[%s2726_s0 + $0x198] sm:$0xff] }
  0x42   :  { %1974 = vmatpush3.bf16.msra.mxu1 %v2086_v53 }
  0x43   :  { %979 = vmatmul.mubr.bf16.gmra.mxu0 %v1591_v34  ;;  %v1587_v34 = vcombine.low %v44_v22, %v48_v23 }
  0x44   :  { %1076 = vmatmul.mubr.bf16.gmra.mxu1 %v1593_v35  ;;  %986 = vmatprep.mubr.bf16.mxu0 %v1600_v36  ;;  %v1589_v35 = vcombine.low %v45_v24, %v49_v25  ;;  %v1596_v36 = vcombine.high %v52_v30, %v56_v31 }
  0x45   :  { %1083 = vmatprep.mubr.bf16.mxu1 %v1602_v37  ;;  %v1598_v37 = vcombine.high %v53_v32, %v57_v33 }
  0x4b   :  { %987 = vmatmul.mubr.bf16.gmra.mxu0 %v1599_v47  ;;  %v72_v47 = vld [vmem:[%s2726_s0 + $0x1b0] sm:$0xff] }
  0x4c   :  { %1084 = vmatmul.mubr.bf16.gmra.mxu1 %v1601_v49  ;;  %994 = vmatprep.mubr.bf16.mxu0 %v1608_v50  ;;  %v73_v49 = vld [vmem:[%s2726_s0 + $0x1b8] sm:$0xff]  ;;  %v1603_v50 = vcombine.low %v60_v38, %v64_v39 }
  0x4d   :  { %1091 = vmatprep.mubr.bf16.mxu1 %v1610_v52  ;;  %v1612_v52 = vcombine.high %v68_v46, %v72_v47  ;;  %v1614_v53 = vcombine.high %v69_v48, %v73_v49 }
  0x53   :  { %995 = vmatmul.mubr.bf16.gmra.mxu0 %v1607_v58  ;;  %v1611_v58 = vcombine.low %v68_v46, %v72_v47 }
  0x54   :  { %1092 = vmatmul.mubr.bf16.gmra.mxu1 %v1609_v59  ;;  %1002 = vmatprep.mubr.bf16.mxu0 %v1616_v60  ;;  %v1613_v59 = vcombine.low %v69_v48, %v73_v49  ;;  %v1620_v60 = vcombine.high %v76_v54, %v80_v55 }
  0x55   :  { %1099 = vmatprep.mubr.bf16.mxu1 %v1618_v61  ;;  %v1622_v61 = vcombine.high %v77_v56, %v81_v57 }
  0x5b   :  { %1003 = vmatmul.mubr.bf16.gmra.mxu0 %v1615_v2 }
  0x5c   :  { %1100 = vmatmul.mubr.bf16.gmra.mxu1 %v1617_v3  ;;  %1140 = vmatprep.mubr.bf16.mxu0 %v1564_v4 }
  0x5d   :  { %1237 = vmatprep.mubr.bf16.mxu1 %v1566_v5 }
  0x63   :  { %1141 = vmatmul.mubr.bf16.vlgmr.msra.gmra.mxu0 %v1563_v10 }
  0x64   :  { %1238 = vmatmul.mubr.bf16.vlgmr.msra.gmra.mxu1 %v1565_v11  ;;  %1148 = vmatprep.mubr.bf16.mxu0 %v1572_v12 }
  0x65   :  { %1245 = vmatprep.mubr.bf16.mxu1 %v1574_v13 }
  0x6b   :  { %1149 = vmatmul.mubr.bf16.gmra.mxu0 %v1571_v18 }
  0x6c   :  { %1246 = vmatmul.mubr.bf16.gmra.mxu1 %v1573_v19  ;;  %1156 = vmatprep.mubr.bf16.mxu0 %v1580_v20 }
  0x6d   :  { %1253 = vmatprep.mubr.bf16.mxu1 %v1582_v21 }
  0x73   :  { %1157 = vmatmul.mubr.bf16.gmra.mxu0 %v1579_v26 }
  0x74   :  { %1254 = vmatmul.mubr.bf16.gmra.mxu1 %v1581_v27  ;;  %1164 = vmatprep.mubr.bf16.mxu0 %v1588_v28 }
  0x75   :  { %1261 = vmatprep.mubr.bf16.mxu1 %v1590_v29 }
  0x7b   :  { %1165 = vmatmul.mubr.bf16.gmra.mxu0 %v1587_v34 }
  0x7c   :  { %1262 = vmatmul.mubr.bf16.gmra.mxu1 %v1589_v35  ;;  %1172 = vmatprep.mubr.bf16.mxu0 %v1596_v36 }
  0x7d   :  { %1269 = vmatprep.mubr.bf16.mxu1 %v1598_v37 }
  0x83   :  { %1173 = vmatmul.mubr.bf16.gmra.mxu0 %v1595_v42 }
  0x84   :  { %1270 = vmatmul.mubr.bf16.gmra.mxu1 %v1597_v43  ;;  %1180 = vmatprep.mubr.bf16.mxu0 %v1604_v44 }
  0x85   :  { %1277 = vmatprep.mubr.bf16.mxu1 %v1606_v45 }
  0x8b   :  { %1181 = vmatmul.mubr.bf16.gmra.mxu0 %v1603_v50 }
  0x8c   :  { %1278 = vmatmul.mubr.bf16.gmra.mxu1 %v1605_v51  ;;  %1188 = vmatprep.mubr.bf16.mxu0 %v1612_v52 }
  0x8d   :  { %1285 = vmatprep.mubr.bf16.mxu1 %v1614_v53 }
  0x93   :  { %1189 = vmatmul.mubr.bf16.gmra.mxu0 %v1611_v58 }
  0x94   :  { %1286 = vmatmul.mubr.bf16.gmra.mxu1 %v1613_v59  ;;  %1196 = vmatprep.mubr.bf16.mxu0 %v1620_v60 }
  0x95   :  { %1293 = vmatprep.mubr.bf16.mxu1 %v1622_v61 }
  0x9b   :  { %1197 = vmatmul.mubr.bf16.gmra.mxu0 %v1619_v62 }
  0x9c   :  { %1294 = vmatmul.mubr.bf16.gmra.mxu1 %v1621_v63 }
  0xe3   :  { %v1783_v0 = vpop.f32.mrf.mxu0 }
  0xe4   :  { %v1847_v1 = vpop.f32.mrf.mxu1 }
  0xe5   :  { %v1784_v2 = vpop.f32.mrf.mxu0 }
  0xe6   :  { %v1785_v3 = vadd.f32 %v1784_v2, %v1783_v0  ;;  %v1848_v4 = vpop.f32.mrf.mxu1 }
  0xe7   :  { %v1849_v5 = vadd.f32 %v1848_v4, %v1847_v1  ;;  %v1786_v6 = vpop.f32.mrf.mxu0 }
  0xe8   :  { %v1850_v7 = vpop.f32.mrf.mxu1 }
  0xe9   :  { %v2498_v8 = vadd.f32 %v1849_v5, %v1785_v3  ;;  %v1787_v9 = vpop.f32.mrf.mxu0 }
  0xea   :  { %v1788_v10 = vadd.f32 %v1787_v9, %v1786_v6  ;;  %v1851_v11 = vpop.f32.mrf.mxu1 }
  0xeb   :  { %v1852_v12 = vadd.f32 %v1851_v11, %v1850_v7  ;;  %v1789_v13 = vpop.f32.mrf.mxu0 }
  0xec   :  { %v1853_v14 = vpop.f32.mrf.mxu1 }
  0xed   :  { %v2500_v15 = vadd.f32 %v1852_v12, %v1788_v10  ;;  %v1790_v16 = vpop.f32.mrf.mxu0 }
  0xee   :  { %v1791_v17 = vadd.f32 %v1790_v16, %v1789_v13  ;;  %v1854_v18 = vpop.f32.mrf.mxu1 }
  0xef   :  { %v1855_v19 = vadd.f32 %v1854_v18, %v1853_v14  ;;  %v1792_v20 = vpop.f32.mrf.mxu0 }
  0xf0   :  { %v1856_v21 = vpop.f32.mrf.mxu1 }
  0xf1   :  { %v2502_v22 = vadd.f32 %v1855_v19, %v1791_v17  ;;  %v1793_v23 = vpop.f32.mrf.mxu0 }
  0xf2   :  { %v1794_v24 = vadd.f32 %v1793_v23, %v1792_v20  ;;  %v1857_v25 = vpop.f32.mrf.mxu1 }
  0xf3   :  { %v1858_v26 = vadd.f32 %v1857_v25, %v1856_v21  ;;  %v1795_v27 = vpop.f32.mrf.mxu0 }
  0xf4   :  { %v1859_v28 = vpop.f32.mrf.mxu1 }
  0xf5   :  { %v2504_v29 = vadd.f32 %v1858_v26, %v1794_v24  ;;  %v1796_v30 = vpop.f32.mrf.mxu0 }
  0xf6   :  { %v1797_v31 = vadd.f32 %v1796_v30, %v1795_v27  ;;  %v1860_v32 = vpop.f32.mrf.mxu1 }
  0xf7   :  { %v1861_v33 = vadd.f32 %v1860_v32, %v1859_v28  ;;  %v1798_v34 = vpop.f32.mrf.mxu0 }
  0xf8   :  { %v1862_v35 = vpop.f32.mrf.mxu1 }
  0xf9   :  { %v2506_v36 = vadd.f32 %v1861_v33, %v1797_v31  ;;  %v1799_v37 = vpop.f32.mrf.mxu0 }
  0xfa   :  { %v1800_v38 = vadd.f32 %v1799_v37, %v1798_v34  ;;  %v1863_v39 = vpop.f32.mrf.mxu1 }
  0xfb   :  { %v1864_v40 = vadd.f32 %v1863_v39, %v1862_v35  ;;  %v1801_v41 = vpop.f32.mrf.mxu0 }
  0xfc   :  { %v1865_v42 = vpop.f32.mrf.mxu1 }
  0xfd   :  { %v2508_v43 = vadd.f32 %v1864_v40, %v1800_v38  ;;  %v1802_v44 = vpop.f32.mrf.mxu0 }
  0xfe   :  { %v1803_v45 = vadd.f32 %v1802_v44, %v1801_v41  ;;  %v1866_v46 = vpop.f32.mrf.mxu1 }
  0xff   :  { %v1867_v47 = vadd.f32 %v1866_v46, %v1865_v42  ;;  %v1804_v48 = vpop.f32.mrf.mxu0 }
 0x100   :  { %v1868_v49 = vpop.f32.mrf.mxu1 }
 0x101   :  { %v2510_v50 = vadd.f32 %v1867_v47, %v1803_v45  ;;  %v1805_v51 = vpop.f32.mrf.mxu0 }
 0x102   :  { %v1806_v52 = vadd.f32 %v1805_v51, %v1804_v48  ;;  %v1869_v53 = vpop.f32.mrf.mxu1 }
 0x103   :  { %v1870_v54 = vadd.f32 %v1869_v53, %v1868_v49  ;;  %v1807_v55 = vpop.f32.mrf.mxu0 }
 0x104   :  { %v1871_v56 = vpop.f32.mrf.mxu1 }
 0x105   :  { %v2512_v57 = vadd.f32 %v1870_v54, %v1806_v52  ;;  %v1808_v58 = vpop.f32.mrf.mxu0 }
 0x106   :  { %v1809_v59 = vadd.f32 %v1808_v58, %v1807_v55  ;;  %v1872_v60 = vpop.f32.mrf.mxu1 }
 0x107   :  { %v1873_v61 = vadd.f32 %v1872_v60, %v1871_v56  ;;  %v1810_v62 = vpop.f32.mrf.mxu0 }
 0x108   :  { %v1874_v63 = vpop.f32.mrf.mxu1 }
 0x109   :  { %v2514_v0 = vadd.f32 %v1873_v61, %v1809_v59  ;;  %v1811_v1 = vpop.f32.mrf.mxu0 }
 0x10a   :  { %v1812_v2 = vadd.f32 %v1811_v1, %v1810_v62  ;;  %v1875_v3 = vpop.f32.mrf.mxu1 }
 0x10b   :  { %v1876_v4 = vadd.f32 %v1875_v3, %v1874_v63  ;;  %v1813_v5 = vpop.f32.mrf.mxu0 }
 0x10c   :  { %v1877_v6 = vpop.f32.mrf.mxu1 }
 0x10d   :  { %v2516_v7 = vadd.f32 %v1876_v4, %v1812_v2  ;;  %v1814_v9 = vpop.f32.mrf.mxu0 }
 0x10e   :  { %v1815_v10 = vadd.f32 %v1814_v9, %v1813_v5  ;;  %v1878_v11 = vpop.f32.mrf.mxu1 }
 0x10f   :  { %v1879_v12 = vadd.f32 %v1878_v11, %v1877_v6  ;;  %v1816_v13 = vpop.f32.mrf.mxu0 }
 0x110   :  { %v1880_v14 = vpop.f32.mrf.mxu1 }
 0x111   :  { %v2518_v16 = vadd.f32 %v1879_v12, %v1815_v10  ;;  %v1817_v17 = vpop.f32.mrf.mxu0 }
 0x112   :  { %v1818_v18 = vadd.f32 %v1817_v17, %v1816_v13  ;;  %v1881_v19 = vpop.f32.mrf.mxu1 }
 0x113   :  { %v1882_v20 = vadd.f32 %v1881_v19, %v1880_v14  ;;  %v1819_v21 = vpop.f32.mrf.mxu0 }
 0x114   :  { %v1883_v23 = vpop.f32.mrf.mxu1 }
 0x115   :  { %v2520_v24 = vadd.f32 %v1882_v20, %v1818_v18  ;;  %v1820_v25 = vpop.f32.mrf.mxu0 }
 0x116   :  { %v1821_v26 = vadd.f32 %v1820_v25, %v1819_v21  ;;  %v1884_v27 = vpop.f32.mrf.mxu1 }
 0x117   :  { %v1885_v28 = vadd.f32 %v1884_v27, %v1883_v23  ;;  %v1822_v30 = vpop.f32.mrf.mxu0 }
 0x118   :  { %v1886_v31 = vpop.f32.mrf.mxu1 }
 0x119   :  { %v2522_v32 = vadd.f32 %v1885_v28, %v1821_v26  ;;  %v1823_v33 = vpop.f32.mrf.mxu0 }
 0x11a   :  { %v1824_v34 = vadd.f32 %v1823_v33, %v1822_v30  ;;  %v1887_v35 = vpop.f32.mrf.mxu1 }
 0x11b   :  { %v1888_v37 = vadd.f32 %v1887_v35, %v1886_v31  ;;  %v1825_v38 = vpop.f32.mrf.mxu0 }
 0x11c   :  { %v1889_v39 = vpop.f32.mrf.mxu1 }
 0x11d   :  { %v2524_v40 = vadd.f32 %v1888_v37, %v1824_v34  ;;  %v1826_v41 = vpop.f32.mrf.mxu0 }
 0x11e   :  { %v1827_v42 = vadd.f32 %v1826_v41, %v1825_v38  ;;  %v1890_v44 = vpop.f32.mrf.mxu1 }
 0x11f   :  { %v1891_v45 = vadd.f32 %v1890_v44, %v1889_v39  ;;  %v2526_v46 = vpop.f32.mrf.mxu0 }
 0x120   :  { %v2528_v47 = vpop.f32.mrf.mxu1 }
 0x121   :  { %v2530_v48 = vadd.f32 %v1891_v45, %v1827_v42  ;;  %v2532_v49 = vpop.f32.mrf.mxu0 }
 0x122   :  { %v2534_v51 = vpop.f32.mrf.mxu1 }
 0x123   :  { %v1911_v52 = vpop.f32.mrf.mxu0 }
 0x124   :  { %v1975_v53 = vpop.f32.mrf.mxu1 }
 0x125   :  { %v1912_v54 = vpop.f32.mrf.mxu0 }
 0x126   :  { %v1913_v55 = vadd.f32 %v1912_v54, %v1911_v52  ;;  %v1976_v56 = vpop.f32.mrf.mxu1 }
 0x127   :  { %v1914_v58 = vpop.f32.mrf.mxu0  ;;  %v1977_v2 = vadd.f32 %v1976_v56, %v1975_v53 }
 0x128   :  { %v1978_v59 = vpop.f32.mrf.mxu1  ;;  %v1143_v61 = vadd.f32 %v1913_v55, %v2498_v8 }
 0x129   :  { %v1915_v60 = vpop.f32.mrf.mxu0 }
 0x12a   :  { %v1916_v62 = vadd.f32 %v1915_v60, %v1914_v58  ;;  %v1979_v63 = vpop.f32.mrf.mxu1  ;;  %v2538_v9 = vadd.f32 %v1977_v2, %v1143_v61 }
 0x12b   :  { %v1917_v1 = vpop.f32.mrf.mxu0  ;;  %v1980_v4 = vadd.f32 %v1979_v63, %v1978_v59 }
 0x12c   :  { %v1146_v3 = vadd.f32 %v1916_v62, %v2500_v15  ;;  %v1981_v5 = vpop.f32.mrf.mxu1 }
 0x12d   :  { %v1918_v6 = vpop.f32.mrf.mxu0 }
 0x12e   :  { %v2540_v10 = vadd.f32 %v1980_v4, %v1146_v3  ;;  %v1919_v11 = vadd.f32 %v1918_v6, %v1917_v1  ;;  %v1982_v12 = vpop.f32.mrf.mxu1 }
 0x12f   :  { %v1920_v13 = vpop.f32.mrf.mxu0  ;;  %v1983_v17 = vadd.f32 %v1982_v12, %v1981_v5 }
 0x130   :  { %v1302_v14 = vadd.f32 %v2540_v10, %v2538_v9  ;;  %v1151_v8 = vadd.f32 %v1919_v11, %v2502_v22  ;;  %v1984_v18 = vpop.f32.mrf.mxu1 }
 0x131   :  { %v1921_v19 = vpop.f32.mrf.mxu0 }
 0x132   :  { %v2545_v20 = vadd.f32 %v1983_v17, %v1151_v8  ;;  %v1922_v15 = vadd.f32 %v1921_v19, %v1920_v13  ;;  %v1985_v21 = vpop.f32.mrf.mxu1 }
 0x133   :  { %v1923_v23 = vpop.f32.mrf.mxu0  ;;  %v1986_v27 = vadd.f32 %v1985_v21, %v1984_v18 }
 0x134   :  { %v1303_v25 = vadd.f32 %v1302_v14, %v2545_v20  ;;  %v1154_v26 = vadd.f32 %v1922_v15, %v2504_v29  ;;  %v1987_v28 = vpop.f32.mrf.mxu1 }
 0x135   :  { %v1924_v30 = vpop.f32.mrf.mxu0 }
 0x136   :  { %v2549_v31 = vadd.f32 %v1986_v27, %v1154_v26  ;;  %v1925_v33 = vadd.f32 %v1924_v30, %v1923_v23  ;;  %v1988_v34 = vpop.f32.mrf.mxu1 }
 0x137   :  { %v1926_v22 = vpop.f32.mrf.mxu0  ;;  %v1989_v38 = vadd.f32 %v1988_v34, %v1987_v28 }
 0x138   :  { %v1304_v35 = vadd.f32 %v1303_v25, %v2549_v31  ;;  %v1159_v37 = vadd.f32 %v1925_v33, %v2506_v36  ;;  %v1990_v39 = vpop.f32.mrf.mxu1 }
 0x139   :  { %v1927_v41 = vpop.f32.mrf.mxu0 }
 0x13a   :  { %v2553_v42 = vadd.f32 %v1989_v38, %v1159_v37  ;;  %v1928_v44 = vadd.f32 %v1927_v41, %v1926_v22  ;;  %v1991_v45 = vpop.f32.mrf.mxu1 }
 0x13b   :  { %v1929_v29 = vpop.f32.mrf.mxu0  ;;  %v1992_v54 = vadd.f32 %v1991_v45, %v1990_v39 }
 0x13c   :  { %v1305_v52 = vadd.f32 %v1304_v35, %v2553_v42  ;;  %v1162_v53 = vadd.f32 %v1928_v44, %v2508_v43  ;;  %v1993_v55 = vpop.f32.mrf.mxu1 }
 0x13d   :  { %v1930_v56 = vpop.f32.mrf.mxu0 }
 0x13e   :  { %v2557_v58 = vadd.f32 %v1992_v54, %v1162_v53  ;;  %v1931_v59 = vadd.f32 %v1930_v56, %v1929_v29  ;;  %v1994_v60 = vpop.f32.mrf.mxu1 }
 0x13f   :  { %v1932_v36 = vpop.f32.mrf.mxu0  ;;  %v1995_v63 = vadd.f32 %v1994_v60, %v1993_v55 }
 0x140   :  { %v1306_v61 = vadd.f32 %v1305_v52, %v2557_v58  ;;  %v1167_v62 = vadd.f32 %v1931_v59, %v2510_v50  ;;  %v1996_v1 = vpop.f32.mrf.mxu1 }
 0x141   :  { %v1933_v2 = vpop.f32.mrf.mxu0 }
 0x142   :  { %v2561_v3 = vadd.f32 %v1995_v63, %v1167_v62  ;;  %v1934_v4 = vadd.f32 %v1933_v2, %v1932_v36  ;;  %v1997_v5 = vpop.f32.mrf.mxu1 }
 0x143   :  { %v1935_v43 = vpop.f32.mrf.mxu0  ;;  %v1998_v12 = vadd.f32 %v1997_v5, %v1996_v1 }
 0x144   :  { %v1307_v6 = vadd.f32 %v1306_v61, %v2561_v3  ;;  %v1170_v11 = vadd.f32 %v1934_v4, %v2512_v57  ;;  %v1999_v13 = vpop.f32.mrf.mxu1 }
 0x145   :  { %v1936_v14 = vpop.f32.mrf.mxu0 }
 0x146   :  { %v2565_v8 = vadd.f32 %v1998_v12, %v1170_v11  ;;  %v1937_v17 = vadd.f32 %v1936_v14, %v1935_v43  ;;  %v2000_v18 = vpop.f32.mrf.mxu1 }
 0x147   :  { %v1938_v50 = vpop.f32.mrf.mxu0  ;;  %v2001_v21 = vadd.f32 %v2000_v18, %v1999_v13 }
 0x148   :  { %v1308_v19 = vadd.f32 %v1307_v6, %v2565_v8  ;;  %v1175_v15 = vadd.f32 %v1937_v17, %v2514_v0  ;;  %v2002_v23 = vpop.f32.mrf.mxu1 }
 0x149   :  { %v1939_v25 = vpop.f32.mrf.mxu0 }
 0x14a   :  { %v2569_v26 = vadd.f32 %v2001_v21, %v1175_v15  ;;  %v1940_v27 = vadd.f32 %v1939_v25, %v1938_v50  ;;  %v2003_v28 = vpop.f32.mrf.mxu1  ;;  %v1830_v15 = vadd.f32 %v2532_v49, %v2526_v46  ;;  %v1894_v21 = vadd.f32 %v2534_v51, %v2528_v47 }
 0x14b   :  { %v1941_v57 = vpop.f32.mrf.mxu0  ;;  %v2004_v34 = vadd.f32 %v2003_v28, %v2002_v23 }
 0x14c   :  { %v1309_v30 = vadd.f32 %v1308_v19, %v2569_v26  ;;  %v1178_v33 = vadd.f32 %v1940_v27, %v2516_v7  ;;  %v2005_v22 = vpop.f32.mrf.mxu1 }
 0x14d   :  { %v1942_v35 = vpop.f32.mrf.mxu0 }
 0x14e   :  { %v2573_v37 = vadd.f32 %v2004_v34, %v1178_v33  ;;  %v1943_v38 = vadd.f32 %v1942_v35, %v1941_v57  ;;  %v2006_v39 = vpop.f32.mrf.mxu1 }
 0x14f   :  { %v1944_v0 = vpop.f32.mrf.mxu0  ;;  %v2007_v45 = vadd.f32 %v2006_v39, %v2005_v22 }
 0x150   :  { %v1310_v41 = vadd.f32 %v1309_v30, %v2573_v37  ;;  %v1183_v44 = vadd.f32 %v1943_v38, %v2518_v16  ;;  %v2008_v29 = vpop.f32.mrf.mxu1 }
 0x151   :  { %v1945_v52 = vpop.f32.mrf.mxu0 }
 0x152   :  { %v2577_v53 = vadd.f32 %v2007_v45, %v1183_v44  ;;  %v1946_v54 = vadd.f32 %v1945_v52, %v1944_v0  ;;  %v2009_v55 = vpop.f32.mrf.mxu1 }
 0x153   :  { %v1947_v7 = vpop.f32.mrf.mxu0  ;;  %v2010_v60 = vadd.f32 %v2009_v55, %v2008_v29 }
 0x154   :  { %v1311_v56 = vadd.f32 %v1310_v41, %v2577_v53  ;;  %v1186_v59 = vadd.f32 %v1946_v54, %v2520_v24  ;;  %v2011_v36 = vpop.f32.mrf.mxu1 }
 0x155   :  { %v1948_v61 = vpop.f32.mrf.mxu0 }
 0x156   :  { %v1283_v62 = vadd.f32 %v2010_v60, %v1186_v59  ;;  %v1949_v63 = vadd.f32 %v1948_v61, %v1947_v7  ;;  %v2012_v1 = vpop.f32.mrf.mxu1 }
 0x157   :  { %v1950_v2 = vpop.f32.mrf.mxu0  ;;  %v2013_v5 = vadd.f32 %v2012_v1, %v2011_v36 }
 0x158   :  { %v1312_v16 = vadd.f32 %v1311_v56, %v1283_v62  ;;  %v1191_v4 = vadd.f32 %v1949_v63, %v2522_v32  ;;  %v2014_v43 = vpop.f32.mrf.mxu1 }
 0x159   :  { %v1951_v6 = vpop.f32.mrf.mxu0 }
 0x15a   :  { %v1288_v11 = vadd.f32 %v2013_v5, %v1191_v4  ;;  %v1952_v12 = vadd.f32 %v1951_v6, %v1950_v2  ;;  %v2015_v13 = vpop.f32.mrf.mxu1 }
 0x15b   :  { %v1953_v14 = vpop.f32.mrf.mxu0  ;;  %v2016_v18 = vadd.f32 %v2015_v13, %v2014_v43 }
 0x15c   :  { %v1313_v17 = vadd.f32 %v1312_v16, %v1288_v11  ;;  %v1194_v24 = vadd.f32 %v1952_v12, %v2524_v40  ;;  %v2017_v50 = vpop.f32.mrf.mxu1  ;;  %v1105_v40 = vadd.f32 %v1894_v21, %v1830_v15 }
 0x15d   :  { %v1954_v19 = vpop.f32.mrf.mxu0 }
 0x15e   :  { %v1291_v32 = vadd.f32 %v2016_v18, %v1194_v24  ;;  %v1955_v23 = vadd.f32 %v1954_v19, %v1953_v14  ;;  %v2018_v25 = vpop.f32.mrf.mxu1 }
 0x15f   :  { %v1956_v27 = vpop.f32.mrf.mxu0  ;;  %v2019_v30 = vadd.f32 %v2018_v25, %v2017_v50 }
 0x160   :  { %v1314_v28 = vadd.f32 %v1313_v17, %v1291_v32  ;;  %v1199_v57 = vadd.f32 %v1955_v23, %v2530_v48  ;;  %v2020_v33 = vpop.f32.mrf.mxu1 }
 0x161   :  { %v1957_v34 = vpop.f32.mrf.mxu0 }
 0x162   :  { %v1296_v22 = vadd.f32 %v2019_v30, %v1199_v57  ;;  %v1958_v35 = vadd.f32 %v1957_v34, %v1956_v27  ;;  %v2021_v38 = vpop.f32.mrf.mxu1 }
 0x163   :  { %v2022_v46 = vadd.f32 %v2021_v38, %v2020_v33 }
 0x164   :  { %v1315_v39 = vadd.f32 %v1314_v28, %v1296_v22  ;;  %v1202_v0 = vadd.f32 %v1958_v35, %v1105_v40 }
 0x166   :  { %v1299_v49 = vadd.f32 %v2022_v46, %v1202_v0 }
 0x168   :  { %v1316_v41 = vadd.f32 %v1315_v39, %v1299_v49 }
 0x16a   :  { %v1317_v47 = vrot.slane %v1316_v41, 4 }
 0x16c   :  { %v1318_v51 = vadd.f32 %v1317_v47, %v1316_v41  ;;  %v1378_v47 = vld [vmem:[%s2727_s2] sm:$0x1] }
 0x16e   :  { %v1319_v44 = vrot.slane %v1318_v51, 2 }
 0x170   :  { %v1320_v45 = vadd.f32 %v1319_v44, %v1318_v51 }
 0x172   :  { %v1321_v29 = vrot.slane %v1320_v45, 1 }
 0x174   :  { %v1322_v52 = vadd.f32 %v1321_v29, %v1320_v45 }
 0x176   :  { %v1323_v54 = vmul.f32 0.0078125, %v1322_v52 }
 0x178   :  { %v2589_v48 = vsub.f32 %v2538_v9, %v1323_v54  ;;  %v2592_v55 = vsub.f32 %v2540_v10, %v1323_v54  ;;  %v2595_v7 = vsub.f32 %v2545_v20, %v1323_v54  ;;  %v2598_v56 = vsub.f32 %v2549_v31, %v1323_v54 }
 0x179   :  { %v2601_v59 = vsub.f32 %v2553_v42, %v1323_v54  ;;  %v2604_v60 = vsub.f32 %v2557_v58, %v1323_v54  ;;  %v2607_v36 = vsub.f32 %v2561_v3, %v1323_v54  ;;  %v2610_v9 = vsub.f32 %v2565_v8, %v1323_v54 }
 0x17a   :  { %v2613_v10 = vsub.f32 %v2569_v26, %v1323_v54  ;;  %v2616_v20 = vsub.f32 %v2573_v37, %v1323_v54  ;;  %v2619_v31 = vsub.f32 %v2577_v53, %v1323_v54  ;;  %v2621_v42 = vsub.f32 %v1283_v62, %v1323_v54 }
 0x17b   :  { %v2623_v61 = vsub.f32 %v1288_v11, %v1323_v54  ;;  %v2625_v58 = vsub.f32 %v1291_v32, %v1323_v54  ;;  %v2627_v3 = vsub.f32 %v1296_v22, %v1323_v54  ;;  %v2629_v63 = vsub.f32 %v1299_v49, %v1323_v54 }
 0x17c   :  { %v1340_v8 = vmul.f32 %v2589_v48, %v2589_v48  ;;  %v1341_v26 = vmul.f32 %v2592_v55, %v2592_v55  ;;  %v1342_v37 = vmul.f32 %v2595_v7, %v2595_v7  ;;  %v1343_v62 = vmul.f32 %v2598_v56, %v2598_v56 }
 0x17d   :  { %v1344_v2 = vmul.f32 %v2601_v59, %v2601_v59  ;;  %v1345_v4 = vmul.f32 %v2604_v60, %v2604_v60  ;;  %v1346_v43 = vmul.f32 %v2607_v36, %v2607_v36  ;;  %v1347_v11 = vmul.f32 %v2610_v9, %v2610_v9 }
 0x17e   :  { %v1356_v53 = vadd.f32 %v1341_v26, %v1340_v8  ;;  %v1348_v13 = vmul.f32 %v2613_v10, %v2613_v10  ;;  %v1349_v17 = vmul.f32 %v2616_v20, %v2616_v20  ;;  %v1350_v18 = vmul.f32 %v2619_v31, %v2619_v31 }
 0x17f   :  { %v1351_v19 = vmul.f32 %v2621_v42, %v2621_v42  ;;  %v1352_v21 = vmul.f32 %v2623_v61, %v2623_v61  ;;  %v1353_v23 = vmul.f32 %v2625_v58, %v2625_v58  ;;  %v1354_v27 = vmul.f32 %v2627_v3, %v2627_v3 }
 0x180   :  { %v1357_v1 = vadd.f32 %v1356_v53, %v1342_v37  ;;  %v1355_v57 = vmul.f32 %v2629_v63, %v2629_v63  ;;  %v1383_v49 = vlaneseq }
 0x182   :  { %v1358_v16 = vadd.f32 %v1357_v1, %v1343_v62  ;;  %v1384_v41 = vshrl.u32 %v1383_v49, 7 }
 0x184   :  { %v1359_v5 = vadd.f32 %v1358_v16, %v1344_v2  ;;  %v1385_v51 = vsub.s32 0, %v1384_v41  ;;  %v1687_v2 = vld [vmem:[%s2728_s3] ss:$0 sm:$0xff] }
 0x186   :  { %v1360_v6 = vadd.f32 %v1359_v5, %v1345_v4 }
 0x188   :  { %v1361_v12 = vadd.f32 %v1360_v6, %v1346_v43 }
 0x18a   :  { %v1362_v14 = vadd.f32 %v1361_v12, %v1347_v11 }
 0x18c   :  { %v1363_v24 = vadd.f32 %v1362_v14, %v1348_v13 }
 0x18e   :  { %v1364_v50 = vadd.f32 %v1363_v24, %v1349_v17 }
 0x190   :  { %v1365_v15 = vadd.f32 %v1364_v50, %v1350_v18 }
 0x192   :  { %v1366_v32 = vadd.f32 %v1365_v15, %v1351_v19 }
 0x194   :  { %v1367_v25 = vadd.f32 %v1366_v32, %v1352_v21 }
 0x196   :  { %v1368_v28 = vadd.f32 %v1367_v25, %v1353_v23 }
 0x198   :  { %v1369_v30 = vadd.f32 %v1368_v28, %v1354_v27 }
 0x19a   :  { %v1370_v33 = vadd.f32 %v1369_v30, %v1355_v57 }
 0x19c   :  { %v1371_v34 = vrot.slane %v1370_v33, 4 }
 0x19e   :  { %v1372_v40 = vadd.f32 %v1371_v34, %v1370_v33 }
 0x1a0   :  { %v1373_v22 = vrot.slane %v1372_v40, 2 }
 0x1a2   :  { %v1374_v35 = vadd.f32 %v1373_v22, %v1372_v40 }
 0x1a4   :  { %v1375_v38 = vrot.slane %v1374_v35, 1 }
 0x1a6   :  { %v1376_v39 = vadd.f32 %v1375_v38, %v1374_v35 }
 0x1a8   :  { %v1377_v0 = vmul.f32 0.0078125, %v1376_v39 }
 0x1aa   :  { %v1379_v46 = vadd.f32 1e-05, %v1377_v0 }
 0x1ac   :  { %2087 = vrsqrt.f32 %v1379_v46 }
 0x1b9   :  { %v2088_v44 = vpop.eup %2087 }
 0x1ba   :  { %v1381_v45 = vmul.f32 %v2088_v44, %v1378_v47 }
 0x1bc   :  { %v1386_v29 = vrot.slane %v1381_v45, %v1385_v51 }
 0x1be   :  { %v1388_v52 = vmul.f32 %v1386_v29, %v2589_v48  ;;  %v1389_v54 = vmul.f32 %v1386_v29, %v2592_v55  ;;  %v1390_v8 = vmul.f32 %v1386_v29, %v2595_v7  ;;  %v1391_v26 = vmul.f32 %v1386_v29, %v2598_v56 }
 0x1bf   :  { %v1392_v37 = vmul.f32 %v1386_v29, %v2601_v59  ;;  %v1393_v53 = vmul.f32 %v1386_v29, %v2604_v60  ;;  %v1394_v62 = vmul.f32 %v1386_v29, %v2607_v36  ;;  %v1395_v1 = vmul.f32 %v1386_v29, %v2610_v9 }
 0x1c0   :  { %v1396_v48 = vmul.f32 %v1386_v29, %v2613_v10  ;;  %v1397_v55 = vmul.f32 %v1386_v29, %v2616_v20  ;;  %v1398_v7 = vmul.f32 %v1386_v29, %v2619_v31  ;;  %v1399_v56 = vmul.f32 %v1386_v29, %v2621_v42 }
 0x1c1   :  { %v1400_v59 = vmul.f32 %v1386_v29, %v2623_v61  ;;  %v1401_v60 = vmul.f32 %v1386_v29, %v2625_v58  ;;  %v1402_v36 = vmul.f32 %v1386_v29, %v2627_v3  ;;  %v1403_v9 = vmul.f32 %v1386_v29, %v2629_v63 }
 0x1c2   :  { %v1411_v16 = vadd.f32 %v1687_v2, %v1388_v52  ;;  %v1412_v4 = vadd.f32 %v1687_v2, %v1389_v54  ;;  %v1413_v5 = vadd.f32 %v1687_v2, %v1390_v8  ;;  %v1414_v43 = vadd.f32 %v1687_v2, %v1391_v26 }
 0x1c3   :  { %v1415_v6 = vadd.f32 %v1687_v2, %v1392_v37  ;;  %v1416_v10 = vadd.f32 %v1687_v2, %v1393_v53  ;;  %v1417_v11 = vadd.f32 %v1687_v2, %v1394_v62  ;;  %v1418_v20 = vadd.f32 %v1687_v2, %v1395_v1 }
 0x1c4   :  { %v1419_v12 = vadd.f32 %v1687_v2, %v1396_v48  ;;  %v1420_v31 = vadd.f32 %v1687_v2, %v1397_v55  ;;  %v1421_v13 = vadd.f32 %v1687_v2, %v1398_v7  ;;  %v1422_v42 = vadd.f32 %v1687_v2, %v1399_v56 }
 0x1c5   :  { %v1423_v14 = vadd.f32 %v1687_v2, %v1400_v59  ;;  %v1424_v61 = vadd.f32 %v1687_v2, %v1401_v60  ;;  %v1425_v17 = vadd.f32 %v1687_v2, %v1402_v36  ;;  %v1426_v58 = vadd.f32 %v1687_v2, %v1403_v9 }
 0x1c6   :  { %vm1427_vm0 = vcmp.ge.f32.partialorder %v1411_v16, 0.0  ;;  %vm1428_vm1 = vcmp.ge.f32.partialorder %v1412_v4, 0.0  ;;  %vm1429_vm2 = vcmp.ge.f32.partialorder %v1413_v5, 0.0  ;;  %vm1430_vm3 = vcmp.ge.f32.partialorder %v1414_v43, 0.0 }
 0x1c7   :  { %vm1431_vm4 = vcmp.ge.f32.partialorder %v1415_v6, 0.0  ;;  %vm1432_vm5 = vcmp.ge.f32.partialorder %v1416_v10, 0.0  ;;  %vm1433_vm6 = vcmp.ge.f32.partialorder %v1417_v11, 0.0  ;;  %vm1434_vm7 = vcmp.ge.f32.partialorder %v1418_v20, 0.0 }
 0x1c8   :  { %vm1435_vm8 = vcmp.ge.f32.partialorder %v1419_v12, 0.0  ;;  %vm1436_vm9 = vcmp.ge.f32.partialorder %v1420_v31, 0.0  ;;  %vm1437_vm10 = vcmp.ge.f32.partialorder %v1421_v13, 0.0  ;;  %vm1438_vm11 = vcmp.ge.f32.partialorder %v1422_v42, 0.0 }
 0x1c9   :  { %vm1439_vm12 = vcmp.ge.f32.partialorder %v1423_v14, 0.0  ;;  %vm1440_vm13 = vcmp.ge.f32.partialorder %v1424_v61, 0.0  ;;  %vm1441_vm14 = vcmp.ge.f32.partialorder %v1425_v17, 0.0  ;;  %vm1442_vm15 = vcmp.ge.f32.partialorder %v1426_v58, 0.0 }
 0x1ca   :  { %v1443_v3 = vmul.f32 0.2, %v1411_v16  ;;  %v1444_v63 = vmul.f32 0.2, %v1412_v4  ;;  %v1445_v24 = vmul.f32 0.2, %v1413_v5 }
 0x1cb   :  { %v1446_v18 = vmul.f32 0.2, %v1414_v43  ;;  %v1447_v50 = vmul.f32 0.2, %v1415_v6  ;;  %v1448_v19 = vmul.f32 0.2, %v1416_v10 }
 0x1cc   :  { %v1449_v15 = vmul.f32 0.2, %v1417_v11  ;;  %v1450_v21 = vmul.f32 0.2, %v1418_v20  ;;  %v1451_v32 = vmul.f32 0.2, %v1419_v12  ;;  %v1459_v23 = vsel %vm1427_vm0, %v1411_v16, %v1443_v3 }
 0x1cd   :  { %v1452_v25 = vmul.f32 0.2, %v1420_v31  ;;  %v1453_v27 = vmul.f32 0.2, %v1421_v13  ;;  %v1454_v28 = vmul.f32 0.2, %v1422_v42  ;;  %v1460_v57 = vsel %vm1428_vm1, %v1412_v4, %v1444_v63 }
 0x1ce   :  { %v1455_v30 = vmul.f32 0.2, %v1423_v14  ;;  %v1456_v33 = vmul.f32 0.2, %v1424_v61  ;;  %v1457_v34 = vmul.f32 0.2, %v1425_v17  ;;  %v1461_v40 = vsel %vm1429_vm2, %v1413_v5, %v1445_v24 }
 0x1cf   :  { %v1458_v22 = vmul.f32 0.2, %v1426_v58  ;;  %v1462_v35 = vsel %vm1430_vm3, %v1414_v43, %v1446_v18  ;;  %v1463_v38 = vsel %vm1431_vm4, %v1415_v6, %v1447_v50  ;;  %v1464_v39 = vsel %vm1432_vm5, %v1416_v10, %v1448_v19 }
 0x1d0   :  { %v1465_v0 = vsel %vm1433_vm6, %v1417_v11, %v1449_v15  ;;  %v1466_v46 = vsel %vm1434_vm7, %v1418_v20, %v1450_v21  ;;  %v1467_v49 = vsel %vm1435_vm8, %v1419_v12, %v1451_v32  ;;  %v1468_v41 = vsel %vm1436_vm9, %v1420_v31, %v1452_v25 }
 0x1d1   :  { %v1469_v47 = vsel %vm1437_vm10, %v1421_v13, %v1453_v27  ;;  %v1470_v51 = vsel %vm1438_vm11, %v1422_v42, %v1454_v28  ;;  %v1471_v44 = vsel %vm1439_vm12, %v1423_v14, %v1455_v30  ;;  %v1472_v45 = vsel %vm1440_vm13, %v1424_v61, %v1456_v33 }
 0x1d2   :  { %v1473_v29 = vsel %vm1441_vm14, %v1425_v17, %v1457_v34  ;;  %v1474_v52 = vsel %vm1442_vm15, %v1426_v58, %v1458_v22  ;;  %v1723_v54 = vpack.c.bf16 %v1460_v57, %v1459_v23  ;;  %v1728_v8 = vpack.c.bf16 %v1462_v35, %v1461_v40 }
 0x1d3   :  { %v1733_v26 = vpack.c.bf16 %v1464_v39, %v1463_v38  ;;  %v1738_v37 = vpack.c.bf16 %v1466_v46, %v1465_v0  ;;  %v1743_v53 = vpack.c.bf16 %v1468_v41, %v1467_v49  ;;  %v1748_v62 = vpack.c.bf16 %v1470_v51, %v1469_v47 }
 0x1d4   :  { %1724 = vst [vmem:[%s2729_s4] sm:$0xff] %v1723_v54   ;;  %1760 = vst [vmem:[%s2729_s4 + $0x8] sm:$0xff] %v1728_v8   ;;  %v1753_v1 = vpack.c.bf16 %v1472_v45, %v1471_v44  ;;  %v1758_v2 = vpack.c.bf16 %v1474_v52, %v1473_v29 }
 0x1d5   :  { %1761 = vst [vmem:[%s2729_s4 + $0x10] sm:$0xff] %v1733_v26   ;;  %1762 = vst [vmem:[%s2729_s4 + $0x18] sm:$0xff] %v1738_v37  }
 0x1d6   :  { %1763 = vst [vmem:[%s2729_s4 + $0x20] sm:$0xff] %v1743_v53   ;;  %1764 = vst [vmem:[%s2729_s4 + $0x28] sm:$0xff] %v1748_v62  }
 0x1d7   :  { %1765 = vst [vmem:[%s2729_s4 + $0x30] sm:$0xff] %v1753_v1   ;;  %1766 = vst [vmem:[%s2729_s4 + $0x38] sm:$0xff] %v1758_v2  }

// kernel: discriminator_forward.7
= control target key start
LH: loop header
LB: loop body
LE: loop exit
PB: predicated region body
PF: predicated region fallthrough
CT: control target
= control target key end

     0   :  { %s3835_s15 = smov 0   ;;  %s3837_s16 = smov 0   ;;  %s4677_s0 = inlined_call_operand.vmem [shape: bf16[32,2048], index: 0, kind: input, shape index: {}]   ;;  %s4678_s1 = inlined_call_operand.vmem [shape: bf16[2048,256], index: 1, kind: input, shape index: {}]   ;;  %s4679_s2 = inlined_call_operand.vmem [shape: f32[1,256], index: 2, kind: input, shape index: {}]   ;;  %s4680_s3 = inlined_call_operand.vmem [shape: f32[1,256], index: 3, kind: input, shape index: {}]   ;;  %s4681_s4 = inlined_call_operand.vmem [shape: bf16[32,256], index: 4, kind: output, shape index: {}]  }
   0x1   :  { %s3839_s17 = smov 0   ;;  %s3841_s18 = smov 0  }
   0x2   :  { %s3843_s19 = smov 0  }
   0x3 LB: > { %s23_s20 = sadd.s32 1, %s3804_s18  ;;  %s3182_s21 = sadd.s32 4294967295, %s3808_s19   ;;  %s3808_s19 = sphi %s3843_s19, %s14_s19   ;;  %s3804_s18 = sphi %s3841_s18, %s4686_s18   ;;  %s3800_s17 = sphi %s3839_s17, %s4685_s17   ;;  %s3796_s16 = sphi %s3837_s16, %s4684_s16   ;;  %s3792_s15 = sphi %s3835_s15, %s4683_s15  }
   0x4   : > { %p24_p0 = scmp.ge.s32.totalorder %s23_s20, 2  ;;  %p66_p1 = scmp.ne.s32.totalorder %s3796_s16, %s3792_s15 }
   0x5   : > { %p67_p2 = scmp.eq.s32.totalorder %s3808_s19, 0  ;;  %p150_p4 = scmp.eq.s32.totalorder %s3182_s21, 1 }
   0x6   : > { %s4688_s20 = smov (%p24_p0, %s23_s20), 0  ;;  %s59_s23 = sadd.s32 1, %s3796_s16 }
   0x7   : > { %p68_p3 = por %p67_p2, %p66_p1  ;;  %s56_s22 = ssub.s32 %s3804_s18, %s4688_s20 }
   0x8   : > { %p57_p5 = scmp.eq.s32.totalorder %s56_s22, 0  ;;  %p3870_p6 = por %p150_p4, %p66_p1 }
   0x9   : > { %p3186_p7 = scmp.ge.s32.totalorder %s3808_s19, 2 }
   0xa   : > { %s3875_s25 = scalar_select %p57_p5, %s3796_s16, %s59_s23  }
   0xb   : > { %182 = sbr.rel (%p3186_p7) target bundleno = 190 (0xbe), region = 20 }
  0x10   : > { %185 = sbr.rel (!%p68_p3) target bundleno = 190 (0xbe), region = 24  ;;  %s187_s26 = sand.u32 (%p68_p3), 1, %s3796_s16  }
  0x11   : > { %s3188_s27 = sshll.u32 (%p68_p3), %s3804_s18, 2  ;;  %s3187_s28 = sshll.u32 (%p68_p3), %s187_s26, 10 }
  0x12   : > { %s3883_s5 = scalar_lea.vmem (%p68_p3), %s4678_s1, %s3188_s27  ;;  %s3887_s6 = scalar_lea.vmem (%p68_p3), [#allocation2], %s3187_s28 }
  0x13   : > { %v208_v0 = vld [vmem:[%s3883_s5] sm:$0xf] (%p68_p3)  ;;  %v210_v1 = vld [vmem:[%s3883_s5 + $0x8] sm:$0xf] (%p68_p3)  ;;  %v212_v2 = vld [vmem:[%s3883_s5 + $0x10] sm:$0xf] (%p68_p3) }
  0x14   : > { %209 = vst [vmem:[%s3887_s6] sm:$0xf] (%p68_p3), %v208_v0  ;;  %211 = vst [vmem:[%s3887_s6 + $0x4] sm:$0xf] (%p68_p3), %v210_v1  ;;  %v214_v3 = vld [vmem:[%s3883_s5 + $0x18] sm:$0xf] (%p68_p3) }
  0x15   : > { %v216_v4 = vld [vmem:[%s3883_s5 + $0x20] sm:$0xf]  ;;  %213 = vst [vmem:[%s3887_s6 + $0x8] sm:$0xf] %v212_v2  ;;  %215 = vst [vmem:[%s3887_s6 + $0xc] sm:$0xf] %v214_v3 }
  0x16   : > { %217 = vst [vmem:[%s3887_s6 + $0x10] sm:$0xf] %v216_v4  ;;  %v218_v5 = vld [vmem:[%s3883_s5 + $0x28] sm:$0xf]  ;;  %v220_v6 = vld [vmem:[%s3883_s5 + $0x30] sm:$0xf] }
  0x17   : > { %v222_v7 = vld [vmem:[%s3883_s5 + $0x38] sm:$0xf]  ;;  %219 = vst [vmem:[%s3887_s6 + $0x14] sm:$0xf] %v218_v5  ;;  %221 = vst [vmem:[%s3887_s6 + $0x18] sm:$0xf] %v220_v6 }
  0x18   : > { %223 = vst [vmem:[%s3887_s6 + $0x1c] sm:$0xf] %v222_v7  ;;  %v224_v8 = vld [vmem:[%s3883_s5 + $0x40] sm:$0xf]  ;;  %v226_v9 = vld [vmem:[%s3883_s5 + $0x48] sm:$0xf] }
  0x19   : > { %v228_v10 = vld [vmem:[%s3883_s5 + $0x50] sm:$0xf]  ;;  %225 = vst [vmem:[%s3887_s6 + $0x20] sm:$0xf] %v224_v8  ;;  %227 = vst [vmem:[%s3887_s6 + $0x24] sm:$0xf] %v226_v9 }
  0x1a   : > { %229 = vst [vmem:[%s3887_s6 + $0x28] sm:$0xf] %v228_v10  ;;  %v230_v11 = vld [vmem:[%s3883_s5 + $0x58] sm:$0xf]  ;;  %v232_v12 = vld [vmem:[%s3883_s5 + $0x60] sm:$0xf] }
  0x1b   : > { %v234_v13 = vld [vmem:[%s3883_s5 + $0x68] sm:$0xf]  ;;  %231 = vst [vmem:[%s3887_s6 + $0x2c] sm:$0xf] %v230_v11  ;;  %233 = vst [vmem:[%s3887_s6 + $0x30] sm:$0xf] %v232_v12 }
  0x1c   : > { %235 = vst [vmem:[%s3887_s6 + $0x34] sm:$0xf] %v234_v13  ;;  %v236_v14 = vld [vmem:[%s3883_s5 + $0x70] sm:$0xf]  ;;  %v238_v15 = vld [vmem:[%s3883_s5 + $0x78] sm:$0xf] }
  0x1d   : > { %v240_v16 = vld [vmem:[%s3883_s5 + $0x80] sm:$0xf]  ;;  %237 = vst [vmem:[%s3887_s6 + $0x38] sm:$0xf] %v236_v14  ;;  %239 = vst [vmem:[%s3887_s6 + $0x3c] sm:$0xf] %v238_v15 }
  0x1e   : > { %241 = vst [vmem:[%s3887_s6 + $0x40] sm:$0xf] %v240_v16  ;;  %v242_v17 = vld [vmem:[%s3883_s5 + $0x88] sm:$0xf]  ;;  %v244_v18 = vld [vmem:[%s3883_s5 + $0x90] sm:$0xf] }
  0x1f   : > { %v246_v19 = vld [vmem:[%s3883_s5 + $0x98] sm:$0xf]  ;;  %243 = vst [vmem:[%s3887_s6 + $0x44] sm:$0xf] %v242_v17  ;;  %245 = vst [vmem:[%s3887_s6 + $0x48] sm:$0xf] %v244_v18 }
  0x20   : > { %247 = vst [vmem:[%s3887_s6 + $0x4c] sm:$0xf] %v246_v19  ;;  %v248_v20 = vld [vmem:[%s3883_s5 + $0xa0] sm:$0xf]  ;;  %v250_v21 = vld [vmem:[%s3883_s5 + $0xa8] sm:$0xf] }
  0x21   : > { %v252_v22 = vld [vmem:[%s3883_s5 + $0xb0] sm:$0xf]  ;;  %249 = vst [vmem:[%s3887_s6 + $0x50] sm:$0xf] %v248_v20  ;;  %251 = vst [vmem:[%s3887_s6 + $0x54] sm:$0xf] %v250_v21 }
  0x22   : > { %253 = vst [vmem:[%s3887_s6 + $0x58] sm:$0xf] %v252_v22  ;;  %v254_v23 = vld [vmem:[%s3883_s5 + $0xb8] sm:$0xf]  ;;  %v256_v24 = vld [vmem:[%s3883_s5 + $0xc0] sm:$0xf] }
  0x23   : > { %v258_v25 = vld [vmem:[%s3883_s5 + $0xc8] sm:$0xf]  ;;  %255 = vst [vmem:[%s3887_s6 + $0x5c] sm:$0xf] %v254_v23  ;;  %257 = vst [vmem:[%s3887_s6 + $0x60] sm:$0xf] %v256_v24 }
  0x24   : > { %259 = vst [vmem:[%s3887_s6 + $0x64] sm:$0xf] %v258_v25  ;;  %v260_v26 = vld [vmem:[%s3883_s5 + $0xd0] sm:$0xf]  ;;  %v262_v27 = vld [vmem:[%s3883_s5 + $0xd8] sm:$0xf] }
  0x25   : > { %v264_v28 = vld [vmem:[%s3883_s5 + $0xe0] sm:$0xf]  ;;  %261 = vst [vmem:[%s3887_s6 + $0x68] sm:$0xf] %v260_v26  ;;  %263 = vst [vmem:[%s3887_s6 + $0x6c] sm:$0xf] %v262_v27 }
  0x26   : > { %265 = vst [vmem:[%s3887_s6 + $0x70] sm:$0xf] %v264_v28  ;;  %v266_v29 = vld [vmem:[%s3883_s5 + $0xe8] sm:$0xf]  ;;  %v268_v30 = vld [vmem:[%s3883_s5 + $0xf0] sm:$0xf] }
  0x27   : > { %v270_v31 = vld [vmem:[%s3883_s5 + $0xf8] sm:$0xf]  ;;  %267 = vst [vmem:[%s3887_s6 + $0x74] sm:$0xf] %v266_v29  ;;  %269 = vst [vmem:[%s3887_s6 + $0x78] sm:$0xf] %v268_v30 }
  0x28   : > { %271 = vst [vmem:[%s3887_s6 + $0x7c] sm:$0xf] %v270_v31  ;;  %v272_v32 = vld [vmem:[%s3883_s5 + $0x100] sm:$0xf]  ;;  %v274_v33 = vld [vmem:[%s3883_s5 + $0x108] sm:$0xf] }
  0x29   : > { %v276_v34 = vld [vmem:[%s3883_s5 + $0x110] sm:$0xf]  ;;  %273 = vst [vmem:[%s3887_s6 + $0x80] sm:$0xf] %v272_v32  ;;  %275 = vst [vmem:[%s3887_s6 + $0x84] sm:$0xf] %v274_v33 }
  0x2a   : > { %277 = vst [vmem:[%s3887_s6 + $0x88] sm:$0xf] %v276_v34  ;;  %v278_v35 = vld [vmem:[%s3883_s5 + $0x118] sm:$0xf]  ;;  %v280_v36 = vld [vmem:[%s3883_s5 + $0x120] sm:$0xf] }
  0x2b   : > { %v282_v37 = vld [vmem:[%s3883_s5 + $0x128] sm:$0xf]  ;;  %279 = vst [vmem:[%s3887_s6 + $0x8c] sm:$0xf] %v278_v35  ;;  %281 = vst [vmem:[%s3887_s6 + $0x90] sm:$0xf] %v280_v36 }
  0x2c   : > { %283 = vst [vmem:[%s3887_s6 + $0x94] sm:$0xf] %v282_v37  ;;  %v284_v38 = vld [vmem:[%s3883_s5 + $0x130] sm:$0xf]  ;;  %v286_v39 = vld [vmem:[%s3883_s5 + $0x138] sm:$0xf] }
  0x2d   : > { %v288_v40 = vld [vmem:[%s3883_s5 + $0x140] sm:$0xf]  ;;  %285 = vst [vmem:[%s3887_s6 + $0x98] sm:$0xf] %v284_v38  ;;  %287 = vst [vmem:[%s3887_s6 + $0x9c] sm:$0xf] %v286_v39 }
  0x2e   : > { %289 = vst [vmem:[%s3887_s6 + $0xa0] sm:$0xf] %v288_v40  ;;  %v290_v41 = vld [vmem:[%s3883_s5 + $0x148] sm:$0xf]  ;;  %v292_v42 = vld [vmem:[%s3883_s5 + $0x150] sm:$0xf] }
  0x2f   : > { %v294_v43 = vld [vmem:[%s3883_s5 + $0x158] sm:$0xf]  ;;  %291 = vst [vmem:[%s3887_s6 + $0xa4] sm:$0xf] %v290_v41  ;;  %293 = vst [vmem:[%s3887_s6 + $0xa8] sm:$0xf] %v292_v42 }
  0x30   : > { %295 = vst [vmem:[%s3887_s6 + $0xac] sm:$0xf] %v294_v43  ;;  %v296_v44 = vld [vmem:[%s3883_s5 + $0x160] sm:$0xf]  ;;  %v298_v45 = vld [vmem:[%s3883_s5 + $0x168] sm:$0xf] }
  0x31   : > { %v300_v46 = vld [vmem:[%s3883_s5 + $0x170] sm:$0xf]  ;;  %297 = vst [vmem:[%s3887_s6 + $0xb0] sm:$0xf] %v296_v44  ;;  %299 = vst [vmem:[%s3887_s6 + $0xb4] sm:$0xf] %v298_v45 }
  0x32   : > { %301 = vst [vmem:[%s3887_s6 + $0xb8] sm:$0xf] %v300_v46  ;;  %v302_v47 = vld [vmem:[%s3883_s5 + $0x178] sm:$0xf]  ;;  %v304_v48 = vld [vmem:[%s3883_s5 + $0x180] sm:$0xf] }
  0x33   : > { %v306_v49 = vld [vmem:[%s3883_s5 + $0x188] sm:$0xf]  ;;  %303 = vst [vmem:[%s3887_s6 + $0xbc] sm:$0xf] %v302_v47  ;;  %305 = vst [vmem:[%s3887_s6 + $0xc0] sm:$0xf] %v304_v48 }
  0x34   : > { %307 = vst [vmem:[%s3887_s6 + $0xc4] sm:$0xf] %v306_v49  ;;  %v308_v50 = vld [vmem:[%s3883_s5 + $0x190] sm:$0xf]  ;;  %v310_v51 = vld [vmem:[%s3883_s5 + $0x198] sm:$0xf] }
  0x35   : > { %v312_v52 = vld [vmem:[%s3883_s5 + $0x1a0] sm:$0xf]  ;;  %309 = vst [vmem:[%s3887_s6 + $0xc8] sm:$0xf] %v308_v50  ;;  %311 = vst [vmem:[%s3887_s6 + $0xcc] sm:$0xf] %v310_v51 }
  0x36   : > { %313 = vst [vmem:[%s3887_s6 + $0xd0] sm:$0xf] %v312_v52  ;;  %v314_v53 = vld [vmem:[%s3883_s5 + $0x1a8] sm:$0xf]  ;;  %v316_v54 = vld [vmem:[%s3883_s5 + $0x1b0] sm:$0xf] }
  0x37   : > { %v318_v55 = vld [vmem:[%s3883_s5 + $0x1b8] sm:$0xf]  ;;  %315 = vst [vmem:[%s3887_s6 + $0xd4] sm:$0xf] %v314_v53  ;;  %317 = vst [vmem:[%s3887_s6 + $0xd8] sm:$0xf] %v316_v54 }
  0x38   : > { %319 = vst [vmem:[%s3887_s6 + $0xdc] sm:$0xf] %v318_v55  ;;  %v320_v56 = vld [vmem:[%s3883_s5 + $0x1c0] sm:$0xf]  ;;  %v322_v57 = vld [vmem:[%s3883_s5 + $0x1c8] sm:$0xf] }
  0x39   : > { %v324_v58 = vld [vmem:[%s3883_s5 + $0x1d0] sm:$0xf]  ;;  %321 = vst [vmem:[%s3887_s6 + $0xe0] sm:$0xf] %v320_v56  ;;  %323 = vst [vmem:[%s3887_s6 + $0xe4] sm:$0xf] %v322_v57 }
  0x3a   : > { %325 = vst [vmem:[%s3887_s6 + $0xe8] sm:$0xf] %v324_v58  ;;  %v326_v59 = vld [vmem:[%s3883_s5 + $0x1d8] sm:$0xf]  ;;  %v328_v60 = vld [vmem:[%s3883_s5 + $0x1e0] sm:$0xf] }
  0x3b   : > { %v330_v61 = vld [vmem:[%s3883_s5 + $0x1e8] sm:$0xf]  ;;  %327 = vst [vmem:[%s3887_s6 + $0xec] sm:$0xf] %v326_v59  ;;  %329 = vst [vmem:[%s3887_s6 + $0xf0] sm:$0xf] %v328_v60 }
  0x3c   : > { %331 = vst [vmem:[%s3887_s6 + $0xf4] sm:$0xf] %v330_v61  ;;  %v332_v62 = vld [vmem:[%s3883_s5 + $0x1f0] sm:$0xf]  ;;  %v334_v63 = vld [vmem:[%s3883_s5 + $0x1f8] sm:$0xf] }
  0x3d   : > { %v336_v0 = vld [vmem:[%s3883_s5 + $0x200] sm:$0xf]  ;;  %333 = vst [vmem:[%s3887_s6 + $0xf8] sm:$0xf] %v332_v62  ;;  %335 = vst [vmem:[%s3887_s6 + $0xfc] sm:$0xf] %v334_v63 }
  0x3e   : > { %337 = vst [vmem:[%s3887_s6 + $0x100] sm:$0xf] %v336_v0  ;;  %v338_v1 = vld [vmem:[%s3883_s5 + $0x208] sm:$0xf]  ;;  %v340_v2 = vld [vmem:[%s3883_s5 + $0x210] sm:$0xf] }
  0x3f   : > { %v342_v3 = vld [vmem:[%s3883_s5 + $0x218] sm:$0xf]  ;;  %339 = vst [vmem:[%s3887_s6 + $0x104] sm:$0xf] %v338_v1  ;;  %341 = vst [vmem:[%s3887_s6 + $0x108] sm:$0xf] %v340_v2 }
  0x40   : > { %343 = vst [vmem:[%s3887_s6 + $0x10c] sm:$0xf] %v342_v3  ;;  %v344_v4 = vld [vmem:[%s3883_s5 + $0x220] sm:$0xf]  ;;  %v346_v5 = vld [vmem:[%s3883_s5 + $0x228] sm:$0xf] }
  0x41   : > { %v348_v6 = vld [vmem:[%s3883_s5 + $0x230] sm:$0xf]  ;;  %345 = vst [vmem:[%s3887_s6 + $0x110] sm:$0xf] %v344_v4  ;;  %347 = vst [vmem:[%s3887_s6 + $0x114] sm:$0xf] %v346_v5 }
  0x42   : > { %349 = vst [vmem:[%s3887_s6 + $0x118] sm:$0xf] %v348_v6  ;;  %v350_v7 = vld [vmem:[%s3883_s5 + $0x238] sm:$0xf]  ;;  %v352_v8 = vld [vmem:[%s3883_s5 + $0x240] sm:$0xf] }
  0x43   : > { %v354_v9 = vld [vmem:[%s3883_s5 + $0x248] sm:$0xf]  ;;  %351 = vst [vmem:[%s3887_s6 + $0x11c] sm:$0xf] %v350_v7  ;;  %353 = vst [vmem:[%s3887_s6 + $0x120] sm:$0xf] %v352_v8 }
  0x44   : > { %355 = vst [vmem:[%s3887_s6 + $0x124] sm:$0xf] %v354_v9  ;;  %v356_v10 = vld [vmem:[%s3883_s5 + $0x250] sm:$0xf]  ;;  %v358_v11 = vld [vmem:[%s3883_s5 + $0x258] sm:$0xf] }
  0x45   : > { %v360_v12 = vld [vmem:[%s3883_s5 + $0x260] sm:$0xf]  ;;  %357 = vst [vmem:[%s3887_s6 + $0x128] sm:$0xf] %v356_v10  ;;  %359 = vst [vmem:[%s3887_s6 + $0x12c] sm:$0xf] %v358_v11 }
  0x46   : > { %361 = vst [vmem:[%s3887_s6 + $0x130] sm:$0xf] %v360_v12  ;;  %v362_v13 = vld [vmem:[%s3883_s5 + $0x268] sm:$0xf]  ;;  %v364_v14 = vld [vmem:[%s3883_s5 + $0x270] sm:$0xf] }
  0x47   : > { %v366_v15 = vld [vmem:[%s3883_s5 + $0x278] sm:$0xf]  ;;  %363 = vst [vmem:[%s3887_s6 + $0x134] sm:$0xf] %v362_v13  ;;  %365 = vst [vmem:[%s3887_s6 + $0x138] sm:$0xf] %v364_v14 }
  0x48   : > { %367 = vst [vmem:[%s3887_s6 + $0x13c] sm:$0xf] %v366_v15  ;;  %v368_v16 = vld [vmem:[%s3883_s5 + $0x280] sm:$0xf]  ;;  %v370_v17 = vld [vmem:[%s3883_s5 + $0x288] sm:$0xf] }
  0x49   : > { %v372_v18 = vld [vmem:[%s3883_s5 + $0x290] sm:$0xf]  ;;  %369 = vst [vmem:[%s3887_s6 + $0x140] sm:$0xf] %v368_v16  ;;  %371 = vst [vmem:[%s3887_s6 + $0x144] sm:$0xf] %v370_v17 }
  0x4a   : > { %373 = vst [vmem:[%s3887_s6 + $0x148] sm:$0xf] %v372_v18  ;;  %v374_v19 = vld [vmem:[%s3883_s5 + $0x298] sm:$0xf]  ;;  %v376_v20 = vld [vmem:[%s3883_s5 + $0x2a0] sm:$0xf] }
  0x4b   : > { %v378_v21 = vld [vmem:[%s3883_s5 + $0x2a8] sm:$0xf]  ;;  %375 = vst [vmem:[%s3887_s6 + $0x14c] sm:$0xf] %v374_v19  ;;  %377 = vst [vmem:[%s3887_s6 + $0x150] sm:$0xf] %v376_v20 }
  0x4c   : > { %379 = vst [vmem:[%s3887_s6 + $0x154] sm:$0xf] %v378_v21  ;;  %v380_v22 = vld [vmem:[%s3883_s5 + $0x2b0] sm:$0xf]  ;;  %v382_v23 = vld [vmem:[%s3883_s5 + $0x2b8] sm:$0xf] }
  0x4d   : > { %v384_v24 = vld [vmem:[%s3883_s5 + $0x2c0] sm:$0xf]  ;;  %381 = vst [vmem:[%s3887_s6 + $0x158] sm:$0xf] %v380_v22  ;;  %383 = vst [vmem:[%s3887_s6 + $0x15c] sm:$0xf] %v382_v23 }
  0x4e   : > { %385 = vst [vmem:[%s3887_s6 + $0x160] sm:$0xf] %v384_v24  ;;  %v386_v25 = vld [vmem:[%s3883_s5 + $0x2c8] sm:$0xf]  ;;  %v388_v26 = vld [vmem:[%s3883_s5 + $0x2d0] sm:$0xf] }
  0x4f   : > { %v390_v27 = vld [vmem:[%s3883_s5 + $0x2d8] sm:$0xf]  ;;  %387 = vst [vmem:[%s3887_s6 + $0x164] sm:$0xf] %v386_v25  ;;  %389 = vst [vmem:[%s3887_s6 + $0x168] sm:$0xf] %v388_v26 }
  0x50   : > { %391 = vst [vmem:[%s3887_s6 + $0x16c] sm:$0xf] %v390_v27  ;;  %v392_v28 = vld [vmem:[%s3883_s5 + $0x2e0] sm:$0xf]  ;;  %v394_v29 = vld [vmem:[%s3883_s5 + $0x2e8] sm:$0xf] }
  0x51   : > { %v396_v30 = vld [vmem:[%s3883_s5 + $0x2f0] sm:$0xf]  ;;  %393 = vst [vmem:[%s3887_s6 + $0x170] sm:$0xf] %v392_v28  ;;  %395 = vst [vmem:[%s3887_s6 + $0x174] sm:$0xf] %v394_v29 }
  0x52   : > { %397 = vst [vmem:[%s3887_s6 + $0x178] sm:$0xf] %v396_v30  ;;  %v398_v31 = vld [vmem:[%s3883_s5 + $0x2f8] sm:$0xf]  ;;  %v400_v32 = vld [vmem:[%s3883_s5 + $0x300] sm:$0xf] }
  0x53   : > { %v402_v33 = vld [vmem:[%s3883_s5 + $0x308] sm:$0xf]  ;;  %399 = vst [vmem:[%s3887_s6 + $0x17c] sm:$0xf] %v398_v31  ;;  %401 = vst [vmem:[%s3887_s6 + $0x180] sm:$0xf] %v400_v32 }
  0x54   : > { %403 = vst [vmem:[%s3887_s6 + $0x184] sm:$0xf] %v402_v33  ;;  %v404_v34 = vld [vmem:[%s3883_s5 + $0x310] sm:$0xf]  ;;  %v406_v35 = vld [vmem:[%s3883_s5 + $0x318] sm:$0xf] }
  0x55   : > { %v408_v36 = vld [vmem:[%s3883_s5 + $0x320] sm:$0xf]  ;;  %405 = vst [vmem:[%s3887_s6 + $0x188] sm:$0xf] %v404_v34  ;;  %407 = vst [vmem:[%s3887_s6 + $0x18c] sm:$0xf] %v406_v35 }
  0x56   : > { %409 = vst [vmem:[%s3887_s6 + $0x190] sm:$0xf] %v408_v36  ;;  %v410_v37 = vld [vmem:[%s3883_s5 + $0x328] sm:$0xf]  ;;  %v412_v38 = vld [vmem:[%s3883_s5 + $0x330] sm:$0xf] }
  0x57   : > { %v414_v39 = vld [vmem:[%s3883_s5 + $0x338] sm:$0xf]  ;;  %411 = vst [vmem:[%s3887_s6 + $0x194] sm:$0xf] %v410_v37  ;;  %413 = vst [vmem:[%s3887_s6 + $0x198] sm:$0xf] %v412_v38 }
  0x58   : > { %415 = vst [vmem:[%s3887_s6 + $0x19c] sm:$0xf] %v414_v39  ;;  %v416_v40 = vld [vmem:[%s3883_s5 + $0x340] sm:$0xf]  ;;  %v418_v41 = vld [vmem:[%s3883_s5 + $0x348] sm:$0xf] }
  0x59   : > { %v420_v42 = vld [vmem:[%s3883_s5 + $0x350] sm:$0xf]  ;;  %417 = vst [vmem:[%s3887_s6 + $0x1a0] sm:$0xf] %v416_v40  ;;  %419 = vst [vmem:[%s3887_s6 + $0x1a4] sm:$0xf] %v418_v41 }
  0x5a   : > { %421 = vst [vmem:[%s3887_s6 + $0x1a8] sm:$0xf] %v420_v42  ;;  %v422_v43 = vld [vmem:[%s3883_s5 + $0x358] sm:$0xf]  ;;  %v424_v44 = vld [vmem:[%s3883_s5 + $0x360] sm:$0xf] }
  0x5b   : > { %v426_v45 = vld [vmem:[%s3883_s5 + $0x368] sm:$0xf]  ;;  %423 = vst [vmem:[%s3887_s6 + $0x1ac] sm:$0xf] %v422_v43  ;;  %425 = vst [vmem:[%s3887_s6 + $0x1b0] sm:$0xf] %v424_v44 }
  0x5c   : > { %427 = vst [vmem:[%s3887_s6 + $0x1b4] sm:$0xf] %v426_v45  ;;  %v428_v46 = vld [vmem:[%s3883_s5 + $0x370] sm:$0xf]  ;;  %v430_v47 = vld [vmem:[%s3883_s5 + $0x378] sm:$0xf] }
  0x5d   : > { %v432_v48 = vld [vmem:[%s3883_s5 + $0x380] sm:$0xf]  ;;  %429 = vst [vmem:[%s3887_s6 + $0x1b8] sm:$0xf] %v428_v46  ;;  %431 = vst [vmem:[%s3887_s6 + $0x1bc] sm:$0xf] %v430_v47 }
  0x5e   : > { %433 = vst [vmem:[%s3887_s6 + $0x1c0] sm:$0xf] %v432_v48  ;;  %v434_v49 = vld [vmem:[%s3883_s5 + $0x388] sm:$0xf]  ;;  %v436_v50 = vld [vmem:[%s3883_s5 + $0x390] sm:$0xf] }
  0x5f   : > { %v438_v51 = vld [vmem:[%s3883_s5 + $0x398] sm:$0xf]  ;;  %435 = vst [vmem:[%s3887_s6 + $0x1c4] sm:$0xf] %v434_v49  ;;  %437 = vst [vmem:[%s3887_s6 + $0x1c8] sm:$0xf] %v436_v50 }
  0x60   : > { %439 = vst [vmem:[%s3887_s6 + $0x1cc] sm:$0xf] %v438_v51  ;;  %v440_v52 = vld [vmem:[%s3883_s5 + $0x3a0] sm:$0xf]  ;;  %v442_v53 = vld [vmem:[%s3883_s5 + $0x3a8] sm:$0xf] }
  0x61   : > { %v444_v54 = vld [vmem:[%s3883_s5 + $0x3b0] sm:$0xf]  ;;  %441 = vst [vmem:[%s3887_s6 + $0x1d0] sm:$0xf] %v440_v52  ;;  %443 = vst [vmem:[%s3887_s6 + $0x1d4] sm:$0xf] %v442_v53 }
  0x62   : > { %445 = vst [vmem:[%s3887_s6 + $0x1d8] sm:$0xf] %v444_v54  ;;  %v446_v55 = vld [vmem:[%s3883_s5 + $0x3b8] sm:$0xf]  ;;  %v448_v56 = vld [vmem:[%s3883_s5 + $0x3c0] sm:$0xf] }
  0x63   : > { %v450_v57 = vld [vmem:[%s3883_s5 + $0x3c8] sm:$0xf]  ;;  %447 = vst [vmem:[%s3887_s6 + $0x1dc] sm:$0xf] %v446_v55  ;;  %449 = vst [vmem:[%s3887_s6 + $0x1e0] sm:$0xf] %v448_v56 }
  0x64   : > { %451 = vst [vmem:[%s3887_s6 + $0x1e4] sm:$0xf] %v450_v57  ;;  %v452_v58 = vld [vmem:[%s3883_s5 + $0x3d0] sm:$0xf]  ;;  %v454_v59 = vld [vmem:[%s3883_s5 + $0x3d8] sm:$0xf] }
  0x65   : > { %v456_v60 = vld [vmem:[%s3883_s5 + $0x3e0] sm:$0xf]  ;;  %453 = vst [vmem:[%s3887_s6 + $0x1e8] sm:$0xf] %v452_v58  ;;  %455 = vst [vmem:[%s3887_s6 + $0x1ec] sm:$0xf] %v454_v59 }
  0x66   : > { %457 = vst [vmem:[%s3887_s6 + $0x1f0] sm:$0xf] %v456_v60  ;;  %v458_v61 = vld [vmem:[%s3883_s5 + $0x3e8] sm:$0xf]  ;;  %v460_v62 = vld [vmem:[%s3883_s5 + $0x3f0] sm:$0xf] }
  0x67   : > { %v462_v63 = vld [vmem:[%s3883_s5 + $0x3f8] sm:$0xf]  ;;  %459 = vst [vmem:[%s3887_s6 + $0x1f4] sm:$0xf] %v458_v61  ;;  %461 = vst [vmem:[%s3887_s6 + $0x1f8] sm:$0xf] %v460_v62 }
  0x68   : > { %463 = vst [vmem:[%s3887_s6 + $0x1fc] sm:$0xf] %v462_v63  ;;  %v464_v0 = vld [vmem:[%s3883_s5 + $0x400] sm:$0xf]  ;;  %v466_v1 = vld [vmem:[%s3883_s5 + $0x408] sm:$0xf] }
  0x69   : > { %v468_v2 = vld [vmem:[%s3883_s5 + $0x410] sm:$0xf]  ;;  %465 = vst [vmem:[%s3887_s6 + $0x200] sm:$0xf] %v464_v0  ;;  %467 = vst [vmem:[%s3887_s6 + $0x204] sm:$0xf] %v466_v1 }
  0x6a   : > { %469 = vst [vmem:[%s3887_s6 + $0x208] sm:$0xf] %v468_v2  ;;  %v470_v3 = vld [vmem:[%s3883_s5 + $0x418] sm:$0xf]  ;;  %v472_v4 = vld [vmem:[%s3883_s5 + $0x420] sm:$0xf] }
  0x6b   : > { %v474_v5 = vld [vmem:[%s3883_s5 + $0x428] sm:$0xf]  ;;  %471 = vst [vmem:[%s3887_s6 + $0x20c] sm:$0xf] %v470_v3  ;;  %473 = vst [vmem:[%s3887_s6 + $0x210] sm:$0xf] %v472_v4 }
  0x6c   : > { %475 = vst [vmem:[%s3887_s6 + $0x214] sm:$0xf] %v474_v5  ;;  %v476_v6 = vld [vmem:[%s3883_s5 + $0x430] sm:$0xf]  ;;  %v478_v7 = vld [vmem:[%s3883_s5 + $0x438] sm:$0xf] }
  0x6d   : > { %v480_v8 = vld [vmem:[%s3883_s5 + $0x440] sm:$0xf]  ;;  %477 = vst [vmem:[%s3887_s6 + $0x218] sm:$0xf] %v476_v6  ;;  %479 = vst [vmem:[%s3887_s6 + $0x21c] sm:$0xf] %v478_v7 }
  0x6e   : > { %481 = vst [vmem:[%s3887_s6 + $0x220] sm:$0xf] %v480_v8  ;;  %v482_v9 = vld [vmem:[%s3883_s5 + $0x448] sm:$0xf]  ;;  %v484_v10 = vld [vmem:[%s3883_s5 + $0x450] sm:$0xf] }
  0x6f   : > { %v486_v11 = vld [vmem:[%s3883_s5 + $0x458] sm:$0xf]  ;;  %483 = vst [vmem:[%s3887_s6 + $0x224] sm:$0xf] %v482_v9  ;;  %485 = vst [vmem:[%s3887_s6 + $0x228] sm:$0xf] %v484_v10 }
  0x70   : > { %487 = vst [vmem:[%s3887_s6 + $0x22c] sm:$0xf] %v486_v11  ;;  %v488_v12 = vld [vmem:[%s3883_s5 + $0x460] sm:$0xf]  ;;  %v490_v13 = vld [vmem:[%s3883_s5 + $0x468] sm:$0xf] }
  0x71   : > { %v492_v14 = vld [vmem:[%s3883_s5 + $0x470] sm:$0xf]  ;;  %489 = vst [vmem:[%s3887_s6 + $0x230] sm:$0xf] %v488_v12  ;;  %491 = vst [vmem:[%s3887_s6 + $0x234] sm:$0xf] %v490_v13 }
  0x72   : > { %493 = vst [vmem:[%s3887_s6 + $0x238] sm:$0xf] %v492_v14  ;;  %v494_v15 = vld [vmem:[%s3883_s5 + $0x478] sm:$0xf]  ;;  %v496_v16 = vld [vmem:[%s3883_s5 + $0x480] sm:$0xf] }
  0x73   : > { %v498_v17 = vld [vmem:[%s3883_s5 + $0x488] sm:$0xf]  ;;  %495 = vst [vmem:[%s3887_s6 + $0x23c] sm:$0xf] %v494_v15  ;;  %497 = vst [vmem:[%s3887_s6 + $0x240] sm:$0xf] %v496_v16 }
  0x74   : > { %499 = vst [vmem:[%s3887_s6 + $0x244] sm:$0xf] %v498_v17  ;;  %v500_v18 = vld [vmem:[%s3883_s5 + $0x490] sm:$0xf]  ;;  %v502_v19 = vld [vmem:[%s3883_s5 + $0x498] sm:$0xf] }
  0x75   : > { %v504_v20 = vld [vmem:[%s3883_s5 + $0x4a0] sm:$0xf]  ;;  %501 = vst [vmem:[%s3887_s6 + $0x248] sm:$0xf] %v500_v18  ;;  %503 = vst [vmem:[%s3887_s6 + $0x24c] sm:$0xf] %v502_v19 }
  0x76   : > { %505 = vst [vmem:[%s3887_s6 + $0x250] sm:$0xf] %v504_v20  ;;  %v506_v21 = vld [vmem:[%s3883_s5 + $0x4a8] sm:$0xf]  ;;  %v508_v22 = vld [vmem:[%s3883_s5 + $0x4b0] sm:$0xf] }
  0x77   : > { %v510_v23 = vld [vmem:[%s3883_s5 + $0x4b8] sm:$0xf]  ;;  %507 = vst [vmem:[%s3887_s6 + $0x254] sm:$0xf] %v506_v21  ;;  %509 = vst [vmem:[%s3887_s6 + $0x258] sm:$0xf] %v508_v22 }
  0x78   : > { %511 = vst [vmem:[%s3887_s6 + $0x25c] sm:$0xf] %v510_v23  ;;  %v512_v24 = vld [vmem:[%s3883_s5 + $0x4c0] sm:$0xf]  ;;  %v514_v25 = vld [vmem:[%s3883_s5 + $0x4c8] sm:$0xf] }
  0x79   : > { %v516_v26 = vld [vmem:[%s3883_s5 + $0x4d0] sm:$0xf]  ;;  %513 = vst [vmem:[%s3887_s6 + $0x260] sm:$0xf] %v512_v24  ;;  %515 = vst [vmem:[%s3887_s6 + $0x264] sm:$0xf] %v514_v25 }
  0x7a   : > { %517 = vst [vmem:[%s3887_s6 + $0x268] sm:$0xf] %v516_v26  ;;  %v518_v27 = vld [vmem:[%s3883_s5 + $0x4d8] sm:$0xf]  ;;  %v520_v28 = vld [vmem:[%s3883_s5 + $0x4e0] sm:$0xf] }
  0x7b   : > { %v522_v29 = vld [vmem:[%s3883_s5 + $0x4e8] sm:$0xf]  ;;  %519 = vst [vmem:[%s3887_s6 + $0x26c] sm:$0xf] %v518_v27  ;;  %521 = vst [vmem:[%s3887_s6 + $0x270] sm:$0xf] %v520_v28 }
  0x7c   : > { %523 = vst [vmem:[%s3887_s6 + $0x274] sm:$0xf] %v522_v29  ;;  %v524_v30 = vld [vmem:[%s3883_s5 + $0x4f0] sm:$0xf]  ;;  %v526_v31 = vld [vmem:[%s3883_s5 + $0x4f8] sm:$0xf] }
  0x7d   : > { %v528_v32 = vld [vmem:[%s3883_s5 + $0x500] sm:$0xf]  ;;  %525 = vst [vmem:[%s3887_s6 + $0x278] sm:$0xf] %v524_v30  ;;  %527 = vst [vmem:[%s3887_s6 + $0x27c] sm:$0xf] %v526_v31 }
  0x7e   : > { %529 = vst [vmem:[%s3887_s6 + $0x280] sm:$0xf] %v528_v32  ;;  %v530_v33 = vld [vmem:[%s3883_s5 + $0x508] sm:$0xf]  ;;  %v532_v34 = vld [vmem:[%s3883_s5 + $0x510] sm:$0xf] }
  0x7f   : > { %v534_v35 = vld [vmem:[%s3883_s5 + $0x518] sm:$0xf]  ;;  %531 = vst [vmem:[%s3887_s6 + $0x284] sm:$0xf] %v530_v33  ;;  %533 = vst [vmem:[%s3887_s6 + $0x288] sm:$0xf] %v532_v34 }
  0x80   : > { %535 = vst [vmem:[%s3887_s6 + $0x28c] sm:$0xf] %v534_v35  ;;  %v536_v36 = vld [vmem:[%s3883_s5 + $0x520] sm:$0xf]  ;;  %v538_v37 = vld [vmem:[%s3883_s5 + $0x528] sm:$0xf] }
  0x81   : > { %v540_v38 = vld [vmem:[%s3883_s5 + $0x530] sm:$0xf]  ;;  %537 = vst [vmem:[%s3887_s6 + $0x290] sm:$0xf] %v536_v36  ;;  %539 = vst [vmem:[%s3887_s6 + $0x294] sm:$0xf] %v538_v37 }
  0x82   : > { %541 = vst [vmem:[%s3887_s6 + $0x298] sm:$0xf] %v540_v38  ;;  %v542_v39 = vld [vmem:[%s3883_s5 + $0x538] sm:$0xf]  ;;  %v544_v40 = vld [vmem:[%s3883_s5 + $0x540] sm:$0xf] }
  0x83   : > { %v546_v41 = vld [vmem:[%s3883_s5 + $0x548] sm:$0xf]  ;;  %543 = vst [vmem:[%s3887_s6 + $0x29c] sm:$0xf] %v542_v39  ;;  %545 = vst [vmem:[%s3887_s6 + $0x2a0] sm:$0xf] %v544_v40 }
  0x84   : > { %547 = vst [vmem:[%s3887_s6 + $0x2a4] sm:$0xf] %v546_v41  ;;  %v548_v42 = vld [vmem:[%s3883_s5 + $0x550] sm:$0xf]  ;;  %v550_v43 = vld [vmem:[%s3883_s5 + $0x558] sm:$0xf] }
  0x85   : > { %v552_v44 = vld [vmem:[%s3883_s5 + $0x560] sm:$0xf]  ;;  %549 = vst [vmem:[%s3887_s6 + $0x2a8] sm:$0xf] %v548_v42  ;;  %551 = vst [vmem:[%s3887_s6 + $0x2ac] sm:$0xf] %v550_v43 }
  0x86   : > { %553 = vst [vmem:[%s3887_s6 + $0x2b0] sm:$0xf] %v552_v44  ;;  %v554_v45 = vld [vmem:[%s3883_s5 + $0x568] sm:$0xf]  ;;  %v556_v46 = vld [vmem:[%s3883_s5 + $0x570] sm:$0xf] }
  0x87   : > { %v558_v47 = vld [vmem:[%s3883_s5 + $0x578] sm:$0xf]  ;;  %555 = vst [vmem:[%s3887_s6 + $0x2b4] sm:$0xf] %v554_v45  ;;  %557 = vst [vmem:[%s3887_s6 + $0x2b8] sm:$0xf] %v556_v46 }
  0x88   : > { %559 = vst [vmem:[%s3887_s6 + $0x2bc] sm:$0xf] %v558_v47  ;;  %v560_v48 = vld [vmem:[%s3883_s5 + $0x580] sm:$0xf]  ;;  %v562_v49 = vld [vmem:[%s3883_s5 + $0x588] sm:$0xf] }
  0x89   : > { %v564_v50 = vld [vmem:[%s3883_s5 + $0x590] sm:$0xf]  ;;  %561 = vst [vmem:[%s3887_s6 + $0x2c0] sm:$0xf] %v560_v48  ;;  %563 = vst [vmem:[%s3887_s6 + $0x2c4] sm:$0xf] %v562_v49 }
  0x8a   : > { %565 = vst [vmem:[%s3887_s6 + $0x2c8] sm:$0xf] %v564_v50  ;;  %v566_v51 = vld [vmem:[%s3883_s5 + $0x598] sm:$0xf]  ;;  %v568_v52 = vld [vmem:[%s3883_s5 + $0x5a0] sm:$0xf] }
  0x8b   : > { %v570_v53 = vld [vmem:[%s3883_s5 + $0x5a8] sm:$0xf]  ;;  %567 = vst [vmem:[%s3887_s6 + $0x2cc] sm:$0xf] %v566_v51  ;;  %569 = vst [vmem:[%s3887_s6 + $0x2d0] sm:$0xf] %v568_v52 }
  0x8c   : > { %571 = vst [vmem:[%s3887_s6 + $0x2d4] sm:$0xf] %v570_v53  ;;  %v572_v54 = vld [vmem:[%s3883_s5 + $0x5b0] sm:$0xf]  ;;  %v574_v55 = vld [vmem:[%s3883_s5 + $0x5b8] sm:$0xf] }
  0x8d   : > { %v576_v56 = vld [vmem:[%s3883_s5 + $0x5c0] sm:$0xf]  ;;  %573 = vst [vmem:[%s3887_s6 + $0x2d8] sm:$0xf] %v572_v54  ;;  %575 = vst [vmem:[%s3887_s6 + $0x2dc] sm:$0xf] %v574_v55 }
  0x8e   : > { %577 = vst [vmem:[%s3887_s6 + $0x2e0] sm:$0xf] %v576_v56  ;;  %v578_v57 = vld [vmem:[%s3883_s5 + $0x5c8] sm:$0xf]  ;;  %v580_v58 = vld [vmem:[%s3883_s5 + $0x5d0] sm:$0xf] }
  0x8f   : > { %v582_v59 = vld [vmem:[%s3883_s5 + $0x5d8] sm:$0xf]  ;;  %579 = vst [vmem:[%s3887_s6 + $0x2e4] sm:$0xf] %v578_v57  ;;  %581 = vst [vmem:[%s3887_s6 + $0x2e8] sm:$0xf] %v580_v58 }
  0x90   : > { %583 = vst [vmem:[%s3887_s6 + $0x2ec] sm:$0xf] %v582_v59  ;;  %v584_v60 = vld [vmem:[%s3883_s5 + $0x5e0] sm:$0xf]  ;;  %v586_v61 = vld [vmem:[%s3883_s5 + $0x5e8] sm:$0xf] }
  0x91   : > { %v588_v62 = vld [vmem:[%s3883_s5 + $0x5f0] sm:$0xf]  ;;  %585 = vst [vmem:[%s3887_s6 + $0x2f0] sm:$0xf] %v584_v60  ;;  %587 = vst [vmem:[%s3887_s6 + $0x2f4] sm:$0xf] %v586_v61 }
  0x92   : > { %589 = vst [vmem:[%s3887_s6 + $0x2f8] sm:$0xf] %v588_v62  ;;  %v590_v63 = vld [vmem:[%s3883_s5 + $0x5f8] sm:$0xf]  ;;  %v592_v0 = vld [vmem:[%s3883_s5 + $0x600] sm:$0xf] }
  0x93   : > { %v594_v1 = vld [vmem:[%s3883_s5 + $0x608] sm:$0xf]  ;;  %591 = vst [vmem:[%s3887_s6 + $0x2fc] sm:$0xf] %v590_v63  ;;  %593 = vst [vmem:[%s3887_s6 + $0x300] sm:$0xf] %v592_v0 }
  0x94   : > { %595 = vst [vmem:[%s3887_s6 + $0x304] sm:$0xf] %v594_v1  ;;  %v596_v2 = vld [vmem:[%s3883_s5 + $0x610] sm:$0xf]  ;;  %v598_v3 = vld [vmem:[%s3883_s5 + $0x618] sm:$0xf] }
  0x95   : > { %v600_v4 = vld [vmem:[%s3883_s5 + $0x620] sm:$0xf]  ;;  %597 = vst [vmem:[%s3887_s6 + $0x308] sm:$0xf] %v596_v2  ;;  %599 = vst [vmem:[%s3887_s6 + $0x30c] sm:$0xf] %v598_v3 }
  0x96   : > { %601 = vst [vmem:[%s3887_s6 + $0x310] sm:$0xf] %v600_v4  ;;  %v602_v5 = vld [vmem:[%s3883_s5 + $0x628] sm:$0xf]  ;;  %v604_v6 = vld [vmem:[%s3883_s5 + $0x630] sm:$0xf] }
  0x97   : > { %v606_v7 = vld [vmem:[%s3883_s5 + $0x638] sm:$0xf]  ;;  %603 = vst [vmem:[%s3887_s6 + $0x314] sm:$0xf] %v602_v5  ;;  %605 = vst [vmem:[%s3887_s6 + $0x318] sm:$0xf] %v604_v6 }
  0x98   : > { %607 = vst [vmem:[%s3887_s6 + $0x31c] sm:$0xf] %v606_v7  ;;  %v608_v8 = vld [vmem:[%s3883_s5 + $0x640] sm:$0xf]  ;;  %v610_v9 = vld [vmem:[%s3883_s5 + $0x648] sm:$0xf] }
  0x99   : > { %v612_v10 = vld [vmem:[%s3883_s5 + $0x650] sm:$0xf]  ;;  %609 = vst [vmem:[%s3887_s6 + $0x320] sm:$0xf] %v608_v8  ;;  %611 = vst [vmem:[%s3887_s6 + $0x324] sm:$0xf] %v610_v9 }
  0x9a   : > { %613 = vst [vmem:[%s3887_s6 + $0x328] sm:$0xf] %v612_v10  ;;  %v614_v11 = vld [vmem:[%s3883_s5 + $0x658] sm:$0xf]  ;;  %v616_v12 = vld [vmem:[%s3883_s5 + $0x660] sm:$0xf] }
  0x9b   : > { %v618_v13 = vld [vmem:[%s3883_s5 + $0x668] sm:$0xf]  ;;  %615 = vst [vmem:[%s3887_s6 + $0x32c] sm:$0xf] %v614_v11  ;;  %617 = vst [vmem:[%s3887_s6 + $0x330] sm:$0xf] %v616_v12 }
  0x9c   : > { %619 = vst [vmem:[%s3887_s6 + $0x334] sm:$0xf] %v618_v13  ;;  %v620_v14 = vld [vmem:[%s3883_s5 + $0x670] sm:$0xf]  ;;  %v622_v15 = vld [vmem:[%s3883_s5 + $0x678] sm:$0xf] }
  0x9d   : > { %v624_v16 = vld [vmem:[%s3883_s5 + $0x680] sm:$0xf]  ;;  %621 = vst [vmem:[%s3887_s6 + $0x338] sm:$0xf] %v620_v14  ;;  %623 = vst [vmem:[%s3887_s6 + $0x33c] sm:$0xf] %v622_v15 }
  0x9e   : > { %625 = vst [vmem:[%s3887_s6 + $0x340] sm:$0xf] %v624_v16  ;;  %v626_v17 = vld [vmem:[%s3883_s5 + $0x688] sm:$0xf]  ;;  %v628_v18 = vld [vmem:[%s3883_s5 + $0x690] sm:$0xf] }
  0x9f   : > { %v630_v19 = vld [vmem:[%s3883_s5 + $0x698] sm:$0xf]  ;;  %627 = vst [vmem:[%s3887_s6 + $0x344] sm:$0xf] %v626_v17  ;;  %629 = vst [vmem:[%s3887_s6 + $0x348] sm:$0xf] %v628_v18 }
  0xa0   : > { %631 = vst [vmem:[%s3887_s6 + $0x34c] sm:$0xf] %v630_v19  ;;  %v632_v20 = vld [vmem:[%s3883_s5 + $0x6a0] sm:$0xf]  ;;  %v634_v21 = vld [vmem:[%s3883_s5 + $0x6a8] sm:$0xf] }
  0xa1   : > { %v636_v22 = vld [vmem:[%s3883_s5 + $0x6b0] sm:$0xf]  ;;  %633 = vst [vmem:[%s3887_s6 + $0x350] sm:$0xf] %v632_v20  ;;  %635 = vst [vmem:[%s3887_s6 + $0x354] sm:$0xf] %v634_v21 }
  0xa2   : > { %637 = vst [vmem:[%s3887_s6 + $0x358] sm:$0xf] %v636_v22  ;;  %v638_v23 = vld [vmem:[%s3883_s5 + $0x6b8] sm:$0xf]  ;;  %v640_v24 = vld [vmem:[%s3883_s5 + $0x6c0] sm:$0xf] }
  0xa3   : > { %v642_v25 = vld [vmem:[%s3883_s5 + $0x6c8] sm:$0xf]  ;;  %639 = vst [vmem:[%s3887_s6 + $0x35c] sm:$0xf] %v638_v23  ;;  %641 = vst [vmem:[%s3887_s6 + $0x360] sm:$0xf] %v640_v24 }
  0xa4   : > { %643 = vst [vmem:[%s3887_s6 + $0x364] sm:$0xf] %v642_v25  ;;  %v644_v26 = vld [vmem:[%s3883_s5 + $0x6d0] sm:$0xf]  ;;  %v646_v27 = vld [vmem:[%s3883_s5 + $0x6d8] sm:$0xf] }
  0xa5   : > { %v648_v28 = vld [vmem:[%s3883_s5 + $0x6e0] sm:$0xf]  ;;  %645 = vst [vmem:[%s3887_s6 + $0x368] sm:$0xf] %v644_v26  ;;  %647 = vst [vmem:[%s3887_s6 + $0x36c] sm:$0xf] %v646_v27 }
  0xa6   : > { %649 = vst [vmem:[%s3887_s6 + $0x370] sm:$0xf] %v648_v28  ;;  %v650_v29 = vld [vmem:[%s3883_s5 + $0x6e8] sm:$0xf]  ;;  %v652_v30 = vld [vmem:[%s3883_s5 + $0x6f0] sm:$0xf] }
  0xa7   : > { %v654_v31 = vld [vmem:[%s3883_s5 + $0x6f8] sm:$0xf]  ;;  %651 = vst [vmem:[%s3887_s6 + $0x374] sm:$0xf] %v650_v29  ;;  %653 = vst [vmem:[%s3887_s6 + $0x378] sm:$0xf] %v652_v30 }
  0xa8   : > { %655 = vst [vmem:[%s3887_s6 + $0x37c] sm:$0xf] %v654_v31  ;;  %v656_v32 = vld [vmem:[%s3883_s5 + $0x700] sm:$0xf]  ;;  %v658_v33 = vld [vmem:[%s3883_s5 + $0x708] sm:$0xf] }
  0xa9   : > { %v660_v34 = vld [vmem:[%s3883_s5 + $0x710] sm:$0xf]  ;;  %657 = vst [vmem:[%s3887_s6 + $0x380] sm:$0xf] %v656_v32  ;;  %659 = vst [vmem:[%s3887_s6 + $0x384] sm:$0xf] %v658_v33 }
  0xaa   : > { %661 = vst [vmem:[%s3887_s6 + $0x388] sm:$0xf] %v660_v34  ;;  %v662_v35 = vld [vmem:[%s3883_s5 + $0x718] sm:$0xf]  ;;  %v664_v36 = vld [vmem:[%s3883_s5 + $0x720] sm:$0xf] }
  0xab   : > { %v666_v37 = vld [vmem:[%s3883_s5 + $0x728] sm:$0xf]  ;;  %663 = vst [vmem:[%s3887_s6 + $0x38c] sm:$0xf] %v662_v35  ;;  %665 = vst [vmem:[%s3887_s6 + $0x390] sm:$0xf] %v664_v36 }
  0xac   : > { %667 = vst [vmem:[%s3887_s6 + $0x394] sm:$0xf] %v666_v37  ;;  %v668_v38 = vld [vmem:[%s3883_s5 + $0x730] sm:$0xf]  ;;  %v670_v39 = vld [vmem:[%s3883_s5 + $0x738] sm:$0xf] }
  0xad   : > { %v672_v40 = vld [vmem:[%s3883_s5 + $0x740] sm:$0xf]  ;;  %669 = vst [vmem:[%s3887_s6 + $0x398] sm:$0xf] %v668_v38  ;;  %671 = vst [vmem:[%s3887_s6 + $0x39c] sm:$0xf] %v670_v39 }
  0xae   : > { %673 = vst [vmem:[%s3887_s6 + $0x3a0] sm:$0xf] %v672_v40  ;;  %v674_v41 = vld [vmem:[%s3883_s5 + $0x748] sm:$0xf]  ;;  %v676_v42 = vld [vmem:[%s3883_s5 + $0x750] sm:$0xf] }
  0xaf   : > { %v678_v43 = vld [vmem:[%s3883_s5 + $0x758] sm:$0xf]  ;;  %675 = vst [vmem:[%s3887_s6 + $0x3a4] sm:$0xf] %v674_v41  ;;  %677 = vst [vmem:[%s3887_s6 + $0x3a8] sm:$0xf] %v676_v42 }
  0xb0   : > { %679 = vst [vmem:[%s3887_s6 + $0x3ac] sm:$0xf] %v678_v43  ;;  %v680_v44 = vld [vmem:[%s3883_s5 + $0x760] sm:$0xf]  ;;  %v682_v45 = vld [vmem:[%s3883_s5 + $0x768] sm:$0xf] }
  0xb1   : > { %v684_v46 = vld [vmem:[%s3883_s5 + $0x770] sm:$0xf]  ;;  %681 = vst [vmem:[%s3887_s6 + $0x3b0] sm:$0xf] %v680_v44  ;;  %683 = vst [vmem:[%s3887_s6 + $0x3b4] sm:$0xf] %v682_v45 }
  0xb2   : > { %685 = vst [vmem:[%s3887_s6 + $0x3b8] sm:$0xf] %v684_v46  ;;  %v686_v47 = vld [vmem:[%s3883_s5 + $0x778] sm:$0xf]  ;;  %v688_v48 = vld [vmem:[%s3883_s5 + $0x780] sm:$0xf] }
  0xb3   : > { %v690_v49 = vld [vmem:[%s3883_s5 + $0x788] sm:$0xf]  ;;  %687 = vst [vmem:[%s3887_s6 + $0x3bc] sm:$0xf] %v686_v47  ;;  %689 = vst [vmem:[%s3887_s6 + $0x3c0] sm:$0xf] %v688_v48 }
  0xb4   : > { %691 = vst [vmem:[%s3887_s6 + $0x3c4] sm:$0xf] %v690_v49  ;;  %v692_v50 = vld [vmem:[%s3883_s5 + $0x790] sm:$0xf]  ;;  %v694_v51 = vld [vmem:[%s3883_s5 + $0x798] sm:$0xf] }
  0xb5   : > { %v696_v52 = vld [vmem:[%s3883_s5 + $0x7a0] sm:$0xf]  ;;  %693 = vst [vmem:[%s3887_s6 + $0x3c8] sm:$0xf] %v692_v50  ;;  %695 = vst [vmem:[%s3887_s6 + $0x3cc] sm:$0xf] %v694_v51 }
  0xb6   : > { %697 = vst [vmem:[%s3887_s6 + $0x3d0] sm:$0xf] %v696_v52  ;;  %v698_v53 = vld [vmem:[%s3883_s5 + $0x7a8] sm:$0xf]  ;;  %v700_v54 = vld [vmem:[%s3883_s5 + $0x7b0] sm:$0xf] }
  0xb7   : > { %v702_v55 = vld [vmem:[%s3883_s5 + $0x7b8] sm:$0xf]  ;;  %699 = vst [vmem:[%s3887_s6 + $0x3d4] sm:$0xf] %v698_v53  ;;  %701 = vst [vmem:[%s3887_s6 + $0x3d8] sm:$0xf] %v700_v54 }
  0xb8   : > { %703 = vst [vmem:[%s3887_s6 + $0x3dc] sm:$0xf] %v702_v55  ;;  %v704_v56 = vld [vmem:[%s3883_s5 + $0x7c0] sm:$0xf]  ;;  %v706_v57 = vld [vmem:[%s3883_s5 + $0x7c8] sm:$0xf] }
  0xb9   : > { %v708_v58 = vld [vmem:[%s3883_s5 + $0x7d0] sm:$0xf]  ;;  %705 = vst [vmem:[%s3887_s6 + $0x3e0] sm:$0xf] %v704_v56  ;;  %707 = vst [vmem:[%s3887_s6 + $0x3e4] sm:$0xf] %v706_v57 }
  0xba   : > { %709 = vst [vmem:[%s3887_s6 + $0x3e8] sm:$0xf] %v708_v58  ;;  %v710_v59 = vld [vmem:[%s3883_s5 + $0x7d8] sm:$0xf]  ;;  %v712_v60 = vld [vmem:[%s3883_s5 + $0x7e0] sm:$0xf] }
  0xbb   : > { %v714_v61 = vld [vmem:[%s3883_s5 + $0x7e8] sm:$0xf]  ;;  %711 = vst [vmem:[%s3887_s6 + $0x3ec] sm:$0xf] %v710_v59  ;;  %713 = vst [vmem:[%s3887_s6 + $0x3f0] sm:$0xf] %v712_v60 }
  0xbc   : > { %715 = vst [vmem:[%s3887_s6 + $0x3f4] sm:$0xf] %v714_v61  ;;  %v716_v62 = vld [vmem:[%s3883_s5 + $0x7f0] sm:$0xf]  ;;  %v718_v63 = vld [vmem:[%s3883_s5 + $0x7f8] sm:$0xf] }
  0xbd   : > { %717 = vst [vmem:[%s3887_s6 + $0x3f8] sm:$0xf] %v716_v62  ;;  %719 = vst [vmem:[%s3887_s6 + $0x3fc] sm:$0xf] %v718_v63 }
  0xbe PF: > { %p3189_p8 = scmp.ge.s32.totalorder %s3808_s19, 1  ;;  %p1266_p9 = scmp.lt.s32.totalorder %s3808_s19, 3 }
  0xc0   : > { %p1267_p10 = pnand %p3189_p8, %p1266_p9 }
  0xc1   : > { %s1273_s7 = sand.u32 (!%p1267_p10), 1, %s3792_s15   ;;  %p1316_p11 = scmp.lt.s32.totalorder (!%p1267_p10), %s3800_s17, 1 }
  0xc2   : > { %1270 = sbr.rel (%p1267_p10) target bundleno = 623 (0x26f), region = 73  ;;  %s3190_s14 = sshll.u32 (!%p1267_p10), %s1273_s7, 10 }
  0xc3   : > { %s4428_s23 = scalar_lea.vmem (!%p1267_p10), [#allocation2], %s3190_s14  ;;  %s3191_s21 = sshll.u32 (!%p1267_p10), %s1273_s7, 4 }
  0xc4   : > { %s1308_s22 = scalar_lea.vmem (!%p1267_p10), [#allocation3], %s3191_s21 }
  0xc7   : > { %v4405_v0 = vld [vmem:[%s4677_s0] sm:$0xff]  ;;  %v4415_v2 = vld [vmem:[%s4677_s0 + $0x8] sm:$0xff]  ;;  %v3640_v6 = vld [vmem:[%s4428_s23 + $0x78] sm:$0xff]   ;;  %s1317_s8 = scalar_select %p1316_p11, %s3800_s17, 1 }
  0xc8   : > { %v4410_v1 = vld [vmem:[%s4677_s0 + $0x40] sm:$0xff]  ;;  %v4424_v4 = vld [vmem:[%s4677_s0 + $0x48] sm:$0xff]  ;;  %v3641_v7 = vld [vmem:[%s4428_s23 + $0xf8] sm:$0xff]   ;;  %3376 = vmatprep.subr.bf16.mxu0 %v3640_v6  ;;  %s3358_s15 = sshll.u32 (%p3870_p6), %s3800_s17, 2 }
  0xc9   : > { %v3193_v3 = vcombine.high %v4405_v0, %v4410_v1  ;;  %v3195_v5 = vcombine.high %v4415_v2, %v4424_v4  ;;  %v3642_v8 = vld [vmem:[%s4428_s23 + $0x38] sm:$0xff]   ;;  %3404 = vmatprep.subr.bf16.mxu1 %v3641_v7  ;;  %v3644_v10 = vld [vmem:[%s4428_s23 + $0x70] sm:$0xff]   ;;  %v3648_v14 = vld [vmem:[%s4428_s23 + $0x68] sm:$0xff]   ;;  %v3192_v42 = vcombine.low %v4405_v0, %v4410_v1  ;;  %v3194_v43 = vcombine.low %v4415_v2, %v4424_v4  ;;  %s1318_s11 = scalar_lea.vmem %s4679_s2, %s1317_s8  ;;  %s1321_s14 = scalar_lea.vmem %s4680_s3, %s1317_s8 }
  0xca   : > { %v3643_v9 = vld [vmem:[%s4428_s23 + $0xb8] sm:$0xff]   ;;  %3377 = vmatpush3.bf16.msra.mxu0 %v3642_v8  ;;  %v3645_v11 = vld [vmem:[%s4428_s23 + $0xf0] sm:$0xff]   ;;  %v3649_v15 = vld [vmem:[%s4428_s23 + $0xe8] sm:$0xff]   ;;  %s3028_s26 = scalar_lea.vmem (%p3870_p6), %s4681_s4, %s3358_s15 }
  0xcb   : > { %2572 = vmatprep.mubr.bf16.mxu0 %v3193_v3  ;;  %2621 = vmatprep.mubr.bf16.mxu1 %v3195_v5  ;;  %v3646_v12 = vld [vmem:[%s4428_s23 + $0x30] sm:$0xff]   ;;  %v3650_v16 = vld [vmem:[%s4428_s23 + $0x28] sm:$0xff]   ;;  %v3652_v18 = vld [vmem:[%s4428_s23 + $0x60] sm:$0xff]  }
  0xcc   : > { %3405 = vmatpush3.bf16.msra.mxu1 %v3643_v9  ;;  %3378 = vmatprep.subr.bf16.mxu0 %v3644_v10  ;;  %v3647_v13 = vld [vmem:[%s4428_s23 + $0xb0] sm:$0xff]   ;;  %v3651_v17 = vld [vmem:[%s4428_s23 + $0xa8] sm:$0xff]   ;;  %v3653_v19 = vld [vmem:[%s4428_s23 + $0xe0] sm:$0xff]  }
  0xcd   : > { %3406 = vmatprep.subr.bf16.mxu1 %v3645_v11  ;;  %v3654_v20 = vld [vmem:[%s4428_s23 + $0x20] sm:$0xff]   ;;  %v3656_v22 = vld [vmem:[%s4428_s23 + $0x58] sm:$0xff]   ;;  %v3660_v26 = vld [vmem:[%s4428_s23 + $0x50] sm:$0xff]  }
  0xce   : > { %3379 = vmatpush3.bf16.msra.mxu0 %v3646_v12  ;;  %v3655_v21 = vld [vmem:[%s4428_s23 + $0xa0] sm:$0xff]   ;;  %v3657_v23 = vld [vmem:[%s4428_s23 + $0xd8] sm:$0xff]   ;;  %v3661_v27 = vld [vmem:[%s4428_s23 + $0xd0] sm:$0xff]  }
  0xcf   : > { %3380 = vmatprep.subr.bf16.mxu0 %v3648_v14  ;;  %v3658_v24 = vld [vmem:[%s4428_s23 + $0x18] sm:$0xff]   ;;  %v3662_v28 = vld [vmem:[%s4428_s23 + $0x10] sm:$0xff]   ;;  %v3664_v30 = vld [vmem:[%s4428_s23 + $0x48] sm:$0xff]  }
  0xd0   : > { %3407 = vmatpush3.bf16.msra.mxu1 %v3647_v13  ;;  %v3659_v25 = vld [vmem:[%s4428_s23 + $0x98] sm:$0xff]   ;;  %v3663_v29 = vld [vmem:[%s4428_s23 + $0x90] sm:$0xff]   ;;  %v3665_v31 = vld [vmem:[%s4428_s23 + $0xc8] sm:$0xff]  }
  0xd1   : > { %3408 = vmatprep.subr.bf16.mxu1 %v3649_v15  ;;  %v3666_v32 = vld [vmem:[%s4428_s23 + $0x8] sm:$0xff]   ;;  %v3668_v34 = vld [vmem:[%s4428_s23 + $0x40] sm:$0xff]   ;;  %v3672_v44 = vld [vmem:[%s4428_s23 + $0x178] sm:$0xff]  }
  0xd2   : > { %3381 = vmatpush3.bf16.msra.mxu0 %v3650_v16  ;;  %v3667_v33 = vld [vmem:[%s4428_s23 + $0x88] sm:$0xff]   ;;  %v1340_v35 = vld [vmem:[%s4677_s0 + $0x80] sm:$0xff]  ;;  %v3673_v45 = vld [vmem:[%s4428_s23 + $0x1f8] sm:$0xff]  }
  0xd3   : > { %3382 = vmatprep.subr.bf16.mxu0 %v3652_v18  ;;  %v1348_v36 = vld [vmem:[%s4677_s0 + $0xc0] sm:$0xff]  ;;  %v1341_v38 = vld [vmem:[%s4677_s0 + $0x88] sm:$0xff]  ;;  %v3674_v47 = vld [vmem:[%s4428_s23 + $0x138] sm:$0xff]  }
  0xd4   : > { %3409 = vmatpush3.bf16.msra.mxu1 %v3651_v17  ;;  %v3669_v37 = vld [vmem:[%s4428_s23 + $0xc0] sm:$0xff]   ;;  %v1349_v39 = vld [vmem:[%s4677_s0 + $0xc8] sm:$0xff]  ;;  %v3209_v46 = vcombine.high %v1340_v35, %v1348_v36  ;;  %v3675_v49 = vld [vmem:[%s4428_s23 + $0x1b8] sm:$0xff]   ;;  %v3208_v54 = vcombine.low %v1340_v35, %v1348_v36 }
  0xd5   : > { %3410 = vmatprep.subr.bf16.mxu1 %v3653_v19  ;;  %v3670_v40 = vld [vmem:[%s4428_s23] sm:$0xff]   ;;  %v3211_v48 = vcombine.high %v1341_v38, %v1349_v39  ;;  %v3676_v50 = vld [vmem:[%s4428_s23 + $0x170] sm:$0xff]   ;;  %v3680_v55 = vld [vmem:[%s4428_s23 + $0x168] sm:$0xff]   ;;  %v3210_v56 = vcombine.low %v1341_v38, %v1349_v39 }
  0xd6   : > { %3383 = vmatpush3.bf16.msra.mxu0 %v3654_v20  ;;  %v3671_v41 = vld [vmem:[%s4428_s23 + $0x80] sm:$0xff]   ;;  %v3677_v51 = vld [vmem:[%s4428_s23 + $0x1f0] sm:$0xff]   ;;  %v3681_v57 = vld [vmem:[%s4428_s23 + $0x1e8] sm:$0xff]  }
  0xd7   : > { %3384 = vmatprep.subr.bf16.mxu0 %v3656_v22  ;;  %v3678_v52 = vld [vmem:[%s4428_s23 + $0x130] sm:$0xff]   ;;  %v3682_v58 = vld [vmem:[%s4428_s23 + $0x128] sm:$0xff]   ;;  %v3684_v60 = vld [vmem:[%s4428_s23 + $0x160] sm:$0xff]  }
  0xd8   : > { %3411 = vmatpush3.bf16.msra.mxu1 %v3655_v21  ;;  %v3679_v53 = vld [vmem:[%s4428_s23 + $0x1b0] sm:$0xff]   ;;  %v3683_v59 = vld [vmem:[%s4428_s23 + $0x1a8] sm:$0xff]   ;;  %v3685_v61 = vld [vmem:[%s4428_s23 + $0x1e0] sm:$0xff]  }
  0xd9   : > { %3412 = vmatprep.subr.bf16.mxu1 %v3657_v23  ;;  %v3686_v62 = vld [vmem:[%s4428_s23 + $0x120] sm:$0xff]   ;;  %v3688_v0 = vld [vmem:[%s4428_s23 + $0x158] sm:$0xff]   ;;  %v3692_v4 = vld [vmem:[%s4428_s23 + $0x150] sm:$0xff]  }
  0xda   : > { %3385 = vmatpush3.bf16.msra.mxu0 %v3658_v24  ;;  %v3687_v63 = vld [vmem:[%s4428_s23 + $0x1a0] sm:$0xff]   ;;  %v3689_v1 = vld [vmem:[%s4428_s23 + $0x1d8] sm:$0xff]   ;;  %v3693_v5 = vld [vmem:[%s4428_s23 + $0x1d0] sm:$0xff]  }
  0xdb   : > { %3386 = vmatprep.subr.bf16.mxu0 %v3660_v26  ;;  %v3690_v2 = vld [vmem:[%s4428_s23 + $0x118] sm:$0xff]   ;;  %v3694_v6 = vld [vmem:[%s4428_s23 + $0x110] sm:$0xff]   ;;  %v3696_v8 = vld [vmem:[%s4428_s23 + $0x148] sm:$0xff]  }
  0xdc   : > { %3413 = vmatpush3.bf16.msra.mxu1 %v3659_v25  ;;  %v3691_v3 = vld [vmem:[%s4428_s23 + $0x198] sm:$0xff]   ;;  %v3695_v7 = vld [vmem:[%s4428_s23 + $0x190] sm:$0xff]   ;;  %v3697_v9 = vld [vmem:[%s4428_s23 + $0x1c8] sm:$0xff]  }
  0xdd   : > { %3414 = vmatprep.subr.bf16.mxu1 %v3661_v27  ;;  %v3698_v10 = vld [vmem:[%s4428_s23 + $0x108] sm:$0xff]   ;;  %v3700_v12 = vld [vmem:[%s4428_s23 + $0x140] sm:$0xff]   ;;  %v1326_v13 = vld [vmem:[%s4677_s0 + $0x10] sm:$0xff] }
  0xde   : > { %3387 = vmatpush3.bf16.msra.mxu0 %v3662_v28  ;;  %v3699_v11 = vld [vmem:[%s4428_s23 + $0x188] sm:$0xff]   ;;  %v3701_v14 = vld [vmem:[%s4428_s23 + $0x1c0] sm:$0xff]   ;;  %v1334_v17 = vld [vmem:[%s4677_s0 + $0x50] sm:$0xff] }
  0xdf   : > { %3388 = vmatprep.subr.bf16.mxu0 %v3664_v30  ;;  %v3702_v15 = vld [vmem:[%s4428_s23 + $0x100] sm:$0xff]   ;;  %v1327_v18 = vld [vmem:[%s4677_s0 + $0x18] sm:$0xff]  ;;  %v3196_v20 = vcombine.low %v1326_v13, %v1334_v17  ;;  %v3197_v21 = vcombine.high %v1326_v13, %v1334_v17  ;;  %v3708_v28 = vld [vmem:[%s4428_s23 + $0x270] sm:$0xff]  }
  0xe0   : > { %3415 = vmatpush3.bf16.msra.mxu1 %v3663_v29  ;;  %v3703_v16 = vld [vmem:[%s4428_s23 + $0x180] sm:$0xff]   ;;  %v1335_v19 = vld [vmem:[%s4677_s0 + $0x58] sm:$0xff]  ;;  %v3709_v29 = vld [vmem:[%s4428_s23 + $0x2f0] sm:$0xff]  }
  0xe1   : > { %3416 = vmatprep.subr.bf16.mxu1 %v3665_v31  ;;  %v3198_v22 = vcombine.low %v1327_v18, %v1335_v19  ;;  %v3199_v23 = vcombine.high %v1327_v18, %v1335_v19  ;;  %v3704_v24 = vld [vmem:[%s4428_s23 + $0x278] sm:$0xff]   ;;  %v3710_v30 = vld [vmem:[%s4428_s23 + $0x230] sm:$0xff]   ;;  %v3712_v36 = vld [vmem:[%s4428_s23 + $0x268] sm:$0xff]  }
  0xe2   : > { %3389 = vmatpush3.bf16.msra.mxu0 %v3666_v32  ;;  %v3705_v25 = vld [vmem:[%s4428_s23 + $0x2f8] sm:$0xff]   ;;  %v3711_v31 = vld [vmem:[%s4428_s23 + $0x2b0] sm:$0xff]   ;;  %v1352_v17 = vld [vmem:[%s4677_s0 + $0xe0] sm:$0xff] }
  0xe3   : > { %3390 = vmatprep.subr.bf16.mxu0 %v3668_v34  ;;  %v3706_v26 = vld [vmem:[%s4428_s23 + $0x238] sm:$0xff]   ;;  %v1342_v32 = vld [vmem:[%s4677_s0 + $0x90] sm:$0xff] }
  0xe4   : > { %3417 = vmatpush3.bf16.msra.mxu1 %v3667_v33  ;;  %v3707_v27 = vld [vmem:[%s4428_s23 + $0x2b8] sm:$0xff]   ;;  %v1350_v33 = vld [vmem:[%s4677_s0 + $0xd0] sm:$0xff] }
  0xe5   : > { %3418 = vmatprep.subr.bf16.mxu1 %v3669_v37  ;;  %v3213_v34 = vcombine.high %v1342_v32, %v1350_v33  ;;  %v3212_v35 = vcombine.low %v1342_v32, %v1350_v33  ;;  %v3713_v37 = vld [vmem:[%s4428_s23 + $0x2e8] sm:$0xff]   ;;  %v1343_v38 = vld [vmem:[%s4677_s0 + $0x98] sm:$0xff]  ;;  %v3741_v13 = vld [vmem:[%s4428_s23 + $0x3f0] sm:$0xff]  }
  0xe6   : > { %3391 = vmatpush3.bf16.msra.mxu0 %v3670_v40  ;;  %v1351_v39 = vld [vmem:[%s4677_s0 + $0xd8] sm:$0xff] }
  0xe7   : > { %3432 = vmatprep.subr.bf16.mxu0 %v3672_v44  ;;  %v3215_v40 = vcombine.high %v1343_v38, %v1351_v39  ;;  %v3716_v44 = vld [vmem:[%s4428_s23 + $0x260] sm:$0xff]   ;;  %v3752_v32 = vld [vmem:[%s4428_s23 + $0x358] sm:$0xff]  }
  0xe8   : > { %3419 = vmatpush3.bf16.msra.mxu1 %v3671_v41  ;;  %v3714_v41 = vld [vmem:[%s4428_s23 + $0x228] sm:$0xff]   ;;  %v3753_v33 = vld [vmem:[%s4428_s23 + $0x3d8] sm:$0xff]  }
  0xe9   : > { %2573 = vmatmul.mubr.bf16.vlgmr.msra.gmra.mxu0 %v3192_v42  ;;  %3460 = vmatprep.subr.bf16.mxu1 %v3673_v45  ;;  %v3214_v42 = vcombine.low %v1343_v38, %v1351_v39  ;;  %v3717_v45 = vld [vmem:[%s4428_s23 + $0x2e0] sm:$0xff]   ;;  %v3758_v38 = vld [vmem:[%s4428_s23 + $0x310] sm:$0xff]  }
  0xea   : > { %3433 = vmatpush3.bf16.msra.mxu0 %v3674_v47  ;;  %2580 = vmatprep.mubr.bf16.mxu0 %v3209_v46  ;;  %v3718_v46 = vld [vmem:[%s4428_s23 + $0x220] sm:$0xff]   ;;  %v3759_v39 = vld [vmem:[%s4428_s23 + $0x390] sm:$0xff]  }
  0xeb   : > { %2622 = vmatmul.mubr.bf16.vlgmr.msra.gmra.mxu1 %v3194_v43  ;;  %3434 = vmatprep.subr.bf16.mxu0 %v3676_v50  ;;  %v3715_v43 = vld [vmem:[%s4428_s23 + $0x2a8] sm:$0xff]   ;;  %v3719_v47 = vld [vmem:[%s4428_s23 + $0x2a0] sm:$0xff]   ;;  %v3722_v50 = vld [vmem:[%s4428_s23 + $0x218] sm:$0xff]  }
  0xec   : > { %3461 = vmatpush3.bf16.msra.mxu1 %v3675_v49  ;;  %2629 = vmatprep.mubr.bf16.mxu1 %v3211_v48  ;;  %v3720_v48 = vld [vmem:[%s4428_s23 + $0x258] sm:$0xff]  }
  0xed   : > { %3462 = vmatprep.subr.bf16.mxu1 %v3677_v51  ;;  %v3721_v49 = vld [vmem:[%s4428_s23 + $0x2d8] sm:$0xff]  }
  0xee   : > { %3435 = vmatpush3.bf16.msra.mxu0 %v3678_v52  ;;  %v3723_v51 = vld [vmem:[%s4428_s23 + $0x298] sm:$0xff]   ;;  %v3724_v52 = vld [vmem:[%s4428_s23 + $0x250] sm:$0xff]  }
  0xef   : > { %3436 = vmatprep.subr.bf16.mxu0 %v3680_v55  ;;  %v3727_v55 = vld [vmem:[%s4428_s23 + $0x290] sm:$0xff]  }
  0xf0   : > { %3463 = vmatpush3.bf16.msra.mxu1 %v3679_v53  ;;  %v3725_v53 = vld [vmem:[%s4428_s23 + $0x2d0] sm:$0xff]  }
  0xf1   : > { %3464 = vmatprep.subr.bf16.mxu1 %v3681_v57  ;;  %2581 = vmatmul.mubr.bf16.gmra.mxu0 %v3208_v54  ;;  %v3726_v54 = vld [vmem:[%s4428_s23 + $0x210] sm:$0xff]   ;;  %v3729_v57 = vld [vmem:[%s4428_s23 + $0x2c8] sm:$0xff]  }
  0xf2   : > { %3437 = vmatpush3.bf16.msra.mxu0 %v3682_v58  ;;  %2670 = vmatprep.mubr.bf16.mxu0 %v3197_v21  ;;  %v3730_v58 = vld [vmem:[%s4428_s23 + $0x208] sm:$0xff]  }
  0xf3   : > { %2630 = vmatmul.mubr.bf16.gmra.mxu1 %v3210_v56  ;;  %3438 = vmatprep.subr.bf16.mxu0 %v3684_v60  ;;  %v3728_v56 = vld [vmem:[%s4428_s23 + $0x248] sm:$0xff]   ;;  %v3732_v60 = vld [vmem:[%s4428_s23 + $0x240] sm:$0xff]  }
  0xf4   : > { %3465 = vmatpush3.bf16.msra.mxu1 %v3683_v59  ;;  %2719 = vmatprep.mubr.bf16.mxu1 %v3199_v23  ;;  %v3731_v59 = vld [vmem:[%s4428_s23 + $0x288] sm:$0xff]  }
  0xf5   : > { %3466 = vmatprep.subr.bf16.mxu1 %v3685_v61  ;;  %v3733_v61 = vld [vmem:[%s4428_s23 + $0x2c0] sm:$0xff]   ;;  %v3745_v21 = vld [vmem:[%s4428_s23 + $0x3e8] sm:$0xff]  }
  0xf6   : > { %3439 = vmatpush3.bf16.msra.mxu0 %v3686_v62  ;;  %v3734_v62 = vld [vmem:[%s4428_s23 + $0x200] sm:$0xff]   ;;  %v1353_v23 = vld [vmem:[%s4677_s0 + $0xe8] sm:$0xff] }
  0xf7   : > { %3440 = vmatprep.subr.bf16.mxu0 %v3688_v0  ;;  %v1328_v0 = vld [vmem:[%s4677_s0 + $0x20] sm:$0xff] }
  0xf8   : > { %3467 = vmatpush3.bf16.msra.mxu1 %v3687_v63  ;;  %v3735_v63 = vld [vmem:[%s4428_s23 + $0x280] sm:$0xff]  }
  0xf9   : > { %3468 = vmatprep.subr.bf16.mxu1 %v3689_v1  ;;  %v1336_v1 = vld [vmem:[%s4677_s0 + $0x60] sm:$0xff] }
  0xfa   : > { %3441 = vmatpush3.bf16.msra.mxu0 %v3690_v2  ;;  %v3200_v2 = vcombine.low %v1328_v0, %v1336_v1 }
  0xfb   : > { %3442 = vmatprep.subr.bf16.mxu0 %v3692_v4  ;;  %v1329_v4 = vld [vmem:[%s4677_s0 + $0x28] sm:$0xff] }
  0xfc   : > { %3469 = vmatpush3.bf16.msra.mxu1 %v3691_v3  ;;  %v3201_v3 = vcombine.high %v1328_v0, %v1336_v1 }
  0xfd   : > { %3470 = vmatprep.subr.bf16.mxu1 %v3693_v5  ;;  %v1337_v5 = vld [vmem:[%s4677_s0 + $0x68] sm:$0xff] }
  0xfe   : > { %3443 = vmatpush3.bf16.msra.mxu0 %v3694_v6  ;;  %v3202_v6 = vcombine.low %v1329_v4, %v1337_v5 }
  0xff   : > { %3444 = vmatprep.subr.bf16.mxu0 %v3696_v8  ;;  %v3736_v8 = vld [vmem:[%s4428_s23 + $0x378] sm:$0xff]  }
 0x100   : > { %3471 = vmatpush3.bf16.msra.mxu1 %v3695_v7  ;;  %v3203_v7 = vcombine.high %v1329_v4, %v1337_v5 }
 0x101   : > { %3472 = vmatprep.subr.bf16.mxu1 %v3697_v9  ;;  %v3737_v9 = vld [vmem:[%s4428_s23 + $0x3f8] sm:$0xff]  }
 0x102   : > { %3445 = vmatpush3.bf16.msra.mxu0 %v3698_v10  ;;  %v3738_v10 = vld [vmem:[%s4428_s23 + $0x338] sm:$0xff]  }
 0x103   : > { %3446 = vmatprep.subr.bf16.mxu0 %v3700_v12  ;;  %v3740_v12 = vld [vmem:[%s4428_s23 + $0x370] sm:$0xff]  }
 0x104   : > { %3473 = vmatpush3.bf16.msra.mxu1 %v3699_v11  ;;  %v3739_v11 = vld [vmem:[%s4428_s23 + $0x3b8] sm:$0xff]  }
 0x105   : > { %3474 = vmatprep.subr.bf16.mxu1 %v3701_v14  ;;  %v3742_v14 = vld [vmem:[%s4428_s23 + $0x330] sm:$0xff]  }
 0x106   : > { %3447 = vmatpush3.bf16.msra.mxu0 %v3702_v15  ;;  %v3743_v15 = vld [vmem:[%s4428_s23 + $0x3b0] sm:$0xff]  }
 0x107   : > { %3488 = vmatprep.subr.bf16.mxu0 %v3704_v24 }
 0x108   : > { %3475 = vmatpush3.bf16.msra.mxu1 %v3703_v16  ;;  %v1344_v16 = vld [vmem:[%s4677_s0 + $0xa0] sm:$0xff] }
 0x109   : > { %2671 = vmatmul.mubr.bf16.vlgmr.msra.gmra.mxu0 %v3196_v20  ;;  %3516 = vmatprep.subr.bf16.mxu1 %v3705_v25  ;;  %v3217_v18 = vcombine.high %v1344_v16, %v1352_v17  ;;  %v3216_v19 = vcombine.low %v1344_v16, %v1352_v17  ;;  %v3744_v20 = vld [vmem:[%s4428_s23 + $0x368] sm:$0xff]  }
 0x10a   : > { %3489 = vmatpush3.bf16.msra.mxu0 %v3706_v26  ;;  %2678 = vmatprep.mubr.bf16.mxu0 %v3213_v34  ;;  %v3746_v25 = vld [vmem:[%s4428_s23 + $0x328] sm:$0xff]   ;;  %v3754_v34 = vld [vmem:[%s4428_s23 + $0x318] sm:$0xff]  }
 0x10b   : > { %2720 = vmatmul.mubr.bf16.vlgmr.msra.gmra.mxu1 %v3198_v22  ;;  %3490 = vmatprep.subr.bf16.mxu0 %v3708_v28  ;;  %v1345_v22 = vld [vmem:[%s4677_s0 + $0xa8] sm:$0xff]  ;;  %v3748_v28 = vld [vmem:[%s4428_s23 + $0x360] sm:$0xff]  }
 0x10c   : > { %3517 = vmatpush3.bf16.msra.mxu1 %v3707_v27  ;;  %2727 = vmatprep.mubr.bf16.mxu1 %v3215_v40  ;;  %v3219_v24 = vcombine.high %v1345_v22, %v1353_v23  ;;  %v3218_v26 = vcombine.low %v1345_v22, %v1353_v23  ;;  %v3747_v27 = vld [vmem:[%s4428_s23 + $0x3a8] sm:$0xff]  }
 0x10d   : > { %3518 = vmatprep.subr.bf16.mxu1 %v3709_v29  ;;  %v3749_v29 = vld [vmem:[%s4428_s23 + $0x3e0] sm:$0xff]   ;;  %v3760_v40 = vld [vmem:[%s4428_s23 + $0x348] sm:$0xff]  }
 0x10e   : > { %3491 = vmatpush3.bf16.msra.mxu0 %v3710_v30  ;;  %v3750_v30 = vld [vmem:[%s4428_s23 + $0x320] sm:$0xff]  }
 0x10f   : > { %3492 = vmatprep.subr.bf16.mxu0 %v3712_v36  ;;  %v3756_v36 = vld [vmem:[%s4428_s23 + $0x350] sm:$0xff]  }
 0x110   : > { %3519 = vmatpush3.bf16.msra.mxu1 %v3711_v31  ;;  %v3751_v31 = vld [vmem:[%s4428_s23 + $0x3a0] sm:$0xff]  }
 0x111   : > { %2679 = vmatmul.mubr.bf16.gmra.mxu0 %v3212_v35  ;;  %3520 = vmatprep.subr.bf16.mxu1 %v3713_v37  ;;  %v3755_v35 = vld [vmem:[%s4428_s23 + $0x398] sm:$0xff]   ;;  %v3757_v37 = vld [vmem:[%s4428_s23 + $0x3d0] sm:$0xff]  }
 0x112   : > { %3493 = vmatpush3.bf16.msra.mxu0 %v3714_v41  ;;  %2768 = vmatprep.mubr.bf16.mxu0 %v3201_v3  ;;  %v3761_v41 = vld [vmem:[%s4428_s23 + $0x3c8] sm:$0xff]  }
 0x113   : > { %2728 = vmatmul.mubr.bf16.gmra.mxu1 %v3214_v42  ;;  %3494 = vmatprep.subr.bf16.mxu0 %v3716_v44  ;;  %v3762_v42 = vld [vmem:[%s4428_s23 + $0x308] sm:$0xff]   ;;  %v3764_v44 = vld [vmem:[%s4428_s23 + $0x340] sm:$0xff]  }
 0x114   : > { %3521 = vmatpush3.bf16.msra.mxu1 %v3715_v43  ;;  %2817 = vmatprep.mubr.bf16.mxu1 %v3203_v7  ;;  %v3763_v43 = vld [vmem:[%s4428_s23 + $0x388] sm:$0xff]  }
 0x115   : > { %3522 = vmatprep.subr.bf16.mxu1 %v3717_v45  ;;  %v3765_v45 = vld [vmem:[%s4428_s23 + $0x3c0] sm:$0xff]  }
 0x116   : > { %3495 = vmatpush3.bf16.msra.mxu0 %v3718_v46  ;;  %v3766_v46 = vld [vmem:[%s4428_s23 + $0x300] sm:$0xff]  }
 0x117   : > { %3496 = vmatprep.subr.bf16.mxu0 %v3720_v48  ;;  %v1330_v48 = vld [vmem:[%s4677_s0 + $0x30] sm:$0xff] }
 0x118   : > { %3523 = vmatpush3.bf16.msra.mxu1 %v3719_v47  ;;  %v3767_v47 = vld [vmem:[%s4428_s23 + $0x380] sm:$0xff]  }
 0x119   : > { %3524 = vmatprep.subr.bf16.mxu1 %v3721_v49  ;;  %v1338_v49 = vld [vmem:[%s4677_s0 + $0x70] sm:$0xff] }
 0x11a   : > { %3497 = vmatpush3.bf16.msra.mxu0 %v3722_v50  ;;  %v1331_v50 = vld [vmem:[%s4677_s0 + $0x38] sm:$0xff] }
 0x11b   : > { %3498 = vmatprep.subr.bf16.mxu0 %v3724_v52  ;;  %v3205_v52 = vcombine.high %v1330_v48, %v1338_v49 }
 0x11c   : > { %3525 = vmatpush3.bf16.msra.mxu1 %v3723_v51  ;;  %v3204_v51 = vcombine.low %v1330_v48, %v1338_v49 }
 0x11d   : > { %3526 = vmatprep.subr.bf16.mxu1 %v3725_v53  ;;  %v1339_v53 = vld [vmem:[%s4677_s0 + $0x78] sm:$0xff] }
 0x11e   : > { %3499 = vmatpush3.bf16.msra.mxu0 %v3726_v54  ;;  %v1346_v54 = vld [vmem:[%s4677_s0 + $0xb0] sm:$0xff] }
 0x11f   : > { %3500 = vmatprep.subr.bf16.mxu0 %v3728_v56  ;;  %v3206_v56 = vcombine.low %v1331_v50, %v1339_v53 }
 0x120   : > { %3527 = vmatpush3.bf16.msra.mxu1 %v3727_v55  ;;  %v1354_v55 = vld [vmem:[%s4677_s0 + $0xf0] sm:$0xff] }
 0x121   : > { %3528 = vmatprep.subr.bf16.mxu1 %v3729_v57  ;;  %v3207_v57 = vcombine.high %v1331_v50, %v1339_v53 }
 0x122   : > { %3501 = vmatpush3.bf16.msra.mxu0 %v3730_v58  ;;  %v3221_v58 = vcombine.high %v1346_v54, %v1354_v55 }
 0x123   : > { %3502 = vmatprep.subr.bf16.mxu0 %v3732_v60  ;;  %v1355_v60 = vld [vmem:[%s4677_s0 + $0xf8] sm:$0xff] }
 0x124   : > { %3529 = vmatpush3.bf16.msra.mxu1 %v3731_v59  ;;  %v1347_v59 = vld [vmem:[%s4677_s0 + $0xb8] sm:$0xff] }
 0x125   : > { %3530 = vmatprep.subr.bf16.mxu1 %v3733_v61  ;;  %v3223_v61 = vcombine.high %v1347_v59, %v1355_v60 }
 0x126   : > { %3503 = vmatpush3.bf16.msra.mxu0 %v3734_v62  ;;  %v3220_v62 = vcombine.low %v1346_v54, %v1354_v55 }
 0x127   : > { %3544 = vmatprep.subr.bf16.mxu0 %v3736_v8 }
 0x128   : > { %3531 = vmatpush3.bf16.msra.mxu1 %v3735_v63  ;;  %v3222_v63 = vcombine.low %v1347_v59, %v1355_v60 }
 0x129   : > { %2769 = vmatmul.mubr.bf16.vlgmr.msra.gmra.mxu0 %v3200_v2  ;;  %3572 = vmatprep.subr.bf16.mxu1 %v3737_v9 }
 0x12a   : > { %3545 = vmatpush3.bf16.msra.mxu0 %v3738_v10  ;;  %2776 = vmatprep.mubr.bf16.mxu0 %v3217_v18 }
 0x12b   : > { %2818 = vmatmul.mubr.bf16.vlgmr.msra.gmra.mxu1 %v3202_v6  ;;  %3546 = vmatprep.subr.bf16.mxu0 %v3740_v12 }
 0x12c   : > { %3573 = vmatpush3.bf16.msra.mxu1 %v3739_v11  ;;  %2825 = vmatprep.mubr.bf16.mxu1 %v3219_v24 }
 0x12d   : > { %3574 = vmatprep.subr.bf16.mxu1 %v3741_v13 }
 0x12e   : > { %3547 = vmatpush3.bf16.msra.mxu0 %v3742_v14 }
 0x12f   : > { %3548 = vmatprep.subr.bf16.mxu0 %v3744_v20 }
 0x130   : > { %3575 = vmatpush3.bf16.msra.mxu1 %v3743_v15 }
 0x131   : > { %2777 = vmatmul.mubr.bf16.gmra.mxu0 %v3216_v19  ;;  %3576 = vmatprep.subr.bf16.mxu1 %v3745_v21 }
 0x132   : > { %3549 = vmatpush3.bf16.msra.mxu0 %v3746_v25  ;;  %2866 = vmatprep.mubr.bf16.mxu0 %v3205_v52 }
 0x133   : > { %2826 = vmatmul.mubr.bf16.gmra.mxu1 %v3218_v26  ;;  %3550 = vmatprep.subr.bf16.mxu0 %v3748_v28 }
 0x134   : > { %3577 = vmatpush3.bf16.msra.mxu1 %v3747_v27  ;;  %2915 = vmatprep.mubr.bf16.mxu1 %v3207_v57 }
 0x135   : > { %3578 = vmatprep.subr.bf16.mxu1 %v3749_v29 }
 0x136   : > { %3551 = vmatpush3.bf16.msra.mxu0 %v3750_v30 }
 0x137   : > { %3552 = vmatprep.subr.bf16.mxu0 %v3752_v32 }
 0x138   : > { %3579 = vmatpush3.bf16.msra.mxu1 %v3751_v31 }
 0x139   : > { %3580 = vmatprep.subr.bf16.mxu1 %v3753_v33 }
 0x13a   : > { %3553 = vmatpush3.bf16.msra.mxu0 %v3754_v34 }
 0x13b   : > { %3554 = vmatprep.subr.bf16.mxu0 %v3756_v36 }
 0x13c   : > { %3581 = vmatpush3.bf16.msra.mxu1 %v3755_v35 }
 0x13d   : > { %3582 = vmatprep.subr.bf16.mxu1 %v3757_v37 }
 0x13e   : > { %3555 = vmatpush3.bf16.msra.mxu0 %v3758_v38 }
 0x13f   : > { %3556 = vmatprep.subr.bf16.mxu0 %v3760_v40 }
 0x140   : > { %3583 = vmatpush3.bf16.msra.mxu1 %v3759_v39 }
 0x141   : > { %3584 = vmatprep.subr.bf16.mxu1 %v3761_v41 }
 0x142   : > { %3557 = vmatpush3.bf16.msra.mxu0 %v3762_v42 }
 0x143   : > { %3558 = vmatprep.subr.bf16.mxu0 %v3764_v44 }
 0x144   : > { %3585 = vmatpush3.bf16.msra.mxu1 %v3763_v43 }
 0x145   : > { %3586 = vmatprep.subr.bf16.mxu1 %v3765_v45 }
 0x146   : > { %3559 = vmatpush3.bf16.msra.mxu0 %v3766_v46 }
 0x148   : > { %3587 = vmatpush3.bf16.msra.mxu1 %v3767_v47 }
 0x149   : > { %2867 = vmatmul.mubr.bf16.vlgmr.msra.gmra.mxu0 %v3204_v51 }
 0x14a   : > { %2874 = vmatprep.mubr.bf16.mxu0 %v3221_v58 }
 0x14b   : > { %2916 = vmatmul.mubr.bf16.vlgmr.msra.gmra.mxu1 %v3206_v56 }
 0x14c   : > { %2923 = vmatprep.mubr.bf16.mxu1 %v3223_v61 }
 0x151   : > { %2875 = vmatmul.mubr.bf16.gmra.mxu0 %v3220_v62 }
 0x153   : > { %2924 = vmatmul.mubr.bf16.gmra.mxu1 %v3222_v63 }
 0x1a9   : > { %v3392_v0 = vpop.f32.mrf.mxu0 }
 0x1ab   : > { %v3393_v1 = vpop.f32.mrf.mxu0  ;;  %v3420_v2 = vpop.f32.mrf.mxu1 }
 0x1ac   : > { %v3394_v46 = vadd.f32 %v3393_v1, %v3392_v0 }
 0x1ad   : > { %v3395_v3 = vpop.f32.mrf.mxu0  ;;  %v3421_v4 = vpop.f32.mrf.mxu1 }
 0x1ae   : > { %v3422_v47 = vadd.f32 %v3421_v4, %v3420_v2 }
 0x1af   : > { %v3396_v5 = vpop.f32.mrf.mxu0  ;;  %v3423_v6 = vpop.f32.mrf.mxu1 }
 0x1b0   : > { %v3397_v43 = vadd.f32 %v3396_v5, %v3395_v3  ;;  %v2624_v56 = vadd.f32 %v3422_v47, %v3394_v46 }
 0x1b1   : > { %v3398_v7 = vpop.f32.mrf.mxu0  ;;  %v3424_v8 = vpop.f32.mrf.mxu1 }
 0x1b2   : > { %v3425_v44 = vadd.f32 %v3424_v8, %v3423_v6 }
 0x1b3   : > { %v3399_v9 = vpop.f32.mrf.mxu0  ;;  %v3426_v10 = vpop.f32.mrf.mxu1 }
 0x1b4   : > { %v3400_v49 = vadd.f32 %v3399_v9, %v3398_v7  ;;  %v2627_v52 = vadd.f32 %v3425_v44, %v3397_v43 }
 0x1b5   : > { %v3401_v11 = vpop.f32.mrf.mxu0  ;;  %v3427_v12 = vpop.f32.mrf.mxu1 }
 0x1b6   : > { %v3428_v50 = vadd.f32 %v3427_v12, %v3426_v10 }
 0x1b7   : > { %v3402_v13 = vpop.f32.mrf.mxu0  ;;  %v3429_v14 = vpop.f32.mrf.mxu1 }
 0x1b8   : > { %v2632_v58 = vadd.f32 %v3428_v50, %v3400_v49  ;;  %v3403_v59 = vadd.f32 %v3402_v13, %v3401_v11 }
 0x1b9   : > { %v3430_v16 = vpop.f32.mrf.mxu1 }
 0x1ba   : > { %v3431_v60 = vadd.f32 %v3430_v16, %v3429_v14 }
 0x1bc   : > { %v2635_v10 = vadd.f32 %v3431_v60, %v3403_v59 }
 0x1c9   : > { %v3448_v15 = vpop.f32.mrf.mxu0 }
 0x1cb   : > { %v3449_v17 = vpop.f32.mrf.mxu0  ;;  %v3476_v18 = vpop.f32.mrf.mxu1 }
 0x1cc   : > { %v3450_v53 = vadd.f32 %v3449_v17, %v3448_v15 }
 0x1cd   : > { %v3451_v19 = vpop.f32.mrf.mxu0  ;;  %v3477_v20 = vpop.f32.mrf.mxu1 }
 0x1ce   : > { %v2673_v62 = vadd.f32 %v3450_v53, %v2624_v56  ;;  %v3478_v63 = vadd.f32 %v3477_v20, %v3476_v18 }
 0x1cf   : > { %v3452_v21 = vpop.f32.mrf.mxu0  ;;  %v3479_v22 = vpop.f32.mrf.mxu1 }
 0x1d0   : > { %v3453_v48 = vadd.f32 %v3452_v21, %v3451_v19  ;;  %v2722_v17 = vadd.f32 %v3478_v63, %v2673_v62 }
 0x1d1   : > { %v3454_v23 = vpop.f32.mrf.mxu0  ;;  %v3480_v24 = vpop.f32.mrf.mxu1 }
 0x1d2   : > { %v2676_v57 = vadd.f32 %v3453_v48, %v2627_v52  ;;  %v3481_v3 = vadd.f32 %v3480_v24, %v3479_v22 }
 0x1d3   : > { %v3482_v25 = vpop.f32.mrf.mxu1  ;;  %v3455_v26 = vpop.f32.mrf.mxu0 }
 0x1d4   : > { %v3456_v55 = vadd.f32 %v3455_v26, %v3454_v23  ;;  %v2725_v7 = vadd.f32 %v3481_v3, %v2676_v57 }
 0x1d5   : > { %v3483_v27 = vpop.f32.mrf.mxu1  ;;  %v3457_v28 = vpop.f32.mrf.mxu0 }
 0x1d6   : > { %v2681_v1 = vadd.f32 %v3456_v55, %v2632_v58  ;;  %v3484_v2 = vadd.f32 %v3483_v27, %v3482_v25 }
 0x1d7   : > { %v3485_v29 = vpop.f32.mrf.mxu1  ;;  %v3458_v30 = vpop.f32.mrf.mxu0 }
 0x1d8   : > { %v3459_v4 = vadd.f32 %v3458_v30, %v3457_v28  ;;  %v2730_v13 = vadd.f32 %v3484_v2, %v2681_v1 }
 0x1d9   : > { %v3486_v32 = vpop.f32.mrf.mxu1 }
 0x1da   : > { %v2684_v14 = vadd.f32 %v3459_v4, %v2635_v10  ;;  %v3487_v16 = vadd.f32 %v3486_v32, %v3485_v29 }
 0x1e9   : > { %v3504_v31 = vpop.f32.mrf.mxu0 }
 0x1eb   : > { %v3532_v33 = vpop.f32.mrf.mxu1  ;;  %v3505_v34 = vpop.f32.mrf.mxu0 }
 0x1ec   : > { %v3506_v8 = vadd.f32 %v3505_v34, %v3504_v31 }
 0x1ed   : > { %v3533_v35 = vpop.f32.mrf.mxu1  ;;  %v3507_v36 = vpop.f32.mrf.mxu0 }
 0x1ee   : > { %v2771_v20 = vadd.f32 %v3506_v8, %v2722_v17  ;;  %v3534_v21 = vadd.f32 %v3533_v35, %v3532_v33 }
 0x1ef   : > { %v3535_v37 = vpop.f32.mrf.mxu1  ;;  %v3508_v38 = vpop.f32.mrf.mxu0 }
 0x1f0   : > { %v3509_v5 = vadd.f32 %v3508_v38, %v3507_v36  ;;  %v2733_v36 = vadd.f32 %v3487_v16, %v2684_v14 }
 0x1f1   : > { %v3536_v39 = vpop.f32.mrf.mxu1  ;;  %v3510_v40 = vpop.f32.mrf.mxu0 }
 0x1f2   : > { %v2774_v19 = vadd.f32 %v3509_v5, %v2725_v7  ;;  %v3537_v22 = vadd.f32 %v3536_v39, %v3535_v37 }
 0x1f3   : > { %v3538_v41 = vpop.f32.mrf.mxu1  ;;  %v3511_v42 = vpop.f32.mrf.mxu0 }
 0x1f4   : > { %v3512_v12 = vadd.f32 %v3511_v42, %v3510_v40  ;;  %v2823_v28 = vadd.f32 %v3537_v22, %v2774_v19  ;;  %v2820_v40 = vadd.f32 %v3534_v21, %v2771_v20 }
 0x1f5   : > { %v3539_v45 = vpop.f32.mrf.mxu1  ;;  %v3513_v51 = vpop.f32.mrf.mxu0 }
 0x1f6   : > { %v2779_v24 = vadd.f32 %v3512_v12, %v2730_v13  ;;  %v3540_v25 = vadd.f32 %v3539_v45, %v3538_v41 }
 0x1f7   : > { %v3541_v54 = vpop.f32.mrf.mxu1  ;;  %v3514_v61 = vpop.f32.mrf.mxu0 }
 0x1f8   : > { %v3515_v26 = vadd.f32 %v3514_v61, %v3513_v51  ;;  %v2828_v44 = vadd.f32 %v3540_v25, %v2779_v24  ;;  %v2965_v25 = vlaneseq }
 0x1f9   : > { %v3542_v0 = vpop.f32.mrf.mxu1 }
 0x1fa   : > { %v2782_v29 = vadd.f32 %v3515_v26, %v2733_v36  ;;  %v3543_v46 = vadd.f32 %v3542_v0, %v3541_v54  ;;  %v2966_v26 = vshrl.u32 %v2965_v25, 7  ;;  %v3352_v36 = vld [vmem:[%s1321_s14] ss:$0 sm:$0xff] }
 0x1fc   : > { %v2831_v52 = vadd.f32 %v3543_v46, %v2782_v29 }
 0x209   : > { %v3560_v6 = vpop.f32.mrf.mxu0 }
 0x20b   : > { %v3588_v9 = vpop.f32.mrf.mxu1  ;;  %v3561_v15 = vpop.f32.mrf.mxu0 }
 0x20c   : > { %v3562_v30 = vadd.f32 %v3561_v15, %v3560_v6 }
 0x20d   : > { %v3589_v11 = vpop.f32.mrf.mxu1  ;;  %v3563_v18 = vpop.f32.mrf.mxu0 }
 0x20e   : > { %v2869_v33 = vadd.f32 %v3562_v30, %v2820_v40  ;;  %v3590_v45 = vadd.f32 %v3589_v11, %v3588_v9 }
 0x20f   : > { %v3591_v23 = vpop.f32.mrf.mxu1  ;;  %v3564_v27 = vpop.f32.mrf.mxu0 }
 0x210   : > { %v3565_v31 = vadd.f32 %v3564_v27, %v3563_v18  ;;  %v2918_v53 = vadd.f32 %v3590_v45, %v2869_v33  ;;  %v2960_v27 = vld [vmem:[%s1318_s11] sm:$0x1] }
 0x211   : > { %v3592_v34 = vpop.f32.mrf.mxu1  ;;  %v3566_v38 = vpop.f32.mrf.mxu0 }
 0x212   : > { %v2872_v42 = vadd.f32 %v3565_v31, %v2823_v28  ;;  %v3593_v35 = vadd.f32 %v3592_v34, %v3591_v23  ;;  %v2967_v28 = vsub.s32 0, %v2966_v26 }
 0x213   : > { %v3594_v43 = vpop.f32.mrf.mxu1  ;;  %v3567_v32 = vpop.f32.mrf.mxu0 }
 0x214   : > { %v3568_v37 = vadd.f32 %v3567_v32, %v3566_v38  ;;  %v2921_v47 = vadd.f32 %v3593_v35, %v2872_v42 }
 0x215   : > { %v3595_v39 = vpop.f32.mrf.mxu1  ;;  %v3569_v41 = vpop.f32.mrf.mxu0 }
 0x216   : > { %v2877_v48 = vadd.f32 %v3568_v37, %v2828_v44  ;;  %v3596_v49 = vadd.f32 %v3595_v39, %v3594_v43  ;;  %v2932_v58 = vadd.f32 %v2921_v47, %v2918_v53 }
 0x217   : > { %v3597_v50 = vpop.f32.mrf.mxu1  ;;  %v3570_v51 = vpop.f32.mrf.mxu0 }
 0x218   : > { %v2926_v55 = vadd.f32 %v3596_v49, %v2877_v48  ;;  %v3571_v56 = vadd.f32 %v3570_v51, %v3569_v41 }
 0x219   : > { %v3598_v57 = vpop.f32.mrf.mxu1 }
 0x21a   : > { %v2880_v59 = vadd.f32 %v3571_v56, %v2831_v52  ;;  %v3599_v60 = vadd.f32 %v3598_v57, %v3597_v50  ;;  %v2933_v54 = vadd.f32 %v2932_v58, %v2926_v55 }
 0x21c   : > { %v2929_v61 = vadd.f32 %v3599_v60, %v2880_v59 }
 0x21e   : > { %v2934_v62 = vadd.f32 %v2933_v54, %v2929_v61 }
 0x220   : > { %v2935_v63 = vrot.slane %v2934_v62, 4 }
 0x222   : > { %v2936_v3 = vadd.f32 %v2935_v63, %v2934_v62 }
 0x224   : > { %v2937_v5 = vrot.slane %v2936_v3, 2 }
 0x226   : > { %v2938_v0 = vadd.f32 %v2937_v5, %v2936_v3 }
 0x228   : > { %v2939_v1 = vrot.slane %v2938_v0, 1 }
 0x22a   : > { %v2940_v2 = vadd.f32 %v2939_v1, %v2938_v0 }
 0x22c   : > { %v2941_v4 = vmul.f32 0.03125, %v2940_v2 }
 0x22e   : > { %v2942_v6 = vsub.f32 %v2918_v53, %v2941_v4  ;;  %v2943_v7 = vsub.f32 %v2921_v47, %v2941_v4  ;;  %v2944_v8 = vsub.f32 %v2926_v55, %v2941_v4  ;;  %v2945_v9 = vsub.f32 %v2929_v61, %v2941_v4 }
 0x230   : > { %v2946_v10 = vmul.f32 %v2942_v6, %v2942_v6  ;;  %v2947_v12 = vmul.f32 %v2943_v7, %v2943_v7  ;;  %v2948_v15 = vmul.f32 %v2944_v8, %v2944_v8  ;;  %v2949_v19 = vmul.f32 %v2945_v9, %v2945_v9 }
 0x232   : > { %v2950_v17 = vadd.f32 %v2947_v12, %v2946_v10 }
 0x234   : > { %v2951_v11 = vadd.f32 %v2950_v17, %v2948_v15 }
 0x236   : > { %v2952_v13 = vadd.f32 %v2951_v11, %v2949_v19 }
 0x238   : > { %v2953_v14 = vrot.slane %v2952_v13, 4 }
 0x23a   : > { %v2954_v16 = vadd.f32 %v2953_v14, %v2952_v13 }
 0x23c   : > { %v2955_v18 = vrot.slane %v2954_v16, 2 }
 0x23e   : > { %v2956_v20 = vadd.f32 %v2955_v18, %v2954_v16 }
 0x240   : > { %v2957_v21 = vrot.slane %v2956_v20, 1 }
 0x242   : > { %v2958_v22 = vadd.f32 %v2957_v21, %v2956_v20 }
 0x244   : > { %v2959_v23 = vmul.f32 0.03125, %v2958_v22 }
 0x246   : > { %v2961_v24 = vadd.f32 1e-05, %v2959_v23 }
 0x248   : > { %3768 = vrsqrt.f32 %v2961_v24 }
 0x255   : > { %v3769_v30 = vpop.eup %3768 }
 0x256   : > { %v2963_v31 = vmul.f32 %v3769_v30, %v2960_v27 }
 0x258   : > { %v2968_v34 = vrot.slane %v2963_v31, %v2967_v28 }
 0x25a   : > { %v2970_v38 = vmul.f32 %v2968_v34, %v2942_v6  ;;  %v2971_v40 = vmul.f32 %v2968_v34, %v2943_v7  ;;  %v2972_v42 = vmul.f32 %v2968_v34, %v2944_v8  ;;  %v2973_v43 = vmul.f32 %v2968_v34, %v2945_v9 }
 0x25c   : > { %v2981_v44 = vadd.f32 %v3352_v36, %v2970_v38  ;;  %v2982_v29 = vadd.f32 %v3352_v36, %v2971_v40  ;;  %v2983_v32 = vadd.f32 %v3352_v36, %v2972_v42  ;;  %v2984_v46 = vadd.f32 %v3352_v36, %v2973_v43 }
 0x25e   : > { %vm2985_vm0 = vcmp.ge.f32.partialorder %v2981_v44, 0.0  ;;  %vm2986_vm1 = vcmp.ge.f32.partialorder %v2982_v29, 0.0  ;;  %vm2987_vm2 = vcmp.ge.f32.partialorder %v2983_v32, 0.0  ;;  %vm2988_vm3 = vcmp.ge.f32.partialorder %v2984_v46, 0.0 }
 0x25f   : > { %v2989_v33 = vmul.f32 0.2, %v2981_v44  ;;  %v2990_v35 = vmul.f32 0.2, %v2982_v29  ;;  %v2991_v37 = vmul.f32 0.2, %v2983_v32 }
 0x260   : > { %v2992_v39 = vmul.f32 0.2, %v2984_v46 }
 0x261   : > { %v2993_v41 = vsel %vm2985_vm0, %v2981_v44, %v2989_v33  ;;  %v2994_v45 = vsel %vm2986_vm1, %v2982_v29, %v2990_v35  ;;  %v2995_v47 = vsel %vm2987_vm2, %v2983_v32, %v2991_v37  ;;  %3023 = sbr.rel (!%p3870_p6) target bundleno = 623 (0x26f), region = 81 }
 0x262   : > { %v2996_v48 = vsel %vm2988_vm3, %v2984_v46, %v2992_v39  ;;  %v3368_v49 = vpack.c.bf16 %v2994_v45, %v2993_v41 }
 0x263   : > { %v3373_v50 = vpack.c.bf16 %v2996_v48, %v2995_v47 }
 0x264   : > { %3369 = vst [vmem:[%s1308_s22] sm:$0xff] %v3368_v49  }
 0x265   : > { %3375 = vst [vmem:[%s1308_s22 + $0x8] sm:$0xff] %v3373_v50  }
 0x26b   : > { %v3045_v51 = vld [vmem:[%s1308_s22] sm:$0xf]  ;;  %v3047_v52 = vld [vmem:[%s1308_s22 + $0x4] sm:$0xf] }
 0x26c   : > { %v3049_v53 = vld [vmem:[%s1308_s22 + $0x8] sm:$0xf]  ;;  %v3051_v55 = vld [vmem:[%s1308_s22 + $0xc] sm:$0xf]  ;;  %3046 = vst [vmem:[%s3028_s26] sm:$0xf] %v3045_v51 }
 0x26d   : > { %3048 = vst [vmem:[%s3028_s26 + $0x8] sm:$0xf] %v3047_v52  ;;  %3050 = vst [vmem:[%s3028_s26 + $0x10] sm:$0xf] %v3049_v53 }
 0x26e   : > { %3052 = vst [vmem:[%s3028_s26 + $0x18] sm:$0xf] %v3051_v55 }
 0x26f PF: > { %s14_s19 = sadd.s32 1, %s3808_s19   ;;  %s4683_s15 = smov %s3796_s16 }
 0x270   : > { %p11_p12 = scmp.ge.s32.totalorder %s14_s19, 4   ;;  %s4684_s16 = smov %s3875_s25 }
 0x271   : > { %s4685_s17 = smov %s3804_s18  ;;  %s4686_s18 = smov %s4688_s20 }
 0x272   :  { %13 = sbr.rel (!%p11_p12) target bundleno = 3 (0x3), region = 162 }

// kernel: discriminator_forward.9
= control target key start
LH: loop header
LB: loop body
LE: loop exit
PB: predicated region body
PF: predicated region fallthrough
CT: control target
= control target key end

     0   :  { %v147_v0 = vlaneseq  ;;  %vm852_vm0 = vcmask 7168   ;;  %s1552_s1 = inlined_call_operand.vmem [shape: bf16[1,8192], index: 1, kind: input, shape index: {}]   ;;  %s1553_s0 = inlined_call_operand.vmem [shape: bf16[8,8192], index: 0, kind: input, shape index: {}]   ;;  %s1554_s2 = inlined_call_operand.vmem [shape: f32[8,1], index: 2, kind: output, shape index: {}]  }
   0x1   :  { %v112_v1 = vld [vmem:[%s1552_s1 + $0x28] sm:$0xff]  ;;  %v113_v2 = vld [vmem:[%s1552_s1 + $0x30] sm:$0xff]  ;;  %v114_v4 = vld [vmem:[%s1552_s1 + $0x38] sm:$0xff] }
   0x2   :  { %v148_v3 = vshrl.u32 %v147_v0, 7  ;;  %v882_v5 = vunpack.c.l.bf16 %v112_v1  ;;  %v884_v6 = vunpack.c.h.bf16 %v112_v1  ;;  %v886_v7 = vunpack.c.l.bf16 %v113_v2  ;;  %v937_v31 = vld [vmem:[%s1553_s0] sm:$0xff]  ;;  %v942_v32 = vld [vmem:[%s1553_s0 + $0x8] sm:$0xff]  ;;  %v955_v37 = vld [vmem:[%s1553_s0 + $0x10] sm:$0xff] }
   0x3   :  { %v896_v12 = vunpack.c.h.bf16 %v113_v2  ;;  %v898_v13 = vunpack.c.l.bf16 %v114_v4  ;;  %v900_v14 = vunpack.c.h.bf16 %v114_v4  ;;  %1572 = vst [vmem:[#allocation6_spill] sm:$0xff] %v955_v37  ;;  %v960_v38 = vld [vmem:[%s1553_s0 + $0x88] sm:$0xff]  ;;  %v111_v39 = vld [vmem:[%s1552_s1 + $0x20] sm:$0xff]  ;;  %v976_v44 = vld [vmem:[%s1553_s0 + $0x90] sm:$0xff] }
   0x4   :  { %v888_v8 = vsub.s32 0, %v148_v3  ;;  %v890_v9 = vsub.s32 2, %v148_v3  ;;  %v892_v10 = vsub.s32 4, %v148_v3  ;;  %v894_v11 = vsub.s32 6, %v148_v3  ;;  %v981_v45 = vld [vmem:[%s1553_s0 + $0x98] sm:$0xff]  ;;  %v107_v53 = vld [vmem:[%s1552_s1] sm:$0xff] }
   0x5   :  { %v993_v54 = vunpack.c.l.bf16 %v111_v39  ;;  %v998_v55 = vld [vmem:[%s1553_s0 + $0xa0] sm:$0xff]  ;;  %v1003_v56 = vld [vmem:[%s1553_s0 + $0xa8] sm:$0xff]  ;;  %v1008_v60 = vunpack.c.h.bf16 %v111_v39  ;;  %v1013_v61 = vld [vmem:[%s1553_s0 + $0xb0] sm:$0xff]  ;;  %v1027_v3 = vunpack.c.l.bf16 %v107_v53  ;;  %v1043_v47 = vunpack.c.h.bf16 %v107_v53 }
   0x6   :  { %1568 = vst [vmem:[#allocation2_spill] sm:$0xff] %v888_v8  ;;  %1569 = vst [vmem:[#allocation3_spill] sm:$0xff] %v890_v9  ;;  %v310_v15 = vrot.slane %v882_v5, %v888_v8  ;;  %v314_v16 = vrot.slane %v882_v5, %v890_v9  ;;  %v318_v17 = vrot.slane %v882_v5, %v892_v10  ;;  %v1018_v62 = vld [vmem:[%s1553_s0 + $0xb8] sm:$0xff]  ;;  %v41_v49 = vld [vmem:[%s1553_s0 + $0xf0] sm:$0xff] }
   0x7   :  { %1570 = vst [vmem:[#allocation4_spill] sm:$0xff] %v892_v10  ;;  %1571 = vst [vmem:[#allocation5_spill] sm:$0xff] %v894_v11  ;;  %v322_v18 = vrot.slane %v882_v5, %v894_v11  ;;  %v326_v19 = vrot.slane %v884_v6, %v888_v8  ;;  %v330_v20 = vrot.slane %v884_v6, %v890_v9 }
   0x8   :  { %v334_v21 = vrot.slane %v884_v6, %v892_v10  ;;  %v338_v22 = vrot.slane %v884_v6, %v894_v11  ;;  %v342_v23 = vrot.slane %v886_v7, %v888_v8  ;;  %v346_v24 = vrot.slane %v886_v7, %v890_v9  ;;  %1573 = vst [vmem:[#allocation7_spill] sm:$0xff] %v993_v54 }
   0x9   :  { %v350_v25 = vrot.slane %v886_v7, %v892_v10  ;;  %v354_v26 = vrot.slane %v886_v7, %v894_v11  ;;  %v358_v27 = vrot.slane %v896_v12, %v888_v8  ;;  %v362_v28 = vrot.slane %v896_v12, %v890_v9 }
   0xa   :  { %v366_v29 = vrot.slane %v896_v12, %v892_v10  ;;  %v370_v30 = vrot.slane %v896_v12, %v894_v11  ;;  %v374_v33 = vrot.slane %v898_v13, %v888_v8  ;;  %v378_v34 = vrot.slane %v898_v13, %v890_v9 }
   0xb   :  { %v382_v35 = vrot.slane %v898_v13, %v892_v10  ;;  %v386_v36 = vrot.slane %v898_v13, %v894_v11  ;;  %v390_v40 = vrot.slane %v900_v14, %v888_v8  ;;  %v394_v41 = vrot.slane %v900_v14, %v890_v9 }
   0xc   :  { %v398_v42 = vrot.slane %v900_v14, %v892_v10  ;;  %v402_v43 = vrot.slane %v900_v14, %v894_v11  ;;  %v282_v0 = vrot.slane %v993_v54, %v890_v9  ;;  %v286_v1 = vrot.slane %v993_v54, %v892_v10  ;;  %v40_v14 = vld [vmem:[%s1553_s0 + $0xe8] sm:$0xff] }
   0xd   :  { %v290_v2 = vrot.slane %v993_v54, %v894_v11  ;;  %v298_v4 = vrot.slane %v1008_v60, %v890_v9  ;;  %v302_v39 = vrot.slane %v1008_v60, %v892_v10  ;;  %v306_v51 = vrot.slane %v1008_v60, %v894_v11 }
   0xe   :  { %v1046_v46 = vrot.slane %v282_v0, %v888_v8  ;;  %v1049_v50 = vrot.slane %v286_v1, %v888_v8  ;;  %v150_v58 = vrot.slane %v1027_v3, %v888_v8  ;;  %v1069_v0 = vrot.slane %v310_v15, %v888_v8 }
   0xf   :  { %v1052_v63 = vrot.slane %v290_v2, %v888_v8  ;;  %v1057_v57 = vrot.slane %v298_v4, %v888_v8  ;;  %v1060_v52 = vrot.slane %v302_v39, %v888_v8  ;;  %v1063_v53 = vrot.slane %v306_v51, %v888_v8 }
  0x10   :  { %1574 = vst [vmem:[#allocation8_spill] sm:$0xff] %v1046_v46  ;;  %v1075_v1 = vrot.slane %v314_v16, %v888_v8  ;;  %v1081_v2 = vrot.slane %v318_v17, %v888_v8  ;;  %v1087_v51 = vrot.slane %v322_v18, %v888_v8  ;;  %v1093_v15 = vrot.slane %v326_v19, %v888_v8 }
  0x11   :  { %v1099_v16 = vrot.slane %v330_v20, %v888_v8  ;;  %v1105_v17 = vrot.slane %v334_v21, %v888_v8  ;;  %v1111_v5 = vrot.slane %v338_v22, %v888_v8  ;;  %v1117_v18 = vrot.slane %v342_v23, %v888_v8  ;;  %v1140_v21 = vld [vmem:[%s1553_s0 + $0xc0] sm:$0xff] }
  0x12   :  { %v1123_v19 = vrot.slane %v346_v24, %v888_v8  ;;  %v1129_v20 = vrot.slane %v350_v25, %v888_v8  ;;  %v1135_v6 = vrot.slane %v354_v26, %v888_v8  ;;  %v1146_v22 = vrot.slane %v358_v27, %v888_v8  ;;  %v1169_v25 = vld [vmem:[%s1553_s0 + $0xc8] sm:$0xff] }
  0x13   :  { %v1152_v23 = vrot.slane %v362_v28, %v888_v8  ;;  %v1158_v7 = vrot.slane %v366_v29, %v888_v8  ;;  %v1164_v24 = vrot.slane %v370_v30, %v888_v8  ;;  %v1175_v26 = vrot.slane %v374_v33, %v888_v8  ;;  %v1198_v29 = vld [vmem:[%s1553_s0 + $0xd0] sm:$0xff]  ;;  %v1203_v30 = vld [vmem:[%s1553_s0 + $0xd8] sm:$0xff] }
  0x14   :  { %1575 = vst [vmem:[#allocation9_spill] sm:$0xff] %v1146_v22  ;;  %v1181_v27 = vrot.slane %v378_v34, %v888_v8  ;;  %v1187_v12 = vrot.slane %v382_v35, %v888_v8  ;;  %v1193_v28 = vrot.slane %v386_v36, %v888_v8  ;;  %v1209_v33 = vrot.slane %v390_v40, %v888_v8  ;;  %v1232_v36 = vld [vmem:[%s1553_s0 + $0xe0] sm:$0xff] }
  0x15   :  { %1576 = vst [vmem:[#allocation10_spill] sm:$0xff] %v1152_v23  ;;  %1577 = vst [vmem:[#allocation11_spill] sm:$0xff] %v1158_v7  ;;  %v1215_v13 = vrot.slane %v394_v41, %v888_v8  ;;  %v1221_v34 = vrot.slane %v398_v42, %v888_v8  ;;  %v1227_v35 = vrot.slane %v402_v43, %v888_v8  ;;  %v90_v40 = vunpack.c.h.bf16 %v1018_v62 }
  0x16   :  { %1578 = vst [vmem:[#allocation12_spill] sm:$0xff] %v1164_v24  ;;  %1579 = vst [vmem:[#allocation13_spill] sm:$0xff] %v1175_v26  ;;  %v91_v41 = vunpack.c.l.bf16 %v1140_v21  ;;  %v154_v4 = vrot.slane %v1027_v3, %v890_v9  ;;  %v158_v42 = vrot.slane %v1027_v3, %v892_v10  ;;  %v92_v43 = vunpack.c.h.bf16 %v1140_v21  ;;  %v42_v21 = vld [vmem:[%s1553_s0 + $0xf8] sm:$0xff] }
  0x17   :  { %1580 = vst [vmem:[#allocation14_spill] sm:$0xff] %v1181_v27  ;;  %1581 = vst [vmem:[#allocation15_spill] sm:$0xff] %v1187_v12  ;;  %v93_v39 = vunpack.c.l.bf16 %v1169_v25  ;;  %v94_v48 = vunpack.c.h.bf16 %v1169_v25  ;;  %v294_v59 = vrot.slane %v1008_v60, %v888_v8  ;;  %v95_v46 = vunpack.c.l.bf16 %v1198_v29  ;;  %v1262_v60 = vld [vmem:[%s1552_s1 + $0x8] sm:$0xff] }
  0x18   :  { %1582 = vst [vmem:[#allocation16_spill] sm:$0xff] %v1193_v28  ;;  %1583 = vst [vmem:[#allocation17_spill] sm:$0xff] %v1209_v33  ;;  %v96_v54 = vunpack.c.h.bf16 %v1198_v29  ;;  %v97_v37 = vunpack.c.l.bf16 %v1203_v30  ;;  %v99_v25 = vunpack.c.l.bf16 %v1232_v36  ;;  %v166_v29 = vrot.slane %v1043_v47, %v888_v8 }
  0x19   :  { %1584 = vst [vmem:[#allocation18_spill] sm:$0xff] %v1215_v13  ;;  %1585 = vst [vmem:[#allocation19_spill] sm:$0xff] %v1221_v34  ;;  %v162_v34 = vrot.slane %v1027_v3, %v894_v11  ;;  %v470_v13 = vrot.slane %v150_v58, %v888_v8  ;;  %v101_v33 = vunpack.c.l.bf16 %v40_v14  ;;  %v474_v28 = vrot.slane %v154_v4, %v888_v8 }
  0x1a   :  { %1586 = vst [vmem:[#allocation20_spill] sm:$0xff] %v1227_v35  ;;  %v98_v35 = vunpack.c.h.bf16 %v1203_v30  ;;  %1587 = vst [vmem:[#allocation21_spill] sm:$0xff] %v1262_v60  ;;  %v100_v30 = vunpack.c.h.bf16 %v1232_v36  ;;  %v478_v12 = vrot.slane %v158_v42, %v888_v8  ;;  %v102_v27 = vunpack.c.h.bf16 %v40_v14 }
  0x1b   :  { %v103_v26 = vunpack.c.l.bf16 %v41_v49  ;;  %v104_v24 = vunpack.c.h.bf16 %v41_v49  ;;  %v614_v7 = vrot.slane %v294_v59, %v888_v8  ;;  %v105_v23 = vunpack.c.l.bf16 %v42_v21 }
  0x1c   :  { %v106_v22 = vunpack.c.h.bf16 %v42_v21  ;;  %v1274_v3 = vunpack.c.l.bf16 %v1262_v60  ;;  %v170_v58 = vrot.slane %v1043_v47, %v890_v9  ;;  %v174_v36 = vrot.slane %v1043_v47, %v892_v10 }
  0x1d   :  { %v482_v4 = vrot.slane %v162_v34, %v888_v8  ;;  %v486_v42 = vrot.slane %v166_v29, %v888_v8  ;;  %v1589_v14 = vunpack.c.l.bf16 %v937_v31  ;;  %v1590_v59 = vunpack.c.h.bf16 %v937_v31 }
  0x1e   :  { %1588 = vst [vmem:[#allocation22_spill] sm:$0xff] %v1274_v3  ;;  %v1591_v21 = vunpack.c.l.bf16 %v942_v32  ;;  %v1592_v3 = vunpack.c.l.bf16 %v960_v38  ;;  %v1593_v10 = vunpack.c.h.bf16 %v960_v38  ;;  %v1594_v29 = vunpack.c.l.bf16 %v976_v44 }
  0x1f   :  { %v723_v49 = vmul.f32 %v470_v13, %v1589_v14  ;;  %v724_v11 = vmul.f32 %v474_v28, %v1590_v59  ;;  %v1595_v31 = vunpack.c.h.bf16 %v976_v44  ;;  %v1599_v44 = vunpack.c.h.bf16 %v998_v55 }
  0x20   :  { %v725_v60 = vmul.f32 %v478_v12, %v1591_v21  ;;  %v1291_v9 = vmul.f32 %v1049_v50, %v1592_v3  ;;  %v1296_v34 = vmul.f32 %v1052_v63, %v1593_v10  ;;  %v1300_v8 = vmul.f32 %v614_v7, %v1594_v29 }
  0x21   :  { %v1305_v28 = vmul.f32 %v1057_v57, %v1595_v31  ;;  %v1596_v12 = vunpack.c.l.bf16 %v981_v45  ;;  %v1597_v50 = vunpack.c.h.bf16 %v981_v45  ;;  %v1598_v10 = vunpack.c.l.bf16 %v998_v55 }
  0x22   :  { %v1325_v57 = vmul.f32 %v1075_v1, %v1599_v44  ;;  %v1600_v7 = vunpack.c.l.bf16 %v1003_v56  ;;  %v1601_v45 = vunpack.c.h.bf16 %v1003_v56  ;;  %v1602_v3 = vunpack.c.l.bf16 %v1013_v61 }
  0x23   :  { %v1310_v13 = vmul.f32 %v1060_v52, %v1596_v12  ;;  %v1315_v38 = vmul.f32 %v1063_v53, %v1597_v50  ;;  %v1320_v63 = vmul.f32 %v1069_v0, %v1598_v10  ;;  %v1603_v55 = vunpack.c.h.bf16 %v1013_v61  ;;  %v1615_v50 = vld [vmem:[#allocation19_spill] sm:$0xff] }
  0x24   :  { %v1330_v52 = vmul.f32 %v1081_v2, %v1600_v7  ;;  %v1335_v53 = vmul.f32 %v1087_v51, %v1601_v45  ;;  %v1340_v0 = vmul.f32 %v1093_v15, %v1602_v3  ;;  %v1604_v14 = vunpack.c.l.bf16 %v1018_v62 }
  0x25   :  { %v1345_v1 = vmul.f32 %v1099_v16, %v1603_v55  ;;  %v1353_v56 = vmul.f32 %v1111_v5, %v90_v40  ;;  %v1356_v51 = vmul.f32 %v1117_v18, %v91_v41  ;;  %v1359_v59 = vmul.f32 %v1123_v19, %v92_v43  ;;  %v1605_v16 = vld [vmem:[#allocation9_spill] sm:$0xff]  ;;  %v1607_v5 = vld [vmem:[#allocation11_spill] sm:$0xff]  ;;  %v1608_v18 = vld [vmem:[#allocation12_spill] sm:$0xff] }
  0x26   :  { %v1350_v2 = vmul.f32 %v1105_v17, %v1604_v14  ;;  %v1362_v15 = vmul.f32 %v1129_v20, %v93_v39  ;;  %v1365_v61 = vmul.f32 %v1135_v6, %v94_v48  ;;  %v1368_v62 = vmul.f32 %v1605_v16, %v95_v46  ;;  %v1606_v17 = vld [vmem:[#allocation10_spill] sm:$0xff]  ;;  %v14_v19 = vld [vmem:[%s1553_s0 + $0x18] sm:$0xff]  ;;  %v1611_v46 = vld [vmem:[#allocation15_spill] sm:$0xff] }
  0x27   :  { %v1371_v21 = vmul.f32 %v1606_v17, %v96_v54  ;;  %v1374_v40 = vmul.f32 %v1607_v5, %v97_v37  ;;  %v1377_v41 = vmul.f32 %v1608_v18, %v98_v35  ;;  %v1609_v20 = vld [vmem:[#allocation13_spill] sm:$0xff]  ;;  %v1610_v48 = vld [vmem:[#allocation14_spill] sm:$0xff]  ;;  %v1389_v39 = vmul.f32 %v1611_v46, %v101_v33  ;;  %v1612_v54 = vld [vmem:[#allocation16_spill] sm:$0xff] }
  0x28   :  { %v1383_v43 = vmul.f32 %v1609_v20, %v99_v25  ;;  %v1386_v6 = vmul.f32 %v1610_v48, %v100_v30  ;;  %v1392_v29 = vmul.f32 %v1612_v54, %v102_v27  ;;  %v1613_v37 = vld [vmem:[#allocation17_spill] sm:$0xff]  ;;  %v1614_v35 = vld [vmem:[#allocation18_spill] sm:$0xff]  ;;  %v1401_v10 = vmul.f32 %v1615_v50, %v105_v23  ;;  %v1616_v25 = vld [vmem:[#allocation20_spill] sm:$0xff] }
  0x29   :  { %v1395_v31 = vmul.f32 %v1613_v37, %v103_v26  ;;  %v1398_v12 = vmul.f32 %v1614_v35, %v104_v24  ;;  %v1404_v44 = vmul.f32 %v1616_v25, %v106_v22  ;;  %v1617_v30 = vld [vmem:[#allocation5_spill] sm:$0xff]  ;;  %v1618_v33 = vld [vmem:[#allocation2_spill] sm:$0xff]  ;;  %v1619_v27 = vunpack.c.h.bf16 %v942_v32  ;;  %v1626_v37 = vld [vmem:[#allocation4_spill] sm:$0xff] }
  0x2a   :  { %v178_v7 = vrot.slane %v1043_v47, %v1617_v30  ;;  %v490_v45 = vrot.slane %v170_v58, %v1618_v33  ;;  %v787_v55 = vadd.f32 %v724_v11, %v723_v49  ;;  %v49_v26 = vunpack.c.l.bf16 %v14_v19  ;;  %v15_v24 = vld [vmem:[%s1553_s0 + $0x20] sm:$0xff]  ;;  %v1623_v58 = vld [vmem:[#allocation3_spill] sm:$0xff]  ;;  %v1625_v46 = vld [vmem:[#allocation21_spill] sm:$0xff] }
  0x2b   :  { %v726_v3 = vmul.f32 %v482_v4, %v1619_v27  ;;  %v1620_v23 = vld [vmem:[#allocation22_spill] sm:$0xff]  ;;  %v494_v22 = vrot.slane %v174_v36, %v1618_v33  ;;  %v50_v18 = vunpack.c.h.bf16 %v14_v19  ;;  %v51_v48 = vunpack.c.l.bf16 %v15_v24  ;;  %v16_v36 = vld [vmem:[%s1553_s0 + $0x28] sm:$0xff] }
  0x2c   :  { %v182_v14 = vrot.slane %v1620_v23, %v1618_v33  ;;  %v1621_v16 = vld [vmem:[#allocation6_spill] sm:$0xff]  ;;  %v788_v47 = vadd.f32 %v787_v55, %v725_v60  ;;  %v186_v32 = vrot.slane %v1620_v23, %v1623_v58  ;;  %v498_v11 = vrot.slane %v178_v7, %v1618_v33  ;;  %v17_v55 = vld [vmem:[%s1553_s0 + $0x30] sm:$0xff] }
  0x2d   :  { %v1622_v17 = vunpack.c.l.bf16 %v1621_v16  ;;  %v1624_v4 = vunpack.c.h.bf16 %v1621_v16  ;;  %v118_v54 = vunpack.c.h.bf16 %v1625_v46  ;;  %v190_v60 = vrot.slane %v1620_v23, %v1626_v37  ;;  %v109_v16 = vld [vmem:[%s1552_s1 + $0x10] sm:$0xff] }
  0x2e   :  { %v789_v20 = vadd.f32 %v788_v47, %v726_v3  ;;  %v729_v19 = vmul.f32 %v494_v22, %v49_v26  ;;  %v52_v50 = vunpack.c.h.bf16 %v15_v24  ;;  %v194_v25 = vrot.slane %v1620_v23, %v1617_v30 }
  0x2f   :  { %v727_v5 = vmul.f32 %v486_v42, %v1622_v17  ;;  %v728_v49 = vmul.f32 %v490_v45, %v1624_v4  ;;  %v502_v42 = vrot.slane %v182_v14, %v1618_v33  ;;  %v506_v7 = vrot.slane %v186_v32, %v1618_v33  ;;  %v18_v4 = vld [vmem:[%s1553_s0 + $0x38] sm:$0xff] }
  0x30   :  { %v730_v45 = vmul.f32 %v498_v11, %v50_v18  ;;  %v53_v3 = vunpack.c.l.bf16 %v16_v36  ;;  %v198_v26 = vrot.slane %v118_v54, %v1618_v33  ;;  %v510_v24 = vrot.slane %v190_v60, %v1618_v33 }
  0x31   :  { %v790_v35 = vadd.f32 %v789_v20, %v727_v5  ;;  %v731_v14 = vmul.f32 %v502_v42, %v51_v48  ;;  %v54_v23 = vunpack.c.h.bf16 %v16_v36  ;;  %v202_v17 = vrot.slane %v118_v54, %v1623_v58 }
  0x32   :  { %v514_v5 = vrot.slane %v194_v25, %v1618_v33  ;;  %v732_v47 = vmul.f32 %v506_v7, %v52_v50  ;;  %v55_v32 = vunpack.c.l.bf16 %v17_v55  ;;  %v119_v11 = vunpack.c.l.bf16 %v109_v16  ;;  %v19_v25 = vld [vmem:[%s1553_s0 + $0x40] sm:$0xff] }
  0x33   :  { %v791_v27 = vadd.f32 %v790_v35, %v728_v49  ;;  %v206_v49 = vrot.slane %v118_v54, %v1626_v37  ;;  %v518_v20 = vrot.slane %v198_v26, %v1618_v33  ;;  %v733_v46 = vmul.f32 %v510_v24, %v53_v3 }
  0x34   :  { %v56_v60 = vunpack.c.h.bf16 %v17_v55  ;;  %v210_v36 = vrot.slane %v118_v54, %v1617_v30  ;;  %v522_v42 = vrot.slane %v202_v17, %v1618_v33  ;;  %v57_v50 = vunpack.c.l.bf16 %v18_v4  ;;  %v20_v17 = vld [vmem:[%s1553_s0 + $0x48] sm:$0xff] }
  0x35   :  { %v792_v22 = vadd.f32 %v791_v27, %v729_v19  ;;  %v734_v19 = vmul.f32 %v514_v5, %v54_v23  ;;  %v214_v7 = vrot.slane %v119_v11, %v1618_v33  ;;  %v735_v27 = vmul.f32 %v518_v20, %v55_v32 }
  0x36   :  { %v58_v3 = vunpack.c.h.bf16 %v18_v4  ;;  %v218_v55 = vrot.slane %v119_v11, %v1623_v58  ;;  %v530_v54 = vrot.slane %v210_v36, %v1618_v33  ;;  %v736_v24 = vmul.f32 %v522_v42, %v56_v60  ;;  %v110_v36 = vld [vmem:[%s1552_s1 + $0x18] sm:$0xff] }
  0x37   :  { %v793_v18 = vadd.f32 %v792_v22, %v730_v45  ;;  %v526_v45 = vrot.slane %v206_v49, %v1618_v33  ;;  %v59_v22 = vunpack.c.l.bf16 %v19_v25  ;;  %v120_v23 = vunpack.c.h.bf16 %v109_v16  ;;  %v21_v16 = vld [vmem:[%s1553_s0 + $0x50] sm:$0xff] }
  0x38   :  { %v222_v5 = vrot.slane %v119_v11, %v1626_v37  ;;  %v60_v49 = vunpack.c.h.bf16 %v19_v25  ;;  %v226_v4 = vrot.slane %v119_v11, %v1617_v30  ;;  %v538_v20 = vrot.slane %v218_v55, %v1618_v33  ;;  %v22_v55 = vld [vmem:[%s1553_s0 + $0x58] sm:$0xff] }
  0x39   :  { %v794_v48 = vadd.f32 %v793_v18, %v731_v14  ;;  %v737_v18 = vmul.f32 %v526_v45, %v57_v50  ;;  %v61_v60 = vunpack.c.l.bf16 %v20_v17  ;;  %v230_v42 = vrot.slane %v120_v23, %v1618_v33 }
  0x3a   :  { %v62_v11 = vunpack.c.h.bf16 %v20_v17  ;;  %v234_v25 = vrot.slane %v120_v23, %v1623_v58  ;;  %v740_v45 = vmul.f32 %v538_v20, %v60_v49  ;;  %v242_v17 = vrot.slane %v120_v23, %v1617_v30 }
  0x3b   :  { %v795_v35 = vadd.f32 %v794_v48, %v732_v47  ;;  %v534_v47 = vrot.slane %v214_v7, %v1618_v33  ;;  %v546_v7 = vrot.slane %v226_v4, %v1618_v33  ;;  %v65_v49 = vunpack.c.l.bf16 %v22_v55  ;;  %v23_v4 = vld [vmem:[%s1553_s0 + $0x60] sm:$0xff] }
  0x3d   :  { %v796_v26 = vadd.f32 %v795_v35, %v733_v46  ;;  %v738_v46 = vmul.f32 %v530_v54, %v58_v3  ;;  %v739_v35 = vmul.f32 %v534_v47, %v59_v22  ;;  %v121_v3 = vunpack.c.l.bf16 %v110_v36 }
  0x3e   :  { %v238_v54 = vrot.slane %v120_v23, %v1626_v37  ;;  %v554_v47 = vrot.slane %v234_v25, %v1618_v33  ;;  %v562_v23 = vrot.slane %v242_v17, %v1618_v33  ;;  %v24_v25 = vld [vmem:[%s1553_s0 + $0x68] sm:$0xff] }
  0x3f   :  { %v797_v14 = vadd.f32 %v796_v26, %v734_v19  ;;  %v542_v19 = vrot.slane %v222_v5, %v1618_v33  ;;  %v63_v26 = vunpack.c.l.bf16 %v21_v16  ;;  %v64_v5 = vunpack.c.h.bf16 %v21_v16 }
  0x40   :  { %v246_v20 = vrot.slane %v121_v3, %v1618_v33  ;;  %v250_v16 = vrot.slane %v121_v3, %v1623_v58 }
  0x41   :  { %v798_v32 = vadd.f32 %v797_v14, %v735_v27  ;;  %v741_v14 = vmul.f32 %v542_v19, %v61_v60  ;;  %v66_v60 = vunpack.c.h.bf16 %v22_v55  ;;  %v744_v19 = vmul.f32 %v554_v47, %v64_v5 }
  0x42   :  { %v258_v55 = vrot.slane %v121_v3, %v1617_v30  ;;  %v69_v5 = vunpack.c.l.bf16 %v24_v25 }
  0x43   :  { %v799_v48 = vadd.f32 %v798_v32, %v736_v24  ;;  %v550_v24 = vrot.slane %v230_v42, %v1618_v33 }
  0x45   :  { %v800_v50 = vadd.f32 %v799_v48, %v737_v18  ;;  %v742_v18 = vmul.f32 %v546_v7, %v62_v11  ;;  %v743_v48 = vmul.f32 %v550_v24, %v63_v26  ;;  %v122_v11 = vunpack.c.h.bf16 %v110_v36  ;;  %v25_v36 = vld [vmem:[%s1553_s0 + $0x70] sm:$0xff] }
  0x46   :  { %v254_v7 = vrot.slane %v121_v3, %v1626_v37  ;;  %v570_v24 = vrot.slane %v250_v16, %v1618_v33  ;;  %v578_v3 = vrot.slane %v258_v55, %v1618_v33 }
  0x47   :  { %v801_v27 = vadd.f32 %v800_v50, %v738_v46  ;;  %v558_v46 = vrot.slane %v238_v54, %v1618_v33  ;;  %v67_v50 = vunpack.c.l.bf16 %v23_v4  ;;  %v68_v54 = vunpack.c.h.bf16 %v23_v4 }
  0x48   :  { %v262_v17 = vrot.slane %v122_v11, %v1618_v33  ;;  %v574_v47 = vrot.slane %v254_v7, %v1618_v33  ;;  %v266_v4 = vrot.slane %v122_v11, %v1623_v58 }
  0x49   :  { %v802_v22 = vadd.f32 %v801_v27, %v739_v35  ;;  %v745_v27 = vmul.f32 %v558_v46, %v65_v49  ;;  %v70_v49 = vunpack.c.h.bf16 %v24_v25 }
  0x4a   :  { %v582_v16 = vrot.slane %v262_v17, %v1618_v33  ;;  %v586_v58 = vrot.slane %v266_v4, %v1618_v33 }
  0x4b   :  { %v803_v32 = vadd.f32 %v802_v22, %v740_v45  ;;  %v566_v45 = vrot.slane %v246_v20, %v1618_v33  ;;  %v748_v20 = vmul.f32 %v570_v24, %v68_v54  ;;  %v750_v25 = vmul.f32 %v578_v3, %v70_v49 }
  0x4d   :  { %v804_v42 = vadd.f32 %v803_v32, %v741_v14  ;;  %v746_v14 = vmul.f32 %v562_v23, %v66_v60  ;;  %v270_v60 = vrot.slane %v122_v11, %v1626_v37  ;;  %v749_v23 = vmul.f32 %v574_v47, %v69_v5  ;;  %v27_v37 = vld [vmem:[%s1553_s0 + $0x80] sm:$0xff] }
  0x4e   :  { %v75_v5 = vunpack.c.l.bf16 %v27_v37 }
  0x4f   :  { %v805_v35 = vadd.f32 %v804_v42, %v742_v18  ;;  %v747_v18 = vmul.f32 %v566_v45, %v67_v50  ;;  %v26_v42 = vld [vmem:[%s1553_s0 + $0x78] sm:$0xff]  ;;  %v274_v50 = vrot.slane %v122_v11, %v1617_v30  ;;  %v590_v54 = vrot.slane %v270_v60, %v1618_v33 }
  0x50   :  { %v73_v45 = vunpack.c.l.bf16 %v26_v42 }
  0x51   :  { %v806_v26 = vadd.f32 %v805_v35, %v743_v48  ;;  %v71_v48 = vunpack.c.l.bf16 %v25_v36  ;;  %v72_v35 = vunpack.c.h.bf16 %v25_v36 }
  0x52   :  { %v753_v17 = vmul.f32 %v590_v54, %v73_v45 }
  0x53   :  { %v807_v22 = vadd.f32 %v806_v26, %v744_v19  ;;  %v751_v55 = vmul.f32 %v582_v16, %v71_v48  ;;  %v752_v30 = vmul.f32 %v586_v58, %v72_v35 }
  0x55   :  { %v808_v32 = vadd.f32 %v807_v22, %v745_v27  ;;  %v1627_v27 = vld [vmem:[#allocation7_spill] sm:$0xff]  ;;  %v594_v22 = vrot.slane %v274_v50, %v1618_v33 }
  0x56   :  { %v278_v26 = vrot.slane %v1627_v27, %v1618_v33 }
  0x57   :  { %v809_v46 = vadd.f32 %v808_v32, %v746_v14  ;;  %v74_v14 = vunpack.c.h.bf16 %v26_v42 }
  0x58   :  { %v598_v36 = vrot.slane %v278_v26, %v1618_v33 }
  0x59   :  { %v810_v19 = vadd.f32 %v809_v46, %v747_v18  ;;  %v76_v18 = vunpack.c.h.bf16 %v27_v37  ;;  %v754_v32 = vmul.f32 %v594_v22, %v74_v14 }
  0x5a   :  { %v755_v4 = vmul.f32 %v598_v36, %v75_v5 }
  0x5b   :  { %v811_v7 = vadd.f32 %v810_v19, %v748_v20  ;;  %v1628_v20 = vld [vmem:[#allocation8_spill] sm:$0xff] }
  0x5c   :  { %v756_v46 = vmul.f32 %v1628_v20, %v76_v18 }
  0x5d   :  { %v812_v24 = vadd.f32 %v811_v7, %v749_v23 }
  0x5f   :  { %v813_v11 = vadd.f32 %v812_v24, %v750_v25 }
  0x61   :  { %v814_v47 = vadd.f32 %v813_v11, %v751_v55 }
  0x63   :  { %v815_v49 = vadd.f32 %v814_v47, %v752_v30 }
  0x65   :  { %v816_v3 = vadd.f32 %v815_v49, %v753_v17 }
  0x67   :  { %v817_v48 = vadd.f32 %v816_v3, %v754_v32 }
  0x69   :  { %v818_v60 = vadd.f32 %v817_v48, %v755_v4 }
  0x6b   :  { %v819_v16 = vadd.f32 %v818_v60, %v756_v46 }
  0x6d   :  { %v820_v42 = vadd.f32 %v819_v16, %v1291_v9 }
  0x6f   :  { %v821_v23 = vadd.f32 %v820_v42, %v1296_v34 }
  0x71   :  { %v822_v19 = vadd.f32 %v821_v23, %v1300_v8 }
  0x73   :  { %v823_v33 = vadd.f32 %v822_v19, %v1305_v28 }
  0x75   :  { %v824_v35 = vadd.f32 %v823_v33, %v1310_v13 }
  0x77   :  { %v825_v50 = vadd.f32 %v824_v35, %v1315_v38 }
  0x79   :  { %v826_v58 = vadd.f32 %v825_v50, %v1320_v63 }
  0x7b   :  { %v827_v25 = vadd.f32 %v826_v58, %v1325_v57 }
  0x7d   :  { %v828_v7 = vadd.f32 %v827_v25, %v1330_v52 }
  0x7f   :  { %v829_v45 = vadd.f32 %v828_v7, %v1335_v53 }
  0x81   :  { %v830_v9 = vadd.f32 %v829_v45, %v1340_v0 }
  0x83   :  { %v831_v34 = vadd.f32 %v830_v9, %v1345_v1 }
  0x85   :  { %v832_v8 = vadd.f32 %v831_v34, %v1350_v2 }
  0x87   :  { %v833_v28 = vadd.f32 %v832_v8, %v1353_v56 }
  0x89   :  { %v834_v13 = vadd.f32 %v833_v28, %v1356_v51 }
  0x8b   :  { %v835_v38 = vadd.f32 %v834_v13, %v1359_v59 }
  0x8d   :  { %v836_v63 = vadd.f32 %v835_v38, %v1362_v15 }
  0x8f   :  { %v837_v57 = vadd.f32 %v836_v63, %v1365_v61 }
  0x91   :  { %v838_v52 = vadd.f32 %v837_v57, %v1368_v62 }
  0x93   :  { %v839_v53 = vadd.f32 %v838_v52, %v1371_v21 }
  0x95   :  { %v840_v0 = vadd.f32 %v839_v53, %v1374_v40 }
  0x97   :  { %v841_v1 = vadd.f32 %v840_v0, %v1377_v41 }
  0x99   :  { %v842_v2 = vadd.f32 %v841_v1, %v1383_v43 }
  0x9b   :  { %v843_v56 = vadd.f32 %v842_v2, %v1386_v6 }
  0x9d   :  { %v844_v51 = vadd.f32 %v843_v56, %v1389_v39 }
  0x9f   :  { %v845_v59 = vadd.f32 %v844_v51, %v1392_v29 }
  0xa1   :  { %v846_v15 = vadd.f32 %v845_v59, %v1395_v31 }
  0xa3   :  { %v847_v61 = vadd.f32 %v846_v15, %v1398_v12 }
  0xa5   :  { %v848_v62 = vadd.f32 %v847_v61, %v1401_v10 }
  0xa7   :  { %v849_v21 = vadd.f32 %v848_v62, %v1404_v44 }
  0xa9   :  { %850 = vadd.xlane.f32.xlu0 %v849_v21 }
 0x132   :  { %v851_v40 = vpop.xlane.xlu0 %850 }
 0x133   :  { %853 = vst.msk [vmem:[%s1554_s2] sm:$0xff] %vm852_vm0, %v851_v40 }

// kernel: discriminator_forward.8
= control target key start
LH: loop header
LB: loop body
LE: loop exit
PB: predicated region body
PF: predicated region fallthrough
CT: control target
= control target key end

     0   :  { %s10583_s15 = smov 0   ;;  %s10585_s16 = smov 0   ;;  %s12766_s0 = inlined_call_operand.vmem [shape: bf16[32,4096], index: 0, kind: input, shape index: {}]   ;;  %s12767_s1 = inlined_call_operand.vmem [shape: bf16[4096,512], index: 1, kind: input, shape index: {}]   ;;  %s12768_s2 = inlined_call_operand.vmem [shape: f32[1,512], index: 2, kind: input, shape index: {}]   ;;  %s12769_s3 = inlined_call_operand.vmem [shape: f32[1,512], index: 3, kind: input, shape index: {}]   ;;  %s12770_s4 = inlined_call_operand.vmem [shape: bf16[32,512], index: 4, kind: output, shape index: {}]  }
   0x1   :  { %s10587_s17 = smov 0   ;;  %s10589_s18 = smov 0  }
   0x2   :  { %s10591_s19 = smov 0  }
   0x3 LB: > { %s23_s20 = sadd.s32 1, %s10551_s18  ;;  %s9100_s21 = sadd.s32 4294967295, %s10555_s19   ;;  %s10555_s19 = sphi %s10591_s19, %s14_s19   ;;  %s10551_s18 = sphi %s10589_s18, %s12803_s18   ;;  %s10547_s17 = sphi %s10587_s17, %s12802_s17   ;;  %s10543_s16 = sphi %s10585_s16, %s12801_s16   ;;  %s10539_s15 = sphi %s10583_s15, %s12800_s15  }
   0x4   : > { %p24_p0 = scmp.ge.s32.totalorder %s23_s20, 2  ;;  %p66_p1 = scmp.ne.s32.totalorder %s10543_s16, %s10539_s15 }
   0x5   : > { %p67_p2 = scmp.eq.s32.totalorder %s10555_s19, 0  ;;  %p150_p4 = scmp.eq.s32.totalorder %s9100_s21, 1 }
   0x6   : > { %s12805_s20 = smov (%p24_p0, %s23_s20), 0  ;;  %s59_s23 = sadd.s32 1, %s10543_s16 }
   0x7   : > { %p68_p3 = por %p67_p2, %p66_p1  ;;  %s56_s22 = ssub.s32 %s10551_s18, %s12805_s20 }
   0x8   : > { %p57_p5 = scmp.eq.s32.totalorder %s56_s22, 0  ;;  %p10618_p6 = por %p150_p4, %p66_p1 }
   0x9   : > { %p9104_p7 = scmp.ge.s32.totalorder %s10555_s19, 2 }
   0xa   : > { %s10623_s25 = scalar_select %p57_p5, %s10543_s16, %s59_s23  }
   0xb   : > { %182 = sbr.rel (%p9104_p7) target bundleno = 276 (0x114), region = 20 }
  0x10   : > { %185 = sbr.rel (!%p68_p3) target bundleno = 276 (0x114), region = 24  ;;  %s187_s26 = sand.u32 (%p68_p3), 1, %s10543_s16  }
  0x11   : > { %s9698_s27 = sshll.u32 (%p68_p3), %s10551_s18, 3  ;;  %s9105_s28 = sshll.u32 (%p68_p3), %s187_s26, 12 }
  0x12   : > { %s10631_s5 = scalar_lea.vmem (%p68_p3), %s12767_s1, %s9698_s27  ;;  %s10636_s6 = scalar_lea.vmem (%p68_p3), [#allocation2], %s9105_s28 }
  0x13   : > { %v1246_v0 = vld [vmem:[%s10631_s5] sm:$0xff] (%p68_p3)  ;;  %v1248_v1 = vld [vmem:[%s10631_s5 + $0x10] sm:$0xff] (%p68_p3) }
  0x14   : > { %v1250_v2 = vld [vmem:[%s10631_s5 + $0x20] sm:$0xff] (%p68_p3)  ;;  %1247 = vst [vmem:[%s10636_s6] sm:$0xff] (%p68_p3), %v1246_v0  ;;  %1249 = vst [vmem:[%s10636_s6 + $0x8] sm:$0xff] (%p68_p3), %v1248_v1  ;;  %v1252_v3 = vld [vmem:[%s10631_s5 + $0x30] sm:$0xff] (%p68_p3) }
  0x15   : > { %1251 = vst [vmem:[%s10636_s6 + $0x10] sm:$0xff] %v1250_v2  ;;  %v1254_v4 = vld [vmem:[%s10631_s5 + $0x40] sm:$0xff]  ;;  %v1256_v5 = vld [vmem:[%s10631_s5 + $0x50] sm:$0xff]  ;;  %1253 = vst [vmem:[%s10636_s6 + $0x18] sm:$0xff] %v1252_v3 }
  0x16   : > { %1255 = vst [vmem:[%s10636_s6 + $0x20] sm:$0xff] %v1254_v4  ;;  %1257 = vst [vmem:[%s10636_s6 + $0x28] sm:$0xff] %v1256_v5  ;;  %v1258_v6 = vld [vmem:[%s10631_s5 + $0x60] sm:$0xff]  ;;  %v1260_v7 = vld [vmem:[%s10631_s5 + $0x70] sm:$0xff] }
  0x17   : > { %v1262_v8 = vld [vmem:[%s10631_s5 + $0x80] sm:$0xff]  ;;  %1259 = vst [vmem:[%s10636_s6 + $0x30] sm:$0xff] %v1258_v6  ;;  %1261 = vst [vmem:[%s10636_s6 + $0x38] sm:$0xff] %v1260_v7  ;;  %v1264_v9 = vld [vmem:[%s10631_s5 + $0x90] sm:$0xff] }
  0x18   : > { %1263 = vst [vmem:[%s10636_s6 + $0x40] sm:$0xff] %v1262_v8  ;;  %v1266_v10 = vld [vmem:[%s10631_s5 + $0xa0] sm:$0xff]  ;;  %v1268_v11 = vld [vmem:[%s10631_s5 + $0xb0] sm:$0xff]  ;;  %1265 = vst [vmem:[%s10636_s6 + $0x48] sm:$0xff] %v1264_v9 }
  0x19   : > { %1267 = vst [vmem:[%s10636_s6 + $0x50] sm:$0xff] %v1266_v10  ;;  %1269 = vst [vmem:[%s10636_s6 + $0x58] sm:$0xff] %v1268_v11  ;;  %v1270_v12 = vld [vmem:[%s10631_s5 + $0xc0] sm:$0xff]  ;;  %v1272_v13 = vld [vmem:[%s10631_s5 + $0xd0] sm:$0xff] }
  0x1a   : > { %v1274_v14 = vld [vmem:[%s10631_s5 + $0xe0] sm:$0xff]  ;;  %1271 = vst [vmem:[%s10636_s6 + $0x60] sm:$0xff] %v1270_v12  ;;  %1273 = vst [vmem:[%s10636_s6 + $0x68] sm:$0xff] %v1272_v13  ;;  %v1276_v15 = vld [vmem:[%s10631_s5 + $0xf0] sm:$0xff] }
  0x1b   : > { %1275 = vst [vmem:[%s10636_s6 + $0x70] sm:$0xff] %v1274_v14  ;;  %v1278_v16 = vld [vmem:[%s10631_s5 + $0x100] sm:$0xff]  ;;  %v1280_v17 = vld [vmem:[%s10631_s5 + $0x110] sm:$0xff]  ;;  %1277 = vst [vmem:[%s10636_s6 + $0x78] sm:$0xff] %v1276_v15 }
  0x1c   : > { %1279 = vst [vmem:[%s10636_s6 + $0x80] sm:$0xff] %v1278_v16  ;;  %1281 = vst [vmem:[%s10636_s6 + $0x88] sm:$0xff] %v1280_v17  ;;  %v1282_v18 = vld [vmem:[%s10631_s5 + $0x120] sm:$0xff]  ;;  %v1284_v19 = vld [vmem:[%s10631_s5 + $0x130] sm:$0xff] }
  0x1d   : > { %v1286_v20 = vld [vmem:[%s10631_s5 + $0x140] sm:$0xff]  ;;  %1283 = vst [vmem:[%s10636_s6 + $0x90] sm:$0xff] %v1282_v18  ;;  %1285 = vst [vmem:[%s10636_s6 + $0x98] sm:$0xff] %v1284_v19  ;;  %v1288_v21 = vld [vmem:[%s10631_s5 + $0x150] sm:$0xff] }
  0x1e   : > { %1287 = vst [vmem:[%s10636_s6 + $0xa0] sm:$0xff] %v1286_v20  ;;  %v1290_v22 = vld [vmem:[%s10631_s5 + $0x160] sm:$0xff]  ;;  %v1292_v23 = vld [vmem:[%s10631_s5 + $0x170] sm:$0xff]  ;;  %1289 = vst [vmem:[%s10636_s6 + $0xa8] sm:$0xff] %v1288_v21 }
  0x1f   : > { %1291 = vst [vmem:[%s10636_s6 + $0xb0] sm:$0xff] %v1290_v22  ;;  %1293 = vst [vmem:[%s10636_s6 + $0xb8] sm:$0xff] %v1292_v23  ;;  %v1294_v24 = vld [vmem:[%s10631_s5 + $0x180] sm:$0xff]  ;;  %v1296_v25 = vld [vmem:[%s10631_s5 + $0x190] sm:$0xff] }
  0x20   : > { %v1298_v26 = vld [vmem:[%s10631_s5 + $0x1a0] sm:$0xff]  ;;  %1295 = vst [vmem:[%s10636_s6 + $0xc0] sm:$0xff] %v1294_v24  ;;  %1297 = vst [vmem:[%s10636_s6 + $0xc8] sm:$0xff] %v1296_v25  ;;  %v1300_v27 = vld [vmem:[%s10631_s5 + $0x1b0] sm:$0xff] }
  0x21   : > { %1299 = vst [vmem:[%s10636_s6 + $0xd0] sm:$0xff] %v1298_v26  ;;  %v1302_v28 = vld [vmem:[%s10631_s5 + $0x1c0] sm:$0xff]  ;;  %v1304_v29 = vld [vmem:[%s10631_s5 + $0x1d0] sm:$0xff]  ;;  %1301 = vst [vmem:[%s10636_s6 + $0xd8] sm:$0xff] %v1300_v27 }
  0x22   : > { %1303 = vst [vmem:[%s10636_s6 + $0xe0] sm:$0xff] %v1302_v28  ;;  %1305 = vst [vmem:[%s10636_s6 + $0xe8] sm:$0xff] %v1304_v29  ;;  %v1306_v30 = vld [vmem:[%s10631_s5 + $0x1e0] sm:$0xff]  ;;  %v1308_v31 = vld [vmem:[%s10631_s5 + $0x1f0] sm:$0xff] }
  0x23   : > { %v1310_v32 = vld [vmem:[%s10631_s5 + $0x200] sm:$0xff]  ;;  %1307 = vst [vmem:[%s10636_s6 + $0xf0] sm:$0xff] %v1306_v30  ;;  %1309 = vst [vmem:[%s10636_s6 + $0xf8] sm:$0xff] %v1308_v31  ;;  %v1312_v33 = vld [vmem:[%s10631_s5 + $0x210] sm:$0xff] }
  0x24   : > { %1311 = vst [vmem:[%s10636_s6 + $0x100] sm:$0xff] %v1310_v32  ;;  %v1314_v34 = vld [vmem:[%s10631_s5 + $0x220] sm:$0xff]  ;;  %v1316_v35 = vld [vmem:[%s10631_s5 + $0x230] sm:$0xff]  ;;  %1313 = vst [vmem:[%s10636_s6 + $0x108] sm:$0xff] %v1312_v33 }
  0x25   : > { %1315 = vst [vmem:[%s10636_s6 + $0x110] sm:$0xff] %v1314_v34  ;;  %1317 = vst [vmem:[%s10636_s6 + $0x118] sm:$0xff] %v1316_v35  ;;  %v1318_v36 = vld [vmem:[%s10631_s5 + $0x240] sm:$0xff]  ;;  %v1320_v37 = vld [vmem:[%s10631_s5 + $0x250] sm:$0xff] }
  0x26   : > { %v1322_v38 = vld [vmem:[%s10631_s5 + $0x260] sm:$0xff]  ;;  %1319 = vst [vmem:[%s10636_s6 + $0x120] sm:$0xff] %v1318_v36  ;;  %1321 = vst [vmem:[%s10636_s6 + $0x128] sm:$0xff] %v1320_v37  ;;  %v1324_v39 = vld [vmem:[%s10631_s5 + $0x270] sm:$0xff] }
  0x27   : > { %1323 = vst [vmem:[%s10636_s6 + $0x130] sm:$0xff] %v1322_v38  ;;  %v1326_v40 = vld [vmem:[%s10631_s5 + $0x280] sm:$0xff]  ;;  %v1328_v41 = vld [vmem:[%s10631_s5 + $0x290] sm:$0xff]  ;;  %1325 = vst [vmem:[%s10636_s6 + $0x138] sm:$0xff] %v1324_v39 }
  0x28   : > { %1327 = vst [vmem:[%s10636_s6 + $0x140] sm:$0xff] %v1326_v40  ;;  %1329 = vst [vmem:[%s10636_s6 + $0x148] sm:$0xff] %v1328_v41  ;;  %v1330_v42 = vld [vmem:[%s10631_s5 + $0x2a0] sm:$0xff]  ;;  %v1332_v43 = vld [vmem:[%s10631_s5 + $0x2b0] sm:$0xff] }
  0x29   : > { %v1334_v44 = vld [vmem:[%s10631_s5 + $0x2c0] sm:$0xff]  ;;  %1331 = vst [vmem:[%s10636_s6 + $0x150] sm:$0xff] %v1330_v42  ;;  %1333 = vst [vmem:[%s10636_s6 + $0x158] sm:$0xff] %v1332_v43  ;;  %v1336_v45 = vld [vmem:[%s10631_s5 + $0x2d0] sm:$0xff] }
  0x2a   : > { %1335 = vst [vmem:[%s10636_s6 + $0x160] sm:$0xff] %v1334_v44  ;;  %v1338_v46 = vld [vmem:[%s10631_s5 + $0x2e0] sm:$0xff]  ;;  %v1340_v47 = vld [vmem:[%s10631_s5 + $0x2f0] sm:$0xff]  ;;  %1337 = vst [vmem:[%s10636_s6 + $0x168] sm:$0xff] %v1336_v45 }
  0x2b   : > { %1339 = vst [vmem:[%s10636_s6 + $0x170] sm:$0xff] %v1338_v46  ;;  %1341 = vst [vmem:[%s10636_s6 + $0x178] sm:$0xff] %v1340_v47  ;;  %v1342_v48 = vld [vmem:[%s10631_s5 + $0x300] sm:$0xff]  ;;  %v1344_v49 = vld [vmem:[%s10631_s5 + $0x310] sm:$0xff] }
  0x2c   : > { %v1346_v50 = vld [vmem:[%s10631_s5 + $0x320] sm:$0xff]  ;;  %1343 = vst [vmem:[%s10636_s6 + $0x180] sm:$0xff] %v1342_v48  ;;  %1345 = vst [vmem:[%s10636_s6 + $0x188] sm:$0xff] %v1344_v49  ;;  %v1348_v51 = vld [vmem:[%s10631_s5 + $0x330] sm:$0xff] }
  0x2d   : > { %1347 = vst [vmem:[%s10636_s6 + $0x190] sm:$0xff] %v1346_v50  ;;  %v1350_v52 = vld [vmem:[%s10631_s5 + $0x340] sm:$0xff]  ;;  %v1352_v53 = vld [vmem:[%s10631_s5 + $0x350] sm:$0xff]  ;;  %1349 = vst [vmem:[%s10636_s6 + $0x198] sm:$0xff] %v1348_v51 }
  0x2e   : > { %1351 = vst [vmem:[%s10636_s6 + $0x1a0] sm:$0xff] %v1350_v52  ;;  %1353 = vst [vmem:[%s10636_s6 + $0x1a8] sm:$0xff] %v1352_v53  ;;  %v1354_v54 = vld [vmem:[%s10631_s5 + $0x360] sm:$0xff]  ;;  %v1356_v55 = vld [vmem:[%s10631_s5 + $0x370] sm:$0xff] }
  0x2f   : > { %v1358_v56 = vld [vmem:[%s10631_s5 + $0x380] sm:$0xff]  ;;  %1355 = vst [vmem:[%s10636_s6 + $0x1b0] sm:$0xff] %v1354_v54  ;;  %1357 = vst [vmem:[%s10636_s6 + $0x1b8] sm:$0xff] %v1356_v55  ;;  %v1360_v57 = vld [vmem:[%s10631_s5 + $0x390] sm:$0xff] }
  0x30   : > { %1359 = vst [vmem:[%s10636_s6 + $0x1c0] sm:$0xff] %v1358_v56  ;;  %v1362_v58 = vld [vmem:[%s10631_s5 + $0x3a0] sm:$0xff]  ;;  %v1364_v59 = vld [vmem:[%s10631_s5 + $0x3b0] sm:$0xff]  ;;  %1361 = vst [vmem:[%s10636_s6 + $0x1c8] sm:$0xff] %v1360_v57 }
  0x31   : > { %1363 = vst [vmem:[%s10636_s6 + $0x1d0] sm:$0xff] %v1362_v58  ;;  %1365 = vst [vmem:[%s10636_s6 + $0x1d8] sm:$0xff] %v1364_v59  ;;  %v1366_v60 = vld [vmem:[%s10631_s5 + $0x3c0] sm:$0xff]  ;;  %v1368_v61 = vld [vmem:[%s10631_s5 + $0x3d0] sm:$0xff] }
  0x32   : > { %v1370_v62 = vld [vmem:[%s10631_s5 + $0x3e0] sm:$0xff]  ;;  %1367 = vst [vmem:[%s10636_s6 + $0x1e0] sm:$0xff] %v1366_v60  ;;  %1369 = vst [vmem:[%s10636_s6 + $0x1e8] sm:$0xff] %v1368_v61  ;;  %v1372_v63 = vld [vmem:[%s10631_s5 + $0x3f0] sm:$0xff] }
  0x33   : > { %1371 = vst [vmem:[%s10636_s6 + $0x1f0] sm:$0xff] %v1370_v62  ;;  %v1374_v0 = vld [vmem:[%s10631_s5 + $0x400] sm:$0xff]  ;;  %v1376_v1 = vld [vmem:[%s10631_s5 + $0x410] sm:$0xff]  ;;  %1373 = vst [vmem:[%s10636_s6 + $0x1f8] sm:$0xff] %v1372_v63 }
  0x34   : > { %1375 = vst [vmem:[%s10636_s6 + $0x200] sm:$0xff] %v1374_v0  ;;  %1377 = vst [vmem:[%s10636_s6 + $0x208] sm:$0xff] %v1376_v1  ;;  %v1378_v2 = vld [vmem:[%s10631_s5 + $0x420] sm:$0xff]  ;;  %v1380_v3 = vld [vmem:[%s10631_s5 + $0x430] sm:$0xff] }
  0x35   : > { %v1382_v4 = vld [vmem:[%s10631_s5 + $0x440] sm:$0xff]  ;;  %1379 = vst [vmem:[%s10636_s6 + $0x210] sm:$0xff] %v1378_v2  ;;  %1381 = vst [vmem:[%s10636_s6 + $0x218] sm:$0xff] %v1380_v3  ;;  %v1384_v5 = vld [vmem:[%s10631_s5 + $0x450] sm:$0xff] }
  0x36   : > { %1383 = vst [vmem:[%s10636_s6 + $0x220] sm:$0xff] %v1382_v4  ;;  %v1386_v6 = vld [vmem:[%s10631_s5 + $0x460] sm:$0xff]  ;;  %v1388_v7 = vld [vmem:[%s10631_s5 + $0x470] sm:$0xff]  ;;  %1385 = vst [vmem:[%s10636_s6 + $0x228] sm:$0xff] %v1384_v5 }
  0x37   : > { %1387 = vst [vmem:[%s10636_s6 + $0x230] sm:$0xff] %v1386_v6  ;;  %1389 = vst [vmem:[%s10636_s6 + $0x238] sm:$0xff] %v1388_v7  ;;  %v1390_v8 = vld [vmem:[%s10631_s5 + $0x480] sm:$0xff]  ;;  %v1392_v9 = vld [vmem:[%s10631_s5 + $0x490] sm:$0xff] }
  0x38   : > { %v1394_v10 = vld [vmem:[%s10631_s5 + $0x4a0] sm:$0xff]  ;;  %1391 = vst [vmem:[%s10636_s6 + $0x240] sm:$0xff] %v1390_v8  ;;  %1393 = vst [vmem:[%s10636_s6 + $0x248] sm:$0xff] %v1392_v9  ;;  %v1396_v11 = vld [vmem:[%s10631_s5 + $0x4b0] sm:$0xff] }
  0x39   : > { %1395 = vst [vmem:[%s10636_s6 + $0x250] sm:$0xff] %v1394_v10  ;;  %v1398_v12 = vld [vmem:[%s10631_s5 + $0x4c0] sm:$0xff]  ;;  %v1400_v13 = vld [vmem:[%s10631_s5 + $0x4d0] sm:$0xff]  ;;  %1397 = vst [vmem:[%s10636_s6 + $0x258] sm:$0xff] %v1396_v11 }
  0x3a   : > { %1399 = vst [vmem:[%s10636_s6 + $0x260] sm:$0xff] %v1398_v12  ;;  %1401 = vst [vmem:[%s10636_s6 + $0x268] sm:$0xff] %v1400_v13  ;;  %v1402_v14 = vld [vmem:[%s10631_s5 + $0x4e0] sm:$0xff]  ;;  %v1404_v15 = vld [vmem:[%s10631_s5 + $0x4f0] sm:$0xff] }
  0x3b   : > { %v1406_v16 = vld [vmem:[%s10631_s5 + $0x500] sm:$0xff]  ;;  %1403 = vst [vmem:[%s10636_s6 + $0x270] sm:$0xff] %v1402_v14  ;;  %1405 = vst [vmem:[%s10636_s6 + $0x278] sm:$0xff] %v1404_v15  ;;  %v1408_v17 = vld [vmem:[%s10631_s5 + $0x510] sm:$0xff] }
  0x3c   : > { %1407 = vst [vmem:[%s10636_s6 + $0x280] sm:$0xff] %v1406_v16  ;;  %v1410_v18 = vld [vmem:[%s10631_s5 + $0x520] sm:$0xff]  ;;  %v1412_v19 = vld [vmem:[%s10631_s5 + $0x530] sm:$0xff]  ;;  %1409 = vst [vmem:[%s10636_s6 + $0x288] sm:$0xff] %v1408_v17 }
  0x3d   : > { %1411 = vst [vmem:[%s10636_s6 + $0x290] sm:$0xff] %v1410_v18  ;;  %1413 = vst [vmem:[%s10636_s6 + $0x298] sm:$0xff] %v1412_v19  ;;  %v1414_v20 = vld [vmem:[%s10631_s5 + $0x540] sm:$0xff]  ;;  %v1416_v21 = vld [vmem:[%s10631_s5 + $0x550] sm:$0xff] }
  0x3e   : > { %v1418_v22 = vld [vmem:[%s10631_s5 + $0x560] sm:$0xff]  ;;  %1415 = vst [vmem:[%s10636_s6 + $0x2a0] sm:$0xff] %v1414_v20  ;;  %1417 = vst [vmem:[%s10636_s6 + $0x2a8] sm:$0xff] %v1416_v21  ;;  %v1420_v23 = vld [vmem:[%s10631_s5 + $0x570] sm:$0xff] }
  0x3f   : > { %1419 = vst [vmem:[%s10636_s6 + $0x2b0] sm:$0xff] %v1418_v22  ;;  %v1422_v24 = vld [vmem:[%s10631_s5 + $0x580] sm:$0xff]  ;;  %v1424_v25 = vld [vmem:[%s10631_s5 + $0x590] sm:$0xff]  ;;  %1421 = vst [vmem:[%s10636_s6 + $0x2b8] sm:$0xff] %v1420_v23 }
  0x40   : > { %1423 = vst [vmem:[%s10636_s6 + $0x2c0] sm:$0xff] %v1422_v24  ;;  %1425 = vst [vmem:[%s10636_s6 + $0x2c8] sm:$0xff] %v1424_v25  ;;  %v1426_v26 = vld [vmem:[%s10631_s5 + $0x5a0] sm:$0xff]  ;;  %v1428_v27 = vld [vmem:[%s10631_s5 + $0x5b0] sm:$0xff] }
  0x41   : > { %v1430_v28 = vld [vmem:[%s10631_s5 + $0x5c0] sm:$0xff]  ;;  %1427 = vst [vmem:[%s10636_s6 + $0x2d0] sm:$0xff] %v1426_v26  ;;  %1429 = vst [vmem:[%s10636_s6 + $0x2d8] sm:$0xff] %v1428_v27  ;;  %v1432_v29 = vld [vmem:[%s10631_s5 + $0x5d0] sm:$0xff] }
  0x42   : > { %1431 = vst [vmem:[%s10636_s6 + $0x2e0] sm:$0xff] %v1430_v28  ;;  %v1434_v30 = vld [vmem:[%s10631_s5 + $0x5e0] sm:$0xff]  ;;  %v1436_v31 = vld [vmem:[%s10631_s5 + $0x5f0] sm:$0xff]  ;;  %1433 = vst [vmem:[%s10636_s6 + $0x2e8] sm:$0xff] %v1432_v29 }
  0x43   : > { %1435 = vst [vmem:[%s10636_s6 + $0x2f0] sm:$0xff] %v1434_v30  ;;  %1437 = vst [vmem:[%s10636_s6 + $0x2f8] sm:$0xff] %v1436_v31  ;;  %v1438_v32 = vld [vmem:[%s10631_s5 + $0x600] sm:$0xff]  ;;  %v1440_v33 = vld [vmem:[%s10631_s5 + $0x610] sm:$0xff] }
  0x44   : > { %v1442_v34 = vld [vmem:[%s10631_s5 + $0x620] sm:$0xff]  ;;  %1439 = vst [vmem:[%s10636_s6 + $0x300] sm:$0xff] %v1438_v32  ;;  %1441 = vst [vmem:[%s10636_s6 + $0x308] sm:$0xff] %v1440_v33  ;;  %v1444_v35 = vld [vmem:[%s10631_s5 + $0x630] sm:$0xff] }
  0x45   : > { %1443 = vst [vmem:[%s10636_s6 + $0x310] sm:$0xff] %v1442_v34  ;;  %v1446_v36 = vld [vmem:[%s10631_s5 + $0x640] sm:$0xff]  ;;  %v1448_v37 = vld [vmem:[%s10631_s5 + $0x650] sm:$0xff]  ;;  %1445 = vst [vmem:[%s10636_s6 + $0x318] sm:$0xff] %v1444_v35 }
  0x46   : > { %1447 = vst [vmem:[%s10636_s6 + $0x320] sm:$0xff] %v1446_v36  ;;  %1449 = vst [vmem:[%s10636_s6 + $0x328] sm:$0xff] %v1448_v37  ;;  %v1450_v38 = vld [vmem:[%s10631_s5 + $0x660] sm:$0xff]  ;;  %v1452_v39 = vld [vmem:[%s10631_s5 + $0x670] sm:$0xff] }
  0x47   : > { %v1454_v40 = vld [vmem:[%s10631_s5 + $0x680] sm:$0xff]  ;;  %1451 = vst [vmem:[%s10636_s6 + $0x330] sm:$0xff] %v1450_v38  ;;  %1453 = vst [vmem:[%s10636_s6 + $0x338] sm:$0xff] %v1452_v39  ;;  %v1456_v41 = vld [vmem:[%s10631_s5 + $0x690] sm:$0xff] }
  0x48   : > { %1455 = vst [vmem:[%s10636_s6 + $0x340] sm:$0xff] %v1454_v40  ;;  %v1458_v42 = vld [vmem:[%s10631_s5 + $0x6a0] sm:$0xff]  ;;  %v1460_v43 = vld [vmem:[%s10631_s5 + $0x6b0] sm:$0xff]  ;;  %1457 = vst [vmem:[%s10636_s6 + $0x348] sm:$0xff] %v1456_v41 }
  0x49   : > { %1459 = vst [vmem:[%s10636_s6 + $0x350] sm:$0xff] %v1458_v42  ;;  %1461 = vst [vmem:[%s10636_s6 + $0x358] sm:$0xff] %v1460_v43  ;;  %v1462_v44 = vld [vmem:[%s10631_s5 + $0x6c0] sm:$0xff]  ;;  %v1464_v45 = vld [vmem:[%s10631_s5 + $0x6d0] sm:$0xff] }
  0x4a   : > { %v1466_v46 = vld [vmem:[%s10631_s5 + $0x6e0] sm:$0xff]  ;;  %1463 = vst [vmem:[%s10636_s6 + $0x360] sm:$0xff] %v1462_v44  ;;  %1465 = vst [vmem:[%s10636_s6 + $0x368] sm:$0xff] %v1464_v45  ;;  %v1468_v47 = vld [vmem:[%s10631_s5 + $0x6f0] sm:$0xff] }
  0x4b   : > { %1467 = vst [vmem:[%s10636_s6 + $0x370] sm:$0xff] %v1466_v46  ;;  %v1470_v48 = vld [vmem:[%s10631_s5 + $0x700] sm:$0xff]  ;;  %v1472_v49 = vld [vmem:[%s10631_s5 + $0x710] sm:$0xff]  ;;  %1469 = vst [vmem:[%s10636_s6 + $0x378] sm:$0xff] %v1468_v47 }
  0x4c   : > { %1471 = vst [vmem:[%s10636_s6 + $0x380] sm:$0xff] %v1470_v48  ;;  %1473 = vst [vmem:[%s10636_s6 + $0x388] sm:$0xff] %v1472_v49  ;;  %v1474_v50 = vld [vmem:[%s10631_s5 + $0x720] sm:$0xff]  ;;  %v1476_v51 = vld [vmem:[%s10631_s5 + $0x730] sm:$0xff] }
  0x4d   : > { %v1478_v52 = vld [vmem:[%s10631_s5 + $0x740] sm:$0xff]  ;;  %1475 = vst [vmem:[%s10636_s6 + $0x390] sm:$0xff] %v1474_v50  ;;  %1477 = vst [vmem:[%s10636_s6 + $0x398] sm:$0xff] %v1476_v51  ;;  %v1480_v53 = vld [vmem:[%s10631_s5 + $0x750] sm:$0xff] }
  0x4e   : > { %1479 = vst [vmem:[%s10636_s6 + $0x3a0] sm:$0xff] %v1478_v52  ;;  %v1482_v54 = vld [vmem:[%s10631_s5 + $0x760] sm:$0xff]  ;;  %v1484_v55 = vld [vmem:[%s10631_s5 + $0x770] sm:$0xff]  ;;  %1481 = vst [vmem:[%s10636_s6 + $0x3a8] sm:$0xff] %v1480_v53 }
  0x4f   : > { %1483 = vst [vmem:[%s10636_s6 + $0x3b0] sm:$0xff] %v1482_v54  ;;  %1485 = vst [vmem:[%s10636_s6 + $0x3b8] sm:$0xff] %v1484_v55  ;;  %v1486_v56 = vld [vmem:[%s10631_s5 + $0x780] sm:$0xff]  ;;  %v1488_v57 = vld [vmem:[%s10631_s5 + $0x790] sm:$0xff] }
  0x50   : > { %v1490_v58 = vld [vmem:[%s10631_s5 + $0x7a0] sm:$0xff]  ;;  %1487 = vst [vmem:[%s10636_s6 + $0x3c0] sm:$0xff] %v1486_v56  ;;  %1489 = vst [vmem:[%s10636_s6 + $0x3c8] sm:$0xff] %v1488_v57  ;;  %v1492_v59 = vld [vmem:[%s10631_s5 + $0x7b0] sm:$0xff] }
  0x51   : > { %1491 = vst [vmem:[%s10636_s6 + $0x3d0] sm:$0xff] %v1490_v58  ;;  %v1494_v60 = vld [vmem:[%s10631_s5 + $0x7c0] sm:$0xff]  ;;  %v1496_v61 = vld [vmem:[%s10631_s5 + $0x7d0] sm:$0xff]  ;;  %1493 = vst [vmem:[%s10636_s6 + $0x3d8] sm:$0xff] %v1492_v59 }
  0x52   : > { %1495 = vst [vmem:[%s10636_s6 + $0x3e0] sm:$0xff] %v1494_v60  ;;  %1497 = vst [vmem:[%s10636_s6 + $0x3e8] sm:$0xff] %v1496_v61  ;;  %v1498_v62 = vld [vmem:[%s10631_s5 + $0x7e0] sm:$0xff]  ;;  %v1500_v63 = vld [vmem:[%s10631_s5 + $0x7f0] sm:$0xff] }
  0x53   : > { %v1502_v0 = vld [vmem:[%s10631_s5 + $0x800] sm:$0xff]  ;;  %1499 = vst [vmem:[%s10636_s6 + $0x3f0] sm:$0xff] %v1498_v62  ;;  %1501 = vst [vmem:[%s10636_s6 + $0x3f8] sm:$0xff] %v1500_v63  ;;  %v1504_v1 = vld [vmem:[%s10631_s5 + $0x810] sm:$0xff] }
  0x54   : > { %1503 = vst [vmem:[%s10636_s6 + $0x400] sm:$0xff] %v1502_v0  ;;  %v1506_v2 = vld [vmem:[%s10631_s5 + $0x820] sm:$0xff]  ;;  %v1508_v3 = vld [vmem:[%s10631_s5 + $0x830] sm:$0xff]  ;;  %1505 = vst [vmem:[%s10636_s6 + $0x408] sm:$0xff] %v1504_v1 }
  0x55   : > { %1507 = vst [vmem:[%s10636_s6 + $0x410] sm:$0xff] %v1506_v2  ;;  %1509 = vst [vmem:[%s10636_s6 + $0x418] sm:$0xff] %v1508_v3  ;;  %v1510_v4 = vld [vmem:[%s10631_s5 + $0x840] sm:$0xff]  ;;  %v1512_v5 = vld [vmem:[%s10631_s5 + $0x850] sm:$0xff] }
  0x56   : > { %v1514_v6 = vld [vmem:[%s10631_s5 + $0x860] sm:$0xff]  ;;  %1511 = vst [vmem:[%s10636_s6 + $0x420] sm:$0xff] %v1510_v4  ;;  %1513 = vst [vmem:[%s10636_s6 + $0x428] sm:$0xff] %v1512_v5  ;;  %v1516_v7 = vld [vmem:[%s10631_s5 + $0x870] sm:$0xff] }
  0x57   : > { %1515 = vst [vmem:[%s10636_s6 + $0x430] sm:$0xff] %v1514_v6  ;;  %v1518_v8 = vld [vmem:[%s10631_s5 + $0x880] sm:$0xff]  ;;  %v1520_v9 = vld [vmem:[%s10631_s5 + $0x890] sm:$0xff]  ;;  %1517 = vst [vmem:[%s10636_s6 + $0x438] sm:$0xff] %v1516_v7 }
  0x58   : > { %1519 = vst [vmem:[%s10636_s6 + $0x440] sm:$0xff] %v1518_v8  ;;  %1521 = vst [vmem:[%s10636_s6 + $0x448] sm:$0xff] %v1520_v9  ;;  %v1522_v10 = vld [vmem:[%s10631_s5 + $0x8a0] sm:$0xff]  ;;  %v1524_v11 = vld [vmem:[%s10631_s5 + $0x8b0] sm:$0xff] }
  0x59   : > { %v1526_v12 = vld [vmem:[%s10631_s5 + $0x8c0] sm:$0xff]  ;;  %1523 = vst [vmem:[%s10636_s6 + $0x450] sm:$0xff] %v1522_v10  ;;  %1525 = vst [vmem:[%s10636_s6 + $0x458] sm:$0xff] %v1524_v11  ;;  %v1528_v13 = vld [vmem:[%s10631_s5 + $0x8d0] sm:$0xff] }
  0x5a   : > { %1527 = vst [vmem:[%s10636_s6 + $0x460] sm:$0xff] %v1526_v12  ;;  %v1530_v14 = vld [vmem:[%s10631_s5 + $0x8e0] sm:$0xff]  ;;  %v1532_v15 = vld [vmem:[%s10631_s5 + $0x8f0] sm:$0xff]  ;;  %1529 = vst [vmem:[%s10636_s6 + $0x468] sm:$0xff] %v1528_v13 }
  0x5b   : > { %1531 = vst [vmem:[%s10636_s6 + $0x470] sm:$0xff] %v1530_v14  ;;  %1533 = vst [vmem:[%s10636_s6 + $0x478] sm:$0xff] %v1532_v15  ;;  %v1534_v16 = vld [vmem:[%s10631_s5 + $0x900] sm:$0xff]  ;;  %v1536_v17 = vld [vmem:[%s10631_s5 + $0x910] sm:$0xff] }
  0x5c   : > { %v1538_v18 = vld [vmem:[%s10631_s5 + $0x920] sm:$0xff]  ;;  %1535 = vst [vmem:[%s10636_s6 + $0x480] sm:$0xff] %v1534_v16  ;;  %1537 = vst [vmem:[%s10636_s6 + $0x488] sm:$0xff] %v1536_v17  ;;  %v1540_v19 = vld [vmem:[%s10631_s5 + $0x930] sm:$0xff] }
  0x5d   : > { %1539 = vst [vmem:[%s10636_s6 + $0x490] sm:$0xff] %v1538_v18  ;;  %v1542_v20 = vld [vmem:[%s10631_s5 + $0x940] sm:$0xff]  ;;  %v1544_v21 = vld [vmem:[%s10631_s5 + $0x950] sm:$0xff]  ;;  %1541 = vst [vmem:[%s10636_s6 + $0x498] sm:$0xff] %v1540_v19 }
  0x5e   : > { %1543 = vst [vmem:[%s10636_s6 + $0x4a0] sm:$0xff] %v1542_v20  ;;  %1545 = vst [vmem:[%s10636_s6 + $0x4a8] sm:$0xff] %v1544_v21  ;;  %v1546_v22 = vld [vmem:[%s10631_s5 + $0x960] sm:$0xff]  ;;  %v1548_v23 = vld [vmem:[%s10631_s5 + $0x970] sm:$0xff] }
  0x5f   : > { %v1550_v24 = vld [vmem:[%s10631_s5 + $0x980] sm:$0xff]  ;;  %1547 = vst [vmem:[%s10636_s6 + $0x4b0] sm:$0xff] %v1546_v22  ;;  %1549 = vst [vmem:[%s10636_s6 + $0x4b8] sm:$0xff] %v1548_v23  ;;  %v1552_v25 = vld [vmem:[%s10631_s5 + $0x990] sm:$0xff] }
  0x60   : > { %1551 = vst [vmem:[%s10636_s6 + $0x4c0] sm:$0xff] %v1550_v24  ;;  %v1554_v26 = vld [vmem:[%s10631_s5 + $0x9a0] sm:$0xff]  ;;  %v1556_v27 = vld [vmem:[%s10631_s5 + $0x9b0] sm:$0xff]  ;;  %1553 = vst [vmem:[%s10636_s6 + $0x4c8] sm:$0xff] %v1552_v25 }
  0x61   : > { %1555 = vst [vmem:[%s10636_s6 + $0x4d0] sm:$0xff] %v1554_v26  ;;  %1557 = vst [vmem:[%s10636_s6 + $0x4d8] sm:$0xff] %v1556_v27  ;;  %v1558_v28 = vld [vmem:[%s10631_s5 + $0x9c0] sm:$0xff]  ;;  %v1560_v29 = vld [vmem:[%s10631_s5 + $0x9d0] sm:$0xff] }
  0x62   : > { %v1562_v30 = vld [vmem:[%s10631_s5 + $0x9e0] sm:$0xff]  ;;  %1559 = vst [vmem:[%s10636_s6 + $0x4e0] sm:$0xff] %v1558_v28  ;;  %1561 = vst [vmem:[%s10636_s6 + $0x4e8] sm:$0xff] %v1560_v29  ;;  %v1564_v31 = vld [vmem:[%s10631_s5 + $0x9f0] sm:$0xff] }
  0x63   : > { %1563 = vst [vmem:[%s10636_s6 + $0x4f0] sm:$0xff] %v1562_v30  ;;  %v1566_v32 = vld [vmem:[%s10631_s5 + $0xa00] sm:$0xff]  ;;  %v1568_v33 = vld [vmem:[%s10631_s5 + $0xa10] sm:$0xff]  ;;  %1565 = vst [vmem:[%s10636_s6 + $0x4f8] sm:$0xff] %v1564_v31 }
  0x64   : > { %1567 = vst [vmem:[%s10636_s6 + $0x500] sm:$0xff] %v1566_v32  ;;  %1569 = vst [vmem:[%s10636_s6 + $0x508] sm:$0xff] %v1568_v33  ;;  %v1570_v34 = vld [vmem:[%s10631_s5 + $0xa20] sm:$0xff]  ;;  %v1572_v35 = vld [vmem:[%s10631_s5 + $0xa30] sm:$0xff] }
  0x65   : > { %v1574_v36 = vld [vmem:[%s10631_s5 + $0xa40] sm:$0xff]  ;;  %1571 = vst [vmem:[%s10636_s6 + $0x510] sm:$0xff] %v1570_v34  ;;  %1573 = vst [vmem:[%s10636_s6 + $0x518] sm:$0xff] %v1572_v35  ;;  %v1576_v37 = vld [vmem:[%s10631_s5 + $0xa50] sm:$0xff] }
  0x66   : > { %1575 = vst [vmem:[%s10636_s6 + $0x520] sm:$0xff] %v1574_v36  ;;  %v1578_v38 = vld [vmem:[%s10631_s5 + $0xa60] sm:$0xff]  ;;  %v1580_v39 = vld [vmem:[%s10631_s5 + $0xa70] sm:$0xff]  ;;  %1577 = vst [vmem:[%s10636_s6 + $0x528] sm:$0xff] %v1576_v37 }
  0x67   : > { %1579 = vst [vmem:[%s10636_s6 + $0x530] sm:$0xff] %v1578_v38  ;;  %1581 = vst [vmem:[%s10636_s6 + $0x538] sm:$0xff] %v1580_v39  ;;  %v1582_v40 = vld [vmem:[%s10631_s5 + $0xa80] sm:$0xff]  ;;  %v1584_v41 = vld [vmem:[%s10631_s5 + $0xa90] sm:$0xff] }
  0x68   : > { %v1586_v42 = vld [vmem:[%s10631_s5 + $0xaa0] sm:$0xff]  ;;  %1583 = vst [vmem:[%s10636_s6 + $0x540] sm:$0xff] %v1582_v40  ;;  %1585 = vst [vmem:[%s10636_s6 + $0x548] sm:$0xff] %v1584_v41  ;;  %v1588_v43 = vld [vmem:[%s10631_s5 + $0xab0] sm:$0xff] }
  0x69   : > { %1587 = vst [vmem:[%s10636_s6 + $0x550] sm:$0xff] %v1586_v42  ;;  %v1590_v44 = vld [vmem:[%s10631_s5 + $0xac0] sm:$0xff]  ;;  %v1592_v45 = vld [vmem:[%s10631_s5 + $0xad0] sm:$0xff]  ;;  %1589 = vst [vmem:[%s10636_s6 + $0x558] sm:$0xff] %v1588_v43 }
  0x6a   : > { %1591 = vst [vmem:[%s10636_s6 + $0x560] sm:$0xff] %v1590_v44  ;;  %1593 = vst [vmem:[%s10636_s6 + $0x568] sm:$0xff] %v1592_v45  ;;  %v1594_v46 = vld [vmem:[%s10631_s5 + $0xae0] sm:$0xff]  ;;  %v1596_v47 = vld [vmem:[%s10631_s5 + $0xaf0] sm:$0xff] }
  0x6b   : > { %v1598_v48 = vld [vmem:[%s10631_s5 + $0xb00] sm:$0xff]  ;;  %1595 = vst [vmem:[%s10636_s6 + $0x570] sm:$0xff] %v1594_v46  ;;  %1597 = vst [vmem:[%s10636_s6 + $0x578] sm:$0xff] %v1596_v47  ;;  %v1600_v49 = vld [vmem:[%s10631_s5 + $0xb10] sm:$0xff] }
  0x6c   : > { %1599 = vst [vmem:[%s10636_s6 + $0x580] sm:$0xff] %v1598_v48  ;;  %v1602_v50 = vld [vmem:[%s10631_s5 + $0xb20] sm:$0xff]  ;;  %v1604_v51 = vld [vmem:[%s10631_s5 + $0xb30] sm:$0xff]  ;;  %1601 = vst [vmem:[%s10636_s6 + $0x588] sm:$0xff] %v1600_v49 }
  0x6d   : > { %1603 = vst [vmem:[%s10636_s6 + $0x590] sm:$0xff] %v1602_v50  ;;  %1605 = vst [vmem:[%s10636_s6 + $0x598] sm:$0xff] %v1604_v51  ;;  %v1606_v52 = vld [vmem:[%s10631_s5 + $0xb40] sm:$0xff]  ;;  %v1608_v53 = vld [vmem:[%s10631_s5 + $0xb50] sm:$0xff] }
  0x6e   : > { %v1610_v54 = vld [vmem:[%s10631_s5 + $0xb60] sm:$0xff]  ;;  %1607 = vst [vmem:[%s10636_s6 + $0x5a0] sm:$0xff] %v1606_v52  ;;  %1609 = vst [vmem:[%s10636_s6 + $0x5a8] sm:$0xff] %v1608_v53  ;;  %v1612_v55 = vld [vmem:[%s10631_s5 + $0xb70] sm:$0xff] }
  0x6f   : > { %1611 = vst [vmem:[%s10636_s6 + $0x5b0] sm:$0xff] %v1610_v54  ;;  %v1614_v56 = vld [vmem:[%s10631_s5 + $0xb80] sm:$0xff]  ;;  %v1616_v57 = vld [vmem:[%s10631_s5 + $0xb90] sm:$0xff]  ;;  %1613 = vst [vmem:[%s10636_s6 + $0x5b8] sm:$0xff] %v1612_v55 }
  0x70   : > { %1615 = vst [vmem:[%s10636_s6 + $0x5c0] sm:$0xff] %v1614_v56  ;;  %1617 = vst [vmem:[%s10636_s6 + $0x5c8] sm:$0xff] %v1616_v57  ;;  %v1618_v58 = vld [vmem:[%s10631_s5 + $0xba0] sm:$0xff]  ;;  %v1620_v59 = vld [vmem:[%s10631_s5 + $0xbb0] sm:$0xff] }
  0x71   : > { %v1622_v60 = vld [vmem:[%s10631_s5 + $0xbc0] sm:$0xff]  ;;  %1619 = vst [vmem:[%s10636_s6 + $0x5d0] sm:$0xff] %v1618_v58  ;;  %1621 = vst [vmem:[%s10636_s6 + $0x5d8] sm:$0xff] %v1620_v59  ;;  %v1624_v61 = vld [vmem:[%s10631_s5 + $0xbd0] sm:$0xff] }
  0x72   : > { %1623 = vst [vmem:[%s10636_s6 + $0x5e0] sm:$0xff] %v1622_v60  ;;  %v1626_v62 = vld [vmem:[%s10631_s5 + $0xbe0] sm:$0xff]  ;;  %v1628_v63 = vld [vmem:[%s10631_s5 + $0xbf0] sm:$0xff]  ;;  %1625 = vst [vmem:[%s10636_s6 + $0x5e8] sm:$0xff] %v1624_v61 }
  0x73   : > { %1627 = vst [vmem:[%s10636_s6 + $0x5f0] sm:$0xff] %v1626_v62  ;;  %1629 = vst [vmem:[%s10636_s6 + $0x5f8] sm:$0xff] %v1628_v63  ;;  %v1630_v0 = vld [vmem:[%s10631_s5 + $0xc00] sm:$0xff]  ;;  %v1632_v1 = vld [vmem:[%s10631_s5 + $0xc10] sm:$0xff] }
  0x74   : > { %v1634_v2 = vld [vmem:[%s10631_s5 + $0xc20] sm:$0xff]  ;;  %1631 = vst [vmem:[%s10636_s6 + $0x600] sm:$0xff] %v1630_v0  ;;  %1633 = vst [vmem:[%s10636_s6 + $0x608] sm:$0xff] %v1632_v1  ;;  %v1636_v3 = vld [vmem:[%s10631_s5 + $0xc30] sm:$0xff] }
  0x75   : > { %1635 = vst [vmem:[%s10636_s6 + $0x610] sm:$0xff] %v1634_v2  ;;  %v1638_v4 = vld [vmem:[%s10631_s5 + $0xc40] sm:$0xff]  ;;  %v1640_v5 = vld [vmem:[%s10631_s5 + $0xc50] sm:$0xff]  ;;  %1637 = vst [vmem:[%s10636_s6 + $0x618] sm:$0xff] %v1636_v3 }
  0x76   : > { %1639 = vst [vmem:[%s10636_s6 + $0x620] sm:$0xff] %v1638_v4  ;;  %1641 = vst [vmem:[%s10636_s6 + $0x628] sm:$0xff] %v1640_v5  ;;  %v1642_v6 = vld [vmem:[%s10631_s5 + $0xc60] sm:$0xff]  ;;  %v1644_v7 = vld [vmem:[%s10631_s5 + $0xc70] sm:$0xff] }
  0x77   : > { %v1646_v8 = vld [vmem:[%s10631_s5 + $0xc80] sm:$0xff]  ;;  %1643 = vst [vmem:[%s10636_s6 + $0x630] sm:$0xff] %v1642_v6  ;;  %1645 = vst [vmem:[%s10636_s6 + $0x638] sm:$0xff] %v1644_v7  ;;  %v1648_v9 = vld [vmem:[%s10631_s5 + $0xc90] sm:$0xff] }
  0x78   : > { %1647 = vst [vmem:[%s10636_s6 + $0x640] sm:$0xff] %v1646_v8  ;;  %v1650_v10 = vld [vmem:[%s10631_s5 + $0xca0] sm:$0xff]  ;;  %v1652_v11 = vld [vmem:[%s10631_s5 + $0xcb0] sm:$0xff]  ;;  %1649 = vst [vmem:[%s10636_s6 + $0x648] sm:$0xff] %v1648_v9 }
  0x79   : > { %1651 = vst [vmem:[%s10636_s6 + $0x650] sm:$0xff] %v1650_v10  ;;  %1653 = vst [vmem:[%s10636_s6 + $0x658] sm:$0xff] %v1652_v11  ;;  %v1654_v12 = vld [vmem:[%s10631_s5 + $0xcc0] sm:$0xff]  ;;  %v1656_v13 = vld [vmem:[%s10631_s5 + $0xcd0] sm:$0xff] }
  0x7a   : > { %v1658_v14 = vld [vmem:[%s10631_s5 + $0xce0] sm:$0xff]  ;;  %1655 = vst [vmem:[%s10636_s6 + $0x660] sm:$0xff] %v1654_v12  ;;  %1657 = vst [vmem:[%s10636_s6 + $0x668] sm:$0xff] %v1656_v13  ;;  %v1660_v15 = vld [vmem:[%s10631_s5 + $0xcf0] sm:$0xff] }
  0x7b   : > { %1659 = vst [vmem:[%s10636_s6 + $0x670] sm:$0xff] %v1658_v14  ;;  %v1662_v16 = vld [vmem:[%s10631_s5 + $0xd00] sm:$0xff]  ;;  %v1664_v17 = vld [vmem:[%s10631_s5 + $0xd10] sm:$0xff]  ;;  %1661 = vst [vmem:[%s10636_s6 + $0x678] sm:$0xff] %v1660_v15 }
  0x7c   : > { %1663 = vst [vmem:[%s10636_s6 + $0x680] sm:$0xff] %v1662_v16  ;;  %1665 = vst [vmem:[%s10636_s6 + $0x688] sm:$0xff] %v1664_v17  ;;  %v1666_v18 = vld [vmem:[%s10631_s5 + $0xd20] sm:$0xff]  ;;  %v1668_v19 = vld [vmem:[%s10631_s5 + $0xd30] sm:$0xff] }
  0x7d   : > { %v1670_v20 = vld [vmem:[%s10631_s5 + $0xd40] sm:$0xff]  ;;  %1667 = vst [vmem:[%s10636_s6 + $0x690] sm:$0xff] %v1666_v18  ;;  %1669 = vst [vmem:[%s10636_s6 + $0x698] sm:$0xff] %v1668_v19  ;;  %v1672_v21 = vld [vmem:[%s10631_s5 + $0xd50] sm:$0xff] }
  0x7e   : > { %1671 = vst [vmem:[%s10636_s6 + $0x6a0] sm:$0xff] %v1670_v20  ;;  %v1674_v22 = vld [vmem:[%s10631_s5 + $0xd60] sm:$0xff]  ;;  %v1676_v23 = vld [vmem:[%s10631_s5 + $0xd70] sm:$0xff]  ;;  %1673 = vst [vmem:[%s10636_s6 + $0x6a8] sm:$0xff] %v1672_v21 }
  0x7f   : > { %1675 = vst [vmem:[%s10636_s6 + $0x6b0] sm:$0xff] %v1674_v22  ;;  %1677 = vst [vmem:[%s10636_s6 + $0x6b8] sm:$0xff] %v1676_v23  ;;  %v1678_v24 = vld [vmem:[%s10631_s5 + $0xd80] sm:$0xff]  ;;  %v1680_v25 = vld [vmem:[%s10631_s5 + $0xd90] sm:$0xff] }
  0x80   : > { %v1682_v26 = vld [vmem:[%s10631_s5 + $0xda0] sm:$0xff]  ;;  %1679 = vst [vmem:[%s10636_s6 + $0x6c0] sm:$0xff] %v1678_v24  ;;  %1681 = vst [vmem:[%s10636_s6 + $0x6c8] sm:$0xff] %v1680_v25  ;;  %v1684_v27 = vld [vmem:[%s10631_s5 + $0xdb0] sm:$0xff] }
  0x81   : > { %1683 = vst [vmem:[%s10636_s6 + $0x6d0] sm:$0xff] %v1682_v26  ;;  %v1686_v28 = vld [vmem:[%s10631_s5 + $0xdc0] sm:$0xff]  ;;  %v1688_v29 = vld [vmem:[%s10631_s5 + $0xdd0] sm:$0xff]  ;;  %1685 = vst [vmem:[%s10636_s6 + $0x6d8] sm:$0xff] %v1684_v27 }
  0x82   : > { %1687 = vst [vmem:[%s10636_s6 + $0x6e0] sm:$0xff] %v1686_v28  ;;  %1689 = vst [vmem:[%s10636_s6 + $0x6e8] sm:$0xff] %v1688_v29  ;;  %v1690_v30 = vld [vmem:[%s10631_s5 + $0xde0] sm:$0xff]  ;;  %v1692_v31 = vld [vmem:[%s10631_s5 + $0xdf0] sm:$0xff] }
  0x83   : > { %v1694_v32 = vld [vmem:[%s10631_s5 + $0xe00] sm:$0xff]  ;;  %1691 = vst [vmem:[%s10636_s6 + $0x6f0] sm:$0xff] %v1690_v30  ;;  %1693 = vst [vmem:[%s10636_s6 + $0x6f8] sm:$0xff] %v1692_v31  ;;  %v1696_v33 = vld [vmem:[%s10631_s5 + $0xe10] sm:$0xff] }
  0x84   : > { %1695 = vst [vmem:[%s10636_s6 + $0x700] sm:$0xff] %v1694_v32  ;;  %v1698_v34 = vld [vmem:[%s10631_s5 + $0xe20] sm:$0xff]  ;;  %v1700_v35 = vld [vmem:[%s10631_s5 + $0xe30] sm:$0xff]  ;;  %1697 = vst [vmem:[%s10636_s6 + $0x708] sm:$0xff] %v1696_v33 }
  0x85   : > { %1699 = vst [vmem:[%s10636_s6 + $0x710] sm:$0xff] %v1698_v34  ;;  %1701 = vst [vmem:[%s10636_s6 + $0x718] sm:$0xff] %v1700_v35  ;;  %v1702_v36 = vld [vmem:[%s10631_s5 + $0xe40] sm:$0xff]  ;;  %v1704_v37 = vld [vmem:[%s10631_s5 + $0xe50] sm:$0xff] }
  0x86   : > { %v1706_v38 = vld [vmem:[%s10631_s5 + $0xe60] sm:$0xff]  ;;  %1703 = vst [vmem:[%s10636_s6 + $0x720] sm:$0xff] %v1702_v36  ;;  %1705 = vst [vmem:[%s10636_s6 + $0x728] sm:$0xff] %v1704_v37  ;;  %v1708_v39 = vld [vmem:[%s10631_s5 + $0xe70] sm:$0xff] }
  0x87   : > { %1707 = vst [vmem:[%s10636_s6 + $0x730] sm:$0xff] %v1706_v38  ;;  %v1710_v40 = vld [vmem:[%s10631_s5 + $0xe80] sm:$0xff]  ;;  %v1712_v41 = vld [vmem:[%s10631_s5 + $0xe90] sm:$0xff]  ;;  %1709 = vst [vmem:[%s10636_s6 + $0x738] sm:$0xff] %v1708_v39 }
  0x88   : > { %1711 = vst [vmem:[%s10636_s6 + $0x740] sm:$0xff] %v1710_v40  ;;  %1713 = vst [vmem:[%s10636_s6 + $0x748] sm:$0xff] %v1712_v41  ;;  %v1714_v42 = vld [vmem:[%s10631_s5 + $0xea0] sm:$0xff]  ;;  %v1716_v43 = vld [vmem:[%s10631_s5 + $0xeb0] sm:$0xff] }
  0x89   : > { %v1718_v44 = vld [vmem:[%s10631_s5 + $0xec0] sm:$0xff]  ;;  %1715 = vst [vmem:[%s10636_s6 + $0x750] sm:$0xff] %v1714_v42  ;;  %1717 = vst [vmem:[%s10636_s6 + $0x758] sm:$0xff] %v1716_v43  ;;  %v1720_v45 = vld [vmem:[%s10631_s5 + $0xed0] sm:$0xff] }
  0x8a   : > { %1719 = vst [vmem:[%s10636_s6 + $0x760] sm:$0xff] %v1718_v44  ;;  %v1722_v46 = vld [vmem:[%s10631_s5 + $0xee0] sm:$0xff]  ;;  %v1724_v47 = vld [vmem:[%s10631_s5 + $0xef0] sm:$0xff]  ;;  %1721 = vst [vmem:[%s10636_s6 + $0x768] sm:$0xff] %v1720_v45 }
  0x8b   : > { %1723 = vst [vmem:[%s10636_s6 + $0x770] sm:$0xff] %v1722_v46  ;;  %1725 = vst [vmem:[%s10636_s6 + $0x778] sm:$0xff] %v1724_v47  ;;  %v1726_v48 = vld [vmem:[%s10631_s5 + $0xf00] sm:$0xff]  ;;  %v1728_v49 = vld [vmem:[%s10631_s5 + $0xf10] sm:$0xff] }
  0x8c   : > { %v1730_v50 = vld [vmem:[%s10631_s5 + $0xf20] sm:$0xff]  ;;  %1727 = vst [vmem:[%s10636_s6 + $0x780] sm:$0xff] %v1726_v48  ;;  %1729 = vst [vmem:[%s10636_s6 + $0x788] sm:$0xff] %v1728_v49  ;;  %v1732_v51 = vld [vmem:[%s10631_s5 + $0xf30] sm:$0xff] }
  0x8d   : > { %1731 = vst [vmem:[%s10636_s6 + $0x790] sm:$0xff] %v1730_v50  ;;  %v1734_v52 = vld [vmem:[%s10631_s5 + $0xf40] sm:$0xff]  ;;  %v1736_v53 = vld [vmem:[%s10631_s5 + $0xf50] sm:$0xff]  ;;  %1733 = vst [vmem:[%s10636_s6 + $0x798] sm:$0xff] %v1732_v51 }
  0x8e   : > { %1735 = vst [vmem:[%s10636_s6 + $0x7a0] sm:$0xff] %v1734_v52  ;;  %1737 = vst [vmem:[%s10636_s6 + $0x7a8] sm:$0xff] %v1736_v53  ;;  %v1738_v54 = vld [vmem:[%s10631_s5 + $0xf60] sm:$0xff]  ;;  %v1740_v55 = vld [vmem:[%s10631_s5 + $0xf70] sm:$0xff] }
  0x8f   : > { %v1742_v56 = vld [vmem:[%s10631_s5 + $0xf80] sm:$0xff]  ;;  %1739 = vst [vmem:[%s10636_s6 + $0x7b0] sm:$0xff] %v1738_v54  ;;  %1741 = vst [vmem:[%s10636_s6 + $0x7b8] sm:$0xff] %v1740_v55  ;;  %v1744_v57 = vld [vmem:[%s10631_s5 + $0xf90] sm:$0xff] }
  0x90   : > { %1743 = vst [vmem:[%s10636_s6 + $0x7c0] sm:$0xff] %v1742_v56  ;;  %v1746_v58 = vld [vmem:[%s10631_s5 + $0xfa0] sm:$0xff]  ;;  %v1748_v59 = vld [vmem:[%s10631_s5 + $0xfb0] sm:$0xff]  ;;  %1745 = vst [vmem:[%s10636_s6 + $0x7c8] sm:$0xff] %v1744_v57 }
  0x91   : > { %1747 = vst [vmem:[%s10636_s6 + $0x7d0] sm:$0xff] %v1746_v58  ;;  %1749 = vst [vmem:[%s10636_s6 + $0x7d8] sm:$0xff] %v1748_v59  ;;  %v1750_v60 = vld [vmem:[%s10631_s5 + $0xfc0] sm:$0xff]  ;;  %v1752_v61 = vld [vmem:[%s10631_s5 + $0xfd0] sm:$0xff] }
  0x92   : > { %v1754_v62 = vld [vmem:[%s10631_s5 + $0xfe0] sm:$0xff]  ;;  %1751 = vst [vmem:[%s10636_s6 + $0x7e0] sm:$0xff] %v1750_v60  ;;  %1753 = vst [vmem:[%s10636_s6 + $0x7e8] sm:$0xff] %v1752_v61  ;;  %v1756_v63 = vld [vmem:[%s10631_s5 + $0xff0] sm:$0xff] }
  0x93   : > { %1755 = vst [vmem:[%s10636_s6 + $0x7f0] sm:$0xff] %v1754_v62  ;;  %v1758_v0 = vld [vmem:[%s10631_s5 + $0x1000] sm:$0xff]  ;;  %v1760_v1 = vld [vmem:[%s10631_s5 + $0x1010] sm:$0xff]  ;;  %1757 = vst [vmem:[%s10636_s6 + $0x7f8] sm:$0xff] %v1756_v63 }
  0x94   : > { %1759 = vst [vmem:[%s10636_s6 + $0x800] sm:$0xff] %v1758_v0  ;;  %1761 = vst [vmem:[%s10636_s6 + $0x808] sm:$0xff] %v1760_v1  ;;  %v1762_v2 = vld [vmem:[%s10631_s5 + $0x1020] sm:$0xff]  ;;  %v1764_v3 = vld [vmem:[%s10631_s5 + $0x1030] sm:$0xff] }
  0x95   : > { %v1766_v4 = vld [vmem:[%s10631_s5 + $0x1040] sm:$0xff]  ;;  %1763 = vst [vmem:[%s10636_s6 + $0x810] sm:$0xff] %v1762_v2  ;;  %1765 = vst [vmem:[%s10636_s6 + $0x818] sm:$0xff] %v1764_v3  ;;  %v1768_v5 = vld [vmem:[%s10631_s5 + $0x1050] sm:$0xff] }
  0x96   : > { %1767 = vst [vmem:[%s10636_s6 + $0x820] sm:$0xff] %v1766_v4  ;;  %v1770_v6 = vld [vmem:[%s10631_s5 + $0x1060] sm:$0xff]  ;;  %v1772_v7 = vld [vmem:[%s10631_s5 + $0x1070] sm:$0xff]  ;;  %1769 = vst [vmem:[%s10636_s6 + $0x828] sm:$0xff] %v1768_v5 }
  0x97   : > { %1771 = vst [vmem:[%s10636_s6 + $0x830] sm:$0xff] %v1770_v6  ;;  %1773 = vst [vmem:[%s10636_s6 + $0x838] sm:$0xff] %v1772_v7  ;;  %v1774_v8 = vld [vmem:[%s10631_s5 + $0x1080] sm:$0xff]  ;;  %v1776_v9 = vld [vmem:[%s10631_s5 + $0x1090] sm:$0xff] }
  0x98   : > { %v1778_v10 = vld [vmem:[%s10631_s5 + $0x10a0] sm:$0xff]  ;;  %1775 = vst [vmem:[%s10636_s6 + $0x840] sm:$0xff] %v1774_v8  ;;  %1777 = vst [vmem:[%s10636_s6 + $0x848] sm:$0xff] %v1776_v9  ;;  %v1780_v11 = vld [vmem:[%s10631_s5 + $0x10b0] sm:$0xff] }
  0x99   : > { %1779 = vst [vmem:[%s10636_s6 + $0x850] sm:$0xff] %v1778_v10  ;;  %v1782_v12 = vld [vmem:[%s10631_s5 + $0x10c0] sm:$0xff]  ;;  %v1784_v13 = vld [vmem:[%s10631_s5 + $0x10d0] sm:$0xff]  ;;  %1781 = vst [vmem:[%s10636_s6 + $0x858] sm:$0xff] %v1780_v11 }
  0x9a   : > { %1783 = vst [vmem:[%s10636_s6 + $0x860] sm:$0xff] %v1782_v12  ;;  %1785 = vst [vmem:[%s10636_s6 + $0x868] sm:$0xff] %v1784_v13  ;;  %v1786_v14 = vld [vmem:[%s10631_s5 + $0x10e0] sm:$0xff]  ;;  %v1788_v15 = vld [vmem:[%s10631_s5 + $0x10f0] sm:$0xff] }
  0x9b   : > { %v1790_v16 = vld [vmem:[%s10631_s5 + $0x1100] sm:$0xff]  ;;  %1787 = vst [vmem:[%s10636_s6 + $0x870] sm:$0xff] %v1786_v14  ;;  %1789 = vst [vmem:[%s10636_s6 + $0x878] sm:$0xff] %v1788_v15  ;;  %v1792_v17 = vld [vmem:[%s10631_s5 + $0x1110] sm:$0xff] }
  0x9c   : > { %1791 = vst [vmem:[%s10636_s6 + $0x880] sm:$0xff] %v1790_v16  ;;  %v1794_v18 = vld [vmem:[%s10631_s5 + $0x1120] sm:$0xff]  ;;  %v1796_v19 = vld [vmem:[%s10631_s5 + $0x1130] sm:$0xff]  ;;  %1793 = vst [vmem:[%s10636_s6 + $0x888] sm:$0xff] %v1792_v17 }
  0x9d   : > { %1795 = vst [vmem:[%s10636_s6 + $0x890] sm:$0xff] %v1794_v18  ;;  %1797 = vst [vmem:[%s10636_s6 + $0x898] sm:$0xff] %v1796_v19  ;;  %v1798_v20 = vld [vmem:[%s10631_s5 + $0x1140] sm:$0xff]  ;;  %v1800_v21 = vld [vmem:[%s10631_s5 + $0x1150] sm:$0xff] }
  0x9e   : > { %v1802_v22 = vld [vmem:[%s10631_s5 + $0x1160] sm:$0xff]  ;;  %1799 = vst [vmem:[%s10636_s6 + $0x8a0] sm:$0xff] %v1798_v20  ;;  %1801 = vst [vmem:[%s10636_s6 + $0x8a8] sm:$0xff] %v1800_v21  ;;  %v1804_v23 = vld [vmem:[%s10631_s5 + $0x1170] sm:$0xff] }
  0x9f   : > { %1803 = vst [vmem:[%s10636_s6 + $0x8b0] sm:$0xff] %v1802_v22  ;;  %v1806_v24 = vld [vmem:[%s10631_s5 + $0x1180] sm:$0xff]  ;;  %v1808_v25 = vld [vmem:[%s10631_s5 + $0x1190] sm:$0xff]  ;;  %1805 = vst [vmem:[%s10636_s6 + $0x8b8] sm:$0xff] %v1804_v23 }
  0xa0   : > { %1807 = vst [vmem:[%s10636_s6 + $0x8c0] sm:$0xff] %v1806_v24  ;;  %1809 = vst [vmem:[%s10636_s6 + $0x8c8] sm:$0xff] %v1808_v25  ;;  %v1810_v26 = vld [vmem:[%s10631_s5 + $0x11a0] sm:$0xff]  ;;  %v1812_v27 = vld [vmem:[%s10631_s5 + $0x11b0] sm:$0xff] }
  0xa1   : > { %v1814_v28 = vld [vmem:[%s10631_s5 + $0x11c0] sm:$0xff]  ;;  %1811 = vst [vmem:[%s10636_s6 + $0x8d0] sm:$0xff] %v1810_v26  ;;  %1813 = vst [vmem:[%s10636_s6 + $0x8d8] sm:$0xff] %v1812_v27  ;;  %v1816_v29 = vld [vmem:[%s10631_s5 + $0x11d0] sm:$0xff] }
  0xa2   : > { %1815 = vst [vmem:[%s10636_s6 + $0x8e0] sm:$0xff] %v1814_v28  ;;  %v1818_v30 = vld [vmem:[%s10631_s5 + $0x11e0] sm:$0xff]  ;;  %v1820_v31 = vld [vmem:[%s10631_s5 + $0x11f0] sm:$0xff]  ;;  %1817 = vst [vmem:[%s10636_s6 + $0x8e8] sm:$0xff] %v1816_v29 }
  0xa3   : > { %1819 = vst [vmem:[%s10636_s6 + $0x8f0] sm:$0xff] %v1818_v30  ;;  %1821 = vst [vmem:[%s10636_s6 + $0x8f8] sm:$0xff] %v1820_v31  ;;  %v1822_v32 = vld [vmem:[%s10631_s5 + $0x1200] sm:$0xff]  ;;  %v1824_v33 = vld [vmem:[%s10631_s5 + $0x1210] sm:$0xff] }
  0xa4   : > { %v1826_v34 = vld [vmem:[%s10631_s5 + $0x1220] sm:$0xff]  ;;  %1823 = vst [vmem:[%s10636_s6 + $0x900] sm:$0xff] %v1822_v32  ;;  %1825 = vst [vmem:[%s10636_s6 + $0x908] sm:$0xff] %v1824_v33  ;;  %v1828_v35 = vld [vmem:[%s10631_s5 + $0x1230] sm:$0xff] }
  0xa5   : > { %1827 = vst [vmem:[%s10636_s6 + $0x910] sm:$0xff] %v1826_v34  ;;  %v1830_v36 = vld [vmem:[%s10631_s5 + $0x1240] sm:$0xff]  ;;  %v1832_v37 = vld [vmem:[%s10631_s5 + $0x1250] sm:$0xff]  ;;  %1829 = vst [vmem:[%s10636_s6 + $0x918] sm:$0xff] %v1828_v35 }
  0xa6   : > { %1831 = vst [vmem:[%s10636_s6 + $0x920] sm:$0xff] %v1830_v36  ;;  %1833 = vst [vmem:[%s10636_s6 + $0x928] sm:$0xff] %v1832_v37  ;;  %v1834_v38 = vld [vmem:[%s10631_s5 + $0x1260] sm:$0xff]  ;;  %v1836_v39 = vld [vmem:[%s10631_s5 + $0x1270] sm:$0xff] }
  0xa7   : > { %v1838_v40 = vld [vmem:[%s10631_s5 + $0x1280] sm:$0xff]  ;;  %1835 = vst [vmem:[%s10636_s6 + $0x930] sm:$0xff] %v1834_v38  ;;  %1837 = vst [vmem:[%s10636_s6 + $0x938] sm:$0xff] %v1836_v39  ;;  %v1840_v41 = vld [vmem:[%s10631_s5 + $0x1290] sm:$0xff] }
  0xa8   : > { %1839 = vst [vmem:[%s10636_s6 + $0x940] sm:$0xff] %v1838_v40  ;;  %v1842_v42 = vld [vmem:[%s10631_s5 + $0x12a0] sm:$0xff]  ;;  %v1844_v43 = vld [vmem:[%s10631_s5 + $0x12b0] sm:$0xff]  ;;  %1841 = vst [vmem:[%s10636_s6 + $0x948] sm:$0xff] %v1840_v41 }
  0xa9   : > { %1843 = vst [vmem:[%s10636_s6 + $0x950] sm:$0xff] %v1842_v42  ;;  %1845 = vst [vmem:[%s10636_s6 + $0x958] sm:$0xff] %v1844_v43  ;;  %v1846_v44 = vld [vmem:[%s10631_s5 + $0x12c0] sm:$0xff]  ;;  %v1848_v45 = vld [vmem:[%s10631_s5 + $0x12d0] sm:$0xff] }
  0xaa   : > { %v1850_v46 = vld [vmem:[%s10631_s5 + $0x12e0] sm:$0xff]  ;;  %1847 = vst [vmem:[%s10636_s6 + $0x960] sm:$0xff] %v1846_v44  ;;  %1849 = vst [vmem:[%s10636_s6 + $0x968] sm:$0xff] %v1848_v45  ;;  %v1852_v47 = vld [vmem:[%s10631_s5 + $0x12f0] sm:$0xff] }
  0xab   : > { %1851 = vst [vmem:[%s10636_s6 + $0x970] sm:$0xff] %v1850_v46  ;;  %v1854_v48 = vld [vmem:[%s10631_s5 + $0x1300] sm:$0xff]  ;;  %v1856_v49 = vld [vmem:[%s10631_s5 + $0x1310] sm:$0xff]  ;;  %1853 = vst [vmem:[%s10636_s6 + $0x978] sm:$0xff] %v1852_v47 }
  0xac   : > { %1855 = vst [vmem:[%s10636_s6 + $0x980] sm:$0xff] %v1854_v48  ;;  %1857 = vst [vmem:[%s10636_s6 + $0x988] sm:$0xff] %v1856_v49  ;;  %v1858_v50 = vld [vmem:[%s10631_s5 + $0x1320] sm:$0xff]  ;;  %v1860_v51 = vld [vmem:[%s10631_s5 + $0x1330] sm:$0xff] }
  0xad   : > { %v1862_v52 = vld [vmem:[%s10631_s5 + $0x1340] sm:$0xff]  ;;  %1859 = vst [vmem:[%s10636_s6 + $0x990] sm:$0xff] %v1858_v50  ;;  %1861 = vst [vmem:[%s10636_s6 + $0x998] sm:$0xff] %v1860_v51  ;;  %v1864_v53 = vld [vmem:[%s10631_s5 + $0x1350] sm:$0xff] }
  0xae   : > { %1863 = vst [vmem:[%s10636_s6 + $0x9a0] sm:$0xff] %v1862_v52  ;;  %v1866_v54 = vld [vmem:[%s10631_s5 + $0x1360] sm:$0xff]  ;;  %v1868_v55 = vld [vmem:[%s10631_s5 + $0x1370] sm:$0xff]  ;;  %1865 = vst [vmem:[%s10636_s6 + $0x9a8] sm:$0xff] %v1864_v53 }
  0xaf   : > { %1867 = vst [vmem:[%s10636_s6 + $0x9b0] sm:$0xff] %v1866_v54  ;;  %1869 = vst [vmem:[%s10636_s6 + $0x9b8] sm:$0xff] %v1868_v55  ;;  %v1870_v56 = vld [vmem:[%s10631_s5 + $0x1380] sm:$0xff]  ;;  %v1872_v57 = vld [vmem:[%s10631_s5 + $0x1390] sm:$0xff] }
  0xb0   : > { %v1874_v58 = vld [vmem:[%s10631_s5 + $0x13a0] sm:$0xff]  ;;  %1871 = vst [vmem:[%s10636_s6 + $0x9c0] sm:$0xff] %v1870_v56  ;;  %1873 = vst [vmem:[%s10636_s6 + $0x9c8] sm:$0xff] %v1872_v57  ;;  %v1876_v59 = vld [vmem:[%s10631_s5 + $0x13b0] sm:$0xff] }
  0xb1   : > { %1875 = vst [vmem:[%s10636_s6 + $0x9d0] sm:$0xff] %v1874_v58  ;;  %v1878_v60 = vld [vmem:[%s10631_s5 + $0x13c0] sm:$0xff]  ;;  %v1880_v61 = vld [vmem:[%s10631_s5 + $0x13d0] sm:$0xff]  ;;  %1877 = vst [vmem:[%s10636_s6 + $0x9d8] sm:$0xff] %v1876_v59 }
  0xb2   : > { %1879 = vst [vmem:[%s10636_s6 + $0x9e0] sm:$0xff] %v1878_v60  ;;  %1881 = vst [vmem:[%s10636_s6 + $0x9e8] sm:$0xff] %v1880_v61  ;;  %v1882_v62 = vld [vmem:[%s10631_s5 + $0x13e0] sm:$0xff]  ;;  %v1884_v63 = vld [vmem:[%s10631_s5 + $0x13f0] sm:$0xff] }
  0xb3   : > { %v1886_v0 = vld [vmem:[%s10631_s5 + $0x1400] sm:$0xff]  ;;  %1883 = vst [vmem:[%s10636_s6 + $0x9f0] sm:$0xff] %v1882_v62  ;;  %1885 = vst [vmem:[%s10636_s6 + $0x9f8] sm:$0xff] %v1884_v63  ;;  %v1888_v1 = vld [vmem:[%s10631_s5 + $0x1410] sm:$0xff] }
  0xb4   : > { %1887 = vst [vmem:[%s10636_s6 + $0xa00] sm:$0xff] %v1886_v0  ;;  %v1890_v2 = vld [vmem:[%s10631_s5 + $0x1420] sm:$0xff]  ;;  %v1892_v3 = vld [vmem:[%s10631_s5 + $0x1430] sm:$0xff]  ;;  %1889 = vst [vmem:[%s10636_s6 + $0xa08] sm:$0xff] %v1888_v1 }
  0xb5   : > { %1891 = vst [vmem:[%s10636_s6 + $0xa10] sm:$0xff] %v1890_v2  ;;  %1893 = vst [vmem:[%s10636_s6 + $0xa18] sm:$0xff] %v1892_v3  ;;  %v1894_v4 = vld [vmem:[%s10631_s5 + $0x1440] sm:$0xff]  ;;  %v1896_v5 = vld [vmem:[%s10631_s5 + $0x1450] sm:$0xff] }
  0xb6   : > { %v1898_v6 = vld [vmem:[%s10631_s5 + $0x1460] sm:$0xff]  ;;  %1895 = vst [vmem:[%s10636_s6 + $0xa20] sm:$0xff] %v1894_v4  ;;  %1897 = vst [vmem:[%s10636_s6 + $0xa28] sm:$0xff] %v1896_v5  ;;  %v1900_v7 = vld [vmem:[%s10631_s5 + $0x1470] sm:$0xff] }
  0xb7   : > { %1899 = vst [vmem:[%s10636_s6 + $0xa30] sm:$0xff] %v1898_v6  ;;  %v1902_v8 = vld [vmem:[%s10631_s5 + $0x1480] sm:$0xff]  ;;  %v1904_v9 = vld [vmem:[%s10631_s5 + $0x1490] sm:$0xff]  ;;  %1901 = vst [vmem:[%s10636_s6 + $0xa38] sm:$0xff] %v1900_v7 }
  0xb8   : > { %1903 = vst [vmem:[%s10636_s6 + $0xa40] sm:$0xff] %v1902_v8  ;;  %1905 = vst [vmem:[%s10636_s6 + $0xa48] sm:$0xff] %v1904_v9  ;;  %v1906_v10 = vld [vmem:[%s10631_s5 + $0x14a0] sm:$0xff]  ;;  %v1908_v11 = vld [vmem:[%s10631_s5 + $0x14b0] sm:$0xff] }
  0xb9   : > { %v1910_v12 = vld [vmem:[%s10631_s5 + $0x14c0] sm:$0xff]  ;;  %1907 = vst [vmem:[%s10636_s6 + $0xa50] sm:$0xff] %v1906_v10  ;;  %1909 = vst [vmem:[%s10636_s6 + $0xa58] sm:$0xff] %v1908_v11  ;;  %v1912_v13 = vld [vmem:[%s10631_s5 + $0x14d0] sm:$0xff] }
  0xba   : > { %1911 = vst [vmem:[%s10636_s6 + $0xa60] sm:$0xff] %v1910_v12  ;;  %v1914_v14 = vld [vmem:[%s10631_s5 + $0x14e0] sm:$0xff]  ;;  %v1916_v15 = vld [vmem:[%s10631_s5 + $0x14f0] sm:$0xff]  ;;  %1913 = vst [vmem:[%s10636_s6 + $0xa68] sm:$0xff] %v1912_v13 }
  0xbb   : > { %1915 = vst [vmem:[%s10636_s6 + $0xa70] sm:$0xff] %v1914_v14  ;;  %1917 = vst [vmem:[%s10636_s6 + $0xa78] sm:$0xff] %v1916_v15  ;;  %v1918_v16 = vld [vmem:[%s10631_s5 + $0x1500] sm:$0xff]  ;;  %v1920_v17 = vld [vmem:[%s10631_s5 + $0x1510] sm:$0xff] }
  0xbc   : > { %v1922_v18 = vld [vmem:[%s10631_s5 + $0x1520] sm:$0xff]  ;;  %1919 = vst [vmem:[%s10636_s6 + $0xa80] sm:$0xff] %v1918_v16  ;;  %1921 = vst [vmem:[%s10636_s6 + $0xa88] sm:$0xff] %v1920_v17  ;;  %v1924_v19 = vld [vmem:[%s10631_s5 + $0x1530] sm:$0xff] }
  0xbd   : > { %1923 = vst [vmem:[%s10636_s6 + $0xa90] sm:$0xff] %v1922_v18  ;;  %v1926_v20 = vld [vmem:[%s10631_s5 + $0x1540] sm:$0xff]  ;;  %v1928_v21 = vld [vmem:[%s10631_s5 + $0x1550] sm:$0xff]  ;;  %1925 = vst [vmem:[%s10636_s6 + $0xa98] sm:$0xff] %v1924_v19 }
  0xbe   : > { %1927 = vst [vmem:[%s10636_s6 + $0xaa0] sm:$0xff] %v1926_v20  ;;  %1929 = vst [vmem:[%s10636_s6 + $0xaa8] sm:$0xff] %v1928_v21  ;;  %v1930_v22 = vld [vmem:[%s10631_s5 + $0x1560] sm:$0xff]  ;;  %v1932_v23 = vld [vmem:[%s10631_s5 + $0x1570] sm:$0xff] }
  0xbf   : > { %v1934_v24 = vld [vmem:[%s10631_s5 + $0x1580] sm:$0xff]  ;;  %1931 = vst [vmem:[%s10636_s6 + $0xab0] sm:$0xff] %v1930_v22  ;;  %1933 = vst [vmem:[%s10636_s6 + $0xab8] sm:$0xff] %v1932_v23  ;;  %v1936_v25 = vld [vmem:[%s10631_s5 + $0x1590] sm:$0xff] }
  0xc0   : > { %1935 = vst [vmem:[%s10636_s6 + $0xac0] sm:$0xff] %v1934_v24  ;;  %v1938_v26 = vld [vmem:[%s10631_s5 + $0x15a0] sm:$0xff]  ;;  %v1940_v27 = vld [vmem:[%s10631_s5 + $0x15b0] sm:$0xff]  ;;  %1937 = vst [vmem:[%s10636_s6 + $0xac8] sm:$0xff] %v1936_v25 }
  0xc1   : > { %1939 = vst [vmem:[%s10636_s6 + $0xad0] sm:$0xff] %v1938_v26  ;;  %1941 = vst [vmem:[%s10636_s6 + $0xad8] sm:$0xff] %v1940_v27  ;;  %v1942_v28 = vld [vmem:[%s10631_s5 + $0x15c0] sm:$0xff]  ;;  %v1944_v29 = vld [vmem:[%s10631_s5 + $0x15d0] sm:$0xff] }
  0xc2   : > { %v1946_v30 = vld [vmem:[%s10631_s5 + $0x15e0] sm:$0xff]  ;;  %1943 = vst [vmem:[%s10636_s6 + $0xae0] sm:$0xff] %v1942_v28  ;;  %1945 = vst [vmem:[%s10636_s6 + $0xae8] sm:$0xff] %v1944_v29  ;;  %v1948_v31 = vld [vmem:[%s10631_s5 + $0x15f0] sm:$0xff] }
  0xc3   : > { %1947 = vst [vmem:[%s10636_s6 + $0xaf0] sm:$0xff] %v1946_v30  ;;  %v1950_v32 = vld [vmem:[%s10631_s5 + $0x1600] sm:$0xff]  ;;  %v1952_v33 = vld [vmem:[%s10631_s5 + $0x1610] sm:$0xff]  ;;  %1949 = vst [vmem:[%s10636_s6 + $0xaf8] sm:$0xff] %v1948_v31 }
  0xc4   : > { %1951 = vst [vmem:[%s10636_s6 + $0xb00] sm:$0xff] %v1950_v32  ;;  %1953 = vst [vmem:[%s10636_s6 + $0xb08] sm:$0xff] %v1952_v33  ;;  %v1954_v34 = vld [vmem:[%s10631_s5 + $0x1620] sm:$0xff]  ;;  %v1956_v35 = vld [vmem:[%s10631_s5 + $0x1630] sm:$0xff] }
  0xc5   : > { %v1958_v36 = vld [vmem:[%s10631_s5 + $0x1640] sm:$0xff]  ;;  %1955 = vst [vmem:[%s10636_s6 + $0xb10] sm:$0xff] %v1954_v34  ;;  %1957 = vst [vmem:[%s10636_s6 + $0xb18] sm:$0xff] %v1956_v35  ;;  %v1960_v37 = vld [vmem:[%s10631_s5 + $0x1650] sm:$0xff] }
  0xc6   : > { %1959 = vst [vmem:[%s10636_s6 + $0xb20] sm:$0xff] %v1958_v36  ;;  %v1962_v38 = vld [vmem:[%s10631_s5 + $0x1660] sm:$0xff]  ;;  %v1964_v39 = vld [vmem:[%s10631_s5 + $0x1670] sm:$0xff]  ;;  %1961 = vst [vmem:[%s10636_s6 + $0xb28] sm:$0xff] %v1960_v37 }
  0xc7   : > { %1963 = vst [vmem:[%s10636_s6 + $0xb30] sm:$0xff] %v1962_v38  ;;  %1965 = vst [vmem:[%s10636_s6 + $0xb38] sm:$0xff] %v1964_v39  ;;  %v1966_v40 = vld [vmem:[%s10631_s5 + $0x1680] sm:$0xff]  ;;  %v1968_v41 = vld [vmem:[%s10631_s5 + $0x1690] sm:$0xff] }
  0xc8   : > { %v1970_v42 = vld [vmem:[%s10631_s5 + $0x16a0] sm:$0xff]  ;;  %1967 = vst [vmem:[%s10636_s6 + $0xb40] sm:$0xff] %v1966_v40  ;;  %1969 = vst [vmem:[%s10636_s6 + $0xb48] sm:$0xff] %v1968_v41  ;;  %v1972_v43 = vld [vmem:[%s10631_s5 + $0x16b0] sm:$0xff] }
  0xc9   : > { %1971 = vst [vmem:[%s10636_s6 + $0xb50] sm:$0xff] %v1970_v42  ;;  %v1974_v44 = vld [vmem:[%s10631_s5 + $0x16c0] sm:$0xff]  ;;  %v1976_v45 = vld [vmem:[%s10631_s5 + $0x16d0] sm:$0xff]  ;;  %1973 = vst [vmem:[%s10636_s6 + $0xb58] sm:$0xff] %v1972_v43 }
  0xca   : > { %1975 = vst [vmem:[%s10636_s6 + $0xb60] sm:$0xff] %v1974_v44  ;;  %1977 = vst [vmem:[%s10636_s6 + $0xb68] sm:$0xff] %v1976_v45  ;;  %v1978_v46 = vld [vmem:[%s10631_s5 + $0x16e0] sm:$0xff]  ;;  %v1980_v47 = vld [vmem:[%s10631_s5 + $0x16f0] sm:$0xff] }
  0xcb   : > { %v1982_v48 = vld [vmem:[%s10631_s5 + $0x1700] sm:$0xff]  ;;  %1979 = vst [vmem:[%s10636_s6 + $0xb70] sm:$0xff] %v1978_v46  ;;  %1981 = vst [vmem:[%s10636_s6 + $0xb78] sm:$0xff] %v1980_v47  ;;  %v1984_v49 = vld [vmem:[%s10631_s5 + $0x1710] sm:$0xff] }
  0xcc   : > { %1983 = vst [vmem:[%s10636_s6 + $0xb80] sm:$0xff] %v1982_v48  ;;  %v1986_v50 = vld [vmem:[%s10631_s5 + $0x1720] sm:$0xff]  ;;  %v1988_v51 = vld [vmem:[%s10631_s5 + $0x1730] sm:$0xff]  ;;  %1985 = vst [vmem:[%s10636_s6 + $0xb88] sm:$0xff] %v1984_v49 }
  0xcd   : > { %1987 = vst [vmem:[%s10636_s6 + $0xb90] sm:$0xff] %v1986_v50  ;;  %1989 = vst [vmem:[%s10636_s6 + $0xb98] sm:$0xff] %v1988_v51  ;;  %v1990_v52 = vld [vmem:[%s10631_s5 + $0x1740] sm:$0xff]  ;;  %v1992_v53 = vld [vmem:[%s10631_s5 + $0x1750] sm:$0xff] }
  0xce   : > { %v1994_v54 = vld [vmem:[%s10631_s5 + $0x1760] sm:$0xff]  ;;  %1991 = vst [vmem:[%s10636_s6 + $0xba0] sm:$0xff] %v1990_v52  ;;  %1993 = vst [vmem:[%s10636_s6 + $0xba8] sm:$0xff] %v1992_v53  ;;  %v1996_v55 = vld [vmem:[%s10631_s5 + $0x1770] sm:$0xff] }
  0xcf   : > { %1995 = vst [vmem:[%s10636_s6 + $0xbb0] sm:$0xff] %v1994_v54  ;;  %v1998_v56 = vld [vmem:[%s10631_s5 + $0x1780] sm:$0xff]  ;;  %v2000_v57 = vld [vmem:[%s10631_s5 + $0x1790] sm:$0xff]  ;;  %1997 = vst [vmem:[%s10636_s6 + $0xbb8] sm:$0xff] %v1996_v55 }
  0xd0   : > { %1999 = vst [vmem:[%s10636_s6 + $0xbc0] sm:$0xff] %v1998_v56  ;;  %2001 = vst [vmem:[%s10636_s6 + $0xbc8] sm:$0xff] %v2000_v57  ;;  %v2002_v58 = vld [vmem:[%s10631_s5 + $0x17a0] sm:$0xff]  ;;  %v2004_v59 = vld [vmem:[%s10631_s5 + $0x17b0] sm:$0xff] }
  0xd1   : > { %v2006_v60 = vld [vmem:[%s10631_s5 + $0x17c0] sm:$0xff]  ;;  %2003 = vst [vmem:[%s10636_s6 + $0xbd0] sm:$0xff] %v2002_v58  ;;  %2005 = vst [vmem:[%s10636_s6 + $0xbd8] sm:$0xff] %v2004_v59  ;;  %v2008_v61 = vld [vmem:[%s10631_s5 + $0x17d0] sm:$0xff] }
  0xd2   : > { %2007 = vst [vmem:[%s10636_s6 + $0xbe0] sm:$0xff] %v2006_v60  ;;  %v2010_v62 = vld [vmem:[%s10631_s5 + $0x17e0] sm:$0xff]  ;;  %v2012_v63 = vld [vmem:[%s10631_s5 + $0x17f0] sm:$0xff]  ;;  %2009 = vst [vmem:[%s10636_s6 + $0xbe8] sm:$0xff] %v2008_v61 }
  0xd3   : > { %2011 = vst [vmem:[%s10636_s6 + $0xbf0] sm:$0xff] %v2010_v62  ;;  %2013 = vst [vmem:[%s10636_s6 + $0xbf8] sm:$0xff] %v2012_v63  ;;  %v2014_v0 = vld [vmem:[%s10631_s5 + $0x1800] sm:$0xff]  ;;  %v2016_v1 = vld [vmem:[%s10631_s5 + $0x1810] sm:$0xff] }
  0xd4   : > { %v2018_v2 = vld [vmem:[%s10631_s5 + $0x1820] sm:$0xff]  ;;  %2015 = vst [vmem:[%s10636_s6 + $0xc00] sm:$0xff] %v2014_v0  ;;  %2017 = vst [vmem:[%s10636_s6 + $0xc08] sm:$0xff] %v2016_v1  ;;  %v2020_v3 = vld [vmem:[%s10631_s5 + $0x1830] sm:$0xff] }
  0xd5   : > { %2019 = vst [vmem:[%s10636_s6 + $0xc10] sm:$0xff] %v2018_v2  ;;  %v2022_v4 = vld [vmem:[%s10631_s5 + $0x1840] sm:$0xff]  ;;  %v2024_v5 = vld [vmem:[%s10631_s5 + $0x1850] sm:$0xff]  ;;  %2021 = vst [vmem:[%s10636_s6 + $0xc18] sm:$0xff] %v2020_v3 }
  0xd6   : > { %2023 = vst [vmem:[%s10636_s6 + $0xc20] sm:$0xff] %v2022_v4  ;;  %2025 = vst [vmem:[%s10636_s6 + $0xc28] sm:$0xff] %v2024_v5  ;;  %v2026_v6 = vld [vmem:[%s10631_s5 + $0x1860] sm:$0xff]  ;;  %v2028_v7 = vld [vmem:[%s10631_s5 + $0x1870] sm:$0xff] }
  0xd7   : > { %v2030_v8 = vld [vmem:[%s10631_s5 + $0x1880] sm:$0xff]  ;;  %2027 = vst [vmem:[%s10636_s6 + $0xc30] sm:$0xff] %v2026_v6  ;;  %2029 = vst [vmem:[%s10636_s6 + $0xc38] sm:$0xff] %v2028_v7  ;;  %v2032_v9 = vld [vmem:[%s10631_s5 + $0x1890] sm:$0xff] }
  0xd8   : > { %2031 = vst [vmem:[%s10636_s6 + $0xc40] sm:$0xff] %v2030_v8  ;;  %v2034_v10 = vld [vmem:[%s10631_s5 + $0x18a0] sm:$0xff]  ;;  %v2036_v11 = vld [vmem:[%s10631_s5 + $0x18b0] sm:$0xff]  ;;  %2033 = vst [vmem:[%s10636_s6 + $0xc48] sm:$0xff] %v2032_v9 }
  0xd9   : > { %2035 = vst [vmem:[%s10636_s6 + $0xc50] sm:$0xff] %v2034_v10  ;;  %2037 = vst [vmem:[%s10636_s6 + $0xc58] sm:$0xff] %v2036_v11  ;;  %v2038_v12 = vld [vmem:[%s10631_s5 + $0x18c0] sm:$0xff]  ;;  %v2040_v13 = vld [vmem:[%s10631_s5 + $0x18d0] sm:$0xff] }
  0xda   : > { %v2042_v14 = vld [vmem:[%s10631_s5 + $0x18e0] sm:$0xff]  ;;  %2039 = vst [vmem:[%s10636_s6 + $0xc60] sm:$0xff] %v2038_v12  ;;  %2041 = vst [vmem:[%s10636_s6 + $0xc68] sm:$0xff] %v2040_v13  ;;  %v2044_v15 = vld [vmem:[%s10631_s5 + $0x18f0] sm:$0xff] }
  0xdb   : > { %2043 = vst [vmem:[%s10636_s6 + $0xc70] sm:$0xff] %v2042_v14  ;;  %v2046_v16 = vld [vmem:[%s10631_s5 + $0x1900] sm:$0xff]  ;;  %v2048_v17 = vld [vmem:[%s10631_s5 + $0x1910] sm:$0xff]  ;;  %2045 = vst [vmem:[%s10636_s6 + $0xc78] sm:$0xff] %v2044_v15 }
  0xdc   : > { %2047 = vst [vmem:[%s10636_s6 + $0xc80] sm:$0xff] %v2046_v16  ;;  %2049 = vst [vmem:[%s10636_s6 + $0xc88] sm:$0xff] %v2048_v17  ;;  %v2050_v18 = vld [vmem:[%s10631_s5 + $0x1920] sm:$0xff]  ;;  %v2052_v19 = vld [vmem:[%s10631_s5 + $0x1930] sm:$0xff] }
  0xdd   : > { %v2054_v20 = vld [vmem:[%s10631_s5 + $0x1940] sm:$0xff]  ;;  %2051 = vst [vmem:[%s10636_s6 + $0xc90] sm:$0xff] %v2050_v18  ;;  %2053 = vst [vmem:[%s10636_s6 + $0xc98] sm:$0xff] %v2052_v19  ;;  %v2056_v21 = vld [vmem:[%s10631_s5 + $0x1950] sm:$0xff] }
  0xde   : > { %2055 = vst [vmem:[%s10636_s6 + $0xca0] sm:$0xff] %v2054_v20  ;;  %v2058_v22 = vld [vmem:[%s10631_s5 + $0x1960] sm:$0xff]  ;;  %v2060_v23 = vld [vmem:[%s10631_s5 + $0x1970] sm:$0xff]  ;;  %2057 = vst [vmem:[%s10636_s6 + $0xca8] sm:$0xff] %v2056_v21 }
  0xdf   : > { %2059 = vst [vmem:[%s10636_s6 + $0xcb0] sm:$0xff] %v2058_v22  ;;  %2061 = vst [vmem:[%s10636_s6 + $0xcb8] sm:$0xff] %v2060_v23  ;;  %v2062_v24 = vld [vmem:[%s10631_s5 + $0x1980] sm:$0xff]  ;;  %v2064_v25 = vld [vmem:[%s10631_s5 + $0x1990] sm:$0xff] }
  0xe0   : > { %v2066_v26 = vld [vmem:[%s10631_s5 + $0x19a0] sm:$0xff]  ;;  %2063 = vst [vmem:[%s10636_s6 + $0xcc0] sm:$0xff] %v2062_v24  ;;  %2065 = vst [vmem:[%s10636_s6 + $0xcc8] sm:$0xff] %v2064_v25  ;;  %v2068_v27 = vld [vmem:[%s10631_s5 + $0x19b0] sm:$0xff] }
  0xe1   : > { %2067 = vst [vmem:[%s10636_s6 + $0xcd0] sm:$0xff] %v2066_v26  ;;  %v2070_v28 = vld [vmem:[%s10631_s5 + $0x19c0] sm:$0xff]  ;;  %v2072_v29 = vld [vmem:[%s10631_s5 + $0x19d0] sm:$0xff]  ;;  %2069 = vst [vmem:[%s10636_s6 + $0xcd8] sm:$0xff] %v2068_v27 }
  0xe2   : > { %2071 = vst [vmem:[%s10636_s6 + $0xce0] sm:$0xff] %v2070_v28  ;;  %2073 = vst [vmem:[%s10636_s6 + $0xce8] sm:$0xff] %v2072_v29  ;;  %v2074_v30 = vld [vmem:[%s10631_s5 + $0x19e0] sm:$0xff]  ;;  %v2076_v31 = vld [vmem:[%s10631_s5 + $0x19f0] sm:$0xff] }
  0xe3   : > { %v2078_v32 = vld [vmem:[%s10631_s5 + $0x1a00] sm:$0xff]  ;;  %2075 = vst [vmem:[%s10636_s6 + $0xcf0] sm:$0xff] %v2074_v30  ;;  %2077 = vst [vmem:[%s10636_s6 + $0xcf8] sm:$0xff] %v2076_v31  ;;  %v2080_v33 = vld [vmem:[%s10631_s5 + $0x1a10] sm:$0xff] }
  0xe4   : > { %2079 = vst [vmem:[%s10636_s6 + $0xd00] sm:$0xff] %v2078_v32  ;;  %v2082_v34 = vld [vmem:[%s10631_s5 + $0x1a20] sm:$0xff]  ;;  %v2084_v35 = vld [vmem:[%s10631_s5 + $0x1a30] sm:$0xff]  ;;  %2081 = vst [vmem:[%s10636_s6 + $0xd08] sm:$0xff] %v2080_v33 }
  0xe5   : > { %2083 = vst [vmem:[%s10636_s6 + $0xd10] sm:$0xff] %v2082_v34  ;;  %2085 = vst [vmem:[%s10636_s6 + $0xd18] sm:$0xff] %v2084_v35  ;;  %v2086_v36 = vld [vmem:[%s10631_s5 + $0x1a40] sm:$0xff]  ;;  %v2088_v37 = vld [vmem:[%s10631_s5 + $0x1a50] sm:$0xff] }
  0xe6   : > { %v2090_v38 = vld [vmem:[%s10631_s5 + $0x1a60] sm:$0xff]  ;;  %2087 = vst [vmem:[%s10636_s6 + $0xd20] sm:$0xff] %v2086_v36  ;;  %2089 = vst [vmem:[%s10636_s6 + $0xd28] sm:$0xff] %v2088_v37  ;;  %v2092_v39 = vld [vmem:[%s10631_s5 + $0x1a70] sm:$0xff] }
  0xe7   : > { %2091 = vst [vmem:[%s10636_s6 + $0xd30] sm:$0xff] %v2090_v38  ;;  %v2094_v40 = vld [vmem:[%s10631_s5 + $0x1a80] sm:$0xff]  ;;  %v2096_v41 = vld [vmem:[%s10631_s5 + $0x1a90] sm:$0xff]  ;;  %2093 = vst [vmem:[%s10636_s6 + $0xd38] sm:$0xff] %v2092_v39 }
  0xe8   : > { %2095 = vst [vmem:[%s10636_s6 + $0xd40] sm:$0xff] %v2094_v40  ;;  %2097 = vst [vmem:[%s10636_s6 + $0xd48] sm:$0xff] %v2096_v41  ;;  %v2098_v42 = vld [vmem:[%s10631_s5 + $0x1aa0] sm:$0xff]  ;;  %v2100_v43 = vld [vmem:[%s10631_s5 + $0x1ab0] sm:$0xff] }
  0xe9   : > { %v2102_v44 = vld [vmem:[%s10631_s5 + $0x1ac0] sm:$0xff]  ;;  %2099 = vst [vmem:[%s10636_s6 + $0xd50] sm:$0xff] %v2098_v42  ;;  %2101 = vst [vmem:[%s10636_s6 + $0xd58] sm:$0xff] %v2100_v43  ;;  %v2104_v45 = vld [vmem:[%s10631_s5 + $0x1ad0] sm:$0xff] }
  0xea   : > { %2103 = vst [vmem:[%s10636_s6 + $0xd60] sm:$0xff] %v2102_v44  ;;  %v2106_v46 = vld [vmem:[%s10631_s5 + $0x1ae0] sm:$0xff]  ;;  %v2108_v47 = vld [vmem:[%s10631_s5 + $0x1af0] sm:$0xff]  ;;  %2105 = vst [vmem:[%s10636_s6 + $0xd68] sm:$0xff] %v2104_v45 }
  0xeb   : > { %2107 = vst [vmem:[%s10636_s6 + $0xd70] sm:$0xff] %v2106_v46  ;;  %2109 = vst [vmem:[%s10636_s6 + $0xd78] sm:$0xff] %v2108_v47  ;;  %v2110_v48 = vld [vmem:[%s10631_s5 + $0x1b00] sm:$0xff]  ;;  %v2112_v49 = vld [vmem:[%s10631_s5 + $0x1b10] sm:$0xff] }
  0xec   : > { %v2114_v50 = vld [vmem:[%s10631_s5 + $0x1b20] sm:$0xff]  ;;  %2111 = vst [vmem:[%s10636_s6 + $0xd80] sm:$0xff] %v2110_v48  ;;  %2113 = vst [vmem:[%s10636_s6 + $0xd88] sm:$0xff] %v2112_v49  ;;  %v2116_v51 = vld [vmem:[%s10631_s5 + $0x1b30] sm:$0xff] }
  0xed   : > { %2115 = vst [vmem:[%s10636_s6 + $0xd90] sm:$0xff] %v2114_v50  ;;  %v2118_v52 = vld [vmem:[%s10631_s5 + $0x1b40] sm:$0xff]  ;;  %v2120_v53 = vld [vmem:[%s10631_s5 + $0x1b50] sm:$0xff]  ;;  %2117 = vst [vmem:[%s10636_s6 + $0xd98] sm:$0xff] %v2116_v51 }
  0xee   : > { %2119 = vst [vmem:[%s10636_s6 + $0xda0] sm:$0xff] %v2118_v52  ;;  %2121 = vst [vmem:[%s10636_s6 + $0xda8] sm:$0xff] %v2120_v53  ;;  %v2122_v54 = vld [vmem:[%s10631_s5 + $0x1b60] sm:$0xff]  ;;  %v2124_v55 = vld [vmem:[%s10631_s5 + $0x1b70] sm:$0xff] }
  0xef   : > { %v2126_v56 = vld [vmem:[%s10631_s5 + $0x1b80] sm:$0xff]  ;;  %2123 = vst [vmem:[%s10636_s6 + $0xdb0] sm:$0xff] %v2122_v54  ;;  %2125 = vst [vmem:[%s10636_s6 + $0xdb8] sm:$0xff] %v2124_v55  ;;  %v2128_v57 = vld [vmem:[%s10631_s5 + $0x1b90] sm:$0xff] }
  0xf0   : > { %2127 = vst [vmem:[%s10636_s6 + $0xdc0] sm:$0xff] %v2126_v56  ;;  %v2130_v58 = vld [vmem:[%s10631_s5 + $0x1ba0] sm:$0xff]  ;;  %v2132_v59 = vld [vmem:[%s10631_s5 + $0x1bb0] sm:$0xff]  ;;  %2129 = vst [vmem:[%s10636_s6 + $0xdc8] sm:$0xff] %v2128_v57 }
  0xf1   : > { %2131 = vst [vmem:[%s10636_s6 + $0xdd0] sm:$0xff] %v2130_v58  ;;  %2133 = vst [vmem:[%s10636_s6 + $0xdd8] sm:$0xff] %v2132_v59  ;;  %v2134_v60 = vld [vmem:[%s10631_s5 + $0x1bc0] sm:$0xff]  ;;  %v2136_v61 = vld [vmem:[%s10631_s5 + $0x1bd0] sm:$0xff] }
  0xf2   : > { %v2138_v62 = vld [vmem:[%s10631_s5 + $0x1be0] sm:$0xff]  ;;  %2135 = vst [vmem:[%s10636_s6 + $0xde0] sm:$0xff] %v2134_v60  ;;  %2137 = vst [vmem:[%s10636_s6 + $0xde8] sm:$0xff] %v2136_v61  ;;  %v2140_v63 = vld [vmem:[%s10631_s5 + $0x1bf0] sm:$0xff] }
  0xf3   : > { %2139 = vst [vmem:[%s10636_s6 + $0xdf0] sm:$0xff] %v2138_v62  ;;  %v2142_v0 = vld [vmem:[%s10631_s5 + $0x1c00] sm:$0xff]  ;;  %v2144_v1 = vld [vmem:[%s10631_s5 + $0x1c10] sm:$0xff]  ;;  %2141 = vst [vmem:[%s10636_s6 + $0xdf8] sm:$0xff] %v2140_v63 }
  0xf4   : > { %2143 = vst [vmem:[%s10636_s6 + $0xe00] sm:$0xff] %v2142_v0  ;;  %2145 = vst [vmem:[%s10636_s6 + $0xe08] sm:$0xff] %v2144_v1  ;;  %v2146_v2 = vld [vmem:[%s10631_s5 + $0x1c20] sm:$0xff]  ;;  %v2148_v3 = vld [vmem:[%s10631_s5 + $0x1c30] sm:$0xff] }
  0xf5   : > { %v2150_v4 = vld [vmem:[%s10631_s5 + $0x1c40] sm:$0xff]  ;;  %2147 = vst [vmem:[%s10636_s6 + $0xe10] sm:$0xff] %v2146_v2  ;;  %2149 = vst [vmem:[%s10636_s6 + $0xe18] sm:$0xff] %v2148_v3  ;;  %v2152_v5 = vld [vmem:[%s10631_s5 + $0x1c50] sm:$0xff] }
  0xf6   : > { %2151 = vst [vmem:[%s10636_s6 + $0xe20] sm:$0xff] %v2150_v4  ;;  %v2154_v6 = vld [vmem:[%s10631_s5 + $0x1c60] sm:$0xff]  ;;  %v2156_v7 = vld [vmem:[%s10631_s5 + $0x1c70] sm:$0xff]  ;;  %2153 = vst [vmem:[%s10636_s6 + $0xe28] sm:$0xff] %v2152_v5 }
  0xf7   : > { %2155 = vst [vmem:[%s10636_s6 + $0xe30] sm:$0xff] %v2154_v6  ;;  %2157 = vst [vmem:[%s10636_s6 + $0xe38] sm:$0xff] %v2156_v7  ;;  %v2158_v8 = vld [vmem:[%s10631_s5 + $0x1c80] sm:$0xff]  ;;  %v2160_v9 = vld [vmem:[%s10631_s5 + $0x1c90] sm:$0xff] }
  0xf8   : > { %v2162_v10 = vld [vmem:[%s10631_s5 + $0x1ca0] sm:$0xff]  ;;  %2159 = vst [vmem:[%s10636_s6 + $0xe40] sm:$0xff] %v2158_v8  ;;  %2161 = vst [vmem:[%s10636_s6 + $0xe48] sm:$0xff] %v2160_v9  ;;  %v2164_v11 = vld [vmem:[%s10631_s5 + $0x1cb0] sm:$0xff] }
  0xf9   : > { %2163 = vst [vmem:[%s10636_s6 + $0xe50] sm:$0xff] %v2162_v10  ;;  %v2166_v12 = vld [vmem:[%s10631_s5 + $0x1cc0] sm:$0xff]  ;;  %v2168_v13 = vld [vmem:[%s10631_s5 + $0x1cd0] sm:$0xff]  ;;  %2165 = vst [vmem:[%s10636_s6 + $0xe58] sm:$0xff] %v2164_v11 }
  0xfa   : > { %2167 = vst [vmem:[%s10636_s6 + $0xe60] sm:$0xff] %v2166_v12  ;;  %2169 = vst [vmem:[%s10636_s6 + $0xe68] sm:$0xff] %v2168_v13  ;;  %v2170_v14 = vld [vmem:[%s10631_s5 + $0x1ce0] sm:$0xff]  ;;  %v2172_v15 = vld [vmem:[%s10631_s5 + $0x1cf0] sm:$0xff] }
  0xfb   : > { %v2174_v16 = vld [vmem:[%s10631_s5 + $0x1d00] sm:$0xff]  ;;  %2171 = vst [vmem:[%s10636_s6 + $0xe70] sm:$0xff] %v2170_v14  ;;  %2173 = vst [vmem:[%s10636_s6 + $0xe78] sm:$0xff] %v2172_v15  ;;  %v2176_v17 = vld [vmem:[%s10631_s5 + $0x1d10] sm:$0xff] }
  0xfc   : > { %2175 = vst [vmem:[%s10636_s6 + $0xe80] sm:$0xff] %v2174_v16  ;;  %v2178_v18 = vld [vmem:[%s10631_s5 + $0x1d20] sm:$0xff]  ;;  %v2180_v19 = vld [vmem:[%s10631_s5 + $0x1d30] sm:$0xff]  ;;  %2177 = vst [vmem:[%s10636_s6 + $0xe88] sm:$0xff] %v2176_v17 }
  0xfd   : > { %2179 = vst [vmem:[%s10636_s6 + $0xe90] sm:$0xff] %v2178_v18  ;;  %2181 = vst [vmem:[%s10636_s6 + $0xe98] sm:$0xff] %v2180_v19  ;;  %v2182_v20 = vld [vmem:[%s10631_s5 + $0x1d40] sm:$0xff]  ;;  %v2184_v21 = vld [vmem:[%s10631_s5 + $0x1d50] sm:$0xff] }
  0xfe   : > { %v2186_v22 = vld [vmem:[%s10631_s5 + $0x1d60] sm:$0xff]  ;;  %2183 = vst [vmem:[%s10636_s6 + $0xea0] sm:$0xff] %v2182_v20  ;;  %2185 = vst [vmem:[%s10636_s6 + $0xea8] sm:$0xff] %v2184_v21  ;;  %v2188_v23 = vld [vmem:[%s10631_s5 + $0x1d70] sm:$0xff] }
  0xff   : > { %2187 = vst [vmem:[%s10636_s6 + $0xeb0] sm:$0xff] %v2186_v22  ;;  %v2190_v24 = vld [vmem:[%s10631_s5 + $0x1d80] sm:$0xff]  ;;  %v2192_v25 = vld [vmem:[%s10631_s5 + $0x1d90] sm:$0xff]  ;;  %2189 = vst [vmem:[%s10636_s6 + $0xeb8] sm:$0xff] %v2188_v23 }
 0x100   : > { %2191 = vst [vmem:[%s10636_s6 + $0xec0] sm:$0xff] %v2190_v24  ;;  %2193 = vst [vmem:[%s10636_s6 + $0xec8] sm:$0xff] %v2192_v25  ;;  %v2194_v26 = vld [vmem:[%s10631_s5 + $0x1da0] sm:$0xff]  ;;  %v2196_v27 = vld [vmem:[%s10631_s5 + $0x1db0] sm:$0xff] }
 0x101   : > { %v2198_v28 = vld [vmem:[%s10631_s5 + $0x1dc0] sm:$0xff]  ;;  %2195 = vst [vmem:[%s10636_s6 + $0xed0] sm:$0xff] %v2194_v26  ;;  %2197 = vst [vmem:[%s10636_s6 + $0xed8] sm:$0xff] %v2196_v27  ;;  %v2200_v29 = vld [vmem:[%s10631_s5 + $0x1dd0] sm:$0xff] }
 0x102   : > { %2199 = vst [vmem:[%s10636_s6 + $0xee0] sm:$0xff] %v2198_v28  ;;  %v2202_v30 = vld [vmem:[%s10631_s5 + $0x1de0] sm:$0xff]  ;;  %v2204_v31 = vld [vmem:[%s10631_s5 + $0x1df0] sm:$0xff]  ;;  %2201 = vst [vmem:[%s10636_s6 + $0xee8] sm:$0xff] %v2200_v29 }
 0x103   : > { %2203 = vst [vmem:[%s10636_s6 + $0xef0] sm:$0xff] %v2202_v30  ;;  %2205 = vst [vmem:[%s10636_s6 + $0xef8] sm:$0xff] %v2204_v31  ;;  %v2206_v32 = vld [vmem:[%s10631_s5 + $0x1e00] sm:$0xff]  ;;  %v2208_v33 = vld [vmem:[%s10631_s5 + $0x1e10] sm:$0xff] }
 0x104   : > { %v2210_v34 = vld [vmem:[%s10631_s5 + $0x1e20] sm:$0xff]  ;;  %2207 = vst [vmem:[%s10636_s6 + $0xf00] sm:$0xff] %v2206_v32  ;;  %2209 = vst [vmem:[%s10636_s6 + $0xf08] sm:$0xff] %v2208_v33  ;;  %v2212_v35 = vld [vmem:[%s10631_s5 + $0x1e30] sm:$0xff] }
 0x105   : > { %2211 = vst [vmem:[%s10636_s6 + $0xf10] sm:$0xff] %v2210_v34  ;;  %v2214_v36 = vld [vmem:[%s10631_s5 + $0x1e40] sm:$0xff]  ;;  %v2216_v37 = vld [vmem:[%s10631_s5 + $0x1e50] sm:$0xff]  ;;  %2213 = vst [vmem:[%s10636_s6 + $0xf18] sm:$0xff] %v2212_v35 }
 0x106   : > { %2215 = vst [vmem:[%s10636_s6 + $0xf20] sm:$0xff] %v2214_v36  ;;  %2217 = vst [vmem:[%s10636_s6 + $0xf28] sm:$0xff] %v2216_v37  ;;  %v2218_v38 = vld [vmem:[%s10631_s5 + $0x1e60] sm:$0xff]  ;;  %v2220_v39 = vld [vmem:[%s10631_s5 + $0x1e70] sm:$0xff] }
 0x107   : > { %v2222_v40 = vld [vmem:[%s10631_s5 + $0x1e80] sm:$0xff]  ;;  %2219 = vst [vmem:[%s10636_s6 + $0xf30] sm:$0xff] %v2218_v38  ;;  %2221 = vst [vmem:[%s10636_s6 + $0xf38] sm:$0xff] %v2220_v39  ;;  %v2224_v41 = vld [vmem:[%s10631_s5 + $0x1e90] sm:$0xff] }
 0x108   : > { %2223 = vst [vmem:[%s10636_s6 + $0xf40] sm:$0xff] %v2222_v40  ;;  %v2226_v42 = vld [vmem:[%s10631_s5 + $0x1ea0] sm:$0xff]  ;;  %v2228_v43 = vld [vmem:[%s10631_s5 + $0x1eb0] sm:$0xff]  ;;  %2225 = vst [vmem:[%s10636_s6 + $0xf48] sm:$0xff] %v2224_v41 }
 0x109   : > { %2227 = vst [vmem:[%s10636_s6 + $0xf50] sm:$0xff] %v2226_v42  ;;  %2229 = vst [vmem:[%s10636_s6 + $0xf58] sm:$0xff] %v2228_v43  ;;  %v2230_v44 = vld [vmem:[%s10631_s5 + $0x1ec0] sm:$0xff]  ;;  %v2232_v45 = vld [vmem:[%s10631_s5 + $0x1ed0] sm:$0xff] }
 0x10a   : > { %v2234_v46 = vld [vmem:[%s10631_s5 + $0x1ee0] sm:$0xff]  ;;  %2231 = vst [vmem:[%s10636_s6 + $0xf60] sm:$0xff] %v2230_v44  ;;  %2233 = vst [vmem:[%s10636_s6 + $0xf68] sm:$0xff] %v2232_v45  ;;  %v2236_v47 = vld [vmem:[%s10631_s5 + $0x1ef0] sm:$0xff] }
 0x10b   : > { %2235 = vst [vmem:[%s10636_s6 + $0xf70] sm:$0xff] %v2234_v46  ;;  %v2238_v48 = vld [vmem:[%s10631_s5 + $0x1f00] sm:$0xff]  ;;  %v2240_v49 = vld [vmem:[%s10631_s5 + $0x1f10] sm:$0xff]  ;;  %2237 = vst [vmem:[%s10636_s6 + $0xf78] sm:$0xff] %v2236_v47 }
 0x10c   : > { %2239 = vst [vmem:[%s10636_s6 + $0xf80] sm:$0xff] %v2238_v48  ;;  %2241 = vst [vmem:[%s10636_s6 + $0xf88] sm:$0xff] %v2240_v49  ;;  %v2242_v50 = vld [vmem:[%s10631_s5 + $0x1f20] sm:$0xff]  ;;  %v2244_v51 = vld [vmem:[%s10631_s5 + $0x1f30] sm:$0xff] }
 0x10d   : > { %v2246_v52 = vld [vmem:[%s10631_s5 + $0x1f40] sm:$0xff]  ;;  %2243 = vst [vmem:[%s10636_s6 + $0xf90] sm:$0xff] %v2242_v50  ;;  %2245 = vst [vmem:[%s10636_s6 + $0xf98] sm:$0xff] %v2244_v51  ;;  %v2248_v53 = vld [vmem:[%s10631_s5 + $0x1f50] sm:$0xff] }
 0x10e   : > { %2247 = vst [vmem:[%s10636_s6 + $0xfa0] sm:$0xff] %v2246_v52  ;;  %v2250_v54 = vld [vmem:[%s10631_s5 + $0x1f60] sm:$0xff]  ;;  %v2252_v55 = vld [vmem:[%s10631_s5 + $0x1f70] sm:$0xff]  ;;  %2249 = vst [vmem:[%s10636_s6 + $0xfa8] sm:$0xff] %v2248_v53 }
 0x10f   : > { %2251 = vst [vmem:[%s10636_s6 + $0xfb0] sm:$0xff] %v2250_v54  ;;  %2253 = vst [vmem:[%s10636_s6 + $0xfb8] sm:$0xff] %v2252_v55  ;;  %v2254_v56 = vld [vmem:[%s10631_s5 + $0x1f80] sm:$0xff]  ;;  %v2256_v57 = vld [vmem:[%s10631_s5 + $0x1f90] sm:$0xff] }
 0x110   : > { %v2258_v58 = vld [vmem:[%s10631_s5 + $0x1fa0] sm:$0xff]  ;;  %2255 = vst [vmem:[%s10636_s6 + $0xfc0] sm:$0xff] %v2254_v56  ;;  %2257 = vst [vmem:[%s10636_s6 + $0xfc8] sm:$0xff] %v2256_v57  ;;  %v2260_v59 = vld [vmem:[%s10631_s5 + $0x1fb0] sm:$0xff] }
 0x111   : > { %2259 = vst [vmem:[%s10636_s6 + $0xfd0] sm:$0xff] %v2258_v58  ;;  %v2262_v60 = vld [vmem:[%s10631_s5 + $0x1fc0] sm:$0xff]  ;;  %v2264_v61 = vld [vmem:[%s10631_s5 + $0x1fd0] sm:$0xff]  ;;  %2261 = vst [vmem:[%s10636_s6 + $0xfd8] sm:$0xff] %v2260_v59 }
 0x112   : > { %2263 = vst [vmem:[%s10636_s6 + $0xfe0] sm:$0xff] %v2262_v60  ;;  %2265 = vst [vmem:[%s10636_s6 + $0xfe8] sm:$0xff] %v2264_v61  ;;  %v2266_v62 = vld [vmem:[%s10631_s5 + $0x1fe0] sm:$0xff]  ;;  %v2268_v63 = vld [vmem:[%s10631_s5 + $0x1ff0] sm:$0xff] }
 0x113   : > { %2267 = vst [vmem:[%s10636_s6 + $0xff0] sm:$0xff] %v2266_v62  ;;  %2269 = vst [vmem:[%s10636_s6 + $0xff8] sm:$0xff] %v2268_v63 }
 0x114 PF: > { %p9108_p8 = scmp.ge.s32.totalorder %s10555_s19, 1  ;;  %p4375_p9 = scmp.lt.s32.totalorder %s10555_s19, 3 }
 0x116   : > { %p4376_p10 = pnand %p9108_p8, %p4375_p9 }
 0x118   : > { %4379 = sbr.rel (%p4376_p10) target bundleno = 1100 (0x44c), region = 84 }
 0x11d   : > { %s4382_s7 = sand.u32 1, %s10539_s15   ;;  %v11665_v0 = vld [vmem:[%s12766_s0] sm:$0xff]  ;;  %v11675_v2 = vld [vmem:[%s12766_s0 + $0x8] sm:$0xff] }
 0x11e   : > { %v11670_v1 = vld [vmem:[%s12766_s0 + $0x80] sm:$0xff]  ;;  %s9109_s14 = sshll.u32 %s4382_s7, 12  ;;  %v11686_v5 = vld [vmem:[%s12766_s0 + $0x88] sm:$0xff]  ;;  %s9110_s21 = sshll.u32 %s4382_s7, 5 }
 0x11f   : > { %v9113_v3 = vcombine.low %v11665_v0, %v11670_v1  ;;  %v9114_v4 = vcombine.high %v11665_v0, %v11670_v1  ;;  %v9115_v6 = vcombine.low %v11675_v2, %v11686_v5  ;;  %v9116_v7 = vcombine.high %v11675_v2, %v11686_v5  ;;  %s11692_s23 = scalar_lea.vmem [#allocation2], %s9109_s14  ;;  %s4419_s15 = scalar_lea.vmem [#allocation3], %s9110_s21 }
 0x120   : > { %v9745_v8 = vld [vmem:[%s11692_s23 + $0x74] ss:$8 sps:$4 sm:$0xff]   ;;  %v9749_v10 = vld [vmem:[%s11692_s23 + $0x70] ss:$8 sps:$4 sm:$0xff]   ;;  %v9751_v12 = vld [vmem:[%s11692_s23 + $0x64] ss:$8 sps:$4 sm:$0xff]  }
 0x121   : > { %7928 = vmatprep.mubr.bf16.mxu0 %v9114_v4  ;;  %v9747_v9 = vld [vmem:[%s11692_s23 + $0x174] ss:$8 sps:$4 sm:$0xff]   ;;  %7981 = vmatprep.mubr.bf16.mxu1 %v9116_v7  ;;  %v9750_v11 = vld [vmem:[%s11692_s23 + $0x170] ss:$8 sps:$4 sm:$0xff]   ;;  %v9753_v13 = vld [vmem:[%s11692_s23 + $0x164] ss:$8 sps:$4 sm:$0xff]  }
 0x122   : > { %7896 = vmatprep.subr.bf16.mxu0 %v9745_v8  ;;  %7949 = vmatprep.subr.bf16.mxu1 %v9747_v9  ;;  %v9755_v14 = vld [vmem:[%s11692_s23 + $0x60] ss:$8 sps:$4 sm:$0xff]   ;;  %v9757_v16 = vld [vmem:[%s11692_s23 + $0x54] ss:$8 sps:$4 sm:$0xff]   ;;  %v9761_v18 = vld [vmem:[%s11692_s23 + $0x50] ss:$8 sps:$4 sm:$0xff]  }
 0x123   : > { %7897 = vmatpush1.bf16.msra.mxu0 %v9749_v10  ;;  %7950 = vmatpush1.bf16.msra.mxu1 %v9750_v11  ;;  %v9756_v15 = vld [vmem:[%s11692_s23 + $0x160] ss:$8 sps:$4 sm:$0xff]   ;;  %v9759_v17 = vld [vmem:[%s11692_s23 + $0x154] ss:$8 sps:$4 sm:$0xff]   ;;  %v9762_v19 = vld [vmem:[%s11692_s23 + $0x150] ss:$8 sps:$4 sm:$0xff]  }
 0x124   : > { %7898 = vmatprep.subr.bf16.mxu0 %v9751_v12  ;;  %7951 = vmatprep.subr.bf16.mxu1 %v9753_v13  ;;  %v9763_v20 = vld [vmem:[%s11692_s23 + $0x44] ss:$8 sps:$4 sm:$0xff]   ;;  %v9767_v22 = vld [vmem:[%s11692_s23 + $0x40] ss:$8 sps:$4 sm:$0xff]   ;;  %v9769_v24 = vld [vmem:[%s11692_s23 + $0x34] ss:$8 sps:$4 sm:$0xff]  }
 0x125   : > { %v9765_v21 = vld [vmem:[%s11692_s23 + $0x144] ss:$8 sps:$4 sm:$0xff]   ;;  %v9768_v23 = vld [vmem:[%s11692_s23 + $0x140] ss:$8 sps:$4 sm:$0xff]   ;;  %v9771_v25 = vld [vmem:[%s11692_s23 + $0x134] ss:$8 sps:$4 sm:$0xff]  }
 0x126   : > { %v9773_v26 = vld [vmem:[%s11692_s23 + $0x30] ss:$8 sps:$4 sm:$0xff]   ;;  %v9775_v28 = vld [vmem:[%s11692_s23 + $0x24] ss:$8 sps:$4 sm:$0xff]   ;;  %v9779_v30 = vld [vmem:[%s11692_s23 + $0x20] ss:$8 sps:$4 sm:$0xff]  }
 0x127   : > { %7899 = vmatpush1.bf16.msra.mxu0 %v9755_v14  ;;  %7952 = vmatpush1.bf16.msra.mxu1 %v9756_v15  ;;  %v9774_v27 = vld [vmem:[%s11692_s23 + $0x130] ss:$8 sps:$4 sm:$0xff]   ;;  %v9777_v29 = vld [vmem:[%s11692_s23 + $0x124] ss:$8 sps:$4 sm:$0xff]   ;;  %v9780_v31 = vld [vmem:[%s11692_s23 + $0x120] ss:$8 sps:$4 sm:$0xff]  }
 0x128   : > { %7900 = vmatprep.subr.bf16.mxu0 %v9757_v16  ;;  %7953 = vmatprep.subr.bf16.mxu1 %v9759_v17  ;;  %v9781_v32 = vld [vmem:[%s11692_s23 + $0x14] ss:$8 sps:$4 sm:$0xff]   ;;  %v9785_v34 = vld [vmem:[%s11692_s23 + $0x10] ss:$8 sps:$4 sm:$0xff]   ;;  %v9787_v36 = vld [vmem:[%s11692_s23 + $0x4] ss:$8 sps:$4 sm:$0xff]  }
 0x129   : > { %v9783_v33 = vld [vmem:[%s11692_s23 + $0x114] ss:$8 sps:$4 sm:$0xff]   ;;  %v9786_v35 = vld [vmem:[%s11692_s23 + $0x110] ss:$8 sps:$4 sm:$0xff]   ;;  %v9789_v37 = vld [vmem:[%s11692_s23 + $0x104] ss:$8 sps:$4 sm:$0xff]  }
 0x12a   : > { %v9791_v38 = vld [vmem:[%s11692_s23] ss:$8 sps:$4 sm:$0xff]   ;;  %v9793_v40 = vld [vmem:[%s11692_s23 + $0xf4] ss:$8 sps:$4 sm:$0xff]   ;;  %v9797_v42 = vld [vmem:[%s11692_s23 + $0xf0] ss:$8 sps:$4 sm:$0xff]  }
 0x12b   : > { %7901 = vmatpush1.bf16.msra.mxu0 %v9761_v18  ;;  %7954 = vmatpush1.bf16.msra.mxu1 %v9762_v19  ;;  %v9792_v39 = vld [vmem:[%s11692_s23 + $0x100] ss:$8 sps:$4 sm:$0xff]   ;;  %v9795_v41 = vld [vmem:[%s11692_s23 + $0x1f4] ss:$8 sps:$4 sm:$0xff]   ;;  %v9798_v43 = vld [vmem:[%s11692_s23 + $0x1f0] ss:$8 sps:$4 sm:$0xff]  }
 0x12c   : > { %7902 = vmatprep.subr.bf16.mxu0 %v9763_v20  ;;  %7955 = vmatprep.subr.bf16.mxu1 %v9765_v21  ;;  %v9799_v44 = vld [vmem:[%s11692_s23 + $0xe4] ss:$8 sps:$4 sm:$0xff]   ;;  %v9803_v46 = vld [vmem:[%s11692_s23 + $0xe0] ss:$8 sps:$4 sm:$0xff]   ;;  %v9805_v48 = vld [vmem:[%s11692_s23 + $0xd4] ss:$8 sps:$4 sm:$0xff]  }
 0x12d   : > { %v9801_v45 = vld [vmem:[%s11692_s23 + $0x1e4] ss:$8 sps:$4 sm:$0xff]   ;;  %v9804_v47 = vld [vmem:[%s11692_s23 + $0x1e0] ss:$8 sps:$4 sm:$0xff]   ;;  %v9807_v49 = vld [vmem:[%s11692_s23 + $0x1d4] ss:$8 sps:$4 sm:$0xff]  }
 0x12e   : > { %v9809_v50 = vld [vmem:[%s11692_s23 + $0xd0] ss:$8 sps:$4 sm:$0xff]   ;;  %v9811_v52 = vld [vmem:[%s11692_s23 + $0xc4] ss:$8 sps:$4 sm:$0xff]   ;;  %v9815_v54 = vld [vmem:[%s11692_s23 + $0xc0] ss:$8 sps:$4 sm:$0xff]  }
 0x12f   : > { %7903 = vmatpush1.bf16.msra.mxu0 %v9767_v22  ;;  %7956 = vmatpush1.bf16.msra.mxu1 %v9768_v23  ;;  %v9810_v51 = vld [vmem:[%s11692_s23 + $0x1d0] ss:$8 sps:$4 sm:$0xff]   ;;  %v9813_v53 = vld [vmem:[%s11692_s23 + $0x1c4] ss:$8 sps:$4 sm:$0xff]   ;;  %v9816_v55 = vld [vmem:[%s11692_s23 + $0x1c0] ss:$8 sps:$4 sm:$0xff]  }
 0x130   : > { %7904 = vmatprep.subr.bf16.mxu0 %v9769_v24  ;;  %7957 = vmatprep.subr.bf16.mxu1 %v9771_v25  ;;  %v9817_v56 = vld [vmem:[%s11692_s23 + $0xb4] ss:$8 sps:$4 sm:$0xff]   ;;  %v9821_v58 = vld [vmem:[%s11692_s23 + $0xb0] ss:$8 sps:$4 sm:$0xff]   ;;  %v9823_v60 = vld [vmem:[%s11692_s23 + $0xa4] ss:$8 sps:$4 sm:$0xff]  }
 0x131   : > { %v9819_v57 = vld [vmem:[%s11692_s23 + $0x1b4] ss:$8 sps:$4 sm:$0xff]   ;;  %v9822_v59 = vld [vmem:[%s11692_s23 + $0x1b0] ss:$8 sps:$4 sm:$0xff]   ;;  %v9825_v61 = vld [vmem:[%s11692_s23 + $0x1a4] ss:$8 sps:$4 sm:$0xff]  }
 0x132   : > { %v9827_v62 = vld [vmem:[%s11692_s23 + $0xa0] ss:$8 sps:$4 sm:$0xff]   ;;  %v9829_v4 = vld [vmem:[%s11692_s23 + $0x94] ss:$8 sps:$4 sm:$0xff]   ;;  %v9833_v8 = vld [vmem:[%s11692_s23 + $0x90] ss:$8 sps:$4 sm:$0xff]  }
 0x133   : > { %7905 = vmatpush1.bf16.msra.mxu0 %v9773_v26  ;;  %7958 = vmatpush1.bf16.msra.mxu1 %v9774_v27  ;;  %v9828_v63 = vld [vmem:[%s11692_s23 + $0x1a0] ss:$8 sps:$4 sm:$0xff]   ;;  %v9831_v7 = vld [vmem:[%s11692_s23 + $0x194] ss:$8 sps:$4 sm:$0xff]   ;;  %v9834_v9 = vld [vmem:[%s11692_s23 + $0x190] ss:$8 sps:$4 sm:$0xff]  }
 0x134   : > { %7906 = vmatprep.subr.bf16.mxu0 %v9775_v28  ;;  %7959 = vmatprep.subr.bf16.mxu1 %v9777_v29  ;;  %v9835_v10 = vld [vmem:[%s11692_s23 + $0x84] ss:$8 sps:$4 sm:$0xff]   ;;  %v9839_v12 = vld [vmem:[%s11692_s23 + $0x80] ss:$8 sps:$4 sm:$0xff]   ;;  %v9843_v14 = vld [vmem:[%s11692_s23 + $0x274] ss:$8 sps:$4 sm:$0xff]  }
 0x135   : > { %v9837_v11 = vld [vmem:[%s11692_s23 + $0x184] ss:$8 sps:$4 sm:$0xff]   ;;  %v9840_v13 = vld [vmem:[%s11692_s23 + $0x180] ss:$8 sps:$4 sm:$0xff]   ;;  %v9846_v15 = vld [vmem:[%s11692_s23 + $0x374] ss:$8 sps:$4 sm:$0xff]  }
 0x136   : > { %v4472_v16 = vld [vmem:[%s12766_s0 + $0x100] sm:$0xff]  ;;  %v4473_v18 = vld [vmem:[%s12766_s0 + $0x108] sm:$0xff]  ;;  %v9841_v20 = vld [vmem:[%s11692_s23 + $0x270] ss:$8 sps:$4 sm:$0xff]   ;;  %s9703_s7 = sshll.u32 (%p10618_p6), %s10547_s17, 3 }
 0x137   : > { %7907 = vmatpush1.bf16.msra.mxu0 %v9779_v30  ;;  %7960 = vmatpush1.bf16.msra.mxu1 %v9780_v31  ;;  %v4488_v17 = vld [vmem:[%s12766_s0 + $0x180] sm:$0xff]  ;;  %v4489_v19 = vld [vmem:[%s12766_s0 + $0x188] sm:$0xff]  ;;  %v9844_v21 = vld [vmem:[%s11692_s23 + $0x370] ss:$8 sps:$4 sm:$0xff]   ;;  %s8944_s27 = scalar_lea.vmem (%p10618_p6), %s12770_s4, %s9703_s7 }
 0x138   : > { %7908 = vmatprep.subr.bf16.mxu0 %v9781_v32  ;;  %7961 = vmatprep.subr.bf16.mxu1 %v9783_v33  ;;  %v9849_v22 = vld [vmem:[%s11692_s23 + $0x264] ss:$8 sps:$4 sm:$0xff]   ;;  %v9146_v24 = vcombine.high %v4472_v16, %v4488_v17  ;;  %v9148_v25 = vcombine.high %v4473_v18, %v4489_v19  ;;  %v9847_v26 = vld [vmem:[%s11692_s23 + $0x260] ss:$8 sps:$4 sm:$0xff]   ;;  %v9855_v28 = vld [vmem:[%s11692_s23 + $0x254] ss:$8 sps:$4 sm:$0xff]   ;;  %v9147_v2 = vcombine.low %v4473_v18, %v4489_v19 }
 0x139   : > { %v9852_v23 = vld [vmem:[%s11692_s23 + $0x364] ss:$8 sps:$4 sm:$0xff]   ;;  %v9850_v27 = vld [vmem:[%s11692_s23 + $0x360] ss:$8 sps:$4 sm:$0xff]   ;;  %v9858_v29 = vld [vmem:[%s11692_s23 + $0x354] ss:$8 sps:$4 sm:$0xff]  }
 0x13a   : > { %v9853_v0 = vld [vmem:[%s11692_s23 + $0x250] ss:$8 sps:$4 sm:$0xff]   ;;  %v9861_v5 = vld [vmem:[%s11692_s23 + $0x244] ss:$8 sps:$4 sm:$0xff]   ;;  %v9859_v30 = vld [vmem:[%s11692_s23 + $0x240] ss:$8 sps:$4 sm:$0xff]  }
 0x13b   : > { %7909 = vmatpush1.bf16.msra.mxu0 %v9785_v34  ;;  %7962 = vmatpush1.bf16.msra.mxu1 %v9786_v35  ;;  %v9856_v1 = vld [vmem:[%s11692_s23 + $0x350] ss:$8 sps:$4 sm:$0xff]   ;;  %v9862_v31 = vld [vmem:[%s11692_s23 + $0x340] ss:$8 sps:$4 sm:$0xff]   ;;  %v9867_v32 = vld [vmem:[%s11692_s23 + $0x234] ss:$8 sps:$4 sm:$0xff]  }
 0x13c   : > { %7910 = vmatprep.subr.bf16.mxu0 %v9787_v36  ;;  %7963 = vmatprep.subr.bf16.mxu1 %v9789_v37  ;;  %v9870_v33 = vld [vmem:[%s11692_s23 + $0x334] ss:$8 sps:$4 sm:$0xff]   ;;  %v9865_v34 = vld [vmem:[%s11692_s23 + $0x230] ss:$8 sps:$4 sm:$0xff]   ;;  %v9873_v36 = vld [vmem:[%s11692_s23 + $0x224] ss:$8 sps:$4 sm:$0xff]  }
 0x13d   : > { %v9868_v35 = vld [vmem:[%s11692_s23 + $0x330] ss:$8 sps:$4 sm:$0xff]   ;;  %v9876_v37 = vld [vmem:[%s11692_s23 + $0x324] ss:$8 sps:$4 sm:$0xff]   ;;  %v9919_v18 = vld [vmem:[%s11692_s23 + $0x2a0] ss:$8 sps:$4 sm:$0xff]  }
 0x13e   : > { %v9922_v19 = vld [vmem:[%s11692_s23 + $0x3a0] ss:$8 sps:$4 sm:$0xff]  }
 0x13f   : > { %7911 = vmatpush1.bf16.msra.mxu0 %v9791_v38  ;;  %7964 = vmatpush1.bf16.msra.mxu1 %v9792_v39  ;;  %v11801_v38 = vld [vmem:[%s12766_s0 + $0x10] sm:$0xff]  ;;  %v9871_v39 = vld [vmem:[%s11692_s23 + $0x220] ss:$8 sps:$4 sm:$0xff]  }
 0x140   : > { %7912 = vmatprep.subr.bf16.mxu0 %v9793_v40  ;;  %7965 = vmatprep.subr.bf16.mxu1 %v9795_v41  ;;  %v9874_v40 = vld [vmem:[%s11692_s23 + $0x320] ss:$8 sps:$4 sm:$0xff]   ;;  %v9879_v41 = vld [vmem:[%s11692_s23 + $0x214] ss:$8 sps:$4 sm:$0xff]  }
 0x143   : > { %7913 = vmatpush2.bf16.msra.mxu0 %v9797_v42  ;;  %7966 = vmatpush2.bf16.msra.mxu1 %v9798_v43  ;;  %v9882_v42 = vld [vmem:[%s11692_s23 + $0x314] ss:$8 sps:$4 sm:$0xff]  }
 0x144   : > { %7914 = vmatprep.subr.bf16.mxu0 %v9799_v44  ;;  %7967 = vmatprep.subr.bf16.mxu1 %v9801_v45  ;;  %v11810_v43 = vld [vmem:[%s12766_s0 + $0x90] sm:$0xff]  ;;  %v11815_v44 = vld [vmem:[%s12766_s0 + $0x18] sm:$0xff] }
 0x145   : > { %v9118_v45 = vcombine.high %v11801_v38, %v11810_v43 }
 0x147   : > { %7915 = vmatpush2.bf16.msra.mxu0 %v9803_v46  ;;  %7968 = vmatpush2.bf16.msra.mxu1 %v9804_v47  ;;  %v11822_v46 = vld [vmem:[%s12766_s0 + $0x98] sm:$0xff] }
 0x148   : > { %7916 = vmatprep.subr.bf16.mxu0 %v9805_v48  ;;  %7969 = vmatprep.subr.bf16.mxu1 %v9807_v49  ;;  %v9877_v47 = vld [vmem:[%s11692_s23 + $0x210] ss:$8 sps:$4 sm:$0xff]   ;;  %v9120_v48 = vcombine.high %v11815_v44, %v11822_v46 }
 0x149   : > { %v9880_v49 = vld [vmem:[%s11692_s23 + $0x310] ss:$8 sps:$4 sm:$0xff]  }
 0x14b   : > { %7917 = vmatpush2.bf16.msra.mxu0 %v9809_v50  ;;  %7970 = vmatpush2.bf16.msra.mxu1 %v9810_v51  ;;  %v9885_v50 = vld [vmem:[%s11692_s23 + $0x204] ss:$8 sps:$4 sm:$0xff]  }
 0x14c   : > { %7918 = vmatprep.subr.bf16.mxu0 %v9811_v52  ;;  %7971 = vmatprep.subr.bf16.mxu1 %v9813_v53  ;;  %v9888_v51 = vld [vmem:[%s11692_s23 + $0x304] ss:$8 sps:$4 sm:$0xff]   ;;  %v9883_v52 = vld [vmem:[%s11692_s23 + $0x200] ss:$8 sps:$4 sm:$0xff]  }
 0x14d   : > { %v9886_v53 = vld [vmem:[%s11692_s23 + $0x300] ss:$8 sps:$4 sm:$0xff]  }
 0x14f   : > { %7919 = vmatpush2.bf16.msra.mxu0 %v9815_v54  ;;  %7972 = vmatpush2.bf16.msra.mxu1 %v9816_v55  ;;  %v9891_v54 = vld [vmem:[%s11692_s23 + $0x2f4] ss:$8 sps:$4 sm:$0xff]  }
 0x150   : > { %7920 = vmatprep.subr.bf16.mxu0 %v9817_v56  ;;  %7973 = vmatprep.subr.bf16.mxu1 %v9819_v57  ;;  %v9894_v55 = vld [vmem:[%s11692_s23 + $0x3f4] ss:$8 sps:$4 sm:$0xff]   ;;  %v9889_v56 = vld [vmem:[%s11692_s23 + $0x2f0] ss:$8 sps:$4 sm:$0xff]  }
 0x151   : > { %v9892_v57 = vld [vmem:[%s11692_s23 + $0x3f0] ss:$8 sps:$4 sm:$0xff]  }
 0x153   : > { %7921 = vmatpush2.bf16.msra.mxu0 %v9821_v58  ;;  %7974 = vmatpush2.bf16.msra.mxu1 %v9822_v59  ;;  %v9897_v58 = vld [vmem:[%s11692_s23 + $0x2e4] ss:$8 sps:$4 sm:$0xff]  }
 0x154   : > { %7922 = vmatprep.subr.bf16.mxu0 %v9823_v60  ;;  %7975 = vmatprep.subr.bf16.mxu1 %v9825_v61  ;;  %v9900_v59 = vld [vmem:[%s11692_s23 + $0x3e4] ss:$8 sps:$4 sm:$0xff]   ;;  %v9895_v60 = vld [vmem:[%s11692_s23 + $0x2e0] ss:$8 sps:$4 sm:$0xff]  }
 0x155   : > { %v9898_v61 = vld [vmem:[%s11692_s23 + $0x3e0] ss:$8 sps:$4 sm:$0xff]  }
 0x157   : > { %7923 = vmatpush2.bf16.msra.mxu0 %v9827_v62  ;;  %7976 = vmatpush2.bf16.msra.mxu1 %v9828_v63  ;;  %v9903_v62 = vld [vmem:[%s11692_s23 + $0x2d4] ss:$8 sps:$4 sm:$0xff]  }
 0x158   : > { %7924 = vmatprep.subr.bf16.mxu0 %v9829_v4  ;;  %7977 = vmatprep.subr.bf16.mxu1 %v9831_v7  ;;  %v9906_v63 = vld [vmem:[%s11692_s23 + $0x3d4] ss:$8 sps:$4 sm:$0xff]   ;;  %v9901_v4 = vld [vmem:[%s11692_s23 + $0x2d0] ss:$8 sps:$4 sm:$0xff]  }
 0x159   : > { %v9904_v7 = vld [vmem:[%s11692_s23 + $0x3d0] ss:$8 sps:$4 sm:$0xff]  }
 0x15b   : > { %7925 = vmatpush2.bf16.msra.mxu0 %v9833_v8  ;;  %7978 = vmatpush2.bf16.msra.mxu1 %v9834_v9  ;;  %v9909_v8 = vld [vmem:[%s11692_s23 + $0x2c4] ss:$8 sps:$4 sm:$0xff]  }
 0x15c   : > { %7926 = vmatprep.subr.bf16.mxu0 %v9835_v10  ;;  %7979 = vmatprep.subr.bf16.mxu1 %v9837_v11  ;;  %v9912_v9 = vld [vmem:[%s11692_s23 + $0x3c4] ss:$8 sps:$4 sm:$0xff]   ;;  %v9907_v10 = vld [vmem:[%s11692_s23 + $0x2c0] ss:$8 sps:$4 sm:$0xff]  }
 0x15d   : > { %v9910_v11 = vld [vmem:[%s11692_s23 + $0x3c0] ss:$8 sps:$4 sm:$0xff]  }
 0x15f   : > { %7927 = vmatpush2.bf16.msra.mxu0 %v9839_v12  ;;  %7980 = vmatpush2.bf16.msra.mxu1 %v9840_v13  ;;  %v9915_v12 = vld [vmem:[%s11692_s23 + $0x2b4] ss:$8 sps:$4 sm:$0xff]  }
 0x160   : > { %8002 = vmatprep.subr.bf16.mxu0 %v9843_v14  ;;  %8055 = vmatprep.subr.bf16.mxu1 %v9846_v15  ;;  %v9918_v13 = vld [vmem:[%s11692_s23 + $0x3b4] ss:$8 sps:$4 sm:$0xff]   ;;  %v9913_v14 = vld [vmem:[%s11692_s23 + $0x2b0] ss:$8 sps:$4 sm:$0xff]  }
 0x161   : > { %v9916_v15 = vld [vmem:[%s11692_s23 + $0x3b0] ss:$8 sps:$4 sm:$0xff]  }
 0x162   : > { %7929 = vmatmul.mubr.bf16.vlgmr.msra.gmra.mxu0 %v9113_v3  ;;  %7982 = vmatmul.mubr.bf16.vlgmr.msra.gmra.mxu1 %v9115_v6  ;;  %v9145_v3 = vcombine.low %v4472_v16, %v4488_v17  ;;  %v9864_v6 = vld [vmem:[%s11692_s23 + $0x344] ss:$8 sps:$4 sm:$0xff]  }
 0x163   : > { %8003 = vmatpush1.bf16.msra.mxu0 %v9841_v20  ;;  %8056 = vmatpush1.bf16.msra.mxu1 %v9844_v21  ;;  %v9921_v16 = vld [vmem:[%s11692_s23 + $0x2a4] ss:$8 sps:$4 sm:$0xff]   ;;  %v9927_v20 = vld [vmem:[%s11692_s23 + $0x294] ss:$8 sps:$4 sm:$0xff]  }
 0x164   : > { %8004 = vmatprep.subr.bf16.mxu0 %v9849_v22  ;;  %8057 = vmatprep.subr.bf16.mxu1 %v9852_v23  ;;  %v9924_v17 = vld [vmem:[%s11692_s23 + $0x3a4] ss:$8 sps:$4 sm:$0xff]   ;;  %v9930_v21 = vld [vmem:[%s11692_s23 + $0x394] ss:$8 sps:$4 sm:$0xff]   ;;  %v9925_v22 = vld [vmem:[%s11692_s23 + $0x290] ss:$8 sps:$4 sm:$0xff]  }
 0x165   : > { %7938 = vmatprep.mubr.bf16.mxu0 %v9146_v24  ;;  %7991 = vmatprep.mubr.bf16.mxu1 %v9148_v25  ;;  %v9928_v23 = vld [vmem:[%s11692_s23 + $0x390] ss:$8 sps:$4 sm:$0xff]   ;;  %v9933_v24 = vld [vmem:[%s11692_s23 + $0x284] ss:$8 sps:$4 sm:$0xff]  }
 0x166   : > { %v9936_v25 = vld [vmem:[%s11692_s23 + $0x384] ss:$8 sps:$4 sm:$0xff]  }
 0x167   : > { %8005 = vmatpush1.bf16.msra.mxu0 %v9847_v26  ;;  %8058 = vmatpush1.bf16.msra.mxu1 %v9850_v27  ;;  %v9931_v26 = vld [vmem:[%s11692_s23 + $0x280] ss:$8 sps:$4 sm:$0xff]  }
 0x168   : > { %8006 = vmatprep.subr.bf16.mxu0 %v9855_v28  ;;  %8059 = vmatprep.subr.bf16.mxu1 %v9858_v29  ;;  %v9934_v27 = vld [vmem:[%s11692_s23 + $0x380] ss:$8 sps:$4 sm:$0xff]   ;;  %v9939_v28 = vld [vmem:[%s11692_s23 + $0x474] ss:$8 sps:$4 sm:$0xff]  }
 0x169   : > { %v9942_v29 = vld [vmem:[%s11692_s23 + $0x574] ss:$8 sps:$4 sm:$0xff]  }
 0x16a   : > { %7939 = vmatmul.mubr.bf16.gmra.mxu0 %v9145_v3  ;;  %7992 = vmatmul.mubr.bf16.gmra.mxu1 %v9147_v2  ;;  %v4490_v3 = vld [vmem:[%s12766_s0 + $0x190] sm:$0xff]  ;;  %v9117_v2 = vcombine.low %v11801_v38, %v11810_v43 }
 0x16b   : > { %8007 = vmatpush1.bf16.msra.mxu0 %v9853_v0  ;;  %8060 = vmatpush1.bf16.msra.mxu1 %v9856_v1  ;;  %v4474_v0 = vld [vmem:[%s12766_s0 + $0x110] sm:$0xff] }
 0x16c   : > { %8008 = vmatprep.subr.bf16.mxu0 %v9861_v5  ;;  %8061 = vmatprep.subr.bf16.mxu1 %v9864_v6  ;;  %v9937_v1 = vld [vmem:[%s11692_s23 + $0x470] ss:$8 sps:$4 sm:$0xff]   ;;  %v9119_v5 = vcombine.low %v11815_v44, %v11822_v46  ;;  %v9951_v38 = vld [vmem:[%s11692_s23 + $0x454] ss:$8 sps:$4 sm:$0xff]   ;;  %v11903_v44 = vld [vmem:[%s12766_s0 + $0x28] sm:$0xff] }
 0x16d   : > { %8034 = vmatprep.mubr.bf16.mxu0 %v9118_v45  ;;  %8087 = vmatprep.mubr.bf16.mxu1 %v9120_v48  ;;  %v4475_v6 = vld [vmem:[%s12766_s0 + $0x118] sm:$0xff]  ;;  %v11908_v45 = vld [vmem:[%s12766_s0 + $0xa8] sm:$0xff] }
 0x16e   : > { %v9949_v46 = vld [vmem:[%s11692_s23 + $0x450] ss:$8 sps:$4 sm:$0xff]   ;;  %v9957_v48 = vld [vmem:[%s11692_s23 + $0x444] ss:$8 sps:$4 sm:$0xff]  }
 0x16f   : > { %8009 = vmatpush1.bf16.msra.mxu0 %v9859_v30  ;;  %8062 = vmatpush1.bf16.msra.mxu1 %v9862_v31  ;;  %v4491_v30 = vld [vmem:[%s12766_s0 + $0x198] sm:$0xff] }
 0x170   : > { %8010 = vmatprep.subr.bf16.mxu0 %v9867_v32  ;;  %8063 = vmatprep.subr.bf16.mxu1 %v9870_v33  ;;  %v9940_v31 = vld [vmem:[%s11692_s23 + $0x570] ss:$8 sps:$4 sm:$0xff]   ;;  %v9945_v32 = vld [vmem:[%s11692_s23 + $0x464] ss:$8 sps:$4 sm:$0xff]   ;;  %v9151_v43 = vcombine.low %v4475_v6, %v4491_v30 }
 0x171   : > { %v9948_v33 = vld [vmem:[%s11692_s23 + $0x564] ss:$8 sps:$4 sm:$0xff]  }
 0x173   : > { %8011 = vmatpush1.bf16.msra.mxu0 %v9865_v34  ;;  %8064 = vmatpush1.bf16.msra.mxu1 %v9868_v35  ;;  %v9150_v34 = vcombine.high %v4474_v0, %v4490_v3  ;;  %v9152_v35 = vcombine.high %v4475_v6, %v4491_v30  ;;  %v10018_v6 = vld [vmem:[%s11692_s23 + $0x5a0] ss:$8 sps:$4 sm:$0xff]   ;;  %v10023_v30 = vld [vmem:[%s11692_s23 + $0x494] ss:$8 sps:$4 sm:$0xff]  }
 0x174   : > { %8012 = vmatprep.subr.bf16.mxu0 %v9873_v36  ;;  %8065 = vmatprep.subr.bf16.mxu1 %v9876_v37  ;;  %v9943_v36 = vld [vmem:[%s11692_s23 + $0x460] ss:$8 sps:$4 sm:$0xff]  }
 0x175   : > { %v9946_v37 = vld [vmem:[%s11692_s23 + $0x560] ss:$8 sps:$4 sm:$0xff]  }
 0x177   : > { %8013 = vmatpush1.bf16.msra.mxu0 %v9871_v39  ;;  %8066 = vmatpush1.bf16.msra.mxu1 %v9874_v40  ;;  %v9954_v39 = vld [vmem:[%s11692_s23 + $0x554] ss:$8 sps:$4 sm:$0xff]   ;;  %v11893_v40 = vld [vmem:[%s12766_s0 + $0x20] sm:$0xff] }
 0x178   : > { %8014 = vmatprep.subr.bf16.mxu0 %v9879_v41  ;;  %8067 = vmatprep.subr.bf16.mxu1 %v9882_v42  ;;  %v11898_v41 = vld [vmem:[%s12766_s0 + $0xa0] sm:$0xff]  ;;  %v9149_v42 = vcombine.low %v4474_v0, %v4490_v3  ;;  %v10009_v0 = vld [vmem:[%s11692_s23 + $0x4b0] ss:$8 sps:$4 sm:$0xff]  }
 0x179   : > { %v10017_v3 = vld [vmem:[%s11692_s23 + $0x4a4] ss:$8 sps:$4 sm:$0xff]  }
 0x17b   : > { %8015 = vmatpush1.bf16.msra.mxu0 %v9877_v47  ;;  %8068 = vmatpush1.bf16.msra.mxu1 %v9880_v49  ;;  %v9952_v47 = vld [vmem:[%s11692_s23 + $0x550] ss:$8 sps:$4 sm:$0xff]   ;;  %v9960_v49 = vld [vmem:[%s11692_s23 + $0x544] ss:$8 sps:$4 sm:$0xff]  }
 0x17c   : > { %8016 = vmatprep.subr.bf16.mxu0 %v9885_v50  ;;  %8069 = vmatprep.subr.bf16.mxu1 %v9888_v51  ;;  %v9122_v50 = vcombine.high %v11893_v40, %v11898_v41  ;;  %v9124_v51 = vcombine.high %v11903_v44, %v11908_v45 }
 0x17f   : > { %8017 = vmatpush1.bf16.msra.mxu0 %v9883_v52  ;;  %8070 = vmatpush1.bf16.msra.mxu1 %v9886_v53  ;;  %v9955_v52 = vld [vmem:[%s11692_s23 + $0x440] ss:$8 sps:$4 sm:$0xff]  }
 0x180   : > { %8018 = vmatprep.subr.bf16.mxu0 %v9891_v54  ;;  %8071 = vmatprep.subr.bf16.mxu1 %v9894_v55  ;;  %v9958_v53 = vld [vmem:[%s11692_s23 + $0x540] ss:$8 sps:$4 sm:$0xff]   ;;  %v9963_v54 = vld [vmem:[%s11692_s23 + $0x434] ss:$8 sps:$4 sm:$0xff]  }
 0x181   : > { %v9966_v55 = vld [vmem:[%s11692_s23 + $0x534] ss:$8 sps:$4 sm:$0xff]  }
 0x183   : > { %8019 = vmatpush2.bf16.msra.mxu0 %v9889_v56  ;;  %8072 = vmatpush2.bf16.msra.mxu1 %v9892_v57  ;;  %v9961_v56 = vld [vmem:[%s11692_s23 + $0x430] ss:$8 sps:$4 sm:$0xff]  }
 0x184   : > { %8020 = vmatprep.subr.bf16.mxu0 %v9897_v58  ;;  %8073 = vmatprep.subr.bf16.mxu1 %v9900_v59  ;;  %v9964_v57 = vld [vmem:[%s11692_s23 + $0x530] ss:$8 sps:$4 sm:$0xff]   ;;  %v9969_v58 = vld [vmem:[%s11692_s23 + $0x424] ss:$8 sps:$4 sm:$0xff]  }
 0x185   : > { %v9972_v59 = vld [vmem:[%s11692_s23 + $0x524] ss:$8 sps:$4 sm:$0xff]  }
 0x187   : > { %8021 = vmatpush2.bf16.msra.mxu0 %v9895_v60  ;;  %8074 = vmatpush2.bf16.msra.mxu1 %v9898_v61  ;;  %v9967_v60 = vld [vmem:[%s11692_s23 + $0x420] ss:$8 sps:$4 sm:$0xff]  }
 0x188   : > { %8022 = vmatprep.subr.bf16.mxu0 %v9903_v62  ;;  %8075 = vmatprep.subr.bf16.mxu1 %v9906_v63  ;;  %v9970_v61 = vld [vmem:[%s11692_s23 + $0x520] ss:$8 sps:$4 sm:$0xff]   ;;  %v9975_v62 = vld [vmem:[%s11692_s23 + $0x414] ss:$8 sps:$4 sm:$0xff]  }
 0x189   : > { %v9978_v63 = vld [vmem:[%s11692_s23 + $0x514] ss:$8 sps:$4 sm:$0xff]  }
 0x18b   : > { %8023 = vmatpush2.bf16.msra.mxu0 %v9901_v4  ;;  %8076 = vmatpush2.bf16.msra.mxu1 %v9904_v7  ;;  %v9973_v4 = vld [vmem:[%s11692_s23 + $0x410] ss:$8 sps:$4 sm:$0xff]  }
 0x18c   : > { %8024 = vmatprep.subr.bf16.mxu0 %v9909_v8  ;;  %8077 = vmatprep.subr.bf16.mxu1 %v9912_v9  ;;  %v9976_v7 = vld [vmem:[%s11692_s23 + $0x510] ss:$8 sps:$4 sm:$0xff]   ;;  %v9981_v8 = vld [vmem:[%s11692_s23 + $0x404] ss:$8 sps:$4 sm:$0xff]  }
 0x18d   : > { %v9984_v9 = vld [vmem:[%s11692_s23 + $0x504] ss:$8 sps:$4 sm:$0xff]  }
 0x18f   : > { %8025 = vmatpush2.bf16.msra.mxu0 %v9907_v10  ;;  %8078 = vmatpush2.bf16.msra.mxu1 %v9910_v11  ;;  %v9979_v10 = vld [vmem:[%s11692_s23 + $0x400] ss:$8 sps:$4 sm:$0xff]  }
 0x190   : > { %8026 = vmatprep.subr.bf16.mxu0 %v9915_v12  ;;  %8079 = vmatprep.subr.bf16.mxu1 %v9918_v13  ;;  %v9982_v11 = vld [vmem:[%s11692_s23 + $0x500] ss:$8 sps:$4 sm:$0xff]   ;;  %v9987_v12 = vld [vmem:[%s11692_s23 + $0x4f4] ss:$8 sps:$4 sm:$0xff]  }
 0x191   : > { %v9990_v13 = vld [vmem:[%s11692_s23 + $0x5f4] ss:$8 sps:$4 sm:$0xff]  }
 0x193   : > { %8027 = vmatpush2.bf16.msra.mxu0 %v9913_v14  ;;  %8080 = vmatpush2.bf16.msra.mxu1 %v9916_v15  ;;  %v9985_v14 = vld [vmem:[%s11692_s23 + $0x4f0] ss:$8 sps:$4 sm:$0xff]  }
 0x194   : > { %8028 = vmatprep.subr.bf16.mxu0 %v9921_v16  ;;  %8081 = vmatprep.subr.bf16.mxu1 %v9924_v17  ;;  %v9988_v15 = vld [vmem:[%s11692_s23 + $0x5f0] ss:$8 sps:$4 sm:$0xff]   ;;  %v9993_v16 = vld [vmem:[%s11692_s23 + $0x4e4] ss:$8 sps:$4 sm:$0xff]  }
 0x195   : > { %v9996_v17 = vld [vmem:[%s11692_s23 + $0x5e4] ss:$8 sps:$4 sm:$0xff]  }
 0x197   : > { %8029 = vmatpush2.bf16.msra.mxu0 %v9919_v18  ;;  %8082 = vmatpush2.bf16.msra.mxu1 %v9922_v19  ;;  %v9991_v18 = vld [vmem:[%s11692_s23 + $0x4e0] ss:$8 sps:$4 sm:$0xff]  }
 0x198   : > { %8030 = vmatprep.subr.bf16.mxu0 %v9927_v20  ;;  %8083 = vmatprep.subr.bf16.mxu1 %v9930_v21  ;;  %v9994_v19 = vld [vmem:[%s11692_s23 + $0x5e0] ss:$8 sps:$4 sm:$0xff]   ;;  %v9999_v20 = vld [vmem:[%s11692_s23 + $0x4d4] ss:$8 sps:$4 sm:$0xff]  }
 0x199   : > { %v10002_v21 = vld [vmem:[%s11692_s23 + $0x5d4] ss:$8 sps:$4 sm:$0xff]  }
 0x19b   : > { %8031 = vmatpush2.bf16.msra.mxu0 %v9925_v22  ;;  %8084 = vmatpush2.bf16.msra.mxu1 %v9928_v23  ;;  %v9997_v22 = vld [vmem:[%s11692_s23 + $0x4d0] ss:$8 sps:$4 sm:$0xff]  }
 0x19c   : > { %8032 = vmatprep.subr.bf16.mxu0 %v9933_v24  ;;  %8085 = vmatprep.subr.bf16.mxu1 %v9936_v25  ;;  %v10000_v23 = vld [vmem:[%s11692_s23 + $0x5d0] ss:$8 sps:$4 sm:$0xff]   ;;  %v10005_v24 = vld [vmem:[%s11692_s23 + $0x4c4] ss:$8 sps:$4 sm:$0xff]  }
 0x19d   : > { %v10008_v25 = vld [vmem:[%s11692_s23 + $0x5c4] ss:$8 sps:$4 sm:$0xff]  }
 0x19f   : > { %8033 = vmatpush2.bf16.msra.mxu0 %v9931_v26  ;;  %8086 = vmatpush2.bf16.msra.mxu1 %v9934_v27  ;;  %v10003_v26 = vld [vmem:[%s11692_s23 + $0x4c0] ss:$8 sps:$4 sm:$0xff]  }
 0x1a0   : > { %8108 = vmatprep.subr.bf16.mxu0 %v9939_v28  ;;  %8161 = vmatprep.subr.bf16.mxu1 %v9942_v29  ;;  %v10006_v27 = vld [vmem:[%s11692_s23 + $0x5c0] ss:$8 sps:$4 sm:$0xff]   ;;  %v10011_v28 = vld [vmem:[%s11692_s23 + $0x4b4] ss:$8 sps:$4 sm:$0xff]  }
 0x1a1   : > { %v10014_v29 = vld [vmem:[%s11692_s23 + $0x5b4] ss:$8 sps:$4 sm:$0xff]  }
 0x1a2   : > { %8035 = vmatmul.mubr.bf16.vlgmr.msra.gmra.mxu0 %v9117_v2  ;;  %8088 = vmatmul.mubr.bf16.vlgmr.msra.gmra.mxu1 %v9119_v5  ;;  %v10020_v2 = vld [vmem:[%s11692_s23 + $0x5a4] ss:$8 sps:$4 sm:$0xff]   ;;  %v10015_v5 = vld [vmem:[%s11692_s23 + $0x4a0] ss:$8 sps:$4 sm:$0xff]  }
 0x1a3   : > { %8109 = vmatpush1.bf16.msra.mxu0 %v9937_v1  ;;  %8162 = vmatpush1.bf16.msra.mxu1 %v9940_v31  ;;  %v10012_v1 = vld [vmem:[%s11692_s23 + $0x5b0] ss:$8 sps:$4 sm:$0xff]   ;;  %v10026_v31 = vld [vmem:[%s11692_s23 + $0x594] ss:$8 sps:$4 sm:$0xff]  }
 0x1a4   : > { %8110 = vmatprep.subr.bf16.mxu0 %v9945_v32  ;;  %8163 = vmatprep.subr.bf16.mxu1 %v9948_v33  ;;  %v10021_v32 = vld [vmem:[%s11692_s23 + $0x490] ss:$8 sps:$4 sm:$0xff]  }
 0x1a5   : > { %8044 = vmatprep.mubr.bf16.mxu0 %v9150_v34  ;;  %8097 = vmatprep.mubr.bf16.mxu1 %v9152_v35  ;;  %v10024_v33 = vld [vmem:[%s11692_s23 + $0x590] ss:$8 sps:$4 sm:$0xff]   ;;  %v10029_v34 = vld [vmem:[%s11692_s23 + $0x484] ss:$8 sps:$4 sm:$0xff]  }
 0x1a6   : > { %v10032_v35 = vld [vmem:[%s11692_s23 + $0x584] ss:$8 sps:$4 sm:$0xff]  }
 0x1a7   : > { %8111 = vmatpush1.bf16.msra.mxu0 %v9943_v36  ;;  %8164 = vmatpush1.bf16.msra.mxu1 %v9946_v37  ;;  %v10027_v36 = vld [vmem:[%s11692_s23 + $0x480] ss:$8 sps:$4 sm:$0xff]  }
 0x1a8   : > { %8112 = vmatprep.subr.bf16.mxu0 %v9951_v38  ;;  %8165 = vmatprep.subr.bf16.mxu1 %v9954_v39  ;;  %v10030_v37 = vld [vmem:[%s11692_s23 + $0x580] ss:$8 sps:$4 sm:$0xff]   ;;  %v10035_v38 = vld [vmem:[%s11692_s23 + $0x674] ss:$8 sps:$4 sm:$0xff]  }
 0x1a9   : > { %v10038_v39 = vld [vmem:[%s11692_s23 + $0x774] ss:$8 sps:$4 sm:$0xff]  }
 0x1aa   : > { %8045 = vmatmul.mubr.bf16.gmra.mxu0 %v9149_v42  ;;  %8098 = vmatmul.mubr.bf16.gmra.mxu1 %v9151_v43  ;;  %v4476_v42 = vld [vmem:[%s12766_s0 + $0x120] sm:$0xff]  ;;  %v10033_v43 = vld [vmem:[%s11692_s23 + $0x670] ss:$8 sps:$4 sm:$0xff]  }
 0x1ab   : > { %8113 = vmatpush1.bf16.msra.mxu0 %v9949_v46  ;;  %8166 = vmatpush1.bf16.msra.mxu1 %v9952_v47  ;;  %v4492_v46 = vld [vmem:[%s12766_s0 + $0x1a0] sm:$0xff]  ;;  %v9121_v47 = vcombine.low %v11893_v40, %v11898_v41 }
 0x1ac   : > { %8114 = vmatprep.subr.bf16.mxu0 %v9957_v48  ;;  %8167 = vmatprep.subr.bf16.mxu1 %v9960_v49  ;;  %v9123_v48 = vcombine.low %v11903_v44, %v11908_v45  ;;  %v4477_v49 = vld [vmem:[%s12766_s0 + $0x128] sm:$0xff]  ;;  %v9154_v41 = vcombine.high %v4476_v42, %v4492_v46 }
 0x1ad   : > { %8140 = vmatprep.mubr.bf16.mxu0 %v9122_v50  ;;  %8193 = vmatprep.mubr.bf16.mxu1 %v9124_v51  ;;  %v4493_v50 = vld [vmem:[%s12766_s0 + $0x1a8] sm:$0xff]  ;;  %v10036_v51 = vld [vmem:[%s11692_s23 + $0x770] ss:$8 sps:$4 sm:$0xff]  }
 0x1ae   : > { %v10044_v40 = vld [vmem:[%s11692_s23 + $0x764] ss:$8 sps:$4 sm:$0xff]   ;;  %v9156_v44 = vcombine.high %v4477_v49, %v4493_v50  ;;  %v10039_v45 = vld [vmem:[%s11692_s23 + $0x660] ss:$8 sps:$4 sm:$0xff]  }
 0x1af   : > { %8115 = vmatpush1.bf16.msra.mxu0 %v9955_v52  ;;  %8168 = vmatpush1.bf16.msra.mxu1 %v9958_v53  ;;  %v10041_v52 = vld [vmem:[%s11692_s23 + $0x664] ss:$8 sps:$4 sm:$0xff]   ;;  %v10042_v53 = vld [vmem:[%s11692_s23 + $0x760] ss:$8 sps:$4 sm:$0xff]  }
 0x1b0   : > { %8116 = vmatprep.subr.bf16.mxu0 %v9963_v54  ;;  %8169 = vmatprep.subr.bf16.mxu1 %v9966_v55  ;;  %v10047_v54 = vld [vmem:[%s11692_s23 + $0x654] ss:$8 sps:$4 sm:$0xff]  }
 0x1b1   : > { %v10050_v55 = vld [vmem:[%s11692_s23 + $0x754] ss:$8 sps:$4 sm:$0xff]  }
 0x1b3   : > { %8117 = vmatpush1.bf16.msra.mxu0 %v9961_v56  ;;  %8170 = vmatpush1.bf16.msra.mxu1 %v9964_v57  ;;  %v11997_v56 = vld [vmem:[%s12766_s0 + $0x30] sm:$0xff] }
 0x1b4   : > { %8118 = vmatprep.subr.bf16.mxu0 %v9969_v58  ;;  %8171 = vmatprep.subr.bf16.mxu1 %v9972_v59  ;;  %v10045_v57 = vld [vmem:[%s11692_s23 + $0x650] ss:$8 sps:$4 sm:$0xff]   ;;  %v9153_v59 = vcombine.low %v4476_v42, %v4492_v46  ;;  %v10113_v46 = vld [vmem:[%s11692_s23 + $0x6a4] ss:$8 sps:$4 sm:$0xff]  }
 0x1b5   : > { %v12003_v58 = vld [vmem:[%s12766_s0 + $0xb0] sm:$0xff] }
 0x1b6   : > { %v10105_v42 = vld [vmem:[%s11692_s23 + $0x6b0] ss:$8 sps:$4 sm:$0xff]  }
 0x1b7   : > { %8119 = vmatpush1.bf16.msra.mxu0 %v9967_v60  ;;  %8172 = vmatpush1.bf16.msra.mxu1 %v9970_v61  ;;  %v9155_v60 = vcombine.low %v4477_v49, %v4493_v50  ;;  %v12008_v61 = vld [vmem:[%s12766_s0 + $0x38] sm:$0xff]  ;;  %v10114_v49 = vld [vmem:[%s11692_s23 + $0x7a0] ss:$8 sps:$4 sm:$0xff]  }
 0x1b8   : > { %8120 = vmatprep.subr.bf16.mxu0 %v9975_v62  ;;  %8173 = vmatprep.subr.bf16.mxu1 %v9978_v63  ;;  %v12013_v62 = vld [vmem:[%s12766_s0 + $0xb8] sm:$0xff] }
 0x1b9   : > { %v10048_v63 = vld [vmem:[%s11692_s23 + $0x750] ss:$8 sps:$4 sm:$0xff]   ;;  %v10119_v50 = vld [vmem:[%s11692_s23 + $0x694] ss:$8 sps:$4 sm:$0xff]  }
 0x1bb   : > { %8121 = vmatpush1.bf16.msra.mxu0 %v9973_v4  ;;  %8174 = vmatpush1.bf16.msra.mxu1 %v9976_v7  ;;  %v10053_v4 = vld [vmem:[%s11692_s23 + $0x644] ss:$8 sps:$4 sm:$0xff]  }
 0x1bc   : > { %8122 = vmatprep.subr.bf16.mxu0 %v9981_v8  ;;  %8175 = vmatprep.subr.bf16.mxu1 %v9984_v9  ;;  %v10056_v7 = vld [vmem:[%s11692_s23 + $0x744] ss:$8 sps:$4 sm:$0xff]   ;;  %v9126_v8 = vcombine.high %v11997_v56, %v12003_v58  ;;  %v9128_v9 = vcombine.high %v12008_v61, %v12013_v62 }
 0x1bf   : > { %8123 = vmatpush1.bf16.msra.mxu0 %v9979_v10  ;;  %8176 = vmatpush1.bf16.msra.mxu1 %v9982_v11  ;;  %v10051_v10 = vld [vmem:[%s11692_s23 + $0x640] ss:$8 sps:$4 sm:$0xff]  }
 0x1c0   : > { %8124 = vmatprep.subr.bf16.mxu0 %v9987_v12  ;;  %8177 = vmatprep.subr.bf16.mxu1 %v9990_v13  ;;  %v10054_v11 = vld [vmem:[%s11692_s23 + $0x740] ss:$8 sps:$4 sm:$0xff]   ;;  %v10059_v12 = vld [vmem:[%s11692_s23 + $0x634] ss:$8 sps:$4 sm:$0xff]  }
 0x1c1   : > { %v10062_v13 = vld [vmem:[%s11692_s23 + $0x734] ss:$8 sps:$4 sm:$0xff]  }
 0x1c3   : > { %8125 = vmatpush2.bf16.msra.mxu0 %v9985_v14  ;;  %8178 = vmatpush2.bf16.msra.mxu1 %v9988_v15  ;;  %v10057_v14 = vld [vmem:[%s11692_s23 + $0x630] ss:$8 sps:$4 sm:$0xff]  }
 0x1c4   : > { %8126 = vmatprep.subr.bf16.mxu0 %v9993_v16  ;;  %8179 = vmatprep.subr.bf16.mxu1 %v9996_v17  ;;  %v10060_v15 = vld [vmem:[%s11692_s23 + $0x730] ss:$8 sps:$4 sm:$0xff]   ;;  %v10065_v16 = vld [vmem:[%s11692_s23 + $0x624] ss:$8 sps:$4 sm:$0xff]  }
 0x1c5   : > { %v10068_v17 = vld [vmem:[%s11692_s23 + $0x724] ss:$8 sps:$4 sm:$0xff]  }
 0x1c7   : > { %8127 = vmatpush2.bf16.msra.mxu0 %v9991_v18  ;;  %8180 = vmatpush2.bf16.msra.mxu1 %v9994_v19  ;;  %v10063_v18 = vld [vmem:[%s11692_s23 + $0x620] ss:$8 sps:$4 sm:$0xff]  }
 0x1c8   : > { %8128 = vmatprep.subr.bf16.mxu0 %v9999_v20  ;;  %8181 = vmatprep.subr.bf16.mxu1 %v10002_v21  ;;  %v10066_v19 = vld [vmem:[%s11692_s23 + $0x720] ss:$8 sps:$4 sm:$0xff]   ;;  %v10071_v20 = vld [vmem:[%s11692_s23 + $0x614] ss:$8 sps:$4 sm:$0xff]  }
 0x1c9   : > { %v10074_v21 = vld [vmem:[%s11692_s23 + $0x714] ss:$8 sps:$4 sm:$0xff]  }
 0x1cb   : > { %8129 = vmatpush2.bf16.msra.mxu0 %v9997_v22  ;;  %8182 = vmatpush2.bf16.msra.mxu1 %v10000_v23  ;;  %v10069_v22 = vld [vmem:[%s11692_s23 + $0x610] ss:$8 sps:$4 sm:$0xff]  }
 0x1cc   : > { %8130 = vmatprep.subr.bf16.mxu0 %v10005_v24  ;;  %8183 = vmatprep.subr.bf16.mxu1 %v10008_v25  ;;  %v10072_v23 = vld [vmem:[%s11692_s23 + $0x710] ss:$8 sps:$4 sm:$0xff]   ;;  %v10077_v24 = vld [vmem:[%s11692_s23 + $0x604] ss:$8 sps:$4 sm:$0xff]  }
 0x1cd   : > { %v10080_v25 = vld [vmem:[%s11692_s23 + $0x704] ss:$8 sps:$4 sm:$0xff]  }
 0x1cf   : > { %8131 = vmatpush2.bf16.msra.mxu0 %v10003_v26  ;;  %8184 = vmatpush2.bf16.msra.mxu1 %v10006_v27  ;;  %v10075_v26 = vld [vmem:[%s11692_s23 + $0x600] ss:$8 sps:$4 sm:$0xff]  }
 0x1d0   : > { %8132 = vmatprep.subr.bf16.mxu0 %v10011_v28  ;;  %8185 = vmatprep.subr.bf16.mxu1 %v10014_v29  ;;  %v10078_v27 = vld [vmem:[%s11692_s23 + $0x700] ss:$8 sps:$4 sm:$0xff]   ;;  %v10083_v28 = vld [vmem:[%s11692_s23 + $0x6f4] ss:$8 sps:$4 sm:$0xff]  }
 0x1d1   : > { %v10086_v29 = vld [vmem:[%s11692_s23 + $0x7f4] ss:$8 sps:$4 sm:$0xff]  }
 0x1d3   : > { %8133 = vmatpush2.bf16.msra.mxu0 %v10009_v0  ;;  %8186 = vmatpush2.bf16.msra.mxu1 %v10012_v1  ;;  %v10081_v0 = vld [vmem:[%s11692_s23 + $0x6f0] ss:$8 sps:$4 sm:$0xff]  }
 0x1d4   : > { %8134 = vmatprep.subr.bf16.mxu0 %v10017_v3  ;;  %8187 = vmatprep.subr.bf16.mxu1 %v10020_v2  ;;  %v10084_v1 = vld [vmem:[%s11692_s23 + $0x7f0] ss:$8 sps:$4 sm:$0xff]   ;;  %v10089_v3 = vld [vmem:[%s11692_s23 + $0x6e4] ss:$8 sps:$4 sm:$0xff]  }
 0x1d5   : > { %v10092_v2 = vld [vmem:[%s11692_s23 + $0x7e4] ss:$8 sps:$4 sm:$0xff]  }
 0x1d7   : > { %8135 = vmatpush2.bf16.msra.mxu0 %v10015_v5  ;;  %8188 = vmatpush2.bf16.msra.mxu1 %v10018_v6  ;;  %v10087_v5 = vld [vmem:[%s11692_s23 + $0x6e0] ss:$8 sps:$4 sm:$0xff]  }
 0x1d8   : > { %8136 = vmatprep.subr.bf16.mxu0 %v10023_v30  ;;  %8189 = vmatprep.subr.bf16.mxu1 %v10026_v31  ;;  %v10090_v6 = vld [vmem:[%s11692_s23 + $0x7e0] ss:$8 sps:$4 sm:$0xff]   ;;  %v10095_v30 = vld [vmem:[%s11692_s23 + $0x6d4] ss:$8 sps:$4 sm:$0xff]  }
 0x1d9   : > { %v10098_v31 = vld [vmem:[%s11692_s23 + $0x7d4] ss:$8 sps:$4 sm:$0xff]  }
 0x1db   : > { %8137 = vmatpush2.bf16.msra.mxu0 %v10021_v32  ;;  %8190 = vmatpush2.bf16.msra.mxu1 %v10024_v33  ;;  %v10093_v32 = vld [vmem:[%s11692_s23 + $0x6d0] ss:$8 sps:$4 sm:$0xff]  }
 0x1dc   : > { %8138 = vmatprep.subr.bf16.mxu0 %v10029_v34  ;;  %8191 = vmatprep.subr.bf16.mxu1 %v10032_v35  ;;  %v10096_v33 = vld [vmem:[%s11692_s23 + $0x7d0] ss:$8 sps:$4 sm:$0xff]   ;;  %v10101_v34 = vld [vmem:[%s11692_s23 + $0x6c4] ss:$8 sps:$4 sm:$0xff]  }
 0x1dd   : > { %v10104_v35 = vld [vmem:[%s11692_s23 + $0x7c4] ss:$8 sps:$4 sm:$0xff]  }
 0x1df   : > { %8139 = vmatpush2.bf16.msra.mxu0 %v10027_v36  ;;  %8192 = vmatpush2.bf16.msra.mxu1 %v10030_v37  ;;  %v10099_v36 = vld [vmem:[%s11692_s23 + $0x6c0] ss:$8 sps:$4 sm:$0xff]  }
 0x1e0   : > { %8214 = vmatprep.subr.bf16.mxu0 %v10035_v38  ;;  %8267 = vmatprep.subr.bf16.mxu1 %v10038_v39  ;;  %v10102_v37 = vld [vmem:[%s11692_s23 + $0x7c0] ss:$8 sps:$4 sm:$0xff]   ;;  %v10107_v38 = vld [vmem:[%s11692_s23 + $0x6b4] ss:$8 sps:$4 sm:$0xff]  }
 0x1e1   : > { %v10110_v39 = vld [vmem:[%s11692_s23 + $0x7b4] ss:$8 sps:$4 sm:$0xff]  }
 0x1e2   : > { %8141 = vmatmul.mubr.bf16.vlgmr.msra.gmra.mxu0 %v9121_v47  ;;  %8194 = vmatmul.mubr.bf16.vlgmr.msra.gmra.mxu1 %v9123_v48  ;;  %v10116_v47 = vld [vmem:[%s11692_s23 + $0x7a4] ss:$8 sps:$4 sm:$0xff]   ;;  %v10111_v48 = vld [vmem:[%s11692_s23 + $0x6a0] ss:$8 sps:$4 sm:$0xff]  }
 0x1e3   : > { %8215 = vmatpush1.bf16.msra.mxu0 %v10033_v43  ;;  %8268 = vmatpush1.bf16.msra.mxu1 %v10036_v51  ;;  %v10108_v43 = vld [vmem:[%s11692_s23 + $0x7b0] ss:$8 sps:$4 sm:$0xff]   ;;  %v10122_v51 = vld [vmem:[%s11692_s23 + $0x794] ss:$8 sps:$4 sm:$0xff]  }
 0x1e4   : > { %8216 = vmatprep.subr.bf16.mxu0 %v10041_v52  ;;  %8269 = vmatprep.subr.bf16.mxu1 %v10044_v40  ;;  %v10117_v52 = vld [vmem:[%s11692_s23 + $0x690] ss:$8 sps:$4 sm:$0xff]  }
 0x1e5   : > { %8150 = vmatprep.mubr.bf16.mxu0 %v9154_v41  ;;  %8203 = vmatprep.mubr.bf16.mxu1 %v9156_v44  ;;  %v10120_v40 = vld [vmem:[%s11692_s23 + $0x790] ss:$8 sps:$4 sm:$0xff]   ;;  %v10125_v41 = vld [vmem:[%s11692_s23 + $0x684] ss:$8 sps:$4 sm:$0xff]  }
 0x1e6   : > { %v10128_v44 = vld [vmem:[%s11692_s23 + $0x784] ss:$8 sps:$4 sm:$0xff]  }
 0x1e7   : > { %8217 = vmatpush1.bf16.msra.mxu0 %v10039_v45  ;;  %8270 = vmatpush1.bf16.msra.mxu1 %v10042_v53  ;;  %v10123_v45 = vld [vmem:[%s11692_s23 + $0x680] ss:$8 sps:$4 sm:$0xff]  }
 0x1e8   : > { %8218 = vmatprep.subr.bf16.mxu0 %v10047_v54  ;;  %8271 = vmatprep.subr.bf16.mxu1 %v10050_v55  ;;  %v10126_v53 = vld [vmem:[%s11692_s23 + $0x780] ss:$8 sps:$4 sm:$0xff]   ;;  %v10131_v54 = vld [vmem:[%s11692_s23 + $0x874] ss:$8 sps:$4 sm:$0xff]  }
 0x1e9   : > { %v10134_v55 = vld [vmem:[%s11692_s23 + $0x974] ss:$8 sps:$4 sm:$0xff]  }
 0x1ea   : > { %8151 = vmatmul.mubr.bf16.gmra.mxu0 %v9153_v59  ;;  %8204 = vmatmul.mubr.bf16.gmra.mxu1 %v9155_v60  ;;  %v10129_v59 = vld [vmem:[%s11692_s23 + $0x870] ss:$8 sps:$4 sm:$0xff]  }
 0x1eb   : > { %8219 = vmatpush1.bf16.msra.mxu0 %v10045_v57  ;;  %8272 = vmatpush1.bf16.msra.mxu1 %v10048_v63  ;;  %v4478_v57 = vld [vmem:[%s12766_s0 + $0x130] sm:$0xff]  ;;  %v9125_v63 = vcombine.low %v11997_v56, %v12003_v58  ;;  %v10140_v56 = vld [vmem:[%s11692_s23 + $0x964] ss:$8 sps:$4 sm:$0xff]  }
 0x1ec   : > { %8220 = vmatprep.subr.bf16.mxu0 %v10053_v4  ;;  %8273 = vmatprep.subr.bf16.mxu1 %v10056_v7  ;;  %v4494_v60 = vld [vmem:[%s12766_s0 + $0x1b0] sm:$0xff]  ;;  %v9127_v4 = vcombine.low %v12008_v61, %v12013_v62  ;;  %v4479_v7 = vld [vmem:[%s12766_s0 + $0x138] sm:$0xff] }
 0x1ed   : > { %8246 = vmatprep.mubr.bf16.mxu0 %v9126_v8  ;;  %8299 = vmatprep.mubr.bf16.mxu1 %v9128_v9  ;;  %v4495_v8 = vld [vmem:[%s12766_s0 + $0x1b8] sm:$0xff]  ;;  %v9158_v58 = vcombine.high %v4478_v57, %v4494_v60 }
 0x1ee   : > { %v10132_v9 = vld [vmem:[%s11692_s23 + $0x970] ss:$8 sps:$4 sm:$0xff]   ;;  %v9160_v61 = vcombine.high %v4479_v7, %v4495_v8 }
 0x1ef   : > { %8221 = vmatpush1.bf16.msra.mxu0 %v10051_v10  ;;  %8274 = vmatpush1.bf16.msra.mxu1 %v10054_v11  ;;  %v10137_v10 = vld [vmem:[%s11692_s23 + $0x864] ss:$8 sps:$4 sm:$0xff]  }
 0x1f0   : > { %8222 = vmatprep.subr.bf16.mxu0 %v10059_v12  ;;  %8275 = vmatprep.subr.bf16.mxu1 %v10062_v13  ;;  %v10135_v12 = vld [vmem:[%s11692_s23 + $0x860] ss:$8 sps:$4 sm:$0xff]  }
 0x1f1   : > { %v10138_v13 = vld [vmem:[%s11692_s23 + $0x960] ss:$8 sps:$4 sm:$0xff]  }
 0x1f3   : > { %8223 = vmatpush1.bf16.msra.mxu0 %v10057_v14  ;;  %8276 = vmatpush1.bf16.msra.mxu1 %v10060_v15  ;;  %v10143_v15 = vld [vmem:[%s11692_s23 + $0x854] ss:$8 sps:$4 sm:$0xff]  }
 0x1f4   : > { %8224 = vmatprep.subr.bf16.mxu0 %v10065_v16  ;;  %8277 = vmatprep.subr.bf16.mxu1 %v10068_v17  ;;  %v10146_v16 = vld [vmem:[%s11692_s23 + $0x954] ss:$8 sps:$4 sm:$0xff]  }
 0x1f7   : > { %8225 = vmatpush1.bf16.msra.mxu0 %v10063_v18  ;;  %8278 = vmatpush1.bf16.msra.mxu1 %v10066_v19  ;;  %v12103_v19 = vld [vmem:[%s12766_s0 + $0x40] sm:$0xff] }
 0x1f8   : > { %8226 = vmatprep.subr.bf16.mxu0 %v10071_v20  ;;  %8279 = vmatprep.subr.bf16.mxu1 %v10074_v21  ;;  %v10141_v21 = vld [vmem:[%s11692_s23 + $0x850] ss:$8 sps:$4 sm:$0xff]  }
 0x1fb   : > { %8227 = vmatpush1.bf16.msra.mxu0 %v10069_v22  ;;  %8280 = vmatpush1.bf16.msra.mxu1 %v10072_v23  ;;  %v12111_v22 = vld [vmem:[%s12766_s0 + $0xc0] sm:$0xff] }
 0x1fc   : > { %8228 = vmatprep.subr.bf16.mxu0 %v10077_v24  ;;  %8281 = vmatprep.subr.bf16.mxu1 %v10080_v25  ;;  %v9157_v25 = vcombine.low %v4478_v57, %v4494_v60  ;;  %v10165_v57 = vld [vmem:[%s11692_s23 + $0x810] ss:$8 sps:$4 sm:$0xff]   ;;  %v10173_v60 = vld [vmem:[%s11692_s23 + $0x804] ss:$8 sps:$4 sm:$0xff]  }
 0x1ff   : > { %8229 = vmatpush1.bf16.msra.mxu0 %v10075_v26  ;;  %8282 = vmatpush1.bf16.msra.mxu1 %v10078_v27  ;;  %v9159_v26 = vcombine.low %v4479_v7, %v4495_v8  ;;  %v12116_v27 = vld [vmem:[%s12766_s0 + $0x48] sm:$0xff]  ;;  %v10179_v8 = vld [vmem:[%s11692_s23 + $0x8f4] ss:$8 sps:$4 sm:$0xff]  }
 0x200   : > { %8230 = vmatprep.subr.bf16.mxu0 %v10083_v28  ;;  %8283 = vmatprep.subr.bf16.mxu1 %v10086_v29  ;;  %v12121_v28 = vld [vmem:[%s12766_s0 + $0xc8] sm:$0xff] }
 0x201   : > { %v10174_v7 = vld [vmem:[%s11692_s23 + $0x900] ss:$8 sps:$4 sm:$0xff]  }
 0x203   : > { %8231 = vmatpush2.bf16.msra.mxu0 %v10081_v0  ;;  %8284 = vmatpush2.bf16.msra.mxu1 %v10084_v1  ;;  %v10144_v0 = vld [vmem:[%s11692_s23 + $0x950] ss:$8 sps:$4 sm:$0xff]   ;;  %v10149_v1 = vld [vmem:[%s11692_s23 + $0x844] ss:$8 sps:$4 sm:$0xff]  }
 0x204   : > { %8232 = vmatprep.subr.bf16.mxu0 %v10089_v3  ;;  %8285 = vmatprep.subr.bf16.mxu1 %v10092_v2 }
 0x207   : > { %8233 = vmatpush2.bf16.msra.mxu0 %v10087_v5  ;;  %8286 = vmatpush2.bf16.msra.mxu1 %v10090_v6  ;;  %v10152_v5 = vld [vmem:[%s11692_s23 + $0x944] ss:$8 sps:$4 sm:$0xff]  }
 0x208   : > { %8234 = vmatprep.subr.bf16.mxu0 %v10095_v30  ;;  %8287 = vmatprep.subr.bf16.mxu1 %v10098_v31  ;;  %v9130_v30 = vcombine.high %v12103_v19, %v12111_v22  ;;  %v9132_v31 = vcombine.high %v12116_v27, %v12121_v28 }
 0x20b   : > { %8235 = vmatpush2.bf16.msra.mxu0 %v10093_v32  ;;  %8288 = vmatpush2.bf16.msra.mxu1 %v10096_v33  ;;  %v10147_v32 = vld [vmem:[%s11692_s23 + $0x840] ss:$8 sps:$4 sm:$0xff]  }
 0x20c   : > { %8236 = vmatprep.subr.bf16.mxu0 %v10101_v34  ;;  %8289 = vmatprep.subr.bf16.mxu1 %v10104_v35  ;;  %v10150_v35 = vld [vmem:[%s11692_s23 + $0x940] ss:$8 sps:$4 sm:$0xff]  }
 0x20f   : > { %8237 = vmatpush2.bf16.msra.mxu0 %v10099_v36  ;;  %8290 = vmatpush2.bf16.msra.mxu1 %v10102_v37  ;;  %v10155_v36 = vld [vmem:[%s11692_s23 + $0x834] ss:$8 sps:$4 sm:$0xff]  }
 0x210   : > { %8238 = vmatprep.subr.bf16.mxu0 %v10107_v38  ;;  %8291 = vmatprep.subr.bf16.mxu1 %v10110_v39  ;;  %v10158_v38 = vld [vmem:[%s11692_s23 + $0x934] ss:$8 sps:$4 sm:$0xff]  }
 0x213   : > { %8239 = vmatpush2.bf16.msra.mxu0 %v10105_v42  ;;  %8292 = vmatpush2.bf16.msra.mxu1 %v10108_v43 }
 0x214   : > { %8240 = vmatprep.subr.bf16.mxu0 %v10113_v46  ;;  %8293 = vmatprep.subr.bf16.mxu1 %v10116_v47 }
 0x217   : > { %8241 = vmatpush2.bf16.msra.mxu0 %v10111_v48  ;;  %8294 = vmatpush2.bf16.msra.mxu1 %v10114_v49  ;;  %v10153_v48 = vld [vmem:[%s11692_s23 + $0x830] ss:$8 sps:$4 sm:$0xff]  }
 0x218   : > { %8242 = vmatprep.subr.bf16.mxu0 %v10119_v50  ;;  %8295 = vmatprep.subr.bf16.mxu1 %v10122_v51  ;;  %v10156_v49 = vld [vmem:[%s11692_s23 + $0x930] ss:$8 sps:$4 sm:$0xff]   ;;  %v10161_v51 = vld [vmem:[%s11692_s23 + $0x824] ss:$8 sps:$4 sm:$0xff]  }
 0x21b   : > { %8243 = vmatpush2.bf16.msra.mxu0 %v10117_v52  ;;  %8296 = vmatpush2.bf16.msra.mxu1 %v10120_v40  ;;  %v10164_v52 = vld [vmem:[%s11692_s23 + $0x924] ss:$8 sps:$4 sm:$0xff]  }
 0x21c   : > { %8244 = vmatprep.subr.bf16.mxu0 %v10125_v41  ;;  %8297 = vmatprep.subr.bf16.mxu1 %v10128_v44 }
 0x21f   : > { %8245 = vmatpush2.bf16.msra.mxu0 %v10123_v45  ;;  %8298 = vmatpush2.bf16.msra.mxu1 %v10126_v53  ;;  %v10159_v45 = vld [vmem:[%s11692_s23 + $0x820] ss:$8 sps:$4 sm:$0xff]  }
 0x220   : > { %8320 = vmatprep.subr.bf16.mxu0 %v10131_v54  ;;  %8373 = vmatprep.subr.bf16.mxu1 %v10134_v55  ;;  %v10162_v53 = vld [vmem:[%s11692_s23 + $0x920] ss:$8 sps:$4 sm:$0xff]   ;;  %v10167_v54 = vld [vmem:[%s11692_s23 + $0x814] ss:$8 sps:$4 sm:$0xff]  }
 0x221   : > { %v10170_v55 = vld [vmem:[%s11692_s23 + $0x914] ss:$8 sps:$4 sm:$0xff]  }
 0x222   : > { %v7930_v62 = vpop.f32.mrf.mxu0  ;;  %v7983_v11 = vpop.f32.mrf.mxu1  ;;  %8247 = vmatmul.mubr.bf16.vlgmr.msra.gmra.mxu0 %v9125_v63  ;;  %8300 = vmatmul.mubr.bf16.vlgmr.msra.gmra.mxu1 %v9127_v4  ;;  %v10176_v63 = vld [vmem:[%s11692_s23 + $0x904] ss:$8 sps:$4 sm:$0xff]   ;;  %v10171_v4 = vld [vmem:[%s11692_s23 + $0x800] ss:$8 sps:$4 sm:$0xff]  }
 0x223   : > { %v12096_v14 = vadd.f32 %v7983_v11, %v7930_v62  ;;  %8321 = vmatpush1.bf16.msra.mxu0 %v10129_v59  ;;  %8374 = vmatpush1.bf16.msra.mxu1 %v10132_v9  ;;  %v10168_v59 = vld [vmem:[%s11692_s23 + $0x910] ss:$8 sps:$4 sm:$0xff]   ;;  %v10182_v9 = vld [vmem:[%s11692_s23 + $0x9f4] ss:$8 sps:$4 sm:$0xff]   ;;  %v10183_v62 = vld [vmem:[%s11692_s23 + $0x8e0] ss:$8 sps:$4 sm:$0xff]  }
 0x224   : > { %v7932_v17 = vpop.f32.mrf.mxu0  ;;  %v7985_v18 = vpop.f32.mrf.mxu1  ;;  %8322 = vmatprep.subr.bf16.mxu0 %v10137_v10  ;;  %8375 = vmatprep.subr.bf16.mxu1 %v10140_v56  ;;  %v10177_v10 = vld [vmem:[%s11692_s23 + $0x8f0] ss:$8 sps:$4 sm:$0xff]   ;;  %v10186_v11 = vld [vmem:[%s11692_s23 + $0x9e0] ss:$8 sps:$4 sm:$0xff]  }
 0x225   : > { %v12105_v20 = vadd.f32 %v7985_v18, %v7932_v17  ;;  %8256 = vmatprep.mubr.bf16.mxu0 %v9158_v58  ;;  %8309 = vmatprep.mubr.bf16.mxu1 %v9160_v61  ;;  %v10180_v56 = vld [vmem:[%s11692_s23 + $0x9f0] ss:$8 sps:$4 sm:$0xff]   ;;  %v10185_v58 = vld [vmem:[%s11692_s23 + $0x8e4] ss:$8 sps:$4 sm:$0xff]  }
 0x226   : > { %v7934_v23 = vpop.f32.mrf.mxu0  ;;  %v7987_v24 = vpop.f32.mrf.mxu1  ;;  %v10188_v61 = vld [vmem:[%s11692_s23 + $0x9e4] ss:$8 sps:$4 sm:$0xff]  }
 0x227   : > { %v12123_v29 = vadd.f32 %v7987_v24, %v7934_v23  ;;  %8323 = vmatpush1.bf16.msra.mxu0 %v10135_v12  ;;  %8376 = vmatpush1.bf16.msra.mxu1 %v10138_v13  ;;  %v10191_v12 = vld [vmem:[%s11692_s23 + $0x8d4] ss:$8 sps:$4 sm:$0xff]   ;;  %v10197_v17 = vld [vmem:[%s11692_s23 + $0x8c4] ss:$8 sps:$4 sm:$0xff]   ;;  %v10198_v23 = vld [vmem:[%s11692_s23 + $0x9c0] ss:$8 sps:$4 sm:$0xff]  }
 0x228   : > { %v7936_v3 = vpop.f32.mrf.mxu0  ;;  %v7989_v2 = vpop.f32.mrf.mxu1  ;;  %8324 = vmatprep.subr.bf16.mxu0 %v10143_v15  ;;  %8377 = vmatprep.subr.bf16.mxu1 %v10146_v16  ;;  %v10194_v13 = vld [vmem:[%s11692_s23 + $0x9d4] ss:$8 sps:$4 sm:$0xff]   ;;  %v10189_v15 = vld [vmem:[%s11692_s23 + $0x8d0] ss:$8 sps:$4 sm:$0xff]   ;;  %v10200_v18 = vld [vmem:[%s11692_s23 + $0x9c4] ss:$8 sps:$4 sm:$0xff]  }
 0x229   : > { %v12128_v6 = vadd.f32 %v7989_v2, %v7936_v3  ;;  %v10192_v16 = vld [vmem:[%s11692_s23 + $0x9d0] ss:$8 sps:$4 sm:$0xff]   ;;  %v10203_v24 = vld [vmem:[%s11692_s23 + $0x8b4] ss:$8 sps:$4 sm:$0xff]   ;;  %v10212_v3 = vld [vmem:[%s11692_s23 + $0x9a4] ss:$8 sps:$4 sm:$0xff]  }
 0x22a   : > { %8257 = vmatmul.mubr.bf16.gmra.mxu0 %v9157_v25  ;;  %8310 = vmatmul.mubr.bf16.gmra.mxu1 %v9159_v26  ;;  %v7940_v33 = vpop.f32.mrf.mxu0  ;;  %v7993_v34 = vpop.f32.mrf.mxu1  ;;  %v10206_v25 = vld [vmem:[%s11692_s23 + $0x9b4] ss:$8 sps:$4 sm:$0xff]   ;;  %v10201_v26 = vld [vmem:[%s11692_s23 + $0x8b0] ss:$8 sps:$4 sm:$0xff]   ;;  %v10207_v2 = vld [vmem:[%s11692_s23 + $0x8a0] ss:$8 sps:$4 sm:$0xff]  }
 0x22b   : > { %8325 = vmatpush1.bf16.msra.mxu0 %v10141_v21  ;;  %8378 = vmatpush1.bf16.msra.mxu1 %v10144_v0  ;;  %v12137_v37 = vadd.f32 %v7993_v34, %v7940_v33  ;;  %v10195_v21 = vld [vmem:[%s11692_s23 + $0x8c0] ss:$8 sps:$4 sm:$0xff]   ;;  %v10204_v0 = vld [vmem:[%s11692_s23 + $0x9b0] ss:$8 sps:$4 sm:$0xff]   ;;  %v10221_v34 = vld [vmem:[%s11692_s23 + $0x884] ss:$8 sps:$4 sm:$0xff]  }
 0x22c   : > { %8326 = vmatprep.subr.bf16.mxu0 %v10149_v1  ;;  %8379 = vmatprep.subr.bf16.mxu1 %v10152_v5  ;;  %v7942_v39 = vpop.f32.mrf.mxu0  ;;  %v7995_v42 = vpop.f32.mrf.mxu1  ;;  %v10209_v1 = vld [vmem:[%s11692_s23 + $0x8a4] ss:$8 sps:$4 sm:$0xff]   ;;  %v10210_v5 = vld [vmem:[%s11692_s23 + $0x9a0] ss:$8 sps:$4 sm:$0xff]   ;;  %v10216_v33 = vld [vmem:[%s11692_s23 + $0x990] ss:$8 sps:$4 sm:$0xff]  }
 0x22d   : > { %v12140_v43 = vadd.f32 %v7995_v42, %v7942_v39  ;;  %8352 = vmatprep.mubr.bf16.mxu0 %v9130_v30  ;;  %8405 = vmatprep.mubr.bf16.mxu1 %v9132_v31  ;;  %v10215_v30 = vld [vmem:[%s11692_s23 + $0x894] ss:$8 sps:$4 sm:$0xff]  }
 0x22e   : > { %v7944_v46 = vpop.f32.mrf.mxu0  ;;  %v7997_v47 = vpop.f32.mrf.mxu1  ;;  %v10218_v31 = vld [vmem:[%s11692_s23 + $0x994] ss:$8 sps:$4 sm:$0xff]  }
 0x22f   : > { %8327 = vmatpush1.bf16.msra.mxu0 %v10147_v32  ;;  %8380 = vmatpush1.bf16.msra.mxu1 %v10150_v35  ;;  %v12144_v50 = vadd.f32 %v7997_v47, %v7944_v46  ;;  %v10213_v32 = vld [vmem:[%s11692_s23 + $0x890] ss:$8 sps:$4 sm:$0xff]   ;;  %v10224_v35 = vld [vmem:[%s11692_s23 + $0x984] ss:$8 sps:$4 sm:$0xff]   ;;  %v10227_v39 = vld [vmem:[%s11692_s23 + $0xa74] ss:$8 sps:$4 sm:$0xff]  }
 0x230   : > { %8328 = vmatprep.subr.bf16.mxu0 %v10155_v36  ;;  %8381 = vmatprep.subr.bf16.mxu1 %v10158_v38  ;;  %v7946_v40 = vpop.f32.mrf.mxu0  ;;  %v7999_v41 = vpop.f32.mrf.mxu1  ;;  %v10219_v36 = vld [vmem:[%s11692_s23 + $0x880] ss:$8 sps:$4 sm:$0xff]   ;;  %v10230_v42 = vld [vmem:[%s11692_s23 + $0xb74] ss:$8 sps:$4 sm:$0xff]   ;;  %v10225_v47 = vld [vmem:[%s11692_s23 + $0xa70] ss:$8 sps:$4 sm:$0xff]  }
 0x231   : > { %v12148_v44 = vadd.f32 %v7999_v41, %v7946_v40  ;;  %v10222_v38 = vld [vmem:[%s11692_s23 + $0x980] ss:$8 sps:$4 sm:$0xff]   ;;  %v10228_v41 = vld [vmem:[%s11692_s23 + $0xb70] ss:$8 sps:$4 sm:$0xff]  }
 0x232   : > { %v4480_v46 = vld [vmem:[%s12766_s0 + $0x140] sm:$0xff]  ;;  %v4497_v40 = vld [vmem:[%s12766_s0 + $0x1c8] sm:$0xff] }
 0x233   : > { %8329 = vmatpush1.bf16.msra.mxu0 %v10153_v48  ;;  %8382 = vmatpush1.bf16.msra.mxu1 %v10156_v49  ;;  %v9129_v48 = vcombine.low %v12103_v19, %v12111_v22  ;;  %v9131_v49 = vcombine.low %v12116_v27, %v12121_v28  ;;  %v10233_v19 = vld [vmem:[%s11692_s23 + $0xa64] ss:$8 sps:$4 sm:$0xff]   ;;  %v10231_v27 = vld [vmem:[%s11692_s23 + $0xa60] ss:$8 sps:$4 sm:$0xff]  }
 0x234   : > { %8330 = vmatprep.subr.bf16.mxu0 %v10161_v51  ;;  %8383 = vmatprep.subr.bf16.mxu1 %v10164_v52  ;;  %v4496_v51 = vld [vmem:[%s12766_s0 + $0x1c0] sm:$0xff]  ;;  %v4481_v52 = vld [vmem:[%s12766_s0 + $0x148] sm:$0xff] }
 0x235   : > { %v10236_v22 = vld [vmem:[%s11692_s23 + $0xb64] ss:$8 sps:$4 sm:$0xff]   ;;  %v10234_v28 = vld [vmem:[%s11692_s23 + $0xb60] ss:$8 sps:$4 sm:$0xff]  }
 0x237   : > { %8331 = vmatpush1.bf16.msra.mxu0 %v10159_v45  ;;  %8384 = vmatpush1.bf16.msra.mxu1 %v10162_v53  ;;  %v9162_v45 = vcombine.high %v4480_v46, %v4496_v51  ;;  %v9164_v53 = vcombine.high %v4481_v52, %v4497_v40 }
 0x238   : > { %8332 = vmatprep.subr.bf16.mxu0 %v10167_v54  ;;  %8385 = vmatprep.subr.bf16.mxu1 %v10170_v55 }
 0x23b   : > { %8333 = vmatpush1.bf16.msra.mxu0 %v10165_v57  ;;  %8386 = vmatpush1.bf16.msra.mxu1 %v10168_v59 }
 0x23c   : > { %8334 = vmatprep.subr.bf16.mxu0 %v10173_v60  ;;  %8387 = vmatprep.subr.bf16.mxu1 %v10176_v63  ;;  %v10239_v63 = vld [vmem:[%s11692_s23 + $0xa54] ss:$8 sps:$4 sm:$0xff]  }
 0x23f   : > { %8335 = vmatpush1.bf16.msra.mxu0 %v10171_v4  ;;  %8388 = vmatpush1.bf16.msra.mxu1 %v10174_v7  ;;  %v10242_v4 = vld [vmem:[%s11692_s23 + $0xb54] ss:$8 sps:$4 sm:$0xff]  }
 0x240   : > { %8336 = vmatprep.subr.bf16.mxu0 %v10179_v8  ;;  %8389 = vmatprep.subr.bf16.mxu1 %v10182_v9  ;;  %v10237_v9 = vld [vmem:[%s11692_s23 + $0xa50] ss:$8 sps:$4 sm:$0xff]  }
 0x243   : > { %8337 = vmatpush2.bf16.msra.mxu0 %v10177_v10  ;;  %8390 = vmatpush2.bf16.msra.mxu1 %v10180_v56  ;;  %v10240_v10 = vld [vmem:[%s11692_s23 + $0xb50] ss:$8 sps:$4 sm:$0xff]  }
 0x244   : > { %8338 = vmatprep.subr.bf16.mxu0 %v10185_v58  ;;  %8391 = vmatprep.subr.bf16.mxu1 %v10188_v61  ;;  %v12232_v56 = vld [vmem:[%s12766_s0 + $0xd0] sm:$0xff] }
 0x247   : > { %8339 = vmatpush2.bf16.msra.mxu0 %v10183_v62  ;;  %8392 = vmatpush2.bf16.msra.mxu1 %v10186_v11  ;;  %v9161_v62 = vcombine.low %v4480_v46, %v4496_v51  ;;  %v12237_v11 = vld [vmem:[%s12766_s0 + $0x58] sm:$0xff] }
 0x248   : > { %8340 = vmatprep.subr.bf16.mxu0 %v10191_v12  ;;  %8393 = vmatprep.subr.bf16.mxu1 %v10194_v13  ;;  %v12242_v12 = vld [vmem:[%s12766_s0 + $0xd8] sm:$0xff] }
 0x24b   : > { %8341 = vmatpush2.bf16.msra.mxu0 %v10189_v15  ;;  %8394 = vmatpush2.bf16.msra.mxu1 %v10192_v16 }
 0x24c   : > { %8342 = vmatprep.subr.bf16.mxu0 %v10197_v17  ;;  %8395 = vmatprep.subr.bf16.mxu1 %v10200_v18  ;;  %v10245_v18 = vld [vmem:[%s11692_s23 + $0xa44] ss:$8 sps:$4 sm:$0xff]  }
 0x24f   : > { %8343 = vmatpush2.bf16.msra.mxu0 %v10195_v21  ;;  %8396 = vmatpush2.bf16.msra.mxu1 %v10198_v23  ;;  %v10248_v21 = vld [vmem:[%s11692_s23 + $0xb44] ss:$8 sps:$4 sm:$0xff]  }
 0x250   : > { %8344 = vmatprep.subr.bf16.mxu0 %v10203_v24  ;;  %8397 = vmatprep.subr.bf16.mxu1 %v10206_v25  ;;  %v10243_v25 = vld [vmem:[%s11692_s23 + $0xa40] ss:$8 sps:$4 sm:$0xff]  }
 0x253   : > { %8345 = vmatpush2.bf16.msra.mxu0 %v10201_v26  ;;  %8398 = vmatpush2.bf16.msra.mxu1 %v10204_v0  ;;  %v10246_v26 = vld [vmem:[%s11692_s23 + $0xb40] ss:$8 sps:$4 sm:$0xff]  }
 0x254   : > { %8346 = vmatprep.subr.bf16.mxu0 %v10209_v1  ;;  %8399 = vmatprep.subr.bf16.mxu1 %v10212_v3 }
 0x257   : > { %8347 = vmatpush2.bf16.msra.mxu0 %v10207_v2  ;;  %8400 = vmatpush2.bf16.msra.mxu1 %v10210_v5 }
 0x258   : > { %8348 = vmatprep.subr.bf16.mxu0 %v10215_v30  ;;  %8401 = vmatprep.subr.bf16.mxu1 %v10218_v31  ;;  %v10251_v31 = vld [vmem:[%s11692_s23 + $0xa34] ss:$8 sps:$4 sm:$0xff]  }
 0x25b   : > { %8349 = vmatpush2.bf16.msra.mxu0 %v10213_v32  ;;  %8402 = vmatpush2.bf16.msra.mxu1 %v10216_v33  ;;  %v10254_v32 = vld [vmem:[%s11692_s23 + $0xb34] ss:$8 sps:$4 sm:$0xff]  }
 0x25c   : > { %8350 = vmatprep.subr.bf16.mxu0 %v10221_v34  ;;  %8403 = vmatprep.subr.bf16.mxu1 %v10224_v35  ;;  %v10249_v35 = vld [vmem:[%s11692_s23 + $0xa30] ss:$8 sps:$4 sm:$0xff]  }
 0x25f   : > { %8351 = vmatpush2.bf16.msra.mxu0 %v10219_v36  ;;  %8404 = vmatpush2.bf16.msra.mxu1 %v10222_v38  ;;  %v10252_v36 = vld [vmem:[%s11692_s23 + $0xb30] ss:$8 sps:$4 sm:$0xff]  }
 0x260   : > { %8426 = vmatprep.subr.bf16.mxu0 %v10227_v39  ;;  %8479 = vmatprep.subr.bf16.mxu1 %v10230_v42 }
 0x262   : > { %v8036_v54 = vpop.f32.mrf.mxu0  ;;  %v8089_v55 = vpop.f32.mrf.mxu1  ;;  %8353 = vmatmul.mubr.bf16.vlgmr.msra.gmra.mxu0 %v9129_v48  ;;  %8406 = vmatmul.mubr.bf16.vlgmr.msra.gmra.mxu1 %v9131_v49  ;;  %v10260_v48 = vld [vmem:[%s11692_s23 + $0xb24] ss:$8 sps:$4 sm:$0xff]  }
 0x263   : > { %v8037_v57 = vadd.f32 %v8036_v54, %v12096_v14  ;;  %8427 = vmatpush1.bf16.msra.mxu0 %v10225_v47  ;;  %8480 = vmatpush1.bf16.msra.mxu1 %v10228_v41  ;;  %v12227_v14 = vld [vmem:[%s12766_s0 + $0x50] sm:$0xff]  ;;  %v10257_v47 = vld [vmem:[%s11692_s23 + $0xa24] ss:$8 sps:$4 sm:$0xff]  }
 0x264   : > { %v8038_v59 = vpop.f32.mrf.mxu0  ;;  %v8091_v60 = vpop.f32.mrf.mxu1  ;;  %8428 = vmatprep.subr.bf16.mxu0 %v10233_v19  ;;  %8481 = vmatprep.subr.bf16.mxu1 %v10236_v22  ;;  %v9134_v0 = vcombine.high %v12227_v14, %v12232_v56  ;;  %v10263_v41 = vld [vmem:[%s11692_s23 + $0xa14] ss:$8 sps:$4 sm:$0xff]   ;;  %v10264_v22 = vld [vmem:[%s11692_s23 + $0xb10] ss:$8 sps:$4 sm:$0xff]  }
 0x265   : > { %v12219_v7 = vadd.f32 %v8089_v55, %v8037_v57  ;;  %v8039_v8 = vadd.f32 %v8038_v59, %v12105_v20  ;;  %8362 = vmatprep.mubr.bf16.mxu0 %v9162_v45  ;;  %8415 = vmatprep.mubr.bf16.mxu1 %v9164_v53  ;;  %v9163_v20 = vcombine.low %v4481_v52, %v4497_v40  ;;  %v10255_v52 = vld [vmem:[%s11692_s23 + $0xa20] ss:$8 sps:$4 sm:$0xff]   ;;  %v10266_v19 = vld [vmem:[%s11692_s23 + $0xb14] ss:$8 sps:$4 sm:$0xff]   ;;  %v10273_v57 = vld [vmem:[%s11692_s23 + $0xaf0] ss:$8 sps:$4 sm:$0xff]  }
 0x266   : > { %v8040_v58 = vpop.f32.mrf.mxu0  ;;  %v8093_v61 = vpop.f32.mrf.mxu1  ;;  %v10258_v40 = vld [vmem:[%s11692_s23 + $0xb20] ss:$8 sps:$4 sm:$0xff]   ;;  %v10275_v54 = vld [vmem:[%s11692_s23 + $0xaf4] ss:$8 sps:$4 sm:$0xff]   ;;  %v10276_v59 = vld [vmem:[%s11692_s23 + $0xbf0] ss:$8 sps:$4 sm:$0xff]  }
 0x267   : > { %v12244_v13 = vadd.f32 %v8091_v60, %v8039_v8  ;;  %v8041_v15 = vadd.f32 %v8040_v58, %v12123_v29  ;;  %8429 = vmatpush1.bf16.msra.mxu0 %v10231_v27  ;;  %8482 = vmatpush1.bf16.msra.mxu1 %v10234_v28  ;;  %v9136_v29 = vcombine.high %v12237_v11, %v12242_v12  ;;  %v10269_v27 = vld [vmem:[%s11692_s23 + $0xa04] ss:$8 sps:$4 sm:$0xff]   ;;  %v10267_v45 = vld [vmem:[%s11692_s23 + $0xa00] ss:$8 sps:$4 sm:$0xff]   ;;  %v10278_v55 = vld [vmem:[%s11692_s23 + $0xbf4] ss:$8 sps:$4 sm:$0xff]  }
 0x268   : > { %v8042_v16 = vpop.f32.mrf.mxu0  ;;  %v8095_v17 = vpop.f32.mrf.mxu1  ;;  %8430 = vmatprep.subr.bf16.mxu0 %v10239_v63  ;;  %8483 = vmatprep.subr.bf16.mxu1 %v10242_v4  ;;  %v10272_v28 = vld [vmem:[%s11692_s23 + $0xb04] ss:$8 sps:$4 sm:$0xff]   ;;  %v10270_v53 = vld [vmem:[%s11692_s23 + $0xb00] ss:$8 sps:$4 sm:$0xff]   ;;  %v10285_v58 = vld [vmem:[%s11692_s23 + $0xad0] ss:$8 sps:$4 sm:$0xff]  }
 0x269   : > { %v12249_v23 = vadd.f32 %v8093_v61, %v8041_v15  ;;  %v8043_v24 = vadd.f32 %v8042_v16, %v12128_v6  ;;  %v10281_v60 = vld [vmem:[%s11692_s23 + $0xae4] ss:$8 sps:$4 sm:$0xff]   ;;  %v10279_v4 = vld [vmem:[%s11692_s23 + $0xae0] ss:$8 sps:$4 sm:$0xff]   ;;  %v10288_v61 = vld [vmem:[%s11692_s23 + $0xbd0] ss:$8 sps:$4 sm:$0xff]  }
 0x26a   : > { %v8046_v1 = vpop.f32.mrf.mxu0  ;;  %8363 = vmatmul.mubr.bf16.gmra.mxu0 %v9161_v62  ;;  %v8099_v3 = vpop.f32.mrf.mxu1  ;;  %8416 = vmatmul.mubr.bf16.gmra.mxu1 %v9163_v20  ;;  %v10284_v63 = vld [vmem:[%s11692_s23 + $0xbe4] ss:$8 sps:$4 sm:$0xff]   ;;  %v10282_v8 = vld [vmem:[%s11692_s23 + $0xbe0] ss:$8 sps:$4 sm:$0xff]  }
 0x26b   : > { %v12258_v2 = vadd.f32 %v8095_v17, %v8043_v24  ;;  %v8047_v6 = vadd.f32 %v8046_v1, %v12137_v37  ;;  %8431 = vmatpush1.bf16.msra.mxu0 %v10237_v9  ;;  %8484 = vmatpush1.bf16.msra.mxu1 %v10240_v10  ;;  %v10287_v9 = vld [vmem:[%s11692_s23 + $0xad4] ss:$8 sps:$4 sm:$0xff]   ;;  %v10293_v62 = vld [vmem:[%s11692_s23 + $0xac4] ss:$8 sps:$4 sm:$0xff]   ;;  %v10291_v15 = vld [vmem:[%s11692_s23 + $0xac0] ss:$8 sps:$4 sm:$0xff]  }
 0x26c   : > { %v8048_v5 = vpop.f32.mrf.mxu0  ;;  %v8101_v30 = vpop.f32.mrf.mxu1  ;;  %8432 = vmatprep.subr.bf16.mxu0 %v10245_v18  ;;  %8485 = vmatprep.subr.bf16.mxu1 %v10248_v21  ;;  %v10290_v10 = vld [vmem:[%s11692_s23 + $0xbd4] ss:$8 sps:$4 sm:$0xff]   ;;  %v10296_v20 = vld [vmem:[%s11692_s23 + $0xbc4] ss:$8 sps:$4 sm:$0xff]   ;;  %v10294_v16 = vld [vmem:[%s11692_s23 + $0xbc0] ss:$8 sps:$4 sm:$0xff]  }
 0x26d   : > { %v8049_v33 = vadd.f32 %v8048_v5, %v12140_v43  ;;  %v12264_v34 = vadd.f32 %v8099_v3, %v8047_v6  ;;  %8458 = vmatprep.mubr.bf16.mxu0 %v9134_v0  ;;  %8511 = vmatprep.mubr.bf16.mxu1 %v9136_v29  ;;  %v10299_v17 = vld [vmem:[%s11692_s23 + $0xab4] ss:$8 sps:$4 sm:$0xff]   ;;  %v10297_v21 = vld [vmem:[%s11692_s23 + $0xab0] ss:$8 sps:$4 sm:$0xff]   ;;  %v10303_v0 = vld [vmem:[%s11692_s23 + $0xaa0] ss:$8 sps:$4 sm:$0xff]  }
 0x26e   : > { %v8050_v38 = vpop.f32.mrf.mxu0  ;;  %v8103_v37 = vpop.f32.mrf.mxu1  ;;  %v10302_v18 = vld [vmem:[%s11692_s23 + $0xbb4] ss:$8 sps:$4 sm:$0xff]   ;;  %v10300_v24 = vld [vmem:[%s11692_s23 + $0xbb0] ss:$8 sps:$4 sm:$0xff]   ;;  %v10306_v29 = vld [vmem:[%s11692_s23 + $0xba0] ss:$8 sps:$4 sm:$0xff]  }
 0x26f   : > { %v8051_v39 = vadd.f32 %v8050_v38, %v12144_v50  ;;  %v12269_v42 = vadd.f32 %v8101_v30, %v8049_v33  ;;  %8433 = vmatpush1.bf16.msra.mxu0 %v10243_v25  ;;  %8486 = vmatpush1.bf16.msra.mxu1 %v10246_v26  ;;  %v10305_v25 = vld [vmem:[%s11692_s23 + $0xaa4] ss:$8 sps:$4 sm:$0xff]   ;;  %v10311_v1 = vld [vmem:[%s11692_s23 + $0xa94] ss:$8 sps:$4 sm:$0xff]   ;;  %v10309_v6 = vld [vmem:[%s11692_s23 + $0xa90] ss:$8 sps:$4 sm:$0xff]  }
 0x270   : > { %v8052_v43 = vpop.f32.mrf.mxu0  ;;  %v8105_v46 = vpop.f32.mrf.mxu1  ;;  %8434 = vmatprep.subr.bf16.mxu0 %v10251_v31  ;;  %8487 = vmatprep.subr.bf16.mxu1 %v10254_v32  ;;  %v10308_v26 = vld [vmem:[%s11692_s23 + $0xba4] ss:$8 sps:$4 sm:$0xff]   ;;  %v10314_v3 = vld [vmem:[%s11692_s23 + $0xb94] ss:$8 sps:$4 sm:$0xff]   ;;  %v10312_v5 = vld [vmem:[%s11692_s23 + $0xb90] ss:$8 sps:$4 sm:$0xff]  }
 0x271   : > { %v8053_v49 = vadd.f32 %v8052_v43, %v12148_v44  ;;  %v12274_v51 = vadd.f32 %v8103_v37, %v8051_v39  ;;  %v10261_v44 = vld [vmem:[%s11692_s23 + $0xa10] ss:$8 sps:$4 sm:$0xff]   ;;  %v10317_v30 = vld [vmem:[%s11692_s23 + $0xa84] ss:$8 sps:$4 sm:$0xff]   ;;  %v10315_v32 = vld [vmem:[%s11692_s23 + $0xa80] ss:$8 sps:$4 sm:$0xff]   ;;  %v9133_v37 = vcombine.low %v12227_v14, %v12232_v56  ;;  %v9135_v39 = vcombine.low %v12237_v11, %v12242_v12 }
 0x272   : > { %v10320_v31 = vld [vmem:[%s11692_s23 + $0xb84] ss:$8 sps:$4 sm:$0xff]   ;;  %v10318_v33 = vld [vmem:[%s11692_s23 + $0xb80] ss:$8 sps:$4 sm:$0xff]   ;;  %v4482_v38 = vld [vmem:[%s12766_s0 + $0x150] sm:$0xff] }
 0x273   : > { %v12276_v50 = vadd.f32 %v8105_v46, %v8053_v49  ;;  %8435 = vmatpush1.bf16.msra.mxu0 %v10249_v35  ;;  %8488 = vmatpush1.bf16.msra.mxu1 %v10252_v36  ;;  %v10323_v35 = vld [vmem:[%s11692_s23 + $0xc74] ss:$8 sps:$4 sm:$0xff]   ;;  %v10324_v14 = vld [vmem:[%s11692_s23 + $0xd70] ss:$8 sps:$4 sm:$0xff]   ;;  %v10329_v56 = vld [vmem:[%s11692_s23 + $0xc64] ss:$8 sps:$4 sm:$0xff]  }
 0x274   : > { %8436 = vmatprep.subr.bf16.mxu0 %v10257_v47  ;;  %8489 = vmatprep.subr.bf16.mxu1 %v10260_v48  ;;  %v10326_v36 = vld [vmem:[%s11692_s23 + $0xd74] ss:$8 sps:$4 sm:$0xff]   ;;  %v10321_v48 = vld [vmem:[%s11692_s23 + $0xc70] ss:$8 sps:$4 sm:$0xff]   ;;  %v10332_v11 = vld [vmem:[%s11692_s23 + $0xd64] ss:$8 sps:$4 sm:$0xff]  }
 0x275   : > { %v4498_v43 = vld [vmem:[%s12766_s0 + $0x1d0] sm:$0xff]  ;;  %v4483_v46 = vld [vmem:[%s12766_s0 + $0x158] sm:$0xff] }
 0x276   : > { %v4499_v47 = vld [vmem:[%s12766_s0 + $0x1d8] sm:$0xff]  ;;  %v9166_v12 = vcombine.high %v4482_v38, %v4498_v43 }
 0x277   : > { %8437 = vmatpush1.bf16.msra.mxu0 %v10255_v52  ;;  %8490 = vmatpush1.bf16.msra.mxu1 %v10258_v40  ;;  %v9168_v49 = vcombine.high %v4483_v46, %v4499_v47 }
 0x278   : > { %8438 = vmatprep.subr.bf16.mxu0 %v10263_v41  ;;  %8491 = vmatprep.subr.bf16.mxu1 %v10266_v19  ;;  %v10327_v19 = vld [vmem:[%s11692_s23 + $0xc60] ss:$8 sps:$4 sm:$0xff]  }
 0x27b   : > { %8439 = vmatpush1.bf16.msra.mxu0 %v10261_v44  ;;  %8492 = vmatpush1.bf16.msra.mxu1 %v10264_v22  ;;  %v10330_v44 = vld [vmem:[%s11692_s23 + $0xd60] ss:$8 sps:$4 sm:$0xff]  }
 0x27c   : > { %8440 = vmatprep.subr.bf16.mxu0 %v10269_v27  ;;  %8493 = vmatprep.subr.bf16.mxu1 %v10272_v28  ;;  %v10335_v28 = vld [vmem:[%s11692_s23 + $0xc54] ss:$8 sps:$4 sm:$0xff]  }
 0x27f   : > { %8441 = vmatpush1.bf16.msra.mxu0 %v10267_v45  ;;  %8494 = vmatpush1.bf16.msra.mxu1 %v10270_v53  ;;  %v10338_v45 = vld [vmem:[%s11692_s23 + $0xd54] ss:$8 sps:$4 sm:$0xff]  }
 0x280   : > { %8442 = vmatprep.subr.bf16.mxu0 %v10275_v54  ;;  %8495 = vmatprep.subr.bf16.mxu1 %v10278_v55 }
 0x283   : > { %8443 = vmatpush2.bf16.msra.mxu0 %v10273_v57  ;;  %8496 = vmatpush2.bf16.msra.mxu1 %v10276_v59  ;;  %v9165_v59 = vcombine.low %v4482_v38, %v4498_v43  ;;  %v10360_v38 = vld [vmem:[%s11692_s23 + $0xd10] ss:$8 sps:$4 sm:$0xff]   ;;  %v10363_v43 = vld [vmem:[%s11692_s23 + $0xc00] ss:$8 sps:$4 sm:$0xff]  }
 0x284   : > { %8444 = vmatprep.subr.bf16.mxu0 %v10281_v60  ;;  %8497 = vmatprep.subr.bf16.mxu1 %v10284_v63  ;;  %v9167_v60 = vcombine.low %v4483_v46, %v4499_v47  ;;  %v12358_v63 = vld [vmem:[%s12766_s0 + $0xe0] sm:$0xff]  ;;  %v10371_v47 = vld [vmem:[%s11692_s23 + $0xcf4] ss:$8 sps:$4 sm:$0xff]  }
 0x285   : > { %v10366_v46 = vld [vmem:[%s11692_s23 + $0xd00] ss:$8 sps:$4 sm:$0xff]  }
 0x287   : > { %8445 = vmatpush2.bf16.msra.mxu0 %v10279_v4  ;;  %8498 = vmatpush2.bf16.msra.mxu1 %v10282_v8  ;;  %v12368_v4 = vld [vmem:[%s12766_s0 + $0xe8] sm:$0xff] }
 0x288   : > { %8446 = vmatprep.subr.bf16.mxu0 %v10287_v9  ;;  %8499 = vmatprep.subr.bf16.mxu1 %v10290_v10  ;;  %v10333_v10 = vld [vmem:[%s11692_s23 + $0xc50] ss:$8 sps:$4 sm:$0xff]  }
 0x28b   : > { %8447 = vmatpush2.bf16.msra.mxu0 %v10285_v58  ;;  %8500 = vmatpush2.bf16.msra.mxu1 %v10288_v61  ;;  %v10336_v58 = vld [vmem:[%s11692_s23 + $0xd50] ss:$8 sps:$4 sm:$0xff]  }
 0x28c   : > { %8448 = vmatprep.subr.bf16.mxu0 %v10293_v62  ;;  %8501 = vmatprep.subr.bf16.mxu1 %v10296_v20  ;;  %v10341_v20 = vld [vmem:[%s11692_s23 + $0xc44] ss:$8 sps:$4 sm:$0xff]  }
 0x28f   : > { %8449 = vmatpush2.bf16.msra.mxu0 %v10291_v15  ;;  %8502 = vmatpush2.bf16.msra.mxu1 %v10294_v16  ;;  %v10344_v15 = vld [vmem:[%s11692_s23 + $0xd44] ss:$8 sps:$4 sm:$0xff]  }
 0x290   : > { %8450 = vmatprep.subr.bf16.mxu0 %v10299_v17  ;;  %8503 = vmatprep.subr.bf16.mxu1 %v10302_v18 }
 0x293   : > { %8451 = vmatpush2.bf16.msra.mxu0 %v10297_v21  ;;  %8504 = vmatpush2.bf16.msra.mxu1 %v10300_v24 }
 0x294   : > { %8452 = vmatprep.subr.bf16.mxu0 %v10305_v25  ;;  %8505 = vmatprep.subr.bf16.mxu1 %v10308_v26 }
 0x297   : > { %8453 = vmatpush2.bf16.msra.mxu0 %v10303_v0  ;;  %8506 = vmatpush2.bf16.msra.mxu1 %v10306_v29  ;;  %v10342_v0 = vld [vmem:[%s11692_s23 + $0xd40] ss:$8 sps:$4 sm:$0xff]   ;;  %v10347_v29 = vld [vmem:[%s11692_s23 + $0xc34] ss:$8 sps:$4 sm:$0xff]  }
 0x298   : > { %8454 = vmatprep.subr.bf16.mxu0 %v10311_v1  ;;  %8507 = vmatprep.subr.bf16.mxu1 %v10314_v3  ;;  %v10350_v1 = vld [vmem:[%s11692_s23 + $0xd34] ss:$8 sps:$4 sm:$0xff]  }
 0x29b   : > { %8455 = vmatpush2.bf16.msra.mxu0 %v10309_v6  ;;  %8508 = vmatpush2.bf16.msra.mxu1 %v10312_v5  ;;  %v10348_v6 = vld [vmem:[%s11692_s23 + $0xd30] ss:$8 sps:$4 sm:$0xff]   ;;  %v10353_v5 = vld [vmem:[%s11692_s23 + $0xc24] ss:$8 sps:$4 sm:$0xff]  }
 0x29c   : > { %8456 = vmatprep.subr.bf16.mxu0 %v10317_v30  ;;  %8509 = vmatprep.subr.bf16.mxu1 %v10320_v31  ;;  %v10356_v30 = vld [vmem:[%s11692_s23 + $0xd24] ss:$8 sps:$4 sm:$0xff]   ;;  %v10351_v31 = vld [vmem:[%s11692_s23 + $0xc20] ss:$8 sps:$4 sm:$0xff]  }
 0x29f   : > { %8457 = vmatpush2.bf16.msra.mxu0 %v10315_v32  ;;  %8510 = vmatpush2.bf16.msra.mxu1 %v10318_v33  ;;  %v10354_v32 = vld [vmem:[%s11692_s23 + $0xd20] ss:$8 sps:$4 sm:$0xff]   ;;  %v10359_v33 = vld [vmem:[%s11692_s23 + $0xc14] ss:$8 sps:$4 sm:$0xff]  }
 0x2a0   : > { %8532 = vmatprep.subr.bf16.mxu0 %v10323_v35  ;;  %8585 = vmatprep.subr.bf16.mxu1 %v10326_v36  ;;  %v10362_v35 = vld [vmem:[%s11692_s23 + $0xd14] ss:$8 sps:$4 sm:$0xff]   ;;  %v10357_v36 = vld [vmem:[%s11692_s23 + $0xc10] ss:$8 sps:$4 sm:$0xff]  }
 0x2a2   : > { %v8142_v52 = vpop.f32.mrf.mxu0  ;;  %v8195_v40 = vpop.f32.mrf.mxu1  ;;  %8459 = vmatmul.mubr.bf16.vlgmr.msra.gmra.mxu0 %v9133_v37  ;;  %8512 = vmatmul.mubr.bf16.vlgmr.msra.gmra.mxu1 %v9135_v39  ;;  %v10365_v37 = vld [vmem:[%s11692_s23 + $0xc04] ss:$8 sps:$4 sm:$0xff]  }
 0x2a3   : > { %v8143_v41 = vadd.f32 %v8142_v52, %v12219_v7  ;;  %8533 = vmatpush1.bf16.msra.mxu0 %v10321_v48  ;;  %8586 = vmatpush1.bf16.msra.mxu1 %v10324_v14  ;;  %v12353_v7 = vld [vmem:[%s12766_s0 + $0x60] sm:$0xff]  ;;  %v10374_v48 = vld [vmem:[%s11692_s23 + $0xdf4] ss:$8 sps:$4 sm:$0xff]   ;;  %v10369_v14 = vld [vmem:[%s11692_s23 + $0xcf0] ss:$8 sps:$4 sm:$0xff]  }
 0x2a4   : > { %v8144_v22 = vpop.f32.mrf.mxu0  ;;  %v8197_v27 = vpop.f32.mrf.mxu1  ;;  %8534 = vmatprep.subr.bf16.mxu0 %v10329_v56  ;;  %8587 = vmatprep.subr.bf16.mxu1 %v10332_v11  ;;  %v10368_v39 = vld [vmem:[%s11692_s23 + $0xd04] ss:$8 sps:$4 sm:$0xff]   ;;  %v10372_v56 = vld [vmem:[%s11692_s23 + $0xdf0] ss:$8 sps:$4 sm:$0xff]   ;;  %v10378_v52 = vld [vmem:[%s11692_s23 + $0xde0] ss:$8 sps:$4 sm:$0xff]  }
 0x2a5   : > { %v12347_v53 = vadd.f32 %v8195_v40, %v8143_v41  ;;  %v8145_v54 = vadd.f32 %v8144_v22, %v12244_v13  ;;  %8468 = vmatprep.mubr.bf16.mxu0 %v9166_v12  ;;  %8521 = vmatprep.mubr.bf16.mxu1 %v9168_v49  ;;  %v12363_v13 = vld [vmem:[%s12766_s0 + $0x68] sm:$0xff]  ;;  %v10383_v40 = vld [vmem:[%s11692_s23 + $0xcd4] ss:$8 sps:$4 sm:$0xff]  }
 0x2a6   : > { %v8146_v55 = vpop.f32.mrf.mxu0  ;;  %v8199_v57 = vpop.f32.mrf.mxu1  ;;  %v9140_v18 = vcombine.high %v12363_v13, %v12368_v4  ;;  %v10377_v11 = vld [vmem:[%s11692_s23 + $0xce4] ss:$8 sps:$4 sm:$0xff]   ;;  %v10375_v49 = vld [vmem:[%s11692_s23 + $0xce0] ss:$8 sps:$4 sm:$0xff]   ;;  %v10386_v41 = vld [vmem:[%s11692_s23 + $0xdd4] ss:$8 sps:$4 sm:$0xff]  }
 0x2a7   : > { %v12370_v8 = vadd.f32 %v8197_v27, %v8145_v54  ;;  %v8147_v9 = vadd.f32 %v8146_v55, %v12249_v23  ;;  %8535 = vmatpush1.bf16.msra.mxu0 %v10327_v19  ;;  %8588 = vmatpush1.bf16.msra.mxu1 %v10330_v44  ;;  %v9138_v23 = vcombine.high %v12353_v7, %v12358_v63  ;;  %v10380_v12 = vld [vmem:[%s11692_s23 + $0xde4] ss:$8 sps:$4 sm:$0xff]   ;;  %v10381_v19 = vld [vmem:[%s11692_s23 + $0xcd0] ss:$8 sps:$4 sm:$0xff]   ;;  %v10395_v54 = vld [vmem:[%s11692_s23 + $0xcb4] ss:$8 sps:$4 sm:$0xff]  }
 0x2a8   : > { %v8148_v61 = vpop.f32.mrf.mxu0  ;;  %v8201_v62 = vpop.f32.mrf.mxu1  ;;  %8536 = vmatprep.subr.bf16.mxu0 %v10335_v28  ;;  %8589 = vmatprep.subr.bf16.mxu1 %v10338_v45  ;;  %v10384_v44 = vld [vmem:[%s11692_s23 + $0xdd0] ss:$8 sps:$4 sm:$0xff]   ;;  %v10389_v22 = vld [vmem:[%s11692_s23 + $0xcc4] ss:$8 sps:$4 sm:$0xff]   ;;  %v10387_v28 = vld [vmem:[%s11692_s23 + $0xcc0] ss:$8 sps:$4 sm:$0xff]  }
 0x2a9   : > { %v12377_v16 = vadd.f32 %v8199_v57, %v8147_v9  ;;  %v8149_v17 = vadd.f32 %v8148_v61, %v12258_v2  ;;  %v10339_v2 = vld [vmem:[%s11692_s23 + $0xc40] ss:$8 sps:$4 sm:$0xff]   ;;  %v10392_v27 = vld [vmem:[%s11692_s23 + $0xdc4] ss:$8 sps:$4 sm:$0xff]   ;;  %v10398_v55 = vld [vmem:[%s11692_s23 + $0xdb4] ss:$8 sps:$4 sm:$0xff]  }
 0x2aa   : > { %v8152_v21 = vpop.f32.mrf.mxu0  ;;  %8469 = vmatmul.mubr.bf16.gmra.mxu0 %v9165_v59  ;;  %v8205_v24 = vpop.f32.mrf.mxu1  ;;  %8522 = vmatmul.mubr.bf16.gmra.mxu1 %v9167_v60  ;;  %v10390_v45 = vld [vmem:[%s11692_s23 + $0xdc0] ss:$8 sps:$4 sm:$0xff]   ;;  %v10393_v57 = vld [vmem:[%s11692_s23 + $0xcb0] ss:$8 sps:$4 sm:$0xff]   ;;  %v10401_v60 = vld [vmem:[%s11692_s23 + $0xca4] ss:$8 sps:$4 sm:$0xff]  }
 0x2ab   : > { %v12384_v25 = vadd.f32 %v8201_v62, %v8149_v17  ;;  %v8153_v26 = vadd.f32 %v8152_v21, %v12264_v34  ;;  %8537 = vmatpush1.bf16.msra.mxu0 %v10333_v10  ;;  %8590 = vmatpush1.bf16.msra.mxu1 %v10336_v58  ;;  %v10345_v34 = vld [vmem:[%s11692_s23 + $0xc30] ss:$8 sps:$4 sm:$0xff]   ;;  %v10404_v9 = vld [vmem:[%s11692_s23 + $0xda4] ss:$8 sps:$4 sm:$0xff]   ;;  %v10399_v10 = vld [vmem:[%s11692_s23 + $0xca0] ss:$8 sps:$4 sm:$0xff]  }
 0x2ac   : > { %8538 = vmatprep.subr.bf16.mxu0 %v10341_v20  ;;  %8591 = vmatprep.subr.bf16.mxu1 %v10344_v15  ;;  %v10396_v59 = vld [vmem:[%s11692_s23 + $0xdb0] ss:$8 sps:$4 sm:$0xff]   ;;  %v10402_v58 = vld [vmem:[%s11692_s23 + $0xda0] ss:$8 sps:$4 sm:$0xff]   ;;  %v10407_v61 = vld [vmem:[%s11692_s23 + $0xc94] ss:$8 sps:$4 sm:$0xff]  }
 0x2ad   : > { %v12391_v3 = vadd.f32 %v8205_v24, %v8153_v26  ;;  %8564 = vmatprep.mubr.bf16.mxu0 %v9138_v23  ;;  %8617 = vmatprep.mubr.bf16.mxu1 %v9140_v18  ;;  %v10410_v62 = vld [vmem:[%s11692_s23 + $0xd94] ss:$8 sps:$4 sm:$0xff]   ;;  %v10405_v20 = vld [vmem:[%s11692_s23 + $0xc90] ss:$8 sps:$4 sm:$0xff]   ;;  %v10413_v17 = vld [vmem:[%s11692_s23 + $0xc84] ss:$8 sps:$4 sm:$0xff]  }
 0x2ae   : > { %v10408_v15 = vld [vmem:[%s11692_s23 + $0xd90] ss:$8 sps:$4 sm:$0xff]   ;;  %v10416_v23 = vld [vmem:[%s11692_s23 + $0xd84] ss:$8 sps:$4 sm:$0xff]   ;;  %v10411_v18 = vld [vmem:[%s11692_s23 + $0xc80] ss:$8 sps:$4 sm:$0xff]  }
 0x2af   : > { %8539 = vmatpush1.bf16.msra.mxu0 %v10339_v2  ;;  %8592 = vmatpush1.bf16.msra.mxu1 %v10342_v0  ;;  %v10414_v21 = vld [vmem:[%s11692_s23 + $0xd80] ss:$8 sps:$4 sm:$0xff]   ;;  %v10419_v24 = vld [vmem:[%s11692_s23 + $0xe74] ss:$8 sps:$4 sm:$0xff]   ;;  %v9137_v0 = vcombine.low %v12353_v7, %v12358_v63  ;;  %v10417_v7 = vld [vmem:[%s11692_s23 + $0xe70] ss:$8 sps:$4 sm:$0xff]  }
 0x2b0   : > { %8540 = vmatprep.subr.bf16.mxu0 %v10347_v29  ;;  %8593 = vmatprep.subr.bf16.mxu1 %v10350_v1  ;;  %v10422_v26 = vld [vmem:[%s11692_s23 + $0xf74] ss:$8 sps:$4 sm:$0xff]   ;;  %v4484_v2 = vld [vmem:[%s12766_s0 + $0x160] sm:$0xff]  ;;  %v9139_v29 = vcombine.low %v12363_v13, %v12368_v4  ;;  %v10420_v63 = vld [vmem:[%s11692_s23 + $0xf70] ss:$8 sps:$4 sm:$0xff]  }
 0x2b1   : > { %v4500_v1 = vld [vmem:[%s12766_s0 + $0x1e0] sm:$0xff] }
 0x2b2   : > { %v10425_v13 = vld [vmem:[%s11692_s23 + $0xe64] ss:$8 sps:$4 sm:$0xff]  }
 0x2b3   : > { %8541 = vmatpush1.bf16.msra.mxu0 %v10345_v34  ;;  %8594 = vmatpush1.bf16.msra.mxu1 %v10348_v6  ;;  %v4485_v34 = vld [vmem:[%s12766_s0 + $0x168] sm:$0xff] }
 0x2b4   : > { %8542 = vmatprep.subr.bf16.mxu0 %v10353_v5  ;;  %8595 = vmatprep.subr.bf16.mxu1 %v10356_v30  ;;  %v4501_v6 = vld [vmem:[%s12766_s0 + $0x1e8] sm:$0xff]  ;;  %v9170_v5 = vcombine.high %v4484_v2, %v4500_v1 }
 0x2b5   : > { %v10428_v4 = vld [vmem:[%s11692_s23 + $0xf64] ss:$8 sps:$4 sm:$0xff]   ;;  %v9172_v30 = vcombine.high %v4485_v34, %v4501_v6 }
 0x2b7   : > { %8543 = vmatpush1.bf16.msra.mxu0 %v10351_v31  ;;  %8596 = vmatpush1.bf16.msra.mxu1 %v10354_v32  ;;  %v10423_v31 = vld [vmem:[%s11692_s23 + $0xe60] ss:$8 sps:$4 sm:$0xff]  }
 0x2b8   : > { %8544 = vmatprep.subr.bf16.mxu0 %v10359_v33  ;;  %8597 = vmatprep.subr.bf16.mxu1 %v10362_v35  ;;  %v10426_v32 = vld [vmem:[%s11692_s23 + $0xf60] ss:$8 sps:$4 sm:$0xff]   ;;  %v10431_v33 = vld [vmem:[%s11692_s23 + $0xe54] ss:$8 sps:$4 sm:$0xff]  }
 0x2b9   : > { %v10434_v35 = vld [vmem:[%s11692_s23 + $0xf54] ss:$8 sps:$4 sm:$0xff]  }
 0x2bb   : > { %8545 = vmatpush1.bf16.msra.mxu0 %v10357_v36  ;;  %8598 = vmatpush1.bf16.msra.mxu1 %v10360_v38  ;;  %v12468_v36 = vld [vmem:[%s12766_s0 + $0x70] sm:$0xff]  ;;  %v9169_v38 = vcombine.low %v4484_v2, %v4500_v1  ;;  %v10488_v1 = vld [vmem:[%s11692_s23 + $0xfc4] ss:$8 sps:$4 sm:$0xff]  }
 0x2bc   : > { %8546 = vmatprep.subr.bf16.mxu0 %v10365_v37  ;;  %8599 = vmatprep.subr.bf16.mxu1 %v10368_v39  ;;  %v9171_v37 = vcombine.low %v4485_v34, %v4501_v6  ;;  %v12473_v39 = vld [vmem:[%s12766_s0 + $0xf0] sm:$0xff]  ;;  %v10483_v34 = vld [vmem:[%s11692_s23 + $0xec0] ss:$8 sps:$4 sm:$0xff]  }
 0x2bd   : > { %v10477_v2 = vld [vmem:[%s11692_s23 + $0xed0] ss:$8 sps:$4 sm:$0xff]   ;;  %v10486_v6 = vld [vmem:[%s11692_s23 + $0xfc0] ss:$8 sps:$4 sm:$0xff]  }
 0x2bf   : > { %8547 = vmatpush1.bf16.msra.mxu0 %v10363_v43  ;;  %8600 = vmatpush1.bf16.msra.mxu1 %v10366_v46  ;;  %v12478_v43 = vld [vmem:[%s12766_s0 + $0x78] sm:$0xff] }
 0x2c0   : > { %8548 = vmatprep.subr.bf16.mxu0 %v10371_v47  ;;  %8601 = vmatprep.subr.bf16.mxu1 %v10374_v48  ;;  %v12483_v46 = vld [vmem:[%s12766_s0 + $0xf8] sm:$0xff] }
 0x2c1   : > { %v10429_v47 = vld [vmem:[%s11692_s23 + $0xe50] ss:$8 sps:$4 sm:$0xff]  }
 0x2c2   : > { %v10432_v48 = vld [vmem:[%s11692_s23 + $0xf50] ss:$8 sps:$4 sm:$0xff]  }
 0x2c3   : > { %8549 = vmatpush2.bf16.msra.mxu0 %v10369_v14  ;;  %8602 = vmatpush2.bf16.msra.mxu1 %v10372_v56  ;;  %v10437_v14 = vld [vmem:[%s11692_s23 + $0xe44] ss:$8 sps:$4 sm:$0xff]  }
 0x2c4   : > { %8550 = vmatprep.subr.bf16.mxu0 %v10377_v11  ;;  %8603 = vmatprep.subr.bf16.mxu1 %v10380_v12  ;;  %v10440_v56 = vld [vmem:[%s11692_s23 + $0xf44] ss:$8 sps:$4 sm:$0xff]   ;;  %v9142_v11 = vcombine.high %v12468_v36, %v12473_v39  ;;  %v9144_v12 = vcombine.high %v12478_v43, %v12483_v46 }
 0x2c7   : > { %8551 = vmatpush2.bf16.msra.mxu0 %v10375_v49  ;;  %8604 = vmatpush2.bf16.msra.mxu1 %v10378_v52  ;;  %v10435_v49 = vld [vmem:[%s11692_s23 + $0xe40] ss:$8 sps:$4 sm:$0xff]  }
 0x2c8   : > { %8552 = vmatprep.subr.bf16.mxu0 %v10383_v40  ;;  %8605 = vmatprep.subr.bf16.mxu1 %v10386_v41  ;;  %v10438_v52 = vld [vmem:[%s11692_s23 + $0xf40] ss:$8 sps:$4 sm:$0xff]   ;;  %v10443_v40 = vld [vmem:[%s11692_s23 + $0xe34] ss:$8 sps:$4 sm:$0xff]  }
 0x2c9   : > { %v10446_v41 = vld [vmem:[%s11692_s23 + $0xf34] ss:$8 sps:$4 sm:$0xff]  }
 0x2cb   : > { %8553 = vmatpush2.bf16.msra.mxu0 %v10381_v19  ;;  %8606 = vmatpush2.bf16.msra.mxu1 %v10384_v44  ;;  %v10441_v19 = vld [vmem:[%s11692_s23 + $0xe30] ss:$8 sps:$4 sm:$0xff]  }
 0x2cc   : > { %8554 = vmatprep.subr.bf16.mxu0 %v10389_v22  ;;  %8607 = vmatprep.subr.bf16.mxu1 %v10392_v27  ;;  %v10444_v44 = vld [vmem:[%s11692_s23 + $0xf30] ss:$8 sps:$4 sm:$0xff]   ;;  %v10449_v22 = vld [vmem:[%s11692_s23 + $0xe24] ss:$8 sps:$4 sm:$0xff]  }
 0x2cd   : > { %v10452_v27 = vld [vmem:[%s11692_s23 + $0xf24] ss:$8 sps:$4 sm:$0xff]  }
 0x2cf   : > { %8555 = vmatpush2.bf16.msra.mxu0 %v10387_v28  ;;  %8608 = vmatpush2.bf16.msra.mxu1 %v10390_v45  ;;  %v10447_v28 = vld [vmem:[%s11692_s23 + $0xe20] ss:$8 sps:$4 sm:$0xff]  }
 0x2d0   : > { %8556 = vmatprep.subr.bf16.mxu0 %v10395_v54  ;;  %8609 = vmatprep.subr.bf16.mxu1 %v10398_v55  ;;  %v10450_v45 = vld [vmem:[%s11692_s23 + $0xf20] ss:$8 sps:$4 sm:$0xff]   ;;  %v10455_v54 = vld [vmem:[%s11692_s23 + $0xe14] ss:$8 sps:$4 sm:$0xff]  }
 0x2d1   : > { %v10458_v55 = vld [vmem:[%s11692_s23 + $0xf14] ss:$8 sps:$4 sm:$0xff]  }
 0x2d3   : > { %8557 = vmatpush2.bf16.msra.mxu0 %v10393_v57  ;;  %8610 = vmatpush2.bf16.msra.mxu1 %v10396_v59  ;;  %v10453_v57 = vld [vmem:[%s11692_s23 + $0xe10] ss:$8 sps:$4 sm:$0xff]  }
 0x2d4   : > { %8558 = vmatprep.subr.bf16.mxu0 %v10401_v60  ;;  %8611 = vmatprep.subr.bf16.mxu1 %v10404_v9  ;;  %v10456_v59 = vld [vmem:[%s11692_s23 + $0xf10] ss:$8 sps:$4 sm:$0xff]   ;;  %v10461_v60 = vld [vmem:[%s11692_s23 + $0xe04] ss:$8 sps:$4 sm:$0xff]  }
 0x2d5   : > { %v10464_v9 = vld [vmem:[%s11692_s23 + $0xf04] ss:$8 sps:$4 sm:$0xff]  }
 0x2d7   : > { %8559 = vmatpush2.bf16.msra.mxu0 %v10399_v10  ;;  %8612 = vmatpush2.bf16.msra.mxu1 %v10402_v58  ;;  %v10459_v10 = vld [vmem:[%s11692_s23 + $0xe00] ss:$8 sps:$4 sm:$0xff]  }
 0x2d8   : > { %8560 = vmatprep.subr.bf16.mxu0 %v10407_v61  ;;  %8613 = vmatprep.subr.bf16.mxu1 %v10410_v62  ;;  %v10462_v58 = vld [vmem:[%s11692_s23 + $0xf00] ss:$8 sps:$4 sm:$0xff]   ;;  %v10467_v61 = vld [vmem:[%s11692_s23 + $0xef4] ss:$8 sps:$4 sm:$0xff]  }
 0x2d9   : > { %v10470_v62 = vld [vmem:[%s11692_s23 + $0xff4] ss:$8 sps:$4 sm:$0xff]  }
 0x2db   : > { %8561 = vmatpush2.bf16.msra.mxu0 %v10405_v20  ;;  %8614 = vmatpush2.bf16.msra.mxu1 %v10408_v15  ;;  %v10465_v20 = vld [vmem:[%s11692_s23 + $0xef0] ss:$8 sps:$4 sm:$0xff]  }
 0x2dc   : > { %8562 = vmatprep.subr.bf16.mxu0 %v10413_v17  ;;  %8615 = vmatprep.subr.bf16.mxu1 %v10416_v23  ;;  %v10468_v15 = vld [vmem:[%s11692_s23 + $0xff0] ss:$8 sps:$4 sm:$0xff]   ;;  %v10473_v17 = vld [vmem:[%s11692_s23 + $0xee4] ss:$8 sps:$4 sm:$0xff]  }
 0x2dd   : > { %v10476_v23 = vld [vmem:[%s11692_s23 + $0xfe4] ss:$8 sps:$4 sm:$0xff]  }
 0x2df   : > { %8563 = vmatpush2.bf16.msra.mxu0 %v10411_v18  ;;  %8616 = vmatpush2.bf16.msra.mxu1 %v10414_v21  ;;  %v10471_v18 = vld [vmem:[%s11692_s23 + $0xee0] ss:$8 sps:$4 sm:$0xff]  }
 0x2e0   : > { %8638 = vmatprep.subr.bf16.mxu0 %v10419_v24  ;;  %8691 = vmatprep.subr.bf16.mxu1 %v10422_v26  ;;  %v10474_v21 = vld [vmem:[%s11692_s23 + $0xfe0] ss:$8 sps:$4 sm:$0xff]   ;;  %v10479_v24 = vld [vmem:[%s11692_s23 + $0xed4] ss:$8 sps:$4 sm:$0xff]  }
 0x2e1   : > { %v10482_v26 = vld [vmem:[%s11692_s23 + $0xfd4] ss:$8 sps:$4 sm:$0xff]  }
 0x2e2   : > { %8565 = vmatmul.mubr.bf16.vlgmr.msra.gmra.mxu0 %v9137_v0  ;;  %8618 = vmatmul.mubr.bf16.vlgmr.msra.gmra.mxu1 %v9139_v29  ;;  %v10480_v0 = vld [vmem:[%s11692_s23 + $0xfd0] ss:$8 sps:$4 sm:$0xff]   ;;  %v10485_v29 = vld [vmem:[%s11692_s23 + $0xec4] ss:$8 sps:$4 sm:$0xff]  }
 0x2e3   : > { %8639 = vmatpush1.bf16.msra.mxu0 %v10417_v7  ;;  %8692 = vmatpush1.bf16.msra.mxu1 %v10420_v63  ;;  %v10491_v7 = vld [vmem:[%s11692_s23 + $0xeb4] ss:$8 sps:$4 sm:$0xff]  }
 0x2e4   : > { %8640 = vmatprep.subr.bf16.mxu0 %v10425_v13  ;;  %8693 = vmatprep.subr.bf16.mxu1 %v10428_v4  ;;  %v10494_v63 = vld [vmem:[%s11692_s23 + $0xfb4] ss:$8 sps:$4 sm:$0xff]   ;;  %v10489_v13 = vld [vmem:[%s11692_s23 + $0xeb0] ss:$8 sps:$4 sm:$0xff]  }
 0x2e5   : > { %8574 = vmatprep.mubr.bf16.mxu0 %v9170_v5  ;;  %8627 = vmatprep.mubr.bf16.mxu1 %v9172_v30  ;;  %v10492_v4 = vld [vmem:[%s11692_s23 + $0xfb0] ss:$8 sps:$4 sm:$0xff]   ;;  %v10497_v5 = vld [vmem:[%s11692_s23 + $0xea4] ss:$8 sps:$4 sm:$0xff]  }
 0x2e6   : > { %v10500_v30 = vld [vmem:[%s11692_s23 + $0xfa4] ss:$8 sps:$4 sm:$0xff]  }
 0x2e7   : > { %8641 = vmatpush1.bf16.msra.mxu0 %v10423_v31  ;;  %8694 = vmatpush1.bf16.msra.mxu1 %v10426_v32  ;;  %v10495_v31 = vld [vmem:[%s11692_s23 + $0xea0] ss:$8 sps:$4 sm:$0xff]  }
 0x2e8   : > { %8642 = vmatprep.subr.bf16.mxu0 %v10431_v33  ;;  %8695 = vmatprep.subr.bf16.mxu1 %v10434_v35  ;;  %v10498_v32 = vld [vmem:[%s11692_s23 + $0xfa0] ss:$8 sps:$4 sm:$0xff]   ;;  %v10503_v33 = vld [vmem:[%s11692_s23 + $0xe94] ss:$8 sps:$4 sm:$0xff]  }
 0x2e9   : > { %v10506_v35 = vld [vmem:[%s11692_s23 + $0xf94] ss:$8 sps:$4 sm:$0xff]  }
 0x2ea   : > { %8575 = vmatmul.mubr.bf16.gmra.mxu0 %v9169_v38  ;;  %8628 = vmatmul.mubr.bf16.gmra.mxu1 %v9171_v37  ;;  %v10501_v38 = vld [vmem:[%s11692_s23 + $0xe90] ss:$8 sps:$4 sm:$0xff]  }
 0x2eb   : > { %8643 = vmatpush1.bf16.msra.mxu0 %v10429_v47  ;;  %8696 = vmatpush1.bf16.msra.mxu1 %v10432_v48  ;;  %v10504_v37 = vld [vmem:[%s11692_s23 + $0xf90] ss:$8 sps:$4 sm:$0xff]   ;;  %v10509_v47 = vld [vmem:[%s11692_s23 + $0xe84] ss:$8 sps:$4 sm:$0xff]  }
 0x2ec   : > { %8644 = vmatprep.subr.bf16.mxu0 %v10437_v14  ;;  %8697 = vmatprep.subr.bf16.mxu1 %v10440_v56  ;;  %v10512_v48 = vld [vmem:[%s11692_s23 + $0xf84] ss:$8 sps:$4 sm:$0xff]   ;;  %v10507_v14 = vld [vmem:[%s11692_s23 + $0xe80] ss:$8 sps:$4 sm:$0xff]  }
 0x2ed   : > { %8670 = vmatprep.mubr.bf16.mxu0 %v9142_v11  ;;  %8723 = vmatprep.mubr.bf16.mxu1 %v9144_v12  ;;  %v10510_v56 = vld [vmem:[%s11692_s23 + $0xf80] ss:$8 sps:$4 sm:$0xff]   ;;  %v4486_v11 = vld [vmem:[%s12766_s0 + $0x170] sm:$0xff]  ;;  %s9111_s23 = sshll.u32 %s10547_s17, 1 }
 0x2ee   : > { %v4502_v12 = vld [vmem:[%s12766_s0 + $0x1f0] sm:$0xff]  ;;  %p4429_p11 = scmp.lt.s32.totalorder %s9111_s23, 3 }
 0x2ef   : > { %8645 = vmatpush1.bf16.msra.mxu0 %v10435_v49  ;;  %8698 = vmatpush1.bf16.msra.mxu1 %v10438_v52  ;;  %v4487_v49 = vld [vmem:[%s12766_s0 + $0x178] sm:$0xff] }
 0x2f0   : > { %8646 = vmatprep.subr.bf16.mxu0 %v10443_v40  ;;  %8699 = vmatprep.subr.bf16.mxu1 %v10446_v41  ;;  %v4503_v52 = vld [vmem:[%s12766_s0 + $0x1f8] sm:$0xff]  ;;  %v9141_v40 = vcombine.low %v12468_v36, %v12473_v39  ;;  %v9143_v41 = vcombine.low %v12478_v43, %v12483_v46  ;;  %s12807_s23 = smov (!%p4429_p11, %s9111_s23), 3 }
 0x2f1   : > { %s4431_s11 = scalar_lea.vmem %s12768_s2, %s12807_s23  ;;  %s4436_s14 = scalar_lea.vmem %s12769_s3, %s12807_s23 }
 0x2f3   : > { %8647 = vmatpush1.bf16.msra.mxu0 %v10441_v19  ;;  %8700 = vmatpush1.bf16.msra.mxu1 %v10444_v44  ;;  %v9174_v19 = vcombine.high %v4486_v11, %v4502_v12  ;;  %v9176_v44 = vcombine.high %v4487_v49, %v4503_v52 }
 0x2f4   : > { %8648 = vmatprep.subr.bf16.mxu0 %v10449_v22  ;;  %8701 = vmatprep.subr.bf16.mxu1 %v10452_v27  ;;  %v9173_v22 = vcombine.low %v4486_v11, %v4502_v12  ;;  %v9175_v27 = vcombine.low %v4487_v49, %v4503_v52 }
 0x2f7   : > { %8649 = vmatpush1.bf16.msra.mxu0 %v10447_v28  ;;  %8702 = vmatpush1.bf16.msra.mxu1 %v10450_v45  ;;  %v8154_v28 = vpop.f32.mrf.mxu0 }
 0x2f8   : > { %8650 = vmatprep.subr.bf16.mxu0 %v10455_v54  ;;  %8703 = vmatprep.subr.bf16.mxu1 %v10458_v55  ;;  %v12561_v54 = vpop.f32.mrf.mxu1 }
 0x2f9   : > { %v12559_v45 = vpop.f32.mrf.mxu0 }
 0x2fa   : > { %v12565_v43 = vpop.f32.mrf.mxu1 }
 0x2fb   : > { %8651 = vmatpush1.bf16.msra.mxu0 %v10453_v57  ;;  %8704 = vmatpush1.bf16.msra.mxu1 %v10456_v59  ;;  %v12563_v36 = vpop.f32.mrf.mxu0 }
 0x2fc   : > { %8652 = vmatprep.subr.bf16.mxu0 %v10461_v60  ;;  %8705 = vmatprep.subr.bf16.mxu1 %v10464_v9  ;;  %v12567_v55 = vpop.f32.mrf.mxu1 }
 0x2fd   : > { %v8248_v39 = vpop.f32.mrf.mxu0 }
 0x2fe   : > { %v8301_v57 = vpop.f32.mrf.mxu1 }
 0x2ff   : > { %8653 = vmatpush1.bf16.msra.mxu0 %v10459_v10  ;;  %8706 = vmatpush1.bf16.msra.mxu1 %v10462_v58  ;;  %v8250_v46 = vpop.f32.mrf.mxu0 }
 0x300   : > { %8654 = vmatprep.subr.bf16.mxu0 %v10467_v61  ;;  %8707 = vmatprep.subr.bf16.mxu1 %v10470_v62  ;;  %v8303_v60 = vpop.f32.mrf.mxu1 }
 0x301   : > { %v8252_v59 = vpop.f32.mrf.mxu0 }
 0x302   : > { %v8305_v10 = vpop.f32.mrf.mxu1 }
 0x303   : > { %8655 = vmatpush2.bf16.msra.mxu0 %v10465_v20  ;;  %8708 = vmatpush2.bf16.msra.mxu1 %v10468_v15  ;;  %v8254_v9 = vpop.f32.mrf.mxu0 }
 0x304   : > { %8656 = vmatprep.subr.bf16.mxu0 %v10473_v17  ;;  %8709 = vmatprep.subr.bf16.mxu1 %v10476_v23  ;;  %v12569_v61 = vpop.f32.mrf.mxu1 }
 0x305   : > { %v8258_v58 = vpop.f32.mrf.mxu0 }
 0x306   : > { %v12571_v20 = vpop.f32.mrf.mxu1 }
 0x307   : > { %8657 = vmatpush2.bf16.msra.mxu0 %v10471_v18  ;;  %8710 = vmatpush2.bf16.msra.mxu1 %v10474_v21  ;;  %v8260_v62 = vpop.f32.mrf.mxu0 }
 0x308   : > { %8658 = vmatprep.subr.bf16.mxu0 %v10479_v24  ;;  %8711 = vmatprep.subr.bf16.mxu1 %v10482_v26  ;;  %v12575_v17 = vpop.f32.mrf.mxu1 }
 0x309   : > { %v12573_v15 = vpop.f32.mrf.mxu0 }
 0x30a   : > { %v12579_v18 = vpop.f32.mrf.mxu1 }
 0x30b   : > { %8659 = vmatpush2.bf16.msra.mxu0 %v10477_v2  ;;  %8712 = vmatpush2.bf16.msra.mxu1 %v10480_v0  ;;  %v12577_v23 = vpop.f32.mrf.mxu0 }
 0x30c   : > { %8660 = vmatprep.subr.bf16.mxu0 %v10485_v29  ;;  %8713 = vmatprep.subr.bf16.mxu1 %v10488_v1  ;;  %v12581_v24 = vpop.f32.mrf.mxu1 }
 0x30f   : > { %8661 = vmatpush2.bf16.msra.mxu0 %v10483_v34  ;;  %8714 = vmatpush2.bf16.msra.mxu1 %v10486_v6 }
 0x310   : > { %8662 = vmatprep.subr.bf16.mxu0 %v10491_v7  ;;  %8715 = vmatprep.subr.bf16.mxu1 %v10494_v63 }
 0x313   : > { %8663 = vmatpush2.bf16.msra.mxu0 %v10489_v13  ;;  %8716 = vmatpush2.bf16.msra.mxu1 %v10492_v4 }
 0x314   : > { %8664 = vmatprep.subr.bf16.mxu0 %v10497_v5  ;;  %8717 = vmatprep.subr.bf16.mxu1 %v10500_v30 }
 0x317   : > { %8665 = vmatpush2.bf16.msra.mxu0 %v10495_v31  ;;  %8718 = vmatpush2.bf16.msra.mxu1 %v10498_v32 }
 0x318   : > { %8666 = vmatprep.subr.bf16.mxu0 %v10503_v33  ;;  %8719 = vmatprep.subr.bf16.mxu1 %v10506_v35 }
 0x31b   : > { %8667 = vmatpush2.bf16.msra.mxu0 %v10501_v38  ;;  %8720 = vmatpush2.bf16.msra.mxu1 %v10504_v37 }
 0x31c   : > { %8668 = vmatprep.subr.bf16.mxu0 %v10509_v47  ;;  %8721 = vmatprep.subr.bf16.mxu1 %v10512_v48 }
 0x31f   : > { %8669 = vmatpush2.bf16.msra.mxu0 %v10507_v14  ;;  %8722 = vmatpush2.bf16.msra.mxu1 %v10510_v56 }
 0x322   : > { %8671 = vmatmul.mubr.bf16.vlgmr.msra.gmra.mxu0 %v9141_v40  ;;  %8724 = vmatmul.mubr.bf16.vlgmr.msra.gmra.mxu1 %v9143_v41  ;;  %v8354_v21 = vpop.f32.mrf.mxu0  ;;  %v8407_v2 = vpop.f32.mrf.mxu1 }
 0x323   : > { %8680 = vmatprep.mubr.bf16.mxu0 %v9174_v19  ;;  %8733 = vmatprep.mubr.bf16.mxu1 %v9176_v44 }
 0x324   : > { %v8356_v26 = vpop.f32.mrf.mxu0  ;;  %v12583_v29 = vpop.f32.mrf.mxu1 }
 0x326   : > { %v8358_v0 = vpop.f32.mrf.mxu0  ;;  %v12585_v34 = vpop.f32.mrf.mxu1 }
 0x328   : > { %v8360_v1 = vpop.f32.mrf.mxu0  ;;  %v12587_v7 = vpop.f32.mrf.mxu1 }
 0x32a   : > { %8681 = vmatmul.mubr.bf16.gmra.mxu0 %v9173_v22  ;;  %8734 = vmatmul.mubr.bf16.gmra.mxu1 %v9175_v27  ;;  %v8364_v6 = vpop.f32.mrf.mxu0  ;;  %v12591_v13 = vpop.f32.mrf.mxu1 }
 0x32c   : > { %v12589_v63 = vpop.f32.mrf.mxu0  ;;  %v12595_v5 = vpop.f32.mrf.mxu1 }
 0x32e   : > { %v12593_v4 = vpop.f32.mrf.mxu0  ;;  %v12599_v31 = vpop.f32.mrf.mxu1 }
 0x32f   : > { %12772 = vst [vmem:[#allocation4_spill] sm:$0xff] %v12599_v31 }
 0x330   : > { %v12597_v30 = vpop.f32.mrf.mxu0  ;;  %v12601_v33 = vpop.f32.mrf.mxu1 }
 0x331   : > { %12773 = vst [vmem:[#allocation5_spill] sm:$0xff] %v12601_v33 }
 0x362   : > { %v8460_v32 = vpop.f32.mrf.mxu0  ;;  %v12603_v35 = vpop.f32.mrf.mxu1 }
 0x364   : > { %v8462_v38 = vpop.f32.mrf.mxu0  ;;  %v12605_v37 = vpop.f32.mrf.mxu1 }
 0x366   : > { %v8464_v47 = vpop.f32.mrf.mxu0  ;;  %v12607_v48 = vpop.f32.mrf.mxu1 }
 0x367   : > { %12774 = vst [vmem:[#allocation6_spill] sm:$0xff] %v12607_v48 }
 0x368   : > { %v8466_v14 = vpop.f32.mrf.mxu0  ;;  %v12609_v56 = vpop.f32.mrf.mxu1 }
 0x369   : > { %12775 = vst [vmem:[#allocation7_spill] sm:$0xff] %v12609_v56 }
 0x36a   : > { %v12611_v11 = vpop.f32.mrf.mxu0  ;;  %v12613_v12 = vpop.f32.mrf.mxu1 }
 0x36b   : > { %12776 = vst [vmem:[#allocation8_spill] sm:$0xff] %v12613_v12  ;;  %v8249_v12 = vadd.f32 %v8248_v39, %v12347_v53  ;;  %v8159_v53 = vadd.f32 %v12563_v36, %v12276_v50 }
 0x36c   : > { %v12615_v49 = vpop.f32.mrf.mxu0  ;;  %v12617_v52 = vpop.f32.mrf.mxu1 }
 0x36d   : > { %12777 = vst [vmem:[#allocation9_spill] sm:$0xff] %v12615_v49  ;;  %12778 = vst [vmem:[#allocation10_spill] sm:$0xff] %v12617_v52  ;;  %v8155_v49 = vadd.f32 %v8154_v28, %v12269_v42  ;;  %v8302_v48 = vadd.f32 %v8301_v57, %v8249_v12  ;;  %v8259_v42 = vadd.f32 %v8258_v58, %v12391_v3 }
 0x36e   : > { %v12619_v40 = vpop.f32.mrf.mxu0  ;;  %v12621_v41 = vpop.f32.mrf.mxu1  ;;  %v8212_v57 = vadd.f32 %v12567_v55, %v8159_v53 }
 0x36f   : > { %12779 = vst [vmem:[#allocation11_spill] sm:$0xff] %v12619_v40  ;;  %12780 = vst [vmem:[#allocation12_spill] sm:$0xff] %v12621_v41  ;;  %v8251_v40 = vadd.f32 %v8250_v46, %v12370_v8  ;;  %v8253_v41 = vadd.f32 %v8252_v59, %v12377_v16  ;;  %v8355_v46 = vadd.f32 %v8354_v21, %v8302_v48 }
 0x370   : > { %v12623_v19 = vpop.f32.mrf.mxu0  ;;  %v12625_v44 = vpop.f32.mrf.mxu1  ;;  %v8312_v50 = vadd.f32 %v12571_v20, %v8259_v42 }
 0x371   : > { %12781 = vst [vmem:[#allocation13_spill] sm:$0xff] %v12623_v19  ;;  %12782 = vst [vmem:[#allocation14_spill] sm:$0xff] %v12625_v44  ;;  %v8157_v44 = vadd.f32 %v12559_v45, %v12274_v51  ;;  %v8304_v39 = vadd.f32 %v8303_v60, %v8251_v40  ;;  %v8306_v8 = vadd.f32 %v8305_v10, %v8253_v41  ;;  %v12788_v40 = vld [vmem:[#allocation4_spill] sm:$0xff]  ;;  %v12789_v41 = vld [vmem:[#allocation7_spill] sm:$0xff] }
 0x372   : > { %v8408_v36 = vadd.f32 %v8407_v2, %v8355_v46  ;;  %v8265_v10 = vadd.f32 %v12577_v23, %v8212_v57  ;;  %v8365_v58 = vadd.f32 %v8364_v6, %v8312_v50 }
 0x373   : > { %v8210_v51 = vadd.f32 %v12565_v43, %v8157_v44  ;;  %v8357_v45 = vadd.f32 %v8356_v26, %v8304_v39 }
 0x374   : > { %v8461_v26 = vadd.f32 %v8460_v32, %v8408_v36  ;;  %v8418_v23 = vadd.f32 %v12591_v13, %v8365_v58 }
 0x375   : > { %v8263_v3 = vadd.f32 %v12573_v15, %v8210_v51  ;;  %v8410_v43 = vadd.f32 %v12583_v29, %v8357_v45 }
 0x376   : > { %v8514_v29 = vadd.f32 %v12603_v35, %v8461_v26 }
 0x377   : > { %v8316_v20 = vadd.f32 %v12579_v18, %v8263_v3  ;;  %v8463_v2 = vadd.f32 %v8462_v38, %v8410_v43  ;;  %v8471_v18 = vadd.f32 %v12611_v11, %v8418_v23  ;;  %v12786_v38 = vld [vmem:[#allocation6_spill] sm:$0xff]  ;;  %v12798_v43 = vld [vmem:[#allocation12_spill] sm:$0xff] }
 0x379   : > { %v8369_v48 = vadd.f32 %v12593_v4, %v8316_v20  ;;  %v12799_v20 = vld [vmem:[#allocation14_spill] sm:$0xff] }
 0x37b   : > { %v8422_v4 = vadd.f32 %v12788_v40, %v8369_v48 }
 0x3a2   : > { %v8566_v22 = vpop.f32.mrf.mxu0  ;;  %v12627_v27 = vpop.f32.mrf.mxu1 }
 0x3a3   : > { %12783 = vst [vmem:[#allocation15_spill] sm:$0xff] %v12627_v27  ;;  %v8255_v27 = vadd.f32 %v8254_v9, %v12384_v25 }
 0x3a4   : > { %v8568_v33 = vpop.f32.mrf.mxu0  ;;  %v12629_v56 = vpop.f32.mrf.mxu1 }
 0x3a5   : > { %12784 = vst [vmem:[#allocation16_spill] sm:$0xff] %v12629_v56  ;;  %v8208_v56 = vadd.f32 %v12561_v54, %v8155_v49  ;;  %v8308_v25 = vadd.f32 %v12569_v61, %v8255_v27  ;;  %v8359_v54 = vadd.f32 %v8358_v0, %v8306_v8 }
 0x3a6   : > { %v8570_v31 = vpop.f32.mrf.mxu0  ;;  %v12633_v52 = vpop.f32.mrf.mxu1 }
 0x3a7   : > { %12785 = vst [vmem:[#allocation17_spill] sm:$0xff] %v12633_v52  ;;  %v8261_v16 = vadd.f32 %v8260_v62, %v8208_v56  ;;  %v8361_v60 = vadd.f32 %v8360_v1, %v8308_v25  ;;  %v8412_v61 = vadd.f32 %v12585_v34, %v8359_v54  ;;  %v12787_v56 = vld [vmem:[#allocation9_spill] sm:$0xff] }
 0x3a8   : > { %v8572_v19 = vpop.f32.mrf.mxu0  ;;  %v12644_v28 = vpop.f32.mrf.mxu1  ;;  %v12795_v25 = vld [vmem:[#allocation13_spill] sm:$0xff] }
 0x3a9   : > { %v8314_v9 = vadd.f32 %v12575_v17, %v8261_v16  ;;  %v8414_v15 = vadd.f32 %v12587_v7, %v8361_v60  ;;  %v8465_v0 = vadd.f32 %v8464_v47, %v8412_v61  ;;  %v8318_v17 = vadd.f32 %v12581_v24, %v8265_v10  ;;  %v12794_v16 = vld [vmem:[#allocation10_spill] sm:$0xff] }
 0x3aa   : > { %v8576_v59 = vpop.f32.mrf.mxu0  ;;  %v12646_v52 = vpop.f32.mrf.mxu1  ;;  %v8516_v7 = vadd.f32 %v12605_v37, %v8463_v2  ;;  %v8567_v24 = vadd.f32 %v8566_v22, %v8514_v29  ;;  %v12792_v37 = vld [vmem:[#allocation11_spill] sm:$0xff] }
 0x3ab   : > { %v8367_v55 = vadd.f32 %v12589_v63, %v8314_v9  ;;  %v8467_v34 = vadd.f32 %v8466_v14, %v8414_v15  ;;  %v8371_v63 = vadd.f32 %v12597_v30, %v8318_v17  ;;  %v8518_v47 = vadd.f32 %v12786_v38, %v8465_v0  ;;  %v12791_v30 = vld [vmem:[#allocation8_spill] sm:$0xff]  ;;  %v12793_v8 = vld [vmem:[#allocation15_spill] sm:$0xff] }
 0x3ac   : > { %v8578_v62 = vpop.f32.mrf.mxu0  ;;  %v8631_v21 = vpop.f32.mrf.mxu1  ;;  %v8569_v14 = vadd.f32 %v8568_v33, %v8516_v7  ;;  %v8524_v53 = vadd.f32 %v12791_v30, %v8471_v18  ;;  %v8475_v39 = vadd.f32 %v12792_v37, %v8422_v4  ;;  %v8620_v22 = vadd.f32 %v12793_v8, %v8567_v24  ;;  %v12796_v33 = vld [vmem:[#allocation16_spill] sm:$0xff] }
 0x3ad   : > { %v8420_v32 = vadd.f32 %v12595_v5, %v8367_v55  ;;  %v8520_v35 = vadd.f32 %v12789_v41, %v8467_v34  ;;  %v8571_v44 = vadd.f32 %v8570_v31, %v8518_v47  ;;  %v12790_v5 = vld [vmem:[#allocation5_spill] sm:$0xff]  ;;  %v8772_v8 = vlaneseq }
 0x3ae   : > { %v8580_v1 = vpop.f32.mrf.mxu0  ;;  %v8633_v6 = vpop.f32.mrf.mxu1  ;;  %v8424_v27 = vadd.f32 %v12790_v5, %v8371_v63  ;;  %v8577_v54 = vadd.f32 %v8576_v59, %v8524_v53  ;;  %v8622_v31 = vadd.f32 %v12796_v33, %v8569_v14  ;;  %v12797_v3 = vld [vmem:[#allocation17_spill] sm:$0xff]  ;;  %v8528_v61 = vadd.f32 %v12798_v43, %v8475_v39 }
 0x3af   : > { %v8473_v13 = vadd.f32 %v12787_v56, %v8420_v32  ;;  %v8573_v46 = vadd.f32 %v8572_v19, %v8520_v35  ;;  %v8624_v36 = vadd.f32 %v12797_v3, %v8571_v44 }
 0x3b0   : > { %v8582_v12 = vpop.f32.mrf.mxu0  ;;  %v8635_v49 = vpop.f32.mrf.mxu1  ;;  %v8477_v45 = vadd.f32 %v12795_v25, %v8424_v27  ;;  %v8630_v59 = vadd.f32 %v12646_v52, %v8577_v54  ;;  %v8581_v17 = vadd.f32 %v8580_v1, %v8528_v61 }
 0x3b1   : > { %v8526_v51 = vadd.f32 %v12794_v16, %v8473_v13  ;;  %v8626_v26 = vadd.f32 %v12644_v28, %v8573_v46 }
 0x3b2   : > { %v8530_v15 = vadd.f32 %v12799_v20, %v8477_v45  ;;  %v8634_v56 = vadd.f32 %v8633_v6, %v8581_v17 }
 0x3b3   : > { %v8579_v9 = vadd.f32 %v8578_v62, %v8526_v51  ;;  %v12690_v51 = vshrl.u32 %v8772_v8, 7 }
 0x3b4   : > { %v8583_v62 = vadd.f32 %v8582_v12, %v8530_v15 }
 0x3b5   : > { %v8632_v34 = vadd.f32 %v8631_v21, %v8579_v9 }
 0x3b6   : > { %v8636_v1 = vadd.f32 %v8635_v49, %v8583_v62 }
 0x3e2   : > { %v8672_v11 = vpop.f32.mrf.mxu0  ;;  %v8725_v42 = vpop.f32.mrf.mxu1 }
 0x3e3   : > { %v8673_v60 = vadd.f32 %v8672_v11, %v8620_v22 }
 0x3e4   : > { %v8674_v57 = vpop.f32.mrf.mxu0  ;;  %v8727_v50 = vpop.f32.mrf.mxu1 }
 0x3e5   : > { %v8675_v19 = vadd.f32 %v8674_v57, %v8622_v31  ;;  %v8726_v23 = vadd.f32 %v8725_v42, %v8673_v60 }
 0x3e6   : > { %v8676_v10 = vpop.f32.mrf.mxu0  ;;  %v8729_v58 = vpop.f32.mrf.mxu1 }
 0x3e7   : > { %v8677_v55 = vadd.f32 %v8676_v10, %v8624_v36  ;;  %v8728_v18 = vadd.f32 %v8727_v50, %v8675_v19  ;;  %v8775_v50 = vadd.s32 16, %v12690_v51 }
 0x3e8   : > { %v8678_v2 = vpop.f32.mrf.mxu0  ;;  %v8731_v0 = vpop.f32.mrf.mxu1 }
 0x3e9   : > { %v8730_v48 = vadd.f32 %v8729_v58, %v8677_v55  ;;  %v8679_v29 = vadd.f32 %v8678_v2, %v8626_v26  ;;  %vm8779_vm0 = vcmp.lt.s32.totalorder %v8775_v50, 18 }
 0x3ea   : > { %v8682_v32 = vpop.f32.mrf.mxu0  ;;  %v8735_v63 = vpop.f32.mrf.mxu1 }
 0x3eb   : > { %v8744_v7 = vadd.f32 %v8730_v48, %v8726_v23  ;;  %v8732_v38 = vadd.f32 %v8731_v0, %v8679_v29  ;;  %v8683_v28 = vadd.f32 %v8682_v32, %v8630_v59 }
 0x3ec   : > { %v8684_v47 = vpop.f32.mrf.mxu0  ;;  %v8737_v24 = vpop.f32.mrf.mxu1 }
 0x3ed   : > { %v8753_v13 = vadd.f32 %v8732_v38, %v8728_v18  ;;  %v8736_v40 = vadd.f32 %v8735_v63, %v8683_v28  ;;  %v8685_v52 = vadd.f32 %v8684_v47, %v8632_v34 }
 0x3ee   : > { %v8686_v4 = vpop.f32.mrf.mxu0  ;;  %v8739_v41 = vpop.f32.mrf.mxu1 }
 0x3ef   : > { %v8745_v35 = vadd.f32 %v8744_v7, %v8736_v40  ;;  %v8738_v14 = vadd.f32 %v8737_v24, %v8685_v52  ;;  %v8687_v44 = vadd.f32 %v8686_v4, %v8634_v56 }
 0x3f0   : > { %v8688_v21 = vpop.f32.mrf.mxu0  ;;  %v8741_v30 = vpop.f32.mrf.mxu1 }
 0x3f1   : > { %v8754_v12 = vadd.f32 %v8753_v13, %v8738_v14  ;;  %v12684_v5 = vadd.f32 %v8739_v41, %v8687_v44  ;;  %v8689_v27 = vadd.f32 %v8688_v21, %v8636_v1 }
 0x3f3   : > { %v8746_v53 = vadd.f32 %v8745_v35, %v12684_v5  ;;  %v12687_v11 = vadd.f32 %v8741_v30, %v8689_v27  ;;  %v10557_v35 = vmov 1966171168  }
 0x3f5   : > { %v8747_v6 = vrot.slane %v8746_v53, 4  ;;  %v8755_v42 = vadd.f32 %v8754_v12, %v12687_v11 }
 0x3f7   : > { %v8748_v37 = vadd.f32 %v8747_v6, %v8746_v53  ;;  %v8756_v39 = vrot.slane %v8755_v42, 4 }
 0x3f9   : > { %v8749_v49 = vrot.slane %v8748_v37, 2  ;;  %v8757_v22 = vadd.f32 %v8756_v39, %v8755_v42  ;;  %v8844_v42 = vsub.s32 0, %v12690_v51  ;;  %v8860_v39 = vld [vmem:[%s4436_s14] sm:$0x3] }
 0x3fb   : > { %v8750_v46 = vadd.f32 %v8749_v49, %v8748_v37  ;;  %v8758_v16 = vrot.slane %v8757_v22, 2  ;;  %v8848_v37 = vsub.s32 1, %v12690_v51 }
 0x3fd   : > { %v8751_v25 = vrot.slane %v8750_v46, 1  ;;  %v8759_v45 = vadd.f32 %v8758_v16, %v8757_v22  ;;  %v8869_v16 = vrot.slane %v8860_v39, %v8848_v37 }
 0x3ff   : > { %v8752_v54 = vadd.f32 %v8751_v25, %v8750_v46  ;;  %v8760_v57 = vrot.slane %v8759_v45, 1  ;;  %v8865_v46 = vrot.slane %v8860_v39, %v8844_v42 }
 0x401   : > { %v12693_v33 = vmul.f32 0.055555556, %v8752_v54  ;;  %v8761_v31 = vadd.f32 %v8760_v57, %v8759_v45 }
 0x403   : > { %v12696_v3 = vsub.f32 %v8726_v23, %v12693_v33  ;;  %v12699_v36 = vsub.f32 %v8730_v48, %v12693_v33  ;;  %v12702_v60 = vsub.f32 %v8736_v40, %v12693_v33  ;;  %v8770_v9 = vsub.f32 %v12684_v5, %v12693_v33 }
 0x404   : > { %v12706_v10 = vmul.f32 0.055555556, %v8761_v31 }
 0x405   : > { %v8781_v58 = vmul.f32 %v12696_v3, %v12696_v3  ;;  %v8783_v43 = vmul.f32 %v12699_v36, %v12699_v36  ;;  %v8785_v61 = vmul.f32 %v12702_v60, %v12702_v60 }
 0x406   : > { %v8765_v26 = vsub.f32 %v8728_v18, %v12706_v10  ;;  %v8767_v19 = vsub.f32 %v8732_v38, %v12706_v10  ;;  %v8769_v55 = vsub.f32 %v8738_v14, %v12706_v10  ;;  %v8771_v20 = vsub.f32 %v12687_v11, %v12706_v10  ;;  %v8817_v11 = vld [vmem:[%s4431_s11] sm:$0x3] }
 0x407   : > { %v8793_v15 = vsel %vm8779_vm0, %v8785_v61, 0.0  ;;  %v8797_v59 = vadd.f32 %v8783_v43, %v8781_v58  ;;  %v8826_v14 = vunpack.c.l.s4 %v10557_v35 }
 0x408   : > { %v8782_v2 = vmul.f32 %v8765_v26, %v8765_v26  ;;  %v8784_v0 = vmul.f32 %v8767_v19, %v8767_v19  ;;  %v8786_v17 = vmul.f32 %v8769_v55, %v8769_v55 }
 0x409   : > { %v8798_v23 = vadd.f32 %v8797_v59, %v8793_v15  ;;  %v8827_v44 = vunpack.c.0.s8 %v8826_v14 }
 0x40a   : > { %v8794_v48 = vsel %vm8779_vm0, %v8786_v17, 0.0  ;;  %v8806_v29 = vadd.f32 %v8784_v0, %v8782_v2 }
 0x40b   : > { %v8800_v34 = vrot.slane %v8798_v23, 4  ;;  %v8830_v12 = vsub.s32 %v8827_v44, %v12690_v51 }
 0x40c   : > { %v8807_v62 = vadd.f32 %v8806_v29, %v8794_v48 }
 0x40d   : > { %v8801_v32 = vadd.f32 %v8800_v34, %v8798_v23 }
 0x40e   : > { %v8809_v63 = vrot.slane %v8807_v62, 4 }
 0x40f   : > { %v8802_v18 = vrot.slane %v8801_v32, 2 }
 0x410   : > { %v8810_v7 = vadd.f32 %v8809_v63, %v8807_v62 }
 0x411   : > { %v8803_v38 = vadd.f32 %v8802_v18, %v8801_v32 }
 0x412   : > { %v8811_v28 = vrot.slane %v8810_v7, 2 }
 0x413   : > { %v8804_v47 = vrot.slane %v8803_v38, 1 }
 0x414   : > { %v8812_v24 = vadd.f32 %v8811_v28, %v8810_v7 }
 0x415   : > { %v8805_v56 = vadd.f32 %v8804_v47, %v8803_v38 }
 0x416   : > { %v8813_v13 = vrot.slane %v8812_v24, 1 }
 0x417   : > { %v8815_v40 = vmul.f32 0.055555556, %v8805_v56 }
 0x418   : > { %v8814_v52 = vadd.f32 %v8813_v13, %v8812_v24 }
 0x419   : > { %v8818_v4 = vadd.f32 1e-05, %v8815_v40 }
 0x41a   : > { %v8816_v41 = vmul.f32 0.055555556, %v8814_v52 }
 0x41b   : > { %10513 = vrsqrt.f32 %v8818_v4 }
 0x41c   : > { %v8819_v1 = vadd.f32 1e-05, %v8816_v41 }
 0x41e   : > { %10515 = vrsqrt.f32 %v8819_v1 }
 0x428   : > { %v10514_v21 = vpop.eup %10513 }
 0x42b   : > { %v10516_v27 = vpop.eup %10515 }
 0x42c   : > { %v8824_v30 = vcombine.low %v10514_v21, %v10516_v27 }
 0x42e   : > { %v8831_v53 = vrot.slane %v8824_v30, %v8830_v12 }
 0x430   : > { %v8838_v6 = vrot.slane %v8831_v53, %v8830_v12 }
 0x432   : > { %v8840_v8 = vmul.f32 %v8838_v6, %v8817_v11 }
 0x434   : > { %v8845_v49 = vrot.slane %v8840_v8, %v8844_v42  ;;  %v8849_v22 = vrot.slane %v8840_v8, %v8848_v37 }
 0x436   : > { %v8852_v25 = vmul.f32 %v8845_v49, %v12696_v3  ;;  %v8853_v45 = vmul.f32 %v8849_v22, %v8765_v26  ;;  %v8854_v54 = vmul.f32 %v8845_v49, %v12699_v36  ;;  %v8855_v57 = vmul.f32 %v8849_v22, %v8767_v19 }
 0x437   : > { %v8856_v50 = vmul.f32 %v8845_v49, %v12702_v60  ;;  %v8857_v31 = vmul.f32 %v8849_v22, %v8769_v55  ;;  %v8858_v51 = vmul.f32 %v8845_v49, %v8770_v9  ;;  %v8859_v10 = vmul.f32 %v8849_v22, %v8771_v20 }
 0x438   : > { %v8872_v58 = vadd.f32 %v8865_v46, %v8852_v25  ;;  %v8873_v43 = vadd.f32 %v8869_v16, %v8853_v45  ;;  %v8874_v61 = vadd.f32 %v8865_v46, %v8854_v54  ;;  %v8875_v15 = vadd.f32 %v8869_v16, %v8855_v57 }
 0x439   : > { %v8876_v59 = vadd.f32 %v8865_v46, %v8856_v50  ;;  %v8877_v2 = vadd.f32 %v8869_v16, %v8857_v31  ;;  %v8878_v3 = vadd.f32 %v8865_v46, %v8858_v51  ;;  %v8879_v26 = vadd.f32 %v8869_v16, %v8859_v10 }
 0x43a   : > { %vm8880_vm1 = vcmp.ge.f32.partialorder %v8872_v58, 0.0  ;;  %vm8881_vm2 = vcmp.ge.f32.partialorder %v8873_v43, 0.0  ;;  %vm8882_vm3 = vcmp.ge.f32.partialorder %v8874_v61, 0.0  ;;  %vm8883_vm4 = vcmp.ge.f32.partialorder %v8875_v15, 0.0 }
 0x43b   : > { %vm8884_vm5 = vcmp.ge.f32.partialorder %v8876_v59, 0.0  ;;  %vm8885_vm6 = vcmp.ge.f32.partialorder %v8877_v2, 0.0  ;;  %vm8886_vm7 = vcmp.ge.f32.partialorder %v8878_v3, 0.0  ;;  %vm8887_vm8 = vcmp.ge.f32.partialorder %v8879_v26, 0.0 }
 0x43c   : > { %v8888_v5 = vmul.f32 0.2, %v8872_v58  ;;  %v8889_v33 = vmul.f32 0.2, %v8873_v43  ;;  %v8890_v36 = vmul.f32 0.2, %v8874_v61 }
 0x43d   : > { %v8891_v60 = vmul.f32 0.2, %v8875_v15  ;;  %v8892_v9 = vmul.f32 0.2, %v8876_v59  ;;  %v8893_v19 = vmul.f32 0.2, %v8877_v2 }
 0x43e   : > { %v8894_v55 = vmul.f32 0.2, %v8878_v3  ;;  %v8895_v20 = vmul.f32 0.2, %v8879_v26  ;;  %v8896_v0 = vsel %vm8880_vm1, %v8872_v58, %v8888_v5  ;;  %v8897_v17 = vsel %vm8881_vm2, %v8873_v43, %v8889_v33 }
 0x43f   : > { %v8898_v23 = vsel %vm8882_vm3, %v8874_v61, %v8890_v36  ;;  %v8899_v48 = vsel %vm8883_vm4, %v8875_v15, %v8891_v60  ;;  %v8900_v29 = vsel %vm8884_vm5, %v8876_v59, %v8892_v9  ;;  %v8901_v34 = vsel %vm8885_vm6, %v8877_v2, %v8893_v19  ;;  %8938 = sbr.rel (!%p10618_p6) target bundleno = 1100 (0x44c), region = 92 }
 0x440   : > { %v8902_v62 = vsel %vm8886_vm7, %v8878_v3, %v8894_v55  ;;  %v8903_v32 = vsel %vm8887_vm8, %v8879_v26, %v8895_v20  ;;  %v9699_v63 = vpack.c.bf16 %v8897_v17, %v8896_v0  ;;  %v9700_v18 = vpack.c.bf16 %v8899_v48, %v8898_v23 }
 0x441   : > { %v9701_v7 = vpack.c.bf16 %v8901_v34, %v8900_v29  ;;  %v9702_v38 = vpack.c.bf16 %v8903_v32, %v8902_v62 }
 0x442   : > { %8928 = vst [vmem:[%s4419_s15] sm:$0xff] %v9699_v63  ;;  %8929 = vst [vmem:[%s4419_s15 + $0x8] sm:$0xff] %v9700_v18 }
 0x443   : > { %8930 = vst [vmem:[%s4419_s15 + $0x10] sm:$0xff] %v9701_v7  ;;  %8931 = vst [vmem:[%s4419_s15 + $0x18] sm:$0xff] %v9702_v38 }
 0x449   : > { %v8979_v28 = vld [vmem:[%s4419_s15] sm:$0xff]  ;;  %v8981_v47 = vld [vmem:[%s4419_s15 + $0x8] sm:$0xff] }
 0x44a   : > { %v8983_v24 = vld [vmem:[%s4419_s15 + $0x10] sm:$0xff]  ;;  %v8985_v56 = vld [vmem:[%s4419_s15 + $0x18] sm:$0xff]  ;;  %8980 = vst [vmem:[%s8944_s27] sm:$0xff] %v8979_v28  ;;  %8982 = vst [vmem:[%s8944_s27 + $0x10] sm:$0xff] %v8981_v47 }
 0x44b   : > { %8984 = vst [vmem:[%s8944_s27 + $0x20] sm:$0xff] %v8983_v24  ;;  %8986 = vst [vmem:[%s8944_s27 + $0x30] sm:$0xff] %v8985_v56 }
 0x44c PF: > { %s14_s19 = sadd.s32 1, %s10555_s19   ;;  %s12800_s15 = smov %s10543_s16 }
 0x44d   : > { %p11_p12 = scmp.ge.s32.totalorder %s14_s19, 4   ;;  %s12801_s16 = smov %s10623_s25 }
 0x44e   : > { %s12802_s17 = smov %s10551_s18  ;;  %s12803_s18 = smov %s12805_s20 }
 0x44f   :  { %13 = sbr.rel (!%p11_p12) target bundleno = 3 (0x3), region = 176 }

</bundles_post_ra>
